<compile_context>
chip_gen: v5e
topology: v5e:2x2
jax: 0.10.0
libtpu: 0.0.40
codegen_flags: <defaults>
</compile_context>

<pallas_src>
import functools

import numpy as np
import jax
import jax.numpy as jnp
from jax.experimental import pallas as pl
from jax.experimental.pallas import tpu as pltpu

# Synthetic GDExpr vocabulary constants (deterministic, in-script).
PAD_ID, QUERY_VALUE, QUERY_POLICY, QUERY_INDEX = 0, 1, 2, 3
NEG_INF = -1e9
LN_EPS = 1e-5


def _round_up(x, m):
    return (x + m - 1) // m * m


# --------------------------- fused decoder kernel ---------------------------

def _decoder_kernel(x_ref, sbias_ref, cbias_ref, kc_ref, voc_ref,
                    wq_s_ref, bq_s_ref, wk_s_ref, bk_s_ref, wvo_s_ref, bvo_s_ref,
                    wq_c_ref, bq_c_ref, bvo_c_ref,
                    w1_ref, b1_ref, w2_ref, b2_ref,
                    lng_ref, lnb_ref, headw_ref, headb_ref,
                    out_ref, *, n_layers, n_head, b_blk, s_pad):
    x = x_ref[...]            # (R, D)   f32 activations, R = b_blk * s_pad
    sbias = sbias_ref[0]      # (R, R)   block-diagonal additive self-attn mask
    cbias = cbias_ref[0]      # (R, Tkv) additive cross-attn mask

    def mm(a, b):             # a @ b    (MXU, bf16 inputs, f32 accumulation)
        return jax.lax.dot_general(
            a.astype(jnp.bfloat16), b.astype(jnp.bfloat16),
            (((1,), (0,)), ((), ())), preferred_element_type=jnp.float32)

    def mm_nt(a, b):          # a @ b.T
        return jax.lax.dot_general(
            a.astype(jnp.bfloat16), b.astype(jnp.bfloat16),
            (((1,), (1,)), ((), ())), preferred_element_type=jnp.float32)

    def softmax(s):           # f32 VPU/EUP path (v5e-safe)
        m = jnp.max(s, axis=-1, keepdims=True)
        p = jnp.exp(s - m)
        return p * pl.reciprocal(jnp.sum(p, axis=-1, keepdims=True), approx=True)

    def ln(v, g, b):
        mu = jnp.mean(v, axis=-1, keepdims=True)
        var = jnp.mean((v - mu) ** 2, axis=-1, keepdims=True)
        return (v - mu) * jax.lax.rsqrt(var + LN_EPS) * g + b

    for l in range(n_layers):                       # static unroll; weights resident
        g_all = lng_ref[l]                          # (3, D)
        b_all = lnb_ref[l]

        # --- self attention (post-norm; tgt_mask + key padding in sbias) ---
        qp = mm(x, wq_s_ref[l]) + bq_s_ref[l]       # (R, nh*128), scale pre-folded
        kp = mm(x, wk_s_ref[l]) + bk_s_ref[l]       # (R, nh*128)
        attn = jnp.zeros_like(x)
        for h in range(n_head):
            band = slice(h * 128, (h + 1) * 128)    # whole (8,128) tiles per head
            s = mm_nt(qp[:, band], kp[:, band]) + sbias
            p = softmax(s)
            vo = mm(x, wvo_s_ref[l * n_head + h])   # (R, D) fused V*Wo per head
            attn = attn + mm(p, vo)
        x = ln(x + attn + bvo_s_ref[l], g_all[0:1, :], b_all[0:1, :])

        # --- cross attention over precomputed memory K / V*Wo ---
        qc = mm(x, wq_c_ref[l]) + bq_c_ref[l]       # (R, nh*128)
        kc_l = kc_ref[0, l]                          # (Tkv, nh*128) bf16
        cattn = jnp.zeros_like(x)
        for h in range(n_head):
            band = slice(h * 128, (h + 1) * 128)
            s = mm_nt(qc[:, band], kc_l[:, band]) + cbias
            p = softmax(s)
            cattn = cattn + mm(p, voc_ref[0, l * n_head + h])
        x = ln(x + cattn + bvo_c_ref[l], g_all[1:2, :], b_all[1:2, :])

        # --- feed-forward (relu) ---
        hdd = jnp.maximum(mm(x, w1_ref[l]) + b1_ref[l], 0.0)   # (R, Dff)
        f = mm(hdd, w2_ref[l]) + b2_ref[l]
        x = ln(x + f, g_all[2:3, :], b_all[2:3, :])

    # fused output heads: only the first 8 rows of each folded sample are
    # consumed (rows 0..2 hold the value/policy/index queries).
    if s_pad > 8:
        xq = jnp.concatenate(
            [x[b * s_pad:b * s_pad + 8, :] for b in range(b_blk)], axis=0)
    else:
        xq = x
    out_ref[...] = mm(xq, headw_ref[...]) + headb_ref[...]


def fused_decoder_stack(pack, x_flat, self_bias, cross_bias, kc, voc, *,
                        per_sample_mem, n_layers, n_head, b_blk, s_pad):
    n_blocks, R, _ = self_bias.shape
    D = x_flat.shape[-1]
    t_kv = kc.shape[2]
    hw_pad = pack["head_w"].shape[1]
    rows_out = b_blk * 8

    names = ("wq_s", "bq_s", "wk_s", "bk_s", "wvo_s", "bvo_s",
             "wq_c", "bq_c", "bvo_c", "w1", "b1", "w2", "b2",
             "ln_g", "ln_b", "head_w", "head_b")
    weights = [pack[n] for n in names]

    def const_spec(a):
        # Full-array block, constant block index -> loaded once, kept in VMEM.
        return pl.BlockSpec(a.shape, lambda b, n=a.ndim: (0,) * n)

    if per_sample_mem:
        kv_idx = lambda b: (b, 0, 0, 0)
    else:
        kv_idx = lambda b: (0, 0, 0, 0)

    kern = functools.partial(_decoder_kernel, n_layers=n_layers, n_head=n_head,
                             b_blk=b_blk, s_pad=s_pad)
    return pl.pallas_call(
        kern,
        out_shape=jax.ShapeDtypeStruct((n_blocks * rows_out, hw_pad), jnp.float32),
        grid=(n_blocks,),
        in_specs=[
            pl.BlockSpec((R, D), lambda b: (b, 0)),             # folded activations
            pl.BlockSpec((1, R, R), lambda b: (b, 0, 0)),       # self-attn bias
            pl.BlockSpec((1, R, t_kv), lambda b: (0, 0, 0)),    # cross-attn bias
            pl.BlockSpec((1,) + kc.shape[1:], kv_idx),          # memory K
            pl.BlockSpec((1,) + voc.shape[1:], kv_idx),         # memory V*Wo
        ] + [const_spec(w) for w in weights],
        out_specs=pl.BlockSpec((rows_out, hw_pad), lambda b: (b, 0)),
        compiler_params=pltpu.CompilerParams(
            dimension_semantics=("parallel",),
            vmem_limit_bytes=32 * 1024 * 1024),
    )(x_flat, self_bias, cross_bias, kc, voc, *weights)


# ----------------------------- model (glue) -----------------------------

def _sinusoidal_pe(length, d):
    pos = np.arange(length, dtype=np.float32)[:, None]
    div = np.exp(np.arange(0, d, 2, dtype=np.float32) * (-np.log(10000.0) / d))
    ang = pos * div
    pe = np.stack([np.sin(ang), np.cos(ang)], axis=-1).reshape(length, d)
    return jnp.asarray(pe)


def decoder_forward(pack, data_emb, expr_ids, parents=None, types=None, *,
                    use_aux_input=True):
    tok_emb = pack["token_embedding"]      # (n_words, d) f32
    idx_emb = pack["index_embedding"]      # (max_seq_len, d) f32
    n_words, d = tok_emb.shape
    max_seq_len = idx_emb.shape[0]
    n_head = d // 64
    n_layers = pack["ln_g"].shape[0]

    M, L = expr_ids.shape
    S = L + 3
    s_pad = _round_up(S, 8)
    b_blk = max(1, 128 // s_pad)           # fold samples -> >=128-row MXU tiles
    m_pad = _round_up(max(M, 1), b_blk)
    n_blocks = m_pad // b_blk
    R = b_blk * s_pad
    tail_len = s_pad - 3
    pad_l = tail_len - L

    # F.pad left with query_value, query_policy, query_index; right-pad to
    # s_pad with PAD (masked via the key-padding part of the bias).
    prefix = jnp.array([QUERY_VALUE, QUERY_POLICY, QUERY_INDEX],
                       dtype=expr_ids.dtype)
    expr_full = jnp.pad(expr_ids, ((0, 0), (0, pad_l)), constant_values=PAD_ID)
    ids = jnp.concatenate(
        [jnp.broadcast_to(prefix[None, :], (M, 3)), expr_full], axis=1)

    x = jnp.take(tok_emb, ids, axis=0)                          # (M, s_pad, d)
    tail = x[:, 3:, :]
    if use_aux_input and parents is not None:
        tail = tail + jnp.take(idx_emb, jnp.pad(parents, ((0, 0), (0, pad_l))),
                               axis=0)
    if use_aux_input and types is not None:
        tail = tail + jnp.take(tok_emb,
                               jnp.pad(types, ((0, 0), (0, pad_l)),
                                       constant_values=PAD_ID), axis=0)
    # TODO(synk): PositionalEncoding class body not shown; standard additive
    # sinusoidal PE (positions restarting at 0 after the 3 query slots) assumed,
    # dropout is identity in eval mode.
    tail = tail + _sinusoidal_pe(tail_len, d)[None]
    x = jnp.concatenate([x[:, :3, :], tail], axis=1).astype(jnp.float32)

    # batch fold: pad M to a multiple of b_blk, flatten (sample, pos) -> rows
    x = jnp.pad(x, ((0, m_pad - M), (0, 0), (0, 0)))
    ids_p = jnp.pad(ids, ((0, m_pad - M), (0, 0)), constant_values=PAD_ID)
    x_flat = x.reshape(n_blocks * R, d)

    # self-attn additive bias: tgt_mask | key_padding, block-diagonal over fold
    r = jnp.arange(s_pad)
    tgt = (r[None, :] < 3) & ~((r[:, None] == r[None, :]) & (r[:, None] < 3))
    per = tgt[None, :, :] | (ids_p == PAD_ID)[:, None, :]       # (m_pad, s, s)
    per = per.reshape(n_blocks, b_blk, s_pad, s_pad)
    eye = jnp.eye(b_blk, dtype=bool)
    blk = jnp.where(eye[None, :, None, :, None], per[:, :, :, None, :], True)
    self_bias = jnp.where(blk.reshape(n_blocks, R, R),
                          NEG_INF, 0.0).astype(jnp.float32)

    # memory: cross-attn K and fused V*Wo precomputed per layer here (wrapper
    # XLA matmuls); shared 2-D data_emb is passed once (constant index_map).
    if data_emb.ndim == 2:
        per_sample_mem = False
        T = data_emb.shape[0]
        t_pad = _round_up(T, 8)
        memb = jnp.pad(data_emb.astype(jnp.float32),
                       ((0, t_pad - T), (0, 0)))[None]          # (1, t_kv, d)
        t_kv = t_pad
        cmask = jnp.broadcast_to((jnp.arange(t_kv) >= T)[None, :], (R, t_kv))
    else:
        assert data_emb.ndim == 3 and data_emb.shape[0] == M
        per_sample_mem = True
        T = data_emb.shape[1]
        t_pad = _round_up(T, 8)
        m3 = jnp.pad(data_emb.astype(jnp.float32),
                     ((0, m_pad - M), (0, t_pad - T), (0, 0)))
        memb = m3.reshape(n_blocks, b_blk * t_pad, d)
        t_kv = b_blk * t_pad
        cm = (~eye[:, None, :, None]) | (jnp.arange(t_pad) >= T)[None, None, None, :]
        cmask = jnp.broadcast_to(cm, (b_blk, s_pad, b_blk, t_pad)).reshape(R, t_kv)
    cross_bias = jnp.where(cmask, NEG_INF, 0.0).astype(jnp.float32)[None]

    kc = (jnp.einsum("gtd,ldn->gltn", memb, pack["wk_c_packed"])
          + pack["bk_c_packed"][None])                           # (G, L, t_kv, nh*128)
    vfull = (jnp.einsum("gtd,lde->glte", memb, pack["wv_cross"])
             + pack["bv_cross"][None, :, None, :])               # (G, L, t_kv, d)
    vh = vfull.reshape(vfull.shape[0], n_layers, t_kv, n_head, 64)
    woh = pack["wo_cross"].reshape(n_layers, n_head, 64, d)
    voc = jnp.einsum("glthc,lhce->glhte", vh, woh)               # (G, L, nh, t_kv, d)
    kc = kc.astype(jnp.bfloat16)
    voc = voc.reshape(voc.shape[0], n_layers * n_head, t_kv, d).astype(jnp.bfloat16)

    out = fused_decoder_stack(pack, x_flat, self_bias, cross_bias, kc, voc,
                              per_sample_mem=per_sample_mem, n_layers=n_layers,
                              n_head=n_head, b_blk=b_blk, s_pad=s_pad)

    out = out.reshape(m_pad, 8, -1)[:M]
    value = out[:, 0, 0]                                         # (M,)
    policy = out[:, 1, 1:1 + n_words]                            # (M, n_words)
    index = out[:, 2, 1 + n_words:1 + n_words + max_seq_len]     # (M, max_seq_len)
    return value, policy, index


# ----------------------------- parameters -----------------------------

def init_params(key, n_words, d_emb, n_layers, max_seq_len):
    """Synthetic weights in math layout (in_features, out_features)."""
    d_ff = 4 * d_emb
    ks = iter(jax.random.split(key, 40))

    def w(shape, scale=0.02):
        return jax.random.normal(next(ks), shape, jnp.float32) * scale

    z = lambda *s: jnp.zeros(s, jnp.float32)
    Ln, D = n_layers, d_emb
    return dict(
        token_embedding=w((n_words, D), 1.0),
        index_embedding=w((max_seq_len, D), 1.0),
        value_W=w((1, D)), value_b=z(1),
        wq_self=w((Ln, D, D)), bq_self=z(Ln, D),
        wk_self=w((Ln, D, D)), bk_self=z(Ln, D),
        wv_self=w((Ln, D, D)), bv_self=z(Ln, D),
        wo_self=w((Ln, D, D)), bo_self=z(Ln, D),
        wq_cross=w((Ln, D, D)), bq_cross=z(Ln, D),
        wk_cross=w((Ln, D, D)), bk_cross=z(Ln, D),
        wv_cross=w((Ln, D, D)), bv_cross=z(Ln, D),
        wo_cross=w((Ln, D, D)), bo_cross=z(Ln, D),
        w1=w((Ln, D, d_ff)), b1=z(Ln, d_ff),
        w2=w((Ln, d_ff, D)), b2=z(Ln, D),
        ln_g=jnp.ones((Ln, 3, D), jnp.float32),
        ln_b=z(Ln, 3, D),
    )


def prepare_params(p):
    """One-time packing: per-head 128-lane-band Q/K (scale folded into Q),
    fused per-head V*Wo, pre-transposed lane-dense fused output head, bf16
    matmul weights."""
    bf = lambda a: a.astype(jnp.bfloat16)
    tok, idx = p["token_embedding"], p["index_embedding"]
    n_words, D = tok.shape
    max_seq_len = idx.shape[0]
    n_head = D // 64
    Ln = p["wq_self"].shape[0]
    scale = 1.0 / np.sqrt(64.0)

    def band_pack(wmat, bvec, s=1.0):
        wp = (wmat * s).reshape(Ln, D, n_head, 64)
        wp = jnp.pad(wp, ((0, 0), (0, 0), (0, 0), (0, 64))).reshape(Ln, D, n_head * 128)
        bp = (bvec * s).reshape(Ln, n_head, 64)
        bp = jnp.pad(bp, ((0, 0), (0, 0), (0, 64))).reshape(Ln, 1, n_head * 128)
        return wp, bp

    wq_s, bq_s = band_pack(p["wq_self"], p["bq_self"], scale)
    wk_s, bk_s = band_pack(p["wk_self"], p["bk_self"])
    wq_c, bq_c = band_pack(p["wq_cross"], p["bq_cross"], scale)
    wk_c, bk_c = band_pack(p["wk_cross"], p["bk_cross"])

    # fused per-head V*Wo for self attention (removes 64-lane V slices + O matmul)
    wvh = p["wv_self"].reshape(Ln, D, n_head, 64)
    woh = p["wo_self"].reshape(Ln, n_head, 64, D)
    wvo_s = jnp.einsum("ldhc,lhce->lhde", wvh, woh).reshape(Ln * n_head, D, D)
    bvo_s = (jnp.einsum("lc,lce->le", p["bv_self"], p["wo_self"])
             + p["bo_self"]).reshape(Ln, 1, D)
    bvo_c = p["bo_cross"].reshape(Ln, 1, D)

    hw = 1 + n_words + max_seq_len
    hw_pad = _round_up(hw, 128)
    head_rows = jnp.concatenate([p["value_W"], tok, idx], axis=0)   # (hw, D)
    head_w = jnp.pad(head_rows.T, ((0, 0), (0, hw_pad - hw)))       # (D, hw_pad)
    head_b = jnp.zeros((1, hw_pad), jnp.float32).at[0, 0].set(p["value_b"][0])

    return dict(
        token_embedding=tok, index_embedding=idx,
        # kernel-resident weights (bf16 MXU operands; f32 biases / LN params)
        wq_s=bf(wq_s), bq_s=bq_s, wk_s=bf(wk_s), bk_s=bk_s,
        wvo_s=bf(wvo_s), bvo_s=bvo_s,
        wq_c=bf(wq_c), bq_c=bq_c, bvo_c=bvo_c,
        w1=bf(p["w1"]), b1=p["b1"].reshape(Ln, 1, -1),
        w2=bf(p["w2"]), b2=p["b2"].reshape(Ln, 1, -1),
        ln_g=p["ln_g"], ln_b=p["ln_b"],
        head_w=bf(head_w), head_b=head_b,
        # wrapper-side (memory K / V*Wo precompute, done once per forward)
        wk_c_packed=wk_c, bk_c_packed=bk_c,
        wv_cross=p["wv_cross"], bv_cross=p["bv_cross"], wo_cross=p["wo_cross"],
    )


# ----------------------------- main -----------------------------

if __name__ == "__main__":
    n_words, d_emb, max_seq_len, n_layers = 16, 128, 12, 2
    M, L, N = 2, 8, 8   # batch, expr length, data tokens

    key = jax.random.PRNGKey(0)
    pkey, dkey, ekey, parkey, tkey = jax.random.split(key, 5)

    raw = init_params(pkey, n_words, d_emb, n_layers, max_seq_len)
    pack = prepare_params(raw)

    data_emb = jax.random.normal(dkey, (N, d_emb), jnp.float32)   # shared 2-D path
    expr_ids = jax.random.randint(ekey, (M, L), 4, n_words, dtype=jnp.int32)
    expr_ids = expr_ids.at[0, L - 2:].set(PAD_ID)                 # padding in row 0
    parents = jax.random.randint(parkey, (M, L), 0, max_seq_len, dtype=jnp.int32)
    types = jax.random.randint(tkey, (M, L), 4, n_words, dtype=jnp.int32)

    fwd = jax.jit(decoder_forward, static_argnames=("use_aux_input",))
    value, policy, index = fwd(pack, data_emb, expr_ids, parents, types,
                               use_aux_input=True)
    value, policy, index = jax.block_until_ready((value, policy, index))

    assert value.shape == (M,)
    assert policy.shape == (M, n_words)
    assert index.shape == (M, max_seq_len)
    assert jnp.all(jnp.isfinite(value))
    assert jnp.all(jnp.isfinite(policy))
    assert jnp.all(jnp.isfinite(index))
    print("KERNEL_OK")
</pallas_src>

<mosaic_0001>
module attributes {stable_mosaic.version = 11 : i64} {
  func.func @_decoder_kernel(%arg0: i32, %arg1: memref<128x128xf32, #tpu.memory_space<vmem>>, %arg2: memref<1x128x128xf32, #tpu.memory_space<vmem>>, %arg3: memref<1x128x8xf32, #tpu.memory_space<vmem>>, %arg4: memref<1x2x8x256xbf16, #tpu.memory_space<vmem>>, %arg5: memref<1x4x8x128xbf16, #tpu.memory_space<vmem>>, %arg6: memref<2x128x256xbf16, #tpu.memory_space<vmem>>, %arg7: memref<2x1x256xf32, #tpu.memory_space<vmem>>, %arg8: memref<2x128x256xbf16, #tpu.memory_space<vmem>>, %arg9: memref<2x1x256xf32, #tpu.memory_space<vmem>>, %arg10: memref<4x128x128xbf16, #tpu.memory_space<vmem>>, %arg11: memref<2x1x128xf32, #tpu.memory_space<vmem>>, %arg12: memref<2x128x256xbf16, #tpu.memory_space<vmem>>, %arg13: memref<2x1x256xf32, #tpu.memory_space<vmem>>, %arg14: memref<2x1x128xf32, #tpu.memory_space<vmem>>, %arg15: memref<2x128x512xbf16, #tpu.memory_space<vmem>>, %arg16: memref<2x1x512xf32, #tpu.memory_space<vmem>>, %arg17: memref<2x512x128xbf16, #tpu.memory_space<vmem>>, %arg18: memref<2x1x128xf32, #tpu.memory_space<vmem>>, %arg19: memref<2x3x128xf32, #tpu.memory_space<vmem>>, %arg20: memref<2x3x128xf32, #tpu.memory_space<vmem>>, %arg21: memref<128x128xbf16, #tpu.memory_space<vmem>>, %arg22: memref<1x128xf32, #tpu.memory_space<vmem>>, %arg23: memref<64x128xf32, #tpu.memory_space<vmem>>) attributes {dimension_semantics = [#tpu.dimension_semantics<parallel>], iteration_bounds = array<i64: 1>, scalar_prefetch = 0 : i64, scratch_operands = 0 : i64, tpu.core_type = #tpu.core_type<tc>, window_params = [{transform_indices = @transform_0, window_bounds = array<i64: 128, 128>}, {transform_indices = @transform_1, window_bounds = array<i64: 1, 128, 128>}, {pipeline_mode = #tpu.pipeline_mode<synchronous>, transform_indices = @transform_2, window_bounds = array<i64: 1, 128, 8>}, {pipeline_mode = #tpu.pipeline_mode<synchronous>, transform_indices = @transform_3, window_bounds = array<i64: 1, 2, 8, 256>}, {pipeline_mode = #tpu.pipeline_mode<synchronous>, transform_indices = @transform_4, window_bounds = array<i64: 1, 4, 8, 128>}, {pipeline_mode = #tpu.pipeline_mode<synchronous>, transform_indices = @transform_5, window_bounds = array<i64: 2, 128, 256>}, {pipeline_mode = #tpu.pipeline_mode<synchronous>, transform_indices = @transform_6, window_bounds = array<i64: 2, 1, 256>}, {pipeline_mode = #tpu.pipeline_mode<synchronous>, transform_indices = @transform_7, window_bounds = array<i64: 2, 128, 256>}, {pipeline_mode = #tpu.pipeline_mode<synchronous>, transform_indices = @transform_8, window_bounds = array<i64: 2, 1, 256>}, {pipeline_mode = #tpu.pipeline_mode<synchronous>, transform_indices = @transform_9, window_bounds = array<i64: 4, 128, 128>}, {pipeline_mode = #tpu.pipeline_mode<synchronous>, transform_indices = @transform_10, window_bounds = array<i64: 2, 1, 128>}, {pipeline_mode = #tpu.pipeline_mode<synchronous>, transform_indices = @transform_11, window_bounds = array<i64: 2, 128, 256>}, {pipeline_mode = #tpu.pipeline_mode<synchronous>, transform_indices = @transform_12, window_bounds = array<i64: 2, 1, 256>}, {pipeline_mode = #tpu.pipeline_mode<synchronous>, transform_indices = @transform_13, window_bounds = array<i64: 2, 1, 128>}, {pipeline_mode = #tpu.pipeline_mode<synchronous>, transform_indices = @transform_14, window_bounds = array<i64: 2, 128, 512>}, {pipeline_mode = #tpu.pipeline_mode<synchronous>, transform_indices = @transform_15, window_bounds = array<i64: 2, 1, 512>}, {pipeline_mode = #tpu.pipeline_mode<synchronous>, transform_indices = @transform_16, window_bounds = array<i64: 2, 512, 128>}, {pipeline_mode = #tpu.pipeline_mode<synchronous>, transform_indices = @transform_17, window_bounds = array<i64: 2, 1, 128>}, {pipeline_mode = #tpu.pipeline_mode<synchronous>, transform_indices = @transform_18, window_bounds = array<i64: 2, 3, 128>}, {pipeline_mode = #tpu.pipeline_mode<synchronous>, transform_indices = @transform_19, window_bounds = array<i64: 2, 3, 128>}, {pipeline_mode = #tpu.pipeline_mode<synchronous>, transform_indices = @transform_20, window_bounds = array<i64: 128, 128>}, {pipeline_mode = #tpu.pipeline_mode<synchronous>, transform_indices = @transform_21, window_bounds = array<i64: 1, 128>}, {transform_indices = @transform_22, window_bounds = array<i64: 64, 128>}]} {
    %c0 = arith.constant 0 : index
    %c0_0 = arith.constant 0 : index
    %0 = vector.load %arg1[%c0, %c0_0] : memref<128x128xf32, #tpu.memory_space<vmem>>, vector<128x128xf32>
    %c0_1 = arith.constant 0 : index
    %c0_2 = arith.constant 0 : index
    %c0_3 = arith.constant 0 : index
    %1 = vector.load %arg2[%c0_1, %c0_2, %c0_3] : memref<1x128x128xf32, #tpu.memory_space<vmem>>, vector<1x128x128xf32>
    %2 = vector.shape_cast %1 : vector<1x128x128xf32> to vector<128x128xf32>
    %c0_4 = arith.constant 0 : index
    %c0_5 = arith.constant 0 : index
    %c0_6 = arith.constant 0 : index
    %3 = vector.load %arg3[%c0_4, %c0_5, %c0_6] : memref<1x128x8xf32, #tpu.memory_space<vmem>>, vector<1x128x8xf32>
    %4 = vector.shape_cast %3 : vector<1x128x8xf32> to vector<128x8xf32>
    %c0_7 = arith.constant 0 : index
    %c0_8 = arith.constant 0 : index
    %c0_9 = arith.constant 0 : index
    %5 = vector.load %arg19[%c0_7, %c0_8, %c0_9] : memref<2x3x128xf32, #tpu.memory_space<vmem>>, vector<1x3x128xf32>
    %6 = vector.shape_cast %5 : vector<1x3x128xf32> to vector<3x128xf32>
    %c0_10 = arith.constant 0 : index
    %c0_11 = arith.constant 0 : index
    %c0_12 = arith.constant 0 : index
    %7 = vector.load %arg20[%c0_10, %c0_11, %c0_12] : memref<2x3x128xf32, #tpu.memory_space<vmem>>, vector<1x3x128xf32>
    %8 = vector.shape_cast %7 : vector<1x3x128xf32> to vector<3x128xf32>
    %c0_13 = arith.constant 0 : index
    %c0_14 = arith.constant 0 : index
    %c0_15 = arith.constant 0 : index
    %9 = vector.load %arg6[%c0_13, %c0_14, %c0_15] : memref<2x128x256xbf16, #tpu.memory_space<vmem>>, vector<1x128x256xbf16>
    %10 = vector.shape_cast %9 : vector<1x128x256xbf16> to vector<128x256xbf16>
    %11 = arith.truncf %0 : vector<128x128xf32> to vector<128x128xbf16>
    %cst = arith.constant dense<0.000000e+00> : vector<128x256xf32>
    %12 = tpu.matmul %11, %10, %cst {dimension_numbers = #tpu.dot_dimension_numbers<[1], [0], [0], [1], [0, 0, 1, 1], [], []>} : vector<128x128xbf16>, vector<128x256xbf16>, vector<128x256xf32> -> vector<128x256xf32>
    %c0_16 = arith.constant 0 : index
    %c0_17 = arith.constant 0 : index
    %c0_18 = arith.constant 0 : index
    %13 = vector.load %arg7[%c0_16, %c0_17, %c0_18] : memref<2x1x256xf32, #tpu.memory_space<vmem>>, vector<1x1x256xf32>
    %14 = vector.shape_cast %13 : vector<1x1x256xf32> to vector<1x256xf32>
    %15 = vector.broadcast %14 : vector<1x256xf32> to vector<128x256xf32>
    %16 = arith.addf %12, %15 : vector<128x256xf32>
    %c0_19 = arith.constant 0 : index
    %c0_20 = arith.constant 0 : index
    %c0_21 = arith.constant 0 : index
    %17 = vector.load %arg8[%c0_19, %c0_20, %c0_21] : memref<2x128x256xbf16, #tpu.memory_space<vmem>>, vector<1x128x256xbf16>
    %18 = vector.shape_cast %17 : vector<1x128x256xbf16> to vector<128x256xbf16>
    %19 = arith.truncf %0 : vector<128x128xf32> to vector<128x128xbf16>
    %cst_22 = arith.constant dense<0.000000e+00> : vector<128x256xf32>
    %20 = tpu.matmul %19, %18, %cst_22 {dimension_numbers = #tpu.dot_dimension_numbers<[1], [0], [0], [1], [0, 0, 1, 1], [], []>} : vector<128x128xbf16>, vector<128x256xbf16>, vector<128x256xf32> -> vector<128x256xf32>
    %c0_23 = arith.constant 0 : index
    %c0_24 = arith.constant 0 : index
    %c0_25 = arith.constant 0 : index
    %21 = vector.load %arg9[%c0_23, %c0_24, %c0_25] : memref<2x1x256xf32, #tpu.memory_space<vmem>>, vector<1x1x256xf32>
    %22 = vector.shape_cast %21 : vector<1x1x256xf32> to vector<1x256xf32>
    %23 = vector.broadcast %22 : vector<1x256xf32> to vector<128x256xf32>
    %24 = arith.addf %20, %23 : vector<128x256xf32>
    %cst_26 = arith.constant 0.000000e+00 : f32
    %25 = vector.broadcast %cst_26 : f32 to vector<128x128xf32>
    %26 = vector.extract_strided_slice %16 {offsets = [0, 0], sizes = [128, 128], strides = [1, 1]} : vector<128x256xf32> to vector<128x128xf32>
    %27 = vector.extract_strided_slice %24 {offsets = [0, 0], sizes = [128, 128], strides = [1, 1]} : vector<128x256xf32> to vector<128x128xf32>
    %28 = arith.truncf %26 : vector<128x128xf32> to vector<128x128xbf16>
    %29 = arith.truncf %27 : vector<128x128xf32> to vector<128x128xbf16>
    %cst_27 = arith.constant dense<0.000000e+00> : vector<128x128xf32>
    %30 = tpu.matmul %28, %29, %cst_27 {dimension_numbers = #tpu.dot_dimension_numbers<[1], [1], [0], [0], [0, 0, 1, 0], [], []>} : vector<128x128xbf16>, vector<128x128xbf16>, vector<128x128xf32> -> vector<128x128xf32>
    %31 = arith.addf %30, %2 : vector<128x128xf32>
    %cst_28 = arith.constant dense<0xFF800000> : vector<128xf32>
    %32 = vector.multi_reduction <maximumf>, %31, %cst_28 [1] : vector<128x128xf32> to vector<128xf32>
    %33 = vector.shape_cast %32 : vector<128xf32> to vector<128x1xf32>
    %34 = vector.broadcast %33 : vector<128x1xf32> to vector<128x128xf32>
    %35 = arith.subf %31, %34 : vector<128x128xf32>
    %36 = math.exp %35 : vector<128x128xf32>
    %cst_29 = arith.constant dense<0.000000e+00> : vector<128xf32>
    %37 = vector.multi_reduction <add>, %36, %cst_29 [1] : vector<128x128xf32> to vector<128xf32>
    %38 = vector.shape_cast %37 : vector<128xf32> to vector<128x1xf32>
    %39 = tpu.reciprocal %38 {approx = true} : vector<128x1xf32> -> vector<128x1xf32>
    %40 = vector.broadcast %39 : vector<128x1xf32> to vector<128x128xf32>
    %41 = arith.mulf %36, %40 : vector<128x128xf32>
    %c0_30 = arith.constant 0 : index
    %c0_31 = arith.constant 0 : index
    %c0_32 = arith.constant 0 : index
    %42 = vector.load %arg10[%c0_30, %c0_31, %c0_32] : memref<4x128x128xbf16, #tpu.memory_space<vmem>>, vector<1x128x128xbf16>
    %43 = vector.shape_cast %42 : vector<1x128x128xbf16> to vector<128x128xbf16>
    %44 = arith.truncf %0 : vector<128x128xf32> to vector<128x128xbf16>
    %cst_33 = arith.constant dense<0.000000e+00> : vector<128x128xf32>
    %45 = tpu.matmul %44, %43, %cst_33 {dimension_numbers = #tpu.dot_dimension_numbers<[1], [0], [0], [1], [0, 0, 1, 1], [], []>} : vector<128x128xbf16>, vector<128x128xbf16>, vector<128x128xf32> -> vector<128x128xf32>
    %46 = arith.truncf %41 : vector<128x128xf32> to vector<128x128xbf16>
    %47 = arith.truncf %45 : vector<128x128xf32> to vector<128x128xbf16>
    %cst_34 = arith.constant dense<0.000000e+00> : vector<128x128xf32>
    %48 = tpu.matmul %46, %47, %cst_34 {dimension_numbers = #tpu.dot_dimension_numbers<[1], [0], [0], [1], [0, 0, 1, 1], [], []>} : vector<128x128xbf16>, vector<128x128xbf16>, vector<128x128xf32> -> vector<128x128xf32>
    %49 = arith.addf %25, %48 : vector<128x128xf32>
    %50 = vector.extract_strided_slice %16 {offsets = [0, 128], sizes = [128, 128], strides = [1, 1]} : vector<128x256xf32> to vector<128x128xf32>
    %51 = vector.extract_strided_slice %24 {offsets = [0, 128], sizes = [128, 128], strides = [1, 1]} : vector<128x256xf32> to vector<128x128xf32>
    %52 = arith.truncf %50 : vector<128x128xf32> to vector<128x128xbf16>
    %53 = arith.truncf %51 : vector<128x128xf32> to vector<128x128xbf16>
    %cst_35 = arith.constant dense<0.000000e+00> : vector<128x128xf32>
    %54 = tpu.matmul %52, %53, %cst_35 {dimension_numbers = #tpu.dot_dimension_numbers<[1], [1], [0], [0], [0, 0, 1, 0], [], []>} : vector<128x128xbf16>, vector<128x128xbf16>, vector<128x128xf32> -> vector<128x128xf32>
    %55 = arith.addf %54, %2 : vector<128x128xf32>
    %cst_36 = arith.constant dense<0xFF800000> : vector<128xf32>
    %56 = vector.multi_reduction <maximumf>, %55, %cst_36 [1] : vector<128x128xf32> to vector<128xf32>
    %57 = vector.shape_cast %56 : vector<128xf32> to vector<128x1xf32>
    %58 = vector.broadcast %57 : vector<128x1xf32> to vector<128x128xf32>
    %59 = arith.subf %55, %58 : vector<128x128xf32>
    %60 = math.exp %59 : vector<128x128xf32>
    %cst_37 = arith.constant dense<0.000000e+00> : vector<128xf32>
    %61 = vector.multi_reduction <add>, %60, %cst_37 [1] : vector<128x128xf32> to vector<128xf32>
    %62 = vector.shape_cast %61 : vector<128xf32> to vector<128x1xf32>
    %63 = tpu.reciprocal %62 {approx = true} : vector<128x1xf32> -> vector<128x1xf32>
    %64 = vector.broadcast %63 : vector<128x1xf32> to vector<128x128xf32>
    %65 = arith.mulf %60, %64 : vector<128x128xf32>
    %c1 = arith.constant 1 : index
    %c0_38 = arith.constant 0 : index
    %c0_39 = arith.constant 0 : index
    %66 = vector.load %arg10[%c1, %c0_38, %c0_39] : memref<4x128x128xbf16, #tpu.memory_space<vmem>>, vector<1x128x128xbf16>
    %67 = vector.shape_cast %66 : vector<1x128x128xbf16> to vector<128x128xbf16>
    %68 = arith.truncf %0 : vector<128x128xf32> to vector<128x128xbf16>
    %cst_40 = arith.constant dense<0.000000e+00> : vector<128x128xf32>
    %69 = tpu.matmul %68, %67, %cst_40 {dimension_numbers = #tpu.dot_dimension_numbers<[1], [0], [0], [1], [0, 0, 1, 1], [], []>} : vector<128x128xbf16>, vector<128x128xbf16>, vector<128x128xf32> -> vector<128x128xf32>
    %70 = arith.truncf %65 : vector<128x128xf32> to vector<128x128xbf16>
    %71 = arith.truncf %69 : vector<128x128xf32> to vector<128x128xbf16>
    %cst_41 = arith.constant dense<0.000000e+00> : vector<128x128xf32>
    %72 = tpu.matmul %70, %71, %cst_41 {dimension_numbers = #tpu.dot_dimension_numbers<[1], [0], [0], [1], [0, 0, 1, 1], [], []>} : vector<128x128xbf16>, vector<128x128xbf16>, vector<128x128xf32> -> vector<128x128xf32>
    %73 = arith.addf %49, %72 : vector<128x128xf32>
    %74 = arith.addf %0, %73 : vector<128x128xf32>
    %c0_42 = arith.constant 0 : index
    %c0_43 = arith.constant 0 : index
    %c0_44 = arith.constant 0 : index
    %75 = vector.load %arg11[%c0_42, %c0_43, %c0_44] : memref<2x1x128xf32, #tpu.memory_space<vmem>>, vector<1x1x128xf32>
    %76 = vector.shape_cast %75 : vector<1x1x128xf32> to vector<1x128xf32>
    %77 = vector.broadcast %76 : vector<1x128xf32> to vector<128x128xf32>
    %78 = arith.addf %74, %77 : vector<128x128xf32>
    %79 = vector.extract_strided_slice %6 {offsets = [0, 0], sizes = [1, 128], strides = [1, 1]} : vector<3x128xf32> to vector<1x128xf32>
    %80 = vector.extract_strided_slice %8 {offsets = [0, 0], sizes = [1, 128], strides = [1, 1]} : vector<3x128xf32> to vector<1x128xf32>
    %cst_45 = arith.constant dense<0.000000e+00> : vector<128xf32>
    %81 = vector.multi_reduction <add>, %78, %cst_45 [1] : vector<128x128xf32> to vector<128xf32>
    %82 = vector.shape_cast %81 : vector<128xf32> to vector<128x1xf32>
    %cst_46 = arith.constant 1.280000e+02 : f32
    %83 = vector.broadcast %cst_46 : f32 to vector<128x1xf32>
    %84 = arith.divf %82, %83 : vector<128x1xf32>
    %85 = vector.broadcast %84 : vector<128x1xf32> to vector<128x128xf32>
    %86 = arith.subf %78, %85 : vector<128x128xf32>
    %87 = arith.mulf %86, %86 : vector<128x128xf32>
    %cst_47 = arith.constant dense<0.000000e+00> : vector<128xf32>
    %88 = vector.multi_reduction <add>, %87, %cst_47 [1] : vector<128x128xf32> to vector<128xf32>
    %89 = vector.shape_cast %88 : vector<128xf32> to vector<128x1xf32>
    %cst_48 = arith.constant 1.280000e+02 : f32
    %90 = vector.broadcast %cst_48 : f32 to vector<128x1xf32>
    %91 = arith.divf %89, %90 : vector<128x1xf32>
    %92 = vector.broadcast %84 : vector<128x1xf32> to vector<128x128xf32>
    %93 = arith.subf %78, %92 : vector<128x128xf32>
    %cst_49 = arith.constant 9.99999974E-6 : f32
    %94 = vector.broadcast %cst_49 : f32 to vector<128x1xf32>
    %95 = arith.addf %91, %94 : vector<128x1xf32>
    %96 = math.rsqrt %95 : vector<128x1xf32>
    %97 = vector.broadcast %96 : vector<128x1xf32> to vector<128x128xf32>
    %98 = arith.mulf %93, %97 : vector<128x128xf32>
    %99 = vector.broadcast %79 : vector<1x128xf32> to vector<128x128xf32>
    %100 = arith.mulf %98, %99 : vector<128x128xf32>
    %101 = vector.broadcast %80 : vector<1x128xf32> to vector<128x128xf32>
    %102 = arith.addf %100, %101 : vector<128x128xf32>
    %c0_50 = arith.constant 0 : index
    %c0_51 = arith.constant 0 : index
    %c0_52 = arith.constant 0 : index
    %103 = vector.load %arg12[%c0_50, %c0_51, %c0_52] : memref<2x128x256xbf16, #tpu.memory_space<vmem>>, vector<1x128x256xbf16>
    %104 = vector.shape_cast %103 : vector<1x128x256xbf16> to vector<128x256xbf16>
    %105 = arith.truncf %102 : vector<128x128xf32> to vector<128x128xbf16>
    %cst_53 = arith.constant dense<0.000000e+00> : vector<128x256xf32>
    %106 = tpu.matmul %105, %104, %cst_53 {dimension_numbers = #tpu.dot_dimension_numbers<[1], [0], [0], [1], [0, 0, 1, 1], [], []>} : vector<128x128xbf16>, vector<128x256xbf16>, vector<128x256xf32> -> vector<128x256xf32>
    %c0_54 = arith.constant 0 : index
    %c0_55 = arith.constant 0 : index
    %c0_56 = arith.constant 0 : index
    %107 = vector.load %arg13[%c0_54, %c0_55, %c0_56] : memref<2x1x256xf32, #tpu.memory_space<vmem>>, vector<1x1x256xf32>
    %108 = vector.shape_cast %107 : vector<1x1x256xf32> to vector<1x256xf32>
    %109 = vector.broadcast %108 : vector<1x256xf32> to vector<128x256xf32>
    %110 = arith.addf %106, %109 : vector<128x256xf32>
    %c0_57 = arith.constant 0 : index
    %c0_58 = arith.constant 0 : index
    %c0_59 = arith.constant 0 : index
    %c0_60 = arith.constant 0 : index
    %111 = vector.load %arg4[%c0_57, %c0_58, %c0_59, %c0_60] : memref<1x2x8x256xbf16, #tpu.memory_space<vmem>>, vector<1x1x8x256xbf16>
    %112 = vector.shape_cast %111 : vector<1x1x8x256xbf16> to vector<8x256xbf16>
    %cst_61 = arith.constant 0.000000e+00 : f32
    %113 = vector.broadcast %cst_61 : f32 to vector<128x128xf32>
    %114 = vector.extract_strided_slice %110 {offsets = [0, 0], sizes = [128, 128], strides = [1, 1]} : vector<128x256xf32> to vector<128x128xf32>
    %115 = vector.extract_strided_slice %112 {offsets = [0, 0], sizes = [8, 128], strides = [1, 1]} : vector<8x256xbf16> to vector<8x128xbf16>
    %116 = arith.truncf %114 : vector<128x128xf32> to vector<128x128xbf16>
    %cst_62 = arith.constant dense<0.000000e+00> : vector<128x8xf32>
    %117 = tpu.matmul %116, %115, %cst_62 {dimension_numbers = #tpu.dot_dimension_numbers<[1], [1], [0], [0], [0, 0, 1, 0], [], []>} : vector<128x128xbf16>, vector<8x128xbf16>, vector<128x8xf32> -> vector<128x8xf32>
    %118 = arith.addf %117, %4 : vector<128x8xf32>
    %cst_63 = arith.constant dense<0xFF800000> : vector<128xf32>
    %119 = vector.multi_reduction <maximumf>, %118, %cst_63 [1] : vector<128x8xf32> to vector<128xf32>
    %120 = vector.shape_cast %119 : vector<128xf32> to vector<128x1xf32>
    %121 = vector.broadcast %120 : vector<128x1xf32> to vector<128x8xf32>
    %122 = arith.subf %118, %121 : vector<128x8xf32>
    %123 = math.exp %122 : vector<128x8xf32>
    %cst_64 = arith.constant dense<0.000000e+00> : vector<128xf32>
    %124 = vector.multi_reduction <add>, %123, %cst_64 [1] : vector<128x8xf32> to vector<128xf32>
    %125 = vector.shape_cast %124 : vector<128xf32> to vector<128x1xf32>
    %126 = tpu.reciprocal %125 {approx = true} : vector<128x1xf32> -> vector<128x1xf32>
    %127 = vector.broadcast %126 : vector<128x1xf32> to vector<128x8xf32>
    %128 = arith.mulf %123, %127 : vector<128x8xf32>
    %c0_65 = arith.constant 0 : index
    %c0_66 = arith.constant 0 : index
    %c0_67 = arith.constant 0 : index
    %c0_68 = arith.constant 0 : index
    %129 = vector.load %arg5[%c0_65, %c0_66, %c0_67, %c0_68] : memref<1x4x8x128xbf16, #tpu.memory_space<vmem>>, vector<1x1x8x128xbf16>
    %130 = vector.shape_cast %129 : vector<1x1x8x128xbf16> to vector<8x128xbf16>
    %131 = arith.truncf %128 : vector<128x8xf32> to vector<128x8xbf16>
    %cst_69 = arith.constant dense<0.000000e+00> : vector<128x128xf32>
    %132 = tpu.matmul %131, %130, %cst_69 {dimension_numbers = #tpu.dot_dimension_numbers<[1], [0], [0], [1], [0, 0, 1, 1], [], []>} : vector<128x8xbf16>, vector<8x128xbf16>, vector<128x128xf32> -> vector<128x128xf32>
    %133 = arith.addf %113, %132 : vector<128x128xf32>
    %134 = vector.extract_strided_slice %110 {offsets = [0, 128], sizes = [128, 128], strides = [1, 1]} : vector<128x256xf32> to vector<128x128xf32>
    %135 = vector.extract_strided_slice %112 {offsets = [0, 128], sizes = [8, 128], strides = [1, 1]} : vector<8x256xbf16> to vector<8x128xbf16>
    %136 = arith.truncf %134 : vector<128x128xf32> to vector<128x128xbf16>
    %cst_70 = arith.constant dense<0.000000e+00> : vector<128x8xf32>
    %137 = tpu.matmul %136, %135, %cst_70 {dimension_numbers = #tpu.dot_dimension_numbers<[1], [1], [0], [0], [0, 0, 1, 0], [], []>} : vector<128x128xbf16>, vector<8x128xbf16>, vector<128x8xf32> -> vector<128x8xf32>
    %138 = arith.addf %137, %4 : vector<128x8xf32>
    %cst_71 = arith.constant dense<0xFF800000> : vector<128xf32>
    %139 = vector.multi_reduction <maximumf>, %138, %cst_71 [1] : vector<128x8xf32> to vector<128xf32>
    %140 = vector.shape_cast %139 : vector<128xf32> to vector<128x1xf32>
    %141 = vector.broadcast %140 : vector<128x1xf32> to vector<128x8xf32>
    %142 = arith.subf %138, %141 : vector<128x8xf32>
    %143 = math.exp %142 : vector<128x8xf32>
    %cst_72 = arith.constant dense<0.000000e+00> : vector<128xf32>
    %144 = vector.multi_reduction <add>, %143, %cst_72 [1] : vector<128x8xf32> to vector<128xf32>
    %145 = vector.shape_cast %144 : vector<128xf32> to vector<128x1xf32>
    %146 = tpu.reciprocal %145 {approx = true} : vector<128x1xf32> -> vector<128x1xf32>
    %147 = vector.broadcast %146 : vector<128x1xf32> to vector<128x8xf32>
    %148 = arith.mulf %143, %147 : vector<128x8xf32>
    %c0_73 = arith.constant 0 : index
    %c1_74 = arith.constant 1 : index
    %c0_75 = arith.constant 0 : index
    %c0_76 = arith.constant 0 : index
    %149 = vector.load %arg5[%c0_73, %c1_74, %c0_75, %c0_76] : memref<1x4x8x128xbf16, #tpu.memory_space<vmem>>, vector<1x1x8x128xbf16>
    %150 = vector.shape_cast %149 : vector<1x1x8x128xbf16> to vector<8x128xbf16>
    %151 = arith.truncf %148 : vector<128x8xf32> to vector<128x8xbf16>
    %cst_77 = arith.constant dense<0.000000e+00> : vector<128x128xf32>
    %152 = tpu.matmul %151, %150, %cst_77 {dimension_numbers = #tpu.dot_dimension_numbers<[1], [0], [0], [1], [0, 0, 1, 1], [], []>} : vector<128x8xbf16>, vector<8x128xbf16>, vector<128x128xf32> -> vector<128x128xf32>
    %153 = arith.addf %133, %152 : vector<128x128xf32>
    %154 = arith.addf %102, %153 : vector<128x128xf32>
    %c0_78 = arith.constant 0 : index
    %c0_79 = arith.constant 0 : index
    %c0_80 = arith.constant 0 : index
    %155 = vector.load %arg14[%c0_78, %c0_79, %c0_80] : memref<2x1x128xf32, #tpu.memory_space<vmem>>, vector<1x1x128xf32>
    %156 = vector.shape_cast %155 : vector<1x1x128xf32> to vector<1x128xf32>
    %157 = vector.broadcast %156 : vector<1x128xf32> to vector<128x128xf32>
    %158 = arith.addf %154, %157 : vector<128x128xf32>
    %159 = vector.extract_strided_slice %6 {offsets = [1, 0], sizes = [1, 128], strides = [1, 1]} : vector<3x128xf32> to vector<1x128xf32>
    %160 = vector.extract_strided_slice %8 {offsets = [1, 0], sizes = [1, 128], strides = [1, 1]} : vector<3x128xf32> to vector<1x128xf32>
    %cst_81 = arith.constant dense<0.000000e+00> : vector<128xf32>
    %161 = vector.multi_reduction <add>, %158, %cst_81 [1] : vector<128x128xf32> to vector<128xf32>
    %162 = vector.shape_cast %161 : vector<128xf32> to vector<128x1xf32>
    %cst_82 = arith.constant 1.280000e+02 : f32
    %163 = vector.broadcast %cst_82 : f32 to vector<128x1xf32>
    %164 = arith.divf %162, %163 : vector<128x1xf32>
    %165 = vector.broadcast %164 : vector<128x1xf32> to vector<128x128xf32>
    %166 = arith.subf %158, %165 : vector<128x128xf32>
    %167 = arith.mulf %166, %166 : vector<128x128xf32>
    %cst_83 = arith.constant dense<0.000000e+00> : vector<128xf32>
    %168 = vector.multi_reduction <add>, %167, %cst_83 [1] : vector<128x128xf32> to vector<128xf32>
    %169 = vector.shape_cast %168 : vector<128xf32> to vector<128x1xf32>
    %cst_84 = arith.constant 1.280000e+02 : f32
    %170 = vector.broadcast %cst_84 : f32 to vector<128x1xf32>
    %171 = arith.divf %169, %170 : vector<128x1xf32>
    %172 = vector.broadcast %164 : vector<128x1xf32> to vector<128x128xf32>
    %173 = arith.subf %158, %172 : vector<128x128xf32>
    %cst_85 = arith.constant 9.99999974E-6 : f32
    %174 = vector.broadcast %cst_85 : f32 to vector<128x1xf32>
    %175 = arith.addf %171, %174 : vector<128x1xf32>
    %176 = math.rsqrt %175 : vector<128x1xf32>
    %177 = vector.broadcast %176 : vector<128x1xf32> to vector<128x128xf32>
    %178 = arith.mulf %173, %177 : vector<128x128xf32>
    %179 = vector.broadcast %159 : vector<1x128xf32> to vector<128x128xf32>
    %180 = arith.mulf %178, %179 : vector<128x128xf32>
    %181 = vector.broadcast %160 : vector<1x128xf32> to vector<128x128xf32>
    %182 = arith.addf %180, %181 : vector<128x128xf32>
    %c0_86 = arith.constant 0 : index
    %c0_87 = arith.constant 0 : index
    %c0_88 = arith.constant 0 : index
    %183 = vector.load %arg15[%c0_86, %c0_87, %c0_88] : memref<2x128x512xbf16, #tpu.memory_space<vmem>>, vector<1x128x512xbf16>
    %184 = vector.shape_cast %183 : vector<1x128x512xbf16> to vector<128x512xbf16>
    %185 = arith.truncf %182 : vector<128x128xf32> to vector<128x128xbf16>
    %cst_89 = arith.constant dense<0.000000e+00> : vector<128x512xf32>
    %186 = tpu.matmul %185, %184, %cst_89 {dimension_numbers = #tpu.dot_dimension_numbers<[1], [0], [0], [1], [0, 0, 1, 1], [], []>} : vector<128x128xbf16>, vector<128x512xbf16>, vector<128x512xf32> -> vector<128x512xf32>
    %c0_90 = arith.constant 0 : index
    %c0_91 = arith.constant 0 : index
    %c0_92 = arith.constant 0 : index
    %187 = vector.load %arg16[%c0_90, %c0_91, %c0_92] : memref<2x1x512xf32, #tpu.memory_space<vmem>>, vector<1x1x512xf32>
    %188 = vector.shape_cast %187 : vector<1x1x512xf32> to vector<1x512xf32>
    %189 = vector.broadcast %188 : vector<1x512xf32> to vector<128x512xf32>
    %190 = arith.addf %186, %189 : vector<128x512xf32>
    %cst_93 = arith.constant 0.000000e+00 : f32
    %191 = vector.broadcast %cst_93 : f32 to vector<128x512xf32>
    %192 = arith.maximumf %190, %191 : vector<128x512xf32>
    %c0_94 = arith.constant 0 : index
    %c0_95 = arith.constant 0 : index
    %c0_96 = arith.constant 0 : index
    %193 = vector.load %arg17[%c0_94, %c0_95, %c0_96] : memref<2x512x128xbf16, #tpu.memory_space<vmem>>, vector<1x512x128xbf16>
    %194 = vector.shape_cast %193 : vector<1x512x128xbf16> to vector<512x128xbf16>
    %195 = arith.truncf %192 : vector<128x512xf32> to vector<128x512xbf16>
    %cst_97 = arith.constant dense<0.000000e+00> : vector<128x128xf32>
    %196 = tpu.matmul %195, %194, %cst_97 {dimension_numbers = #tpu.dot_dimension_numbers<[1], [0], [0], [1], [0, 0, 1, 1], [], []>} : vector<128x512xbf16>, vector<512x128xbf16>, vector<128x128xf32> -> vector<128x128xf32>
    %c0_98 = arith.constant 0 : index
    %c0_99 = arith.constant 0 : index
    %c0_100 = arith.constant 0 : index
    %197 = vector.load %arg18[%c0_98, %c0_99, %c0_100] : memref<2x1x128xf32, #tpu.memory_space<vmem>>, vector<1x1x128xf32>
    %198 = vector.shape_cast %197 : vector<1x1x128xf32> to vector<1x128xf32>
    %199 = vector.broadcast %198 : vector<1x128xf32> to vector<128x128xf32>
    %200 = arith.addf %196, %199 : vector<128x128xf32>
    %201 = arith.addf %182, %200 : vector<128x128xf32>
    %202 = vector.extract_strided_slice %6 {offsets = [2, 0], sizes = [1, 128], strides = [1, 1]} : vector<3x128xf32> to vector<1x128xf32>
    %203 = vector.extract_strided_slice %8 {offsets = [2, 0], sizes = [1, 128], strides = [1, 1]} : vector<3x128xf32> to vector<1x128xf32>
    %cst_101 = arith.constant dense<0.000000e+00> : vector<128xf32>
    %204 = vector.multi_reduction <add>, %201, %cst_101 [1] : vector<128x128xf32> to vector<128xf32>
    %205 = vector.shape_cast %204 : vector<128xf32> to vector<128x1xf32>
    %cst_102 = arith.constant 1.280000e+02 : f32
    %206 = vector.broadcast %cst_102 : f32 to vector<128x1xf32>
    %207 = arith.divf %205, %206 : vector<128x1xf32>
    %208 = vector.broadcast %207 : vector<128x1xf32> to vector<128x128xf32>
    %209 = arith.subf %201, %208 : vector<128x128xf32>
    %210 = arith.mulf %209, %209 : vector<128x128xf32>
    %cst_103 = arith.constant dense<0.000000e+00> : vector<128xf32>
    %211 = vector.multi_reduction <add>, %210, %cst_103 [1] : vector<128x128xf32> to vector<128xf32>
    %212 = vector.shape_cast %211 : vector<128xf32> to vector<128x1xf32>
    %cst_104 = arith.constant 1.280000e+02 : f32
    %213 = vector.broadcast %cst_104 : f32 to vector<128x1xf32>
    %214 = arith.divf %212, %213 : vector<128x1xf32>
    %215 = vector.broadcast %207 : vector<128x1xf32> to vector<128x128xf32>
    %216 = arith.subf %201, %215 : vector<128x128xf32>
    %cst_105 = arith.constant 9.99999974E-6 : f32
    %217 = vector.broadcast %cst_105 : f32 to vector<128x1xf32>
    %218 = arith.addf %214, %217 : vector<128x1xf32>
    %219 = math.rsqrt %218 : vector<128x1xf32>
    %220 = vector.broadcast %219 : vector<128x1xf32> to vector<128x128xf32>
    %221 = arith.mulf %216, %220 : vector<128x128xf32>
    %222 = vector.broadcast %202 : vector<1x128xf32> to vector<128x128xf32>
    %223 = arith.mulf %221, %222 : vector<128x128xf32>
    %224 = vector.broadcast %203 : vector<1x128xf32> to vector<128x128xf32>
    %225 = arith.addf %223, %224 : vector<128x128xf32>
    %c1_106 = arith.constant 1 : index
    %c0_107 = arith.constant 0 : index
    %c0_108 = arith.constant 0 : index
    %226 = vector.load %arg19[%c1_106, %c0_107, %c0_108] : memref<2x3x128xf32, #tpu.memory_space<vmem>>, vector<1x3x128xf32>
    %227 = vector.shape_cast %226 : vector<1x3x128xf32> to vector<3x128xf32>
    %c1_109 = arith.constant 1 : index
    %c0_110 = arith.constant 0 : index
    %c0_111 = arith.constant 0 : index
    %228 = vector.load %arg20[%c1_109, %c0_110, %c0_111] : memref<2x3x128xf32, #tpu.memory_space<vmem>>, vector<1x3x128xf32>
    %229 = vector.shape_cast %228 : vector<1x3x128xf32> to vector<3x128xf32>
    %c1_112 = arith.constant 1 : index
    %c0_113 = arith.constant 0 : index
    %c0_114 = arith.constant 0 : index
    %230 = vector.load %arg6[%c1_112, %c0_113, %c0_114] : memref<2x128x256xbf16, #tpu.memory_space<vmem>>, vector<1x128x256xbf16>
    %231 = vector.shape_cast %230 : vector<1x128x256xbf16> to vector<128x256xbf16>
    %232 = arith.truncf %225 : vector<128x128xf32> to vector<128x128xbf16>
    %cst_115 = arith.constant dense<0.000000e+00> : vector<128x256xf32>
    %233 = tpu.matmul %232, %231, %cst_115 {dimension_numbers = #tpu.dot_dimension_numbers<[1], [0], [0], [1], [0, 0, 1, 1], [], []>} : vector<128x128xbf16>, vector<128x256xbf16>, vector<128x256xf32> -> vector<128x256xf32>
    %c1_116 = arith.constant 1 : index
    %c0_117 = arith.constant 0 : index
    %c0_118 = arith.constant 0 : index
    %234 = vector.load %arg7[%c1_116, %c0_117, %c0_118] : memref<2x1x256xf32, #tpu.memory_space<vmem>>, vector<1x1x256xf32>
    %235 = vector.shape_cast %234 : vector<1x1x256xf32> to vector<1x256xf32>
    %236 = vector.broadcast %235 : vector<1x256xf32> to vector<128x256xf32>
    %237 = arith.addf %233, %236 : vector<128x256xf32>
    %c1_119 = arith.constant 1 : index
    %c0_120 = arith.constant 0 : index
    %c0_121 = arith.constant 0 : index
    %238 = vector.load %arg8[%c1_119, %c0_120, %c0_121] : memref<2x128x256xbf16, #tpu.memory_space<vmem>>, vector<1x128x256xbf16>
    %239 = vector.shape_cast %238 : vector<1x128x256xbf16> to vector<128x256xbf16>
    %240 = arith.truncf %225 : vector<128x128xf32> to vector<128x128xbf16>
    %cst_122 = arith.constant dense<0.000000e+00> : vector<128x256xf32>
    %241 = tpu.matmul %240, %239, %cst_122 {dimension_numbers = #tpu.dot_dimension_numbers<[1], [0], [0], [1], [0, 0, 1, 1], [], []>} : vector<128x128xbf16>, vector<128x256xbf16>, vector<128x256xf32> -> vector<128x256xf32>
    %c1_123 = arith.constant 1 : index
    %c0_124 = arith.constant 0 : index
    %c0_125 = arith.constant 0 : index
    %242 = vector.load %arg9[%c1_123, %c0_124, %c0_125] : memref<2x1x256xf32, #tpu.memory_space<vmem>>, vector<1x1x256xf32>
    %243 = vector.shape_cast %242 : vector<1x1x256xf32> to vector<1x256xf32>
    %244 = vector.broadcast %243 : vector<1x256xf32> to vector<128x256xf32>
    %245 = arith.addf %241, %244 : vector<128x256xf32>
    %cst_126 = arith.constant 0.000000e+00 : f32
    %246 = vector.broadcast %cst_126 : f32 to vector<128x128xf32>
    %247 = vector.extract_strided_slice %237 {offsets = [0, 0], sizes = [128, 128], strides = [1, 1]} : vector<128x256xf32> to vector<128x128xf32>
    %248 = vector.extract_strided_slice %245 {offsets = [0, 0], sizes = [128, 128], strides = [1, 1]} : vector<128x256xf32> to vector<128x128xf32>
    %249 = arith.truncf %247 : vector<128x128xf32> to vector<128x128xbf16>
    %250 = arith.truncf %248 : vector<128x128xf32> to vector<128x128xbf16>
    %cst_127 = arith.constant dense<0.000000e+00> : vector<128x128xf32>
    %251 = tpu.matmul %249, %250, %cst_127 {dimension_numbers = #tpu.dot_dimension_numbers<[1], [1], [0], [0], [0, 0, 1, 0], [], []>} : vector<128x128xbf16>, vector<128x128xbf16>, vector<128x128xf32> -> vector<128x128xf32>
    %252 = arith.addf %251, %2 : vector<128x128xf32>
    %cst_128 = arith.constant dense<0xFF800000> : vector<128xf32>
    %253 = vector.multi_reduction <maximumf>, %252, %cst_128 [1] : vector<128x128xf32> to vector<128xf32>
    %254 = vector.shape_cast %253 : vector<128xf32> to vector<128x1xf32>
    %255 = vector.broadcast %254 : vector<128x1xf32> to vector<128x128xf32>
    %256 = arith.subf %252, %255 : vector<128x128xf32>
    %257 = math.exp %256 : vector<128x128xf32>
    %cst_129 = arith.constant dense<0.000000e+00> : vector<128xf32>
    %258 = vector.multi_reduction <add>, %257, %cst_129 [1] : vector<128x128xf32> to vector<128xf32>
    %259 = vector.shape_cast %258 : vector<128xf32> to vector<128x1xf32>
    %260 = tpu.reciprocal %259 {approx = true} : vector<128x1xf32> -> vector<128x1xf32>
    %261 = vector.broadcast %260 : vector<128x1xf32> to vector<128x128xf32>
    %262 = arith.mulf %257, %261 : vector<128x128xf32>
    %c2 = arith.constant 2 : index
    %c0_130 = arith.constant 0 : index
    %c0_131 = arith.constant 0 : index
    %263 = vector.load %arg10[%c2, %c0_130, %c0_131] : memref<4x128x128xbf16, #tpu.memory_space<vmem>>, vector<1x128x128xbf16>
    %264 = vector.shape_cast %263 : vector<1x128x128xbf16> to vector<128x128xbf16>
    %265 = arith.truncf %225 : vector<128x128xf32> to vector<128x128xbf16>
    %cst_132 = arith.constant dense<0.000000e+00> : vector<128x128xf32>
    %266 = tpu.matmul %265, %264, %cst_132 {dimension_numbers = #tpu.dot_dimension_numbers<[1], [0], [0], [1], [0, 0, 1, 1], [], []>} : vector<128x128xbf16>, vector<128x128xbf16>, vector<128x128xf32> -> vector<128x128xf32>
    %267 = arith.truncf %262 : vector<128x128xf32> to vector<128x128xbf16>
    %268 = arith.truncf %266 : vector<128x128xf32> to vector<128x128xbf16>
    %cst_133 = arith.constant dense<0.000000e+00> : vector<128x128xf32>
    %269 = tpu.matmul %267, %268, %cst_133 {dimension_numbers = #tpu.dot_dimension_numbers<[1], [0], [0], [1], [0, 0, 1, 1], [], []>} : vector<128x128xbf16>, vector<128x128xbf16>, vector<128x128xf32> -> vector<128x128xf32>
    %270 = arith.addf %246, %269 : vector<128x128xf32>
    %271 = vector.extract_strided_slice %237 {offsets = [0, 128], sizes = [128, 128], strides = [1, 1]} : vector<128x256xf32> to vector<128x128xf32>
    %272 = vector.extract_strided_slice %245 {offsets = [0, 128], sizes = [128, 128], strides = [1, 1]} : vector<128x256xf32> to vector<128x128xf32>
    %273 = arith.truncf %271 : vector<128x128xf32> to vector<128x128xbf16>
    %274 = arith.truncf %272 : vector<128x128xf32> to vector<128x128xbf16>
    %cst_134 = arith.constant dense<0.000000e+00> : vector<128x128xf32>
    %275 = tpu.matmul %273, %274, %cst_134 {dimension_numbers = #tpu.dot_dimension_numbers<[1], [1], [0], [0], [0, 0, 1, 0], [], []>} : vector<128x128xbf16>, vector<128x128xbf16>, vector<128x128xf32> -> vector<128x128xf32>
    %276 = arith.addf %275, %2 : vector<128x128xf32>
    %cst_135 = arith.constant dense<0xFF800000> : vector<128xf32>
    %277 = vector.multi_reduction <maximumf>, %276, %cst_135 [1] : vector<128x128xf32> to vector<128xf32>
    %278 = vector.shape_cast %277 : vector<128xf32> to vector<128x1xf32>
    %279 = vector.broadcast %278 : vector<128x1xf32> to vector<128x128xf32>
    %280 = arith.subf %276, %279 : vector<128x128xf32>
    %281 = math.exp %280 : vector<128x128xf32>
    %cst_136 = arith.constant dense<0.000000e+00> : vector<128xf32>
    %282 = vector.multi_reduction <add>, %281, %cst_136 [1] : vector<128x128xf32> to vector<128xf32>
    %283 = vector.shape_cast %282 : vector<128xf32> to vector<128x1xf32>
    %284 = tpu.reciprocal %283 {approx = true} : vector<128x1xf32> -> vector<128x1xf32>
    %285 = vector.broadcast %284 : vector<128x1xf32> to vector<128x128xf32>
    %286 = arith.mulf %281, %285 : vector<128x128xf32>
    %c3 = arith.constant 3 : index
    %c0_137 = arith.constant 0 : index
    %c0_138 = arith.constant 0 : index
    %287 = vector.load %arg10[%c3, %c0_137, %c0_138] : memref<4x128x128xbf16, #tpu.memory_space<vmem>>, vector<1x128x128xbf16>
    %288 = vector.shape_cast %287 : vector<1x128x128xbf16> to vector<128x128xbf16>
    %289 = arith.truncf %225 : vector<128x128xf32> to vector<128x128xbf16>
    %cst_139 = arith.constant dense<0.000000e+00> : vector<128x128xf32>
    %290 = tpu.matmul %289, %288, %cst_139 {dimension_numbers = #tpu.dot_dimension_numbers<[1], [0], [0], [1], [0, 0, 1, 1], [], []>} : vector<128x128xbf16>, vector<128x128xbf16>, vector<128x128xf32> -> vector<128x128xf32>
    %291 = arith.truncf %286 : vector<128x128xf32> to vector<128x128xbf16>
    %292 = arith.truncf %290 : vector<128x128xf32> to vector<128x128xbf16>
    %cst_140 = arith.constant dense<0.000000e+00> : vector<128x128xf32>
    %293 = tpu.matmul %291, %292, %cst_140 {dimension_numbers = #tpu.dot_dimension_numbers<[1], [0], [0], [1], [0, 0, 1, 1], [], []>} : vector<128x128xbf16>, vector<128x128xbf16>, vector<128x128xf32> -> vector<128x128xf32>
    %294 = arith.addf %270, %293 : vector<128x128xf32>
    %295 = arith.addf %225, %294 : vector<128x128xf32>
    %c1_141 = arith.constant 1 : index
    %c0_142 = arith.constant 0 : index
    %c0_143 = arith.constant 0 : index
    %296 = vector.load %arg11[%c1_141, %c0_142, %c0_143] : memref<2x1x128xf32, #tpu.memory_space<vmem>>, vector<1x1x128xf32>
    %297 = vector.shape_cast %296 : vector<1x1x128xf32> to vector<1x128xf32>
    %298 = vector.broadcast %297 : vector<1x128xf32> to vector<128x128xf32>
    %299 = arith.addf %295, %298 : vector<128x128xf32>
    %300 = vector.extract_strided_slice %227 {offsets = [0, 0], sizes = [1, 128], strides = [1, 1]} : vector<3x128xf32> to vector<1x128xf32>
    %301 = vector.extract_strided_slice %229 {offsets = [0, 0], sizes = [1, 128], strides = [1, 1]} : vector<3x128xf32> to vector<1x128xf32>
    %cst_144 = arith.constant dense<0.000000e+00> : vector<128xf32>
    %302 = vector.multi_reduction <add>, %299, %cst_144 [1] : vector<128x128xf32> to vector<128xf32>
    %303 = vector.shape_cast %302 : vector<128xf32> to vector<128x1xf32>
    %cst_145 = arith.constant 1.280000e+02 : f32
    %304 = vector.broadcast %cst_145 : f32 to vector<128x1xf32>
    %305 = arith.divf %303, %304 : vector<128x1xf32>
    %306 = vector.broadcast %305 : vector<128x1xf32> to vector<128x128xf32>
    %307 = arith.subf %299, %306 : vector<128x128xf32>
    %308 = arith.mulf %307, %307 : vector<128x128xf32>
    %cst_146 = arith.constant dense<0.000000e+00> : vector<128xf32>
    %309 = vector.multi_reduction <add>, %308, %cst_146 [1] : vector<128x128xf32> to vector<128xf32>
    %310 = vector.shape_cast %309 : vector<128xf32> to vector<128x1xf32>
    %cst_147 = arith.constant 1.280000e+02 : f32
    %311 = vector.broadcast %cst_147 : f32 to vector<128x1xf32>
    %312 = arith.divf %310, %311 : vector<128x1xf32>
    %313 = vector.broadcast %305 : vector<128x1xf32> to vector<128x128xf32>
    %314 = arith.subf %299, %313 : vector<128x128xf32>
    %cst_148 = arith.constant 9.99999974E-6 : f32
    %315 = vector.broadcast %cst_148 : f32 to vector<128x1xf32>
    %316 = arith.addf %312, %315 : vector<128x1xf32>
    %317 = math.rsqrt %316 : vector<128x1xf32>
    %318 = vector.broadcast %317 : vector<128x1xf32> to vector<128x128xf32>
    %319 = arith.mulf %314, %318 : vector<128x128xf32>
    %320 = vector.broadcast %300 : vector<1x128xf32> to vector<128x128xf32>
    %321 = arith.mulf %319, %320 : vector<128x128xf32>
    %322 = vector.broadcast %301 : vector<1x128xf32> to vector<128x128xf32>
    %323 = arith.addf %321, %322 : vector<128x128xf32>
    %c1_149 = arith.constant 1 : index
    %c0_150 = arith.constant 0 : index
    %c0_151 = arith.constant 0 : index
    %324 = vector.load %arg12[%c1_149, %c0_150, %c0_151] : memref<2x128x256xbf16, #tpu.memory_space<vmem>>, vector<1x128x256xbf16>
    %325 = vector.shape_cast %324 : vector<1x128x256xbf16> to vector<128x256xbf16>
    %326 = arith.truncf %323 : vector<128x128xf32> to vector<128x128xbf16>
    %cst_152 = arith.constant dense<0.000000e+00> : vector<128x256xf32>
    %327 = tpu.matmul %326, %325, %cst_152 {dimension_numbers = #tpu.dot_dimension_numbers<[1], [0], [0], [1], [0, 0, 1, 1], [], []>} : vector<128x128xbf16>, vector<128x256xbf16>, vector<128x256xf32> -> vector<128x256xf32>
    %c1_153 = arith.constant 1 : index
    %c0_154 = arith.constant 0 : index
    %c0_155 = arith.constant 0 : index
    %328 = vector.load %arg13[%c1_153, %c0_154, %c0_155] : memref<2x1x256xf32, #tpu.memory_space<vmem>>, vector<1x1x256xf32>
    %329 = vector.shape_cast %328 : vector<1x1x256xf32> to vector<1x256xf32>
    %330 = vector.broadcast %329 : vector<1x256xf32> to vector<128x256xf32>
    %331 = arith.addf %327, %330 : vector<128x256xf32>
    %c0_156 = arith.constant 0 : index
    %c1_157 = arith.constant 1 : index
    %c0_158 = arith.constant 0 : index
    %c0_159 = arith.constant 0 : index
    %332 = vector.load %arg4[%c0_156, %c1_157, %c0_158, %c0_159] : memref<1x2x8x256xbf16, #tpu.memory_space<vmem>>, vector<1x1x8x256xbf16>
    %333 = vector.shape_cast %332 : vector<1x1x8x256xbf16> to vector<8x256xbf16>
    %cst_160 = arith.constant 0.000000e+00 : f32
    %334 = vector.broadcast %cst_160 : f32 to vector<128x128xf32>
    %335 = vector.extract_strided_slice %331 {offsets = [0, 0], sizes = [128, 128], strides = [1, 1]} : vector<128x256xf32> to vector<128x128xf32>
    %336 = vector.extract_strided_slice %333 {offsets = [0, 0], sizes = [8, 128], strides = [1, 1]} : vector<8x256xbf16> to vector<8x128xbf16>
    %337 = arith.truncf %335 : vector<128x128xf32> to vector<128x128xbf16>
    %cst_161 = arith.constant dense<0.000000e+00> : vector<128x8xf32>
    %338 = tpu.matmul %337, %336, %cst_161 {dimension_numbers = #tpu.dot_dimension_numbers<[1], [1], [0], [0], [0, 0, 1, 0], [], []>} : vector<128x128xbf16>, vector<8x128xbf16>, vector<128x8xf32> -> vector<128x8xf32>
    %339 = arith.addf %338, %4 : vector<128x8xf32>
    %cst_162 = arith.constant dense<0xFF800000> : vector<128xf32>
    %340 = vector.multi_reduction <maximumf>, %339, %cst_162 [1] : vector<128x8xf32> to vector<128xf32>
    %341 = vector.shape_cast %340 : vector<128xf32> to vector<128x1xf32>
    %342 = vector.broadcast %341 : vector<128x1xf32> to vector<128x8xf32>
    %343 = arith.subf %339, %342 : vector<128x8xf32>
    %344 = math.exp %343 : vector<128x8xf32>
    %cst_163 = arith.constant dense<0.000000e+00> : vector<128xf32>
    %345 = vector.multi_reduction <add>, %344, %cst_163 [1] : vector<128x8xf32> to vector<128xf32>
    %346 = vector.shape_cast %345 : vector<128xf32> to vector<128x1xf32>
    %347 = tpu.reciprocal %346 {approx = true} : vector<128x1xf32> -> vector<128x1xf32>
    %348 = vector.broadcast %347 : vector<128x1xf32> to vector<128x8xf32>
    %349 = arith.mulf %344, %348 : vector<128x8xf32>
    %c0_164 = arith.constant 0 : index
    %c2_165 = arith.constant 2 : index
    %c0_166 = arith.constant 0 : index
    %c0_167 = arith.constant 0 : index
    %350 = vector.load %arg5[%c0_164, %c2_165, %c0_166, %c0_167] : memref<1x4x8x128xbf16, #tpu.memory_space<vmem>>, vector<1x1x8x128xbf16>
    %351 = vector.shape_cast %350 : vector<1x1x8x128xbf16> to vector<8x128xbf16>
    %352 = arith.truncf %349 : vector<128x8xf32> to vector<128x8xbf16>
    %cst_168 = arith.constant dense<0.000000e+00> : vector<128x128xf32>
    %353 = tpu.matmul %352, %351, %cst_168 {dimension_numbers = #tpu.dot_dimension_numbers<[1], [0], [0], [1], [0, 0, 1, 1], [], []>} : vector<128x8xbf16>, vector<8x128xbf16>, vector<128x128xf32> -> vector<128x128xf32>
    %354 = arith.addf %334, %353 : vector<128x128xf32>
    %355 = vector.extract_strided_slice %331 {offsets = [0, 128], sizes = [128, 128], strides = [1, 1]} : vector<128x256xf32> to vector<128x128xf32>
    %356 = vector.extract_strided_slice %333 {offsets = [0, 128], sizes = [8, 128], strides = [1, 1]} : vector<8x256xbf16> to vector<8x128xbf16>
    %357 = arith.truncf %355 : vector<128x128xf32> to vector<128x128xbf16>
    %cst_169 = arith.constant dense<0.000000e+00> : vector<128x8xf32>
    %358 = tpu.matmul %357, %356, %cst_169 {dimension_numbers = #tpu.dot_dimension_numbers<[1], [1], [0], [0], [0, 0, 1, 0], [], []>} : vector<128x128xbf16>, vector<8x128xbf16>, vector<128x8xf32> -> vector<128x8xf32>
    %359 = arith.addf %358, %4 : vector<128x8xf32>
    %cst_170 = arith.constant dense<0xFF800000> : vector<128xf32>
    %360 = vector.multi_reduction <maximumf>, %359, %cst_170 [1] : vector<128x8xf32> to vector<128xf32>
    %361 = vector.shape_cast %360 : vector<128xf32> to vector<128x1xf32>
    %362 = vector.broadcast %361 : vector<128x1xf32> to vector<128x8xf32>
    %363 = arith.subf %359, %362 : vector<128x8xf32>
    %364 = math.exp %363 : vector<128x8xf32>
    %cst_171 = arith.constant dense<0.000000e+00> : vector<128xf32>
    %365 = vector.multi_reduction <add>, %364, %cst_171 [1] : vector<128x8xf32> to vector<128xf32>
    %366 = vector.shape_cast %365 : vector<128xf32> to vector<128x1xf32>
    %367 = tpu.reciprocal %366 {approx = true} : vector<128x1xf32> -> vector<128x1xf32>
    %368 = vector.broadcast %367 : vector<128x1xf32> to vector<128x8xf32>
    %369 = arith.mulf %364, %368 : vector<128x8xf32>
    %c0_172 = arith.constant 0 : index
    %c3_173 = arith.constant 3 : index
    %c0_174 = arith.constant 0 : index
    %c0_175 = arith.constant 0 : index
    %370 = vector.load %arg5[%c0_172, %c3_173, %c0_174, %c0_175] : memref<1x4x8x128xbf16, #tpu.memory_space<vmem>>, vector<1x1x8x128xbf16>
    %371 = vector.shape_cast %370 : vector<1x1x8x128xbf16> to vector<8x128xbf16>
    %372 = arith.truncf %369 : vector<128x8xf32> to vector<128x8xbf16>
    %cst_176 = arith.constant dense<0.000000e+00> : vector<128x128xf32>
    %373 = tpu.matmul %372, %371, %cst_176 {dimension_numbers = #tpu.dot_dimension_numbers<[1], [0], [0], [1], [0, 0, 1, 1], [], []>} : vector<128x8xbf16>, vector<8x128xbf16>, vector<128x128xf32> -> vector<128x128xf32>
    %374 = arith.addf %354, %373 : vector<128x128xf32>
    %375 = arith.addf %323, %374 : vector<128x128xf32>
    %c1_177 = arith.constant 1 : index
    %c0_178 = arith.constant 0 : index
    %c0_179 = arith.constant 0 : index
    %376 = vector.load %arg14[%c1_177, %c0_178, %c0_179] : memref<2x1x128xf32, #tpu.memory_space<vmem>>, vector<1x1x128xf32>
    %377 = vector.shape_cast %376 : vector<1x1x128xf32> to vector<1x128xf32>
    %378 = vector.broadcast %377 : vector<1x128xf32> to vector<128x128xf32>
    %379 = arith.addf %375, %378 : vector<128x128xf32>
    %380 = vector.extract_strided_slice %227 {offsets = [1, 0], sizes = [1, 128], strides = [1, 1]} : vector<3x128xf32> to vector<1x128xf32>
    %381 = vector.extract_strided_slice %229 {offsets = [1, 0], sizes = [1, 128], strides = [1, 1]} : vector<3x128xf32> to vector<1x128xf32>
    %cst_180 = arith.constant dense<0.000000e+00> : vector<128xf32>
    %382 = vector.multi_reduction <add>, %379, %cst_180 [1] : vector<128x128xf32> to vector<128xf32>
    %383 = vector.shape_cast %382 : vector<128xf32> to vector<128x1xf32>
    %cst_181 = arith.constant 1.280000e+02 : f32
    %384 = vector.broadcast %cst_181 : f32 to vector<128x1xf32>
    %385 = arith.divf %383, %384 : vector<128x1xf32>
    %386 = vector.broadcast %385 : vector<128x1xf32> to vector<128x128xf32>
    %387 = arith.subf %379, %386 : vector<128x128xf32>
    %388 = arith.mulf %387, %387 : vector<128x128xf32>
    %cst_182 = arith.constant dense<0.000000e+00> : vector<128xf32>
    %389 = vector.multi_reduction <add>, %388, %cst_182 [1] : vector<128x128xf32> to vector<128xf32>
    %390 = vector.shape_cast %389 : vector<128xf32> to vector<128x1xf32>
    %cst_183 = arith.constant 1.280000e+02 : f32
    %391 = vector.broadcast %cst_183 : f32 to vector<128x1xf32>
    %392 = arith.divf %390, %391 : vector<128x1xf32>
    %393 = vector.broadcast %385 : vector<128x1xf32> to vector<128x128xf32>
    %394 = arith.subf %379, %393 : vector<128x128xf32>
    %cst_184 = arith.constant 9.99999974E-6 : f32
    %395 = vector.broadcast %cst_184 : f32 to vector<128x1xf32>
    %396 = arith.addf %392, %395 : vector<128x1xf32>
    %397 = math.rsqrt %396 : vector<128x1xf32>
    %398 = vector.broadcast %397 : vector<128x1xf32> to vector<128x128xf32>
    %399 = arith.mulf %394, %398 : vector<128x128xf32>
    %400 = vector.broadcast %380 : vector<1x128xf32> to vector<128x128xf32>
    %401 = arith.mulf %399, %400 : vector<128x128xf32>
    %402 = vector.broadcast %381 : vector<1x128xf32> to vector<128x128xf32>
    %403 = arith.addf %401, %402 : vector<128x128xf32>
    %c1_185 = arith.constant 1 : index
    %c0_186 = arith.constant 0 : index
    %c0_187 = arith.constant 0 : index
    %404 = vector.load %arg15[%c1_185, %c0_186, %c0_187] : memref<2x128x512xbf16, #tpu.memory_space<vmem>>, vector<1x128x512xbf16>
    %405 = vector.shape_cast %404 : vector<1x128x512xbf16> to vector<128x512xbf16>
    %406 = arith.truncf %403 : vector<128x128xf32> to vector<128x128xbf16>
    %cst_188 = arith.constant dense<0.000000e+00> : vector<128x512xf32>
    %407 = tpu.matmul %406, %405, %cst_188 {dimension_numbers = #tpu.dot_dimension_numbers<[1], [0], [0], [1], [0, 0, 1, 1], [], []>} : vector<128x128xbf16>, vector<128x512xbf16>, vector<128x512xf32> -> vector<128x512xf32>
    %c1_189 = arith.constant 1 : index
    %c0_190 = arith.constant 0 : index
    %c0_191 = arith.constant 0 : index
    %408 = vector.load %arg16[%c1_189, %c0_190, %c0_191] : memref<2x1x512xf32, #tpu.memory_space<vmem>>, vector<1x1x512xf32>
    %409 = vector.shape_cast %408 : vector<1x1x512xf32> to vector<1x512xf32>
    %410 = vector.broadcast %409 : vector<1x512xf32> to vector<128x512xf32>
    %411 = arith.addf %407, %410 : vector<128x512xf32>
    %cst_192 = arith.constant 0.000000e+00 : f32
    %412 = vector.broadcast %cst_192 : f32 to vector<128x512xf32>
    %413 = arith.maximumf %411, %412 : vector<128x512xf32>
    %c1_193 = arith.constant 1 : index
    %c0_194 = arith.constant 0 : index
    %c0_195 = arith.constant 0 : index
    %414 = vector.load %arg17[%c1_193, %c0_194, %c0_195] : memref<2x512x128xbf16, #tpu.memory_space<vmem>>, vector<1x512x128xbf16>
    %415 = vector.shape_cast %414 : vector<1x512x128xbf16> to vector<512x128xbf16>
    %416 = arith.truncf %413 : vector<128x512xf32> to vector<128x512xbf16>
    %cst_196 = arith.constant dense<0.000000e+00> : vector<128x128xf32>
    %417 = tpu.matmul %416, %415, %cst_196 {dimension_numbers = #tpu.dot_dimension_numbers<[1], [0], [0], [1], [0, 0, 1, 1], [], []>} : vector<128x512xbf16>, vector<512x128xbf16>, vector<128x128xf32> -> vector<128x128xf32>
    %c1_197 = arith.constant 1 : index
    %c0_198 = arith.constant 0 : index
    %c0_199 = arith.constant 0 : index
    %418 = vector.load %arg18[%c1_197, %c0_198, %c0_199] : memref<2x1x128xf32, #tpu.memory_space<vmem>>, vector<1x1x128xf32>
    %419 = vector.shape_cast %418 : vector<1x1x128xf32> to vector<1x128xf32>
    %420 = vector.broadcast %419 : vector<1x128xf32> to vector<128x128xf32>
    %421 = arith.addf %417, %420 : vector<128x128xf32>
    %422 = arith.addf %403, %421 : vector<128x128xf32>
    %423 = vector.extract_strided_slice %227 {offsets = [2, 0], sizes = [1, 128], strides = [1, 1]} : vector<3x128xf32> to vector<1x128xf32>
    %424 = vector.extract_strided_slice %229 {offsets = [2, 0], sizes = [1, 128], strides = [1, 1]} : vector<3x128xf32> to vector<1x128xf32>
    %cst_200 = arith.constant dense<0.000000e+00> : vector<128xf32>
    %425 = vector.multi_reduction <add>, %422, %cst_200 [1] : vector<128x128xf32> to vector<128xf32>
    %426 = vector.shape_cast %425 : vector<128xf32> to vector<128x1xf32>
    %cst_201 = arith.constant 1.280000e+02 : f32
    %427 = vector.broadcast %cst_201 : f32 to vector<128x1xf32>
    %428 = arith.divf %426, %427 : vector<128x1xf32>
    %429 = vector.broadcast %428 : vector<128x1xf32> to vector<128x128xf32>
    %430 = arith.subf %422, %429 : vector<128x128xf32>
    %431 = arith.mulf %430, %430 : vector<128x128xf32>
    %cst_202 = arith.constant dense<0.000000e+00> : vector<128xf32>
    %432 = vector.multi_reduction <add>, %431, %cst_202 [1] : vector<128x128xf32> to vector<128xf32>
    %433 = vector.shape_cast %432 : vector<128xf32> to vector<128x1xf32>
    %cst_203 = arith.constant 1.280000e+02 : f32
    %434 = vector.broadcast %cst_203 : f32 to vector<128x1xf32>
    %435 = arith.divf %433, %434 : vector<128x1xf32>
    %436 = vector.broadcast %428 : vector<128x1xf32> to vector<128x128xf32>
    %437 = arith.subf %422, %436 : vector<128x128xf32>
    %cst_204 = arith.constant 9.99999974E-6 : f32
    %438 = vector.broadcast %cst_204 : f32 to vector<128x1xf32>
    %439 = arith.addf %435, %438 : vector<128x1xf32>
    %440 = math.rsqrt %439 : vector<128x1xf32>
    %441 = vector.broadcast %440 : vector<128x1xf32> to vector<128x128xf32>
    %442 = arith.mulf %437, %441 : vector<128x128xf32>
    %443 = vector.broadcast %423 : vector<1x128xf32> to vector<128x128xf32>
    %444 = arith.mulf %442, %443 : vector<128x128xf32>
    %445 = vector.broadcast %424 : vector<1x128xf32> to vector<128x128xf32>
    %446 = arith.addf %444, %445 : vector<128x128xf32>
    %447 = vector.extract_strided_slice %446 {offsets = [0, 0], sizes = [8, 128], strides = [1, 1]} : vector<128x128xf32> to vector<8x128xf32>
    %448 = vector.extract_strided_slice %446 {offsets = [16, 0], sizes = [8, 128], strides = [1, 1]} : vector<128x128xf32> to vector<8x128xf32>
    %449 = vector.extract_strided_slice %446 {offsets = [32, 0], sizes = [8, 128], strides = [1, 1]} : vector<128x128xf32> to vector<8x128xf32>
    %450 = vector.extract_strided_slice %446 {offsets = [48, 0], sizes = [8, 128], strides = [1, 1]} : vector<128x128xf32> to vector<8x128xf32>
    %451 = vector.extract_strided_slice %446 {offsets = [64, 0], sizes = [8, 128], strides = [1, 1]} : vector<128x128xf32> to vector<8x128xf32>
    %452 = vector.extract_strided_slice %446 {offsets = [80, 0], sizes = [8, 128], strides = [1, 1]} : vector<128x128xf32> to vector<8x128xf32>
    %453 = vector.extract_strided_slice %446 {offsets = [96, 0], sizes = [8, 128], strides = [1, 1]} : vector<128x128xf32> to vector<8x128xf32>
    %454 = vector.extract_strided_slice %446 {offsets = [112, 0], sizes = [8, 128], strides = [1, 1]} : vector<128x128xf32> to vector<8x128xf32>
    %455 = tpu.concatenate %447, %448, %449, %450, %451, %452, %453, %454 in 0 : vector<8x128xf32>, vector<8x128xf32>, vector<8x128xf32>, vector<8x128xf32>, vector<8x128xf32>, vector<8x128xf32>, vector<8x128xf32>, vector<8x128xf32> -> vector<64x128xf32>
    %c0_205 = arith.constant 0 : index
    %c0_206 = arith.constant 0 : index
    %456 = vector.load %arg21[%c0_205, %c0_206] : memref<128x128xbf16, #tpu.memory_space<vmem>>, vector<128x128xbf16>
    %457 = arith.truncf %455 : vector<64x128xf32> to vector<64x128xbf16>
    %cst_207 = arith.constant dense<0.000000e+00> : vector<64x128xf32>
    %458 = tpu.matmul %457, %456, %cst_207 {dimension_numbers = #tpu.dot_dimension_numbers<[1], [0], [0], [1], [0, 0, 1, 1], [], []>} : vector<64x128xbf16>, vector<128x128xbf16>, vector<64x128xf32> -> vector<64x128xf32>
    %c0_208 = arith.constant 0 : index
    %c0_209 = arith.constant 0 : index
    %459 = vector.load %arg22[%c0_208, %c0_209] : memref<1x128xf32, #tpu.memory_space<vmem>>, vector<1x128xf32>
    %460 = vector.broadcast %459 : vector<1x128xf32> to vector<64x128xf32>
    %461 = arith.addf %458, %460 : vector<64x128xf32>
    %c0_210 = arith.constant 0 : index
    %c0_211 = arith.constant 0 : index
    %462 = vector.load %arg23[%c0_210, %c0_211] : memref<64x128xf32, #tpu.memory_space<vmem>>, vector<64x128xf32>
    tpu.vector_store %arg23[%c0_210, %c0_211], %461 {strides = array<i32>} : memref<64x128xf32, #tpu.memory_space<vmem>>, vector<64x128xf32>,
    return
  }
  func.func @transform_0(%arg0: i32) -> (i32, i32) {
    %c0_i32 = arith.constant 0 : i32
    %c0_i32_0 = arith.constant 0 : i32
    return %arg0, %c0_i32 : i32, i32
  }
  func.func @transform_1(%arg0: i32) -> (i32, i32, i32) {
    %c0_i32 = arith.constant 0 : i32
    %c0_i32_0 = arith.constant 0 : i32
    %c0_i32_1 = arith.constant 0 : i32
    return %arg0, %c0_i32, %c0_i32_0 : i32, i32, i32
  }
  func.func @transform_2(%arg0: i32) -> (i32, i32, i32) {
    %c0_i32 = arith.constant 0 : i32
    %c0_i32_0 = arith.constant 0 : i32
    %c0_i32_1 = arith.constant 0 : i32
    %c0_i32_2 = arith.constant 0 : i32
    return %c0_i32, %c0_i32_0, %c0_i32_1 : i32, i32, i32
  }
  func.func @transform_3(%arg0: i32) -> (i32, i32, i32, i32) {
    %c0_i32 = arith.constant 0 : i32
    %c0_i32_0 = arith.constant 0 : i32
    %c0_i32_1 = arith.constant 0 : i32
    %c0_i32_2 = arith.constant 0 : i32
    %c0_i32_3 = arith.constant 0 : i32
    return %c0_i32, %c0_i32_0, %c0_i32_1, %c0_i32_2 : i32, i32, i32, i32
  }
  func.func @transform_4(%arg0: i32) -> (i32, i32, i32, i32) {
    %c0_i32 = arith.constant 0 : i32
    %c0_i32_0 = arith.constant 0 : i32
    %c0_i32_1 = arith.constant 0 : i32
    %c0_i32_2 = arith.constant 0 : i32
    %c0_i32_3 = arith.constant 0 : i32
    return %c0_i32, %c0_i32_0, %c0_i32_1, %c0_i32_2 : i32, i32, i32, i32
  }
  func.func @transform_5(%arg0: i32) -> (i32, i32, i32) {
    %c0_i32 = arith.constant 0 : i32
    %c0_i32_0 = arith.constant 0 : i32
    %c0_i32_1 = arith.constant 0 : i32
    %c0_i32_2 = arith.constant 0 : i32
    return %c0_i32, %c0_i32_0, %c0_i32_1 : i32, i32, i32
  }
  func.func @transform_6(%arg0: i32) -> (i32, i32, i32) {
    %c0_i32 = arith.constant 0 : i32
    %c0_i32_0 = arith.constant 0 : i32
    %c0_i32_1 = arith.constant 0 : i32
    %c0_i32_2 = arith.constant 0 : i32
    return %c0_i32, %c0_i32_0, %c0_i32_1 : i32, i32, i32
  }
  func.func @transform_7(%arg0: i32) -> (i32, i32, i32) {
    %c0_i32 = arith.constant 0 : i32
    %c0_i32_0 = arith.constant 0 : i32
    %c0_i32_1 = arith.constant 0 : i32
    %c0_i32_2 = arith.constant 0 : i32
    return %c0_i32, %c0_i32_0, %c0_i32_1 : i32, i32, i32
  }
  func.func @transform_8(%arg0: i32) -> (i32, i32, i32) {
    %c0_i32 = arith.constant 0 : i32
    %c0_i32_0 = arith.constant 0 : i32
    %c0_i32_1 = arith.constant 0 : i32
    %c0_i32_2 = arith.constant 0 : i32
    return %c0_i32, %c0_i32_0, %c0_i32_1 : i32, i32, i32
  }
  func.func @transform_9(%arg0: i32) -> (i32, i32, i32) {
    %c0_i32 = arith.constant 0 : i32
    %c0_i32_0 = arith.constant 0 : i32
    %c0_i32_1 = arith.constant 0 : i32
    %c0_i32_2 = arith.constant 0 : i32
    return %c0_i32, %c0_i32_0, %c0_i32_1 : i32, i32, i32
  }
  func.func @transform_10(%arg0: i32) -> (i32, i32, i32) {
    %c0_i32 = arith.constant 0 : i32
    %c0_i32_0 = arith.constant 0 : i32
    %c0_i32_1 = arith.constant 0 : i32
    %c0_i32_2 = arith.constant 0 : i32
    return %c0_i32, %c0_i32_0, %c0_i32_1 : i32, i32, i32
  }
  func.func @transform_11(%arg0: i32) -> (i32, i32, i32) {
    %c0_i32 = arith.constant 0 : i32
    %c0_i32_0 = arith.constant 0 : i32
    %c0_i32_1 = arith.constant 0 : i32
    %c0_i32_2 = arith.constant 0 : i32
    return %c0_i32, %c0_i32_0, %c0_i32_1 : i32, i32, i32
  }
  func.func @transform_12(%arg0: i32) -> (i32, i32, i32) {
    %c0_i32 = arith.constant 0 : i32
    %c0_i32_0 = arith.constant 0 : i32
    %c0_i32_1 = arith.constant 0 : i32
    %c0_i32_2 = arith.constant 0 : i32
    return %c0_i32, %c0_i32_0, %c0_i32_1 : i32, i32, i32
  }
  func.func @transform_13(%arg0: i32) -> (i32, i32, i32) {
    %c0_i32 = arith.constant 0 : i32
    %c0_i32_0 = arith.constant 0 : i32
    %c0_i32_1 = arith.constant 0 : i32
    %c0_i32_2 = arith.constant 0 : i32
    return %c0_i32, %c0_i32_0, %c0_i32_1 : i32, i32, i32
  }
  func.func @transform_14(%arg0: i32) -> (i32, i32, i32) {
    %c0_i32 = arith.constant 0 : i32
    %c0_i32_0 = arith.constant 0 : i32
    %c0_i32_1 = arith.constant 0 : i32
    %c0_i32_2 = arith.constant 0 : i32
    return %c0_i32, %c0_i32_0, %c0_i32_1 : i32, i32, i32
  }
  func.func @transform_15(%arg0: i32) -> (i32, i32, i32) {
    %c0_i32 = arith.constant 0 : i32
    %c0_i32_0 = arith.constant 0 : i32
    %c0_i32_1 = arith.constant 0 : i32
    %c0_i32_2 = arith.constant 0 : i32
    return %c0_i32, %c0_i32_0, %c0_i32_1 : i32, i32, i32
  }
  func.func @transform_16(%arg0: i32) -> (i32, i32, i32) {
    %c0_i32 = arith.constant 0 : i32
    %c0_i32_0 = arith.constant 0 : i32
    %c0_i32_1 = arith.constant 0 : i32
    %c0_i32_2 = arith.constant 0 : i32
    return %c0_i32, %c0_i32_0, %c0_i32_1 : i32, i32, i32
  }
  func.func @transform_17(%arg0: i32) -> (i32, i32, i32) {
    %c0_i32 = arith.constant 0 : i32
    %c0_i32_0 = arith.constant 0 : i32
    %c0_i32_1 = arith.constant 0 : i32
    %c0_i32_2 = arith.constant 0 : i32
    return %c0_i32, %c0_i32_0, %c0_i32_1 : i32, i32, i32
  }
  func.func @transform_18(%arg0: i32) -> (i32, i32, i32) {
    %c0_i32 = arith.constant 0 : i32
    %c0_i32_0 = arith.constant 0 : i32
    %c0_i32_1 = arith.constant 0 : i32
    %c0_i32_2 = arith.constant 0 : i32
    return %c0_i32, %c0_i32_0, %c0_i32_1 : i32, i32, i32
  }
  func.func @transform_19(%arg0: i32) -> (i32, i32, i32) {
    %c0_i32 = arith.constant 0 : i32
    %c0_i32_0 = arith.constant 0 : i32
    %c0_i32_1 = arith.constant 0 : i32
    %c0_i32_2 = arith.constant 0 : i32
    return %c0_i32, %c0_i32_0, %c0_i32_1 : i32, i32, i32
  }
  func.func @transform_20(%arg0: i32) -> (i32, i32) {
    %c0_i32 = arith.constant 0 : i32
    %c0_i32_0 = arith.constant 0 : i32
    %c0_i32_1 = arith.constant 0 : i32
    return %c0_i32, %c0_i32_0 : i32, i32
  }
  func.func @transform_21(%arg0: i32) -> (i32, i32) {
    %c0_i32 = arith.constant 0 : i32
    %c0_i32_0 = arith.constant 0 : i32
    %c0_i32_1 = arith.constant 0 : i32
    return %c0_i32, %c0_i32_0 : i32, i32
  }
  func.func @transform_22(%arg0: i32) -> (i32, i32) {
    %c0_i32 = arith.constant 0 : i32
    %c0_i32_0 = arith.constant 0 : i32
    return %arg0, %c0_i32 : i32, i32
  }
}

</mosaic_0001>

<bundles_post_ra>
// kernel: decoder_forward.1
= control target key start
LH: loop header
LB: loop body
LE: loop exit
PB: predicated region body
PF: predicated region fallthrough
CT: control target
= control target key end

     0   :  { %s16074_s5 = inlined_call_operand.vmem [shape: bf16[2,128,256], index: 5, kind: input, shape index: {}]   ;;  %s16075_s7 = inlined_call_operand.vmem [shape: bf16[2,128,256], index: 7, kind: input, shape index: {}]   ;;  %s16076_s0 = inlined_call_operand.vmem [shape: f32[128,128], index: 0, kind: input, shape index: {}]   ;;  %s16077_s9 = inlined_call_operand.vmem [shape: bf16[4,128,128], index: 9, kind: input, shape index: {}]   ;;  %s16078_s8 = inlined_call_operand.vmem [shape: f32[2,1,256], index: 8, kind: input, shape index: {}]   ;;  %s16079_s6 = inlined_call_operand.vmem [shape: f32[2,1,256], index: 6, kind: input, shape index: {}]   ;;  %s16080_s1 = inlined_call_operand.vmem [shape: f32[1,128,128], index: 1, kind: input, shape index: {}]   ;;  %s16081_s10 = inlined_call_operand.vmem [shape: f32[2,1,128], index: 10, kind: input, shape index: {}]   ;;  %s16082_s11 = inlined_call_operand.vmem [shape: bf16[2,128,256], index: 11, kind: input, shape index: {}]   ;;  %s16083_s18 = inlined_call_operand.vmem [shape: f32[2,3,128], index: 18, kind: input, shape index: {}]   ;;  %s16084_s19 = inlined_call_operand.vmem [shape: f32[2,3,128], index: 19, kind: input, shape index: {}]   ;;  %s16085_s3 = inlined_call_operand.vmem [shape: bf16[1,2,8,256], index: 3, kind: input, shape index: {}]   ;;  %s16086_s12 = inlined_call_operand.vmem [shape: f32[2,1,256], index: 12, kind: input, shape index: {}]   ;;  %s16087_s2 = inlined_call_operand.vmem [shape: f32[1,128,8], index: 2, kind: input, shape index: {}]   ;;  %s16088_s4 = inlined_call_operand.vmem [shape: bf16[1,4,8,128], index: 4, kind: input, shape index: {}]   ;;  %s16089_s13 = inlined_call_operand.vmem [shape: f32[2,1,128], index: 13, kind: input, shape index: {}]   ;;  %s16090_s14 = inlined_call_operand.vmem [shape: bf16[2,128,512], index: 14, kind: input, shape index: {}]   ;;  %s16091_s16 = inlined_call_operand.vmem [shape: bf16[2,512,128], index: 16, kind: input, shape index: {}]   ;;  %s16092_s15 = inlined_call_operand.vmem [shape: f32[2,1,512], index: 15, kind: input, shape index: {}]   ;;  %s16093_s17 = inlined_call_operand.vmem [shape: f32[2,1,128], index: 17, kind: input, shape index: {}]   ;;  %s16094_s20 = inlined_call_operand.vmem [shape: bf16[128,128], index: 20, kind: input, shape index: {}]   ;;  %s16095_s21 = inlined_call_operand.vmem [shape: f32[1,128], index: 21, kind: input, shape index: {}]   ;;  %s16096_s22 = inlined_call_operand.vmem [shape: f32[64,128], index: 22, kind: output, shape index: {}]  }
   0x1   :  { %16120 = sst [smem:[#allocation16_spill]] %s16074_s5 }
   0x2   :  { %16121 = sst [smem:[#allocation17_spill]] %s16075_s7 }
   0x3   :  { %16122 = sst [smem:[#allocation18_spill]] %s16076_s0 }
   0x4   :  { %16123 = sst [smem:[#allocation19_spill]] %s16077_s9 }
   0x5   :  { %16124 = sst [smem:[#allocation20_spill]] %s16078_s8 }
   0x6   :  { %16125 = sst [smem:[#allocation21_spill]] %s16079_s6 }
   0x7   :  { %16126 = sst [smem:[#allocation22_spill]] %s16080_s1 }
   0x8   :  { %16127 = sst [smem:[#allocation23_spill]] %s16095_s21 }
   0x9   :  { %16128 = sst [smem:[#allocation24_spill]] %s16096_s22 }
   0xa   :  { %s16129_s29 = sld [smem:[#allocation16_spill]] }
   0xb   :  { %s16130_s23 = sld [smem:[#allocation17_spill]] }
   0xc   :  { %s16131_s6 = sld [smem:[#allocation18_spill]] }
   0xd   :  { %s16132_s28 = sld [smem:[#allocation19_spill]] }
   0xe   :  { %s16133_s25 = sld [smem:[#allocation20_spill]] }
   0xf   :  { %s16134_s5 = sld [smem:[#allocation21_spill]] }
  0x10   :  { %v8387_v0 = vld [vmem:[%s16129_s29 + $0x70] sm:$0xf]  ;;  %v9637_v1 = vld [vmem:[%s16129_s29 + $0x74] sm:$0xf0]  ;;  %v8379_v5 = vld [vmem:[%s16129_s29 + $0x60] sm:$0xf] }
  0x11   :  { %v9652_v2 = vld [vmem:[%s16130_s23 + $0x74] sm:$0xf]  ;;  %v8388_v3 = vor.u32 %v9637_v1, %v8387_v0  ;;  %v8453_v4 = vld [vmem:[%s16130_s23 + $0x78] sm:$0xf0]  ;;  %v9635_v6 = vld [vmem:[%s16129_s29 + $0x64] sm:$0xf0] }
  0x12   :  { %v8456_v7 = vor.u32 %v9652_v2, %v8453_v4  ;;  %v9650_v8 = vld [vmem:[%s16130_s23 + $0x64] sm:$0xf]  ;;  %v8445_v9 = vld [vmem:[%s16130_s23 + $0x68] sm:$0xf0]  ;;  %v8380_v10 = vor.u32 %v9635_v6, %v8379_v5  ;;  %v8371_v12 = vld [vmem:[%s16129_s29 + $0x50] sm:$0xf] }
  0x13   :  { %9887 = vmatpush.bf16.msra.mxu2 %v8388_v3  ;;  %9886 = vmatpush.bf16.msra.mxu1 %v8388_v3  ;;  %v8448_v11 = vor.u32 %v9650_v8, %v8445_v9  ;;  %v9633_v13 = vld [vmem:[%s16129_s29 + $0x54] sm:$0xf0]  ;;  %v9648_v14 = vld [vmem:[%s16130_s23 + $0x54] sm:$0xf]  ;;  %v8437_v15 = vld [vmem:[%s16130_s23 + $0x58] sm:$0xf0] }
  0x14   :  { %481 = vmatpush.bf16.msra.mxu3 %v8456_v7  ;;  %232 = vmatpush.bf16.msra.mxu0 %v8388_v3  ;;  %v8372_v16 = vor.u32 %v9633_v13, %v8371_v12  ;;  %v8440_v17 = vor.u32 %v9648_v14, %v8437_v15  ;;  %v8363_v18 = vld [vmem:[%s16129_s29 + $0x40] sm:$0xf]  ;;  %v9631_v19 = vld [vmem:[%s16129_s29 + $0x44] sm:$0xf0]  ;;  %v9646_v20 = vld [vmem:[%s16130_s23 + $0x44] sm:$0xf] }
  0x15   :  { %v8429_v21 = vld [vmem:[%s16130_s23 + $0x48] sm:$0xf0]  ;;  %v8364_v22 = vor.u32 %v9631_v19, %v8363_v18  ;;  %v8355_v24 = vld [vmem:[%s16129_s29 + $0x30] sm:$0xf]  ;;  %v9629_v25 = vld [vmem:[%s16129_s29 + $0x34] sm:$0xf0] }
  0x16   :  { %v8432_v23 = vor.u32 %v9646_v20, %v8429_v21  ;;  %v9644_v26 = vld [vmem:[%s16130_s23 + $0x34] sm:$0xf]  ;;  %v8421_v27 = vld [vmem:[%s16130_s23 + $0x38] sm:$0xf0]  ;;  %v8356_v28 = vor.u32 %v9629_v25, %v8355_v24  ;;  %v8347_v30 = vld [vmem:[%s16129_s29 + $0x20] sm:$0xf] }
  0x17   :  { %9889 = vmatpush.bf16.msra.mxu2 %v8380_v10  ;;  %9888 = vmatpush.bf16.msra.mxu1 %v8380_v10  ;;  %v8424_v29 = vor.u32 %v9644_v26, %v8421_v27  ;;  %v9627_v31 = vld [vmem:[%s16129_s29 + $0x24] sm:$0xf0]  ;;  %v9642_v32 = vld [vmem:[%s16130_s23 + $0x24] sm:$0xf]  ;;  %v8413_v33 = vld [vmem:[%s16130_s23 + $0x28] sm:$0xf0] }
  0x18   :  { %482 = vmatpush.bf16.msra.mxu3 %v8448_v11  ;;  %233 = vmatpush.bf16.msra.mxu0 %v8380_v10  ;;  %v8348_v34 = vor.u32 %v9627_v31, %v8347_v30  ;;  %v8416_v35 = vor.u32 %v9642_v32, %v8413_v33  ;;  %v8339_v36 = vld [vmem:[%s16129_s29 + $0x10] sm:$0xf]  ;;  %v9625_v37 = vld [vmem:[%s16129_s29 + $0x14] sm:$0xf0]  ;;  %v9640_v38 = vld [vmem:[%s16130_s23 + $0x14] sm:$0xf] }
  0x19   :  { %v8405_v39 = vld [vmem:[%s16130_s23 + $0x18] sm:$0xf0]  ;;  %v8340_v40 = vor.u32 %v9625_v37, %v8339_v36  ;;  %v8331_v42 = vld [vmem:[%s16129_s29] sm:$0xf]  ;;  %v9623_v43 = vld [vmem:[%s16129_s29 + $0x4] sm:$0xf0] }
  0x1a   :  { %v8408_v41 = vor.u32 %v9640_v38, %v8405_v39  ;;  %v9638_v44 = vld [vmem:[%s16130_s23 + $0x4] sm:$0xf]  ;;  %v8397_v45 = vld [vmem:[%s16130_s23 + $0x8] sm:$0xf0]  ;;  %v8451_v46 = vld [vmem:[%s16130_s23 + $0x70] sm:$0xf]  ;;  %v8332_v48 = vor.u32 %v9623_v43, %v8331_v42 }
  0x1b   :  { %9891 = vmatpush.bf16.msra.mxu2 %v8372_v16  ;;  %9890 = vmatpush.bf16.msra.mxu1 %v8372_v16  ;;  %v9653_v47 = vld [vmem:[%s16130_s23 + $0x74] sm:$0xf0]  ;;  %v86_v49 = vld [vmem:[%s16131_s6 + $0x70] sm:$0xff]  ;;  %v8400_v51 = vor.u32 %v9638_v44, %v8397_v45  ;;  %v72_v53 = vld [vmem:[%s16131_s6] sm:$0xff]  ;;  %s16135_s1 = sld [smem:[#allocation22_spill]] }
  0x1c   :  { %483 = vmatpush.bf16.msra.mxu3 %v8440_v17  ;;  %234 = vmatpush.bf16.msra.mxu0 %v8372_v16  ;;  %v87_v50 = vld [vmem:[%s16131_s6 + $0x78] sm:$0xff]  ;;  %v8452_v52 = vor.u32 %v9653_v47, %v8451_v46  ;;  %v73_v54 = vld [vmem:[%s16131_s6 + $0x8] sm:$0xff]  ;;  %v8443_v55 = vld [vmem:[%s16130_s23 + $0x60] sm:$0xf]  ;;  %s16170_s7 = sld [smem:[#allocation23_spill]] }
  0x1d   :  { %v9651_v56 = vld [vmem:[%s16130_s23 + $0x64] sm:$0xf0]  ;;  %v10892_v57 = vpack.c.bf16 %v87_v50, %v86_v49  ;;  %v10894_v58 = vpack.c.bf16 %v73_v54, %v72_v53  ;;  %v8435_v60 = vld [vmem:[%s16130_s23 + $0x50] sm:$0xf]  ;;  %v9649_v61 = vld [vmem:[%s16130_s23 + $0x54] sm:$0xf0] }
  0x1e   :  { %v8444_v59 = vor.u32 %v9651_v56, %v8443_v55  ;;  %v8436_v62 = vor.u32 %v9649_v61, %v8435_v60  ;;  %v8427_v63 = vld [vmem:[%s16130_s23 + $0x40] sm:$0xf]  ;;  %v9647_v0 = vld [vmem:[%s16130_s23 + $0x44] sm:$0xf0]  ;;  %v8419_v2 = vld [vmem:[%s16130_s23 + $0x30] sm:$0xf] }
  0x1f   :  { %9893 = vmatpush.bf16.msra.mxu2 %v8364_v22  ;;  %9892 = vmatpush.bf16.msra.mxu1 %v8364_v22  ;;  %v8428_v1 = vor.u32 %v9647_v0, %v8427_v63  ;;  %v9645_v3 = vld [vmem:[%s16130_s23 + $0x34] sm:$0xf0]  ;;  %v74_v5 = vld [vmem:[%s16131_s6 + $0x10] sm:$0xff]  ;;  %v8411_v7 = vld [vmem:[%s16130_s23 + $0x20] sm:$0xf]  ;;  %s16171_s24 = sld [smem:[#allocation24_spill]] }
  0x20   :  { %484 = vmatpush.bf16.msra.mxu3 %v8432_v23  ;;  %235 = vmatpush.bf16.msra.mxu0 %v8364_v22  ;;  %v8420_v4 = vor.u32 %v9645_v3, %v8419_v2  ;;  %v75_v6 = vld [vmem:[%s16131_s6 + $0x18] sm:$0xff]  ;;  %v9643_v8 = vld [vmem:[%s16130_s23 + $0x24] sm:$0xf0]  ;;  %v8403_v11 = vld [vmem:[%s16130_s23 + $0x10] sm:$0xf] }
  0x21   :  { %v10929_v9 = vpack.c.bf16 %v75_v6, %v74_v5  ;;  %v8412_v10 = vor.u32 %v9643_v8, %v8411_v7  ;;  %v9641_v12 = vld [vmem:[%s16130_s23 + $0x14] sm:$0xf0]  ;;  %v8395_v14 = vld [vmem:[%s16130_s23] sm:$0xf]  ;;  %v9639_v15 = vld [vmem:[%s16130_s23 + $0x4] sm:$0xf0] }
  0x22   :  { %v8404_v13 = vor.u32 %v9641_v12, %v8403_v11  ;;  %v8396_v16 = vor.u32 %v9639_v15, %v8395_v14  ;;  %v76_v17 = vld [vmem:[%s16131_s6 + $0x20] sm:$0xff]  ;;  %v77_v18 = vld [vmem:[%s16131_s6 + $0x28] sm:$0xff]  ;;  %v78_v20 = vld [vmem:[%s16131_s6 + $0x30] sm:$0xff] }
  0x23   :  { %9895 = vmatpush.bf16.msra.mxu2 %v8356_v28  ;;  %9894 = vmatpush.bf16.msra.mxu1 %v8356_v28  ;;  %v10952_v19 = vpack.c.bf16 %v77_v18, %v76_v17  ;;  %v79_v21 = vld [vmem:[%s16131_s6 + $0x38] sm:$0xff]  ;;  %v82_v23 = vld [vmem:[%s16131_s6 + $0x50] sm:$0xff]  ;;  %v80_v26 = vld [vmem:[%s16131_s6 + $0x40] sm:$0xff] }
  0x24   :  { %485 = vmatpush.bf16.msra.mxu3 %v8424_v29  ;;  %236 = vmatpush.bf16.msra.mxu0 %v8356_v28  ;;  %v10963_v22 = vpack.c.bf16 %v79_v21, %v78_v20  ;;  %v83_v24 = vld [vmem:[%s16131_s6 + $0x58] sm:$0xff]  ;;  %v81_v27 = vld [vmem:[%s16131_s6 + $0x48] sm:$0xff]  ;;  %v84_v29 = vld [vmem:[%s16131_s6 + $0x60] sm:$0xff] }
  0x25   :  { %v10971_v25 = vpack.c.bf16 %v83_v24, %v82_v23  ;;  %v10983_v28 = vpack.c.bf16 %v81_v27, %v80_v26  ;;  %v85_v30 = vld [vmem:[%s16131_s6 + $0x68] sm:$0xff]  ;;  %v9636_v32 = vld [vmem:[%s16129_s29 + $0x74] sm:$0xf]  ;;  %v8389_v33 = vld [vmem:[%s16129_s29 + $0x78] sm:$0xf0] }
  0x26   :  { %v10991_v31 = vpack.c.bf16 %v85_v30, %v84_v29  ;;  %v8381_v36 = vld [vmem:[%s16129_s29 + $0x68] sm:$0xf0]  ;;  %v9632_v38 = vld [vmem:[%s16129_s29 + $0x54] sm:$0xf]  ;;  %v8373_v39 = vld [vmem:[%s16129_s29 + $0x58] sm:$0xf0] }
  0x27   :  { %9897 = vmatpush.bf16.msra.mxu2 %v8348_v34  ;;  %9896 = vmatpush.bf16.msra.mxu1 %v8348_v34  ;;  %v8365_v42 = vld [vmem:[%s16129_s29 + $0x48] sm:$0xf0]  ;;  %v9628_v43 = vld [vmem:[%s16129_s29 + $0x34] sm:$0xf]  ;;  %v8357_v45 = vld [vmem:[%s16129_s29 + $0x38] sm:$0xf0] }
  0x28   :  { %486 = vmatpush.bf16.msra.mxu3 %v8416_v35  ;;  %237 = vmatpush.bf16.msra.mxu0 %v8348_v34  ;;  %v8392_v34 = vor.u32 %v9636_v32, %v8389_v33  ;;  %v9634_v35 = vld [vmem:[%s16129_s29 + $0x64] sm:$0xf]  ;;  %v8360_v46 = vor.u32 %v9628_v43, %v8357_v45  ;;  %v9624_v50 = vld [vmem:[%s16129_s29 + $0x14] sm:$0xf]  ;;  %v8333_v54 = vld [vmem:[%s16129_s29 + $0x8] sm:$0xf0] }
  0x29   :  { %v8384_v37 = vor.u32 %v9634_v35, %v8381_v36  ;;  %v9626_v47 = vld [vmem:[%s16129_s29 + $0x24] sm:$0xf]  ;;  %v9668_v20 = vld [vmem:[%s16132_s28 + $0x70] sm:$0xff]  ;;  %v9661_v23 = vld [vmem:[%s16132_s28 + $0x38] sm:$0xff] }
  0x2a   :  { %v9622_v53 = vld [vmem:[%s16129_s29 + $0x4] sm:$0xf]  ;;  %v9667_v24 = vld [vmem:[%s16132_s28 + $0x68] sm:$0xff]  ;;  %v9660_v26 = vld [vmem:[%s16132_s28 + $0x30] sm:$0xff] }
  0x2b   :  { %9899 = vmatpush.bf16.msra.mxu2 %v8340_v40  ;;  %9898 = vmatpush.bf16.msra.mxu1 %v8340_v40  ;;  %v8336_v55 = vor.u32 %v9622_v53, %v8333_v54  ;;  %v9666_v29 = vld [vmem:[%s16132_s28 + $0x60] sm:$0xff]  ;;  %v9659_v33 = vld [vmem:[%s16132_s28 + $0x28] sm:$0xff] }
  0x2c   :  { %487 = vmatpush.bf16.msra.mxu3 %v8408_v41  ;;  %238 = vmatpush.bf16.msra.mxu0 %v8340_v40  ;;  %v8376_v40 = vor.u32 %v9632_v38, %v8373_v39  ;;  %v9630_v41 = vld [vmem:[%s16129_s29 + $0x44] sm:$0xf]  ;;  %v346_v45 = vld [vmem:[%s16133_s25] sm:$0x3] }
  0x2d   :  { %v8368_v44 = vor.u32 %v9630_v41, %v8365_v42  ;;  %v9658_v35 = vld [vmem:[%s16132_s28 + $0x20] sm:$0xff]  ;;  %v9663_v41 = vld [vmem:[%s16132_s28 + $0x48] sm:$0xff]  ;;  %v9656_v42 = vld [vmem:[%s16132_s28 + $0x10] sm:$0xff] }
  0x2f   :  { %9901 = vmatpush.bf16.msra.mxu2 %v8332_v48  ;;  %9900 = vmatpush.bf16.msra.mxu1 %v8332_v48 }
  0x30   :  { %488 = vmatpush.bf16.msra.mxu3 %v8400_v51  ;;  %239 = vmatpush.bf16.msra.mxu0 %v8332_v48  ;;  %v8349_v48 = vld [vmem:[%s16129_s29 + $0x28] sm:$0xf0]  ;;  %v8341_v51 = vld [vmem:[%s16129_s29 + $0x18] sm:$0xf0] }
  0x31   :  { %v8352_v49 = vor.u32 %v9626_v47, %v8349_v48  ;;  %v11157_v48 = vperm.slane %v346_v45, 1 }
  0x32   :  { %275 = vmatmul.bf16.vlgmr.msra.gmra.mxu2 %v10892_v57  ;;  %265 = vmatmul.bf16.vlgmr.msra.gmra.mxu1 %v10971_v25 }
  0x33   :  { %432 = vmatpush.bf16.msrb.mxu2 %v8452_v52  ;;  %489 = vmatmul.bf16.vlgmr.msra.gmra.mxu3 %v10894_v58  ;;  %v8344_v52 = vor.u32 %v9624_v50, %v8341_v51  ;;  %v9654_v51 = vld [vmem:[%s16132_s28] sm:$0xff] }
  0x34   :  { %240 = vmatmul.bf16.vlgmr.msra.gmra.mxu0 %v10894_v58  ;;  %281 = vmatpush.bf16.msrb.mxu1 %v8392_v34  ;;  %v9665_v34 = vld [vmem:[%s16132_s28 + $0x58] sm:$0xff] }
  0x37   :  { %433 = vmatpush.bf16.msrb.mxu2 %v8444_v59 }
  0x38   :  { %282 = vmatpush.bf16.msrb.mxu1 %v8384_v37  ;;  %v9664_v37 = vld [vmem:[%s16132_s28 + $0x50] sm:$0xff] }
  0x3b   :  { %434 = vmatpush.bf16.msrb.mxu2 %v8436_v62 }
  0x3c   :  { %283 = vmatpush.bf16.msrb.mxu1 %v8376_v40  ;;  %v9657_v40 = vld [vmem:[%s16132_s28 + $0x18] sm:$0xff] }
  0x3f   :  { %435 = vmatpush.bf16.msrb.mxu2 %v8428_v1 }
  0x40   :  { %284 = vmatpush.bf16.msrb.mxu1 %v8368_v44  ;;  %v9662_v44 = vld [vmem:[%s16132_s28 + $0x40] sm:$0xff] }
  0x42   :  { %270 = vmatmul.bf16.gmra.mxu1 %v10991_v31 }
  0x43   :  { %436 = vmatpush.bf16.msrb.mxu2 %v8420_v4  ;;  %494 = vmatmul.bf16.gmra.mxu3 %v10929_v9 }
  0x44   :  { %245 = vmatmul.bf16.gmra.mxu0 %v10929_v9  ;;  %285 = vmatpush.bf16.msrb.mxu1 %v8360_v46 }
  0x47   :  { %437 = vmatpush.bf16.msrb.mxu2 %v8412_v10 }
  0x48   :  { %286 = vmatpush.bf16.msrb.mxu1 %v8352_v49  ;;  %v9655_v49 = vld [vmem:[%s16132_s28 + $0x8] sm:$0xff] }
  0x4b   :  { %438 = vmatpush.bf16.msrb.mxu2 %v8404_v13 }
  0x4c   :  { %287 = vmatpush.bf16.msrb.mxu1 %v8344_v52  ;;  %v11169_v52 = vld [vmem:[%s16134_s5] sm:$0x3] }
  0x4f   :  { %439 = vmatpush.bf16.msrb.mxu2 %v8396_v16  ;;  %v9669_v16 = vld [vmem:[%s16132_s28 + $0x78] sm:$0xff] }
  0x50   :  { %288 = vmatpush.bf16.msrb.mxu1 %v8336_v55  ;;  %1142 = vmatpush.bf16.msrb.mxu3 %v9669_v16  ;;  %v11174_v55 = vperm.slane %v11169_v52, 0 }
  0x52   :  { %440 = vmatmul.bf16.vlgmr.msrb.gmra.mxu2 %v10894_v58 }
  0x53   :  { %499 = vmatmul.bf16.gmra.mxu3 %v10952_v19  ;;  %289 = vmatmul.bf16.vlgmr.msrb.gmra.mxu1 %v10894_v58 }
  0x54   :  { %250 = vmatmul.bf16.gmra.mxu0 %v10952_v19  ;;  %1143 = vmatpush.bf16.msrb.mxu3 %v9668_v20 }
  0x55   :  { %803 = vmatpush.bf16.msra.mxu1 %v9661_v23 }
  0x58   :  { %1144 = vmatpush.bf16.msrb.mxu3 %v9667_v24 }
  0x59   :  { %804 = vmatpush.bf16.msra.mxu1 %v9660_v26 }
  0x5c   :  { %1145 = vmatpush.bf16.msrb.mxu3 %v9666_v29 }
  0x5d   :  { %805 = vmatpush.bf16.msra.mxu1 %v9659_v33 }
  0x60   :  { %1146 = vmatpush.bf16.msrb.mxu3 %v9665_v34 }
  0x61   :  { %806 = vmatpush.bf16.msra.mxu1 %v9658_v35 }
  0x62   :  { %445 = vmatmul.bf16.gmra.mxu2 %v10929_v9 }
  0x63   :  { %504 = vmatmul.bf16.gmra.mxu3 %v10963_v22  ;;  %294 = vmatmul.bf16.gmra.mxu1 %v10929_v9 }
  0x64   :  { %255 = vmatmul.bf16.gmra.mxu0 %v10963_v22  ;;  %1147 = vmatpush.bf16.msrb.mxu3 %v9664_v37 }
  0x65   :  { %807 = vmatpush.bf16.msra.mxu1 %v9657_v40 }
  0x68   :  { %1148 = vmatpush.bf16.msrb.mxu3 %v9663_v41 }
  0x69   :  { %808 = vmatpush.bf16.msra.mxu1 %v9656_v42 }
  0x6c   :  { %1149 = vmatpush.bf16.msrb.mxu3 %v9662_v44  ;;  %v11209_v44 = vperm.slane %v346_v45, 0 }
  0x6d   :  { %809 = vmatpush.bf16.msra.mxu1 %v9655_v49 }
  0x71   :  { %810 = vmatpush.bf16.msra.mxu1 %v9654_v51 }
  0x72   :  { %450 = vmatmul.bf16.gmra.mxu2 %v10952_v19 }
  0x73   :  { %509 = vmatmul.bf16.gmra.mxu3 %v10983_v28  ;;  %299 = vmatmul.bf16.gmra.mxu1 %v10952_v19 }
  0x74   :  { %260 = vmatmul.bf16.gmra.mxu0 %v10983_v28 }
  0x82   :  { %455 = vmatmul.bf16.gmra.mxu2 %v10963_v22 }
  0x83   :  { %514 = vmatmul.bf16.gmra.mxu3 %v10971_v25  ;;  %304 = vmatmul.bf16.gmra.mxu1 %v10963_v22 }
  0x92   :  { %460 = vmatmul.bf16.gmra.mxu2 %v10983_v28 }
  0x93   :  { %519 = vmatmul.bf16.gmra.mxu3 %v10991_v31  ;;  %309 = vmatmul.bf16.gmra.mxu1 %v10983_v28 }
  0xa2   :  { %465 = vmatmul.bf16.gmra.mxu2 %v10971_v25 }
  0xa3   :  { %524 = vmatmul.bf16.gmra.mxu3 %v10892_v57  ;;  %314 = vmatmul.bf16.gmra.mxu1 %v10971_v25 }
  0xaf   :  { %v266_v18 = vpop.f32.mrf.mxu1 }
  0xb0   :  { %v11177_v23 = vadd.f32 %v266_v18, %v11174_v55 }
  0xb2   :  { %470 = vmatmul.bf16.gmra.mxu2 %v10991_v31 }
  0xb3   :  { %319 = vmatmul.bf16.gmra.mxu1 %v10991_v31  ;;  %1150 = vmatmul.bf16.vlgmr.msrb.gmra.mxu3 %v10894_v58 }
  0xb5   :  { %v11057_v60 = vpop.f32.mrf.mxu2 }
  0xb6   :  { %v11051_v56 = vpop.f32.mrf.mxu3 }
  0xb7   :  { %v268_v30 = vpop.f32.mrf.mxu1 }
  0xb8   :  { %v11180_v24 = vadd.f32 %v268_v30, %v11174_v55 }
  0xba   :  { %v535_v34 = vpack.c.bf16 %v11180_v24, %v11177_v23  ;;  %v88_v23 = vld [vmem:[%s16135_s1] sm:$0xff] }
  0xbd   :  { %v11062_v62 = vpop.f32.mrf.mxu2 }
  0xbe   :  { %v11054_v59 = vpop.f32.mrf.mxu3 }
  0xbf   :  { %v271_v38 = vpop.f32.mrf.mxu1 }
  0xc2   :  { %475 = vmatmul.bf16.gmra.mxu2 %v10892_v57 }
  0xc3   :  { %324 = vmatmul.bf16.gmra.mxu1 %v10892_v57  ;;  %1155 = vmatmul.bf16.gmra.mxu3 %v10929_v9 }
  0xc6   :  { %v11059_v61 = vpop.f32.mrf.mxu3 }
  0xc7   :  { %v273_v47 = vpop.f32.mrf.mxu1 }
  0xce   :  { %v11064_v63 = vpop.f32.mrf.mxu3 }
  0xd0   :  { %v11182_v26 = vpop.f32.mrf.mxu1 }
  0xd3   :  { %811 = vmatmul.bf16.vlgmr.msra.gmra.mxu1 %v10894_v58  ;;  %v11198_v58 = vadd.f32 %v273_v47, %v11174_v55  ;;  %1160 = vmatmul.bf16.gmra.mxu3 %v10952_v19 }
  0xd5   :  { %v11066_v0 = vpop.f32.mrf.mxu2 }
  0xd6   :  { %v11068_v1 = vpop.f32.mrf.mxu3 }
  0xd8   :  { %v292_v18 = vpop.f32.mrf.mxu1 }
  0xdd   :  { %v11071_v2 = vpop.f32.mrf.mxu2 }
  0xde   :  { %v11073_v3 = vpop.f32.mrf.mxu3 }
  0xe0   :  { %v11200_v42 = vpop.f32.mrf.mxu1 }
  0xe3   :  { %816 = vmatmul.bf16.gmra.mxu1 %v10929_v9  ;;  %1165 = vmatmul.bf16.gmra.mxu3 %v10963_v22 }
  0xe5   :  { %v11075_v4 = vpop.f32.mrf.mxu2 }
  0xe6   :  { %v11077_v5 = vpop.f32.mrf.mxu3 }
  0xe8   :  { %v297_v51 = vpop.f32.mrf.mxu1 }
  0xed   :  { %v11080_v6 = vpop.f32.mrf.mxu2 }
  0xee   :  { %v11082_v7 = vpop.f32.mrf.mxu3 }
  0xf3   :  { %821 = vmatmul.bf16.gmra.mxu1 %v10952_v19  ;;  %1170 = vmatmul.bf16.gmra.mxu3 %v10983_v28 }
  0xf5   :  { %v11084_v8 = vpop.f32.mrf.mxu2 }
  0xf6   :  { %v11086_v10 = vpop.f32.mrf.mxu3 }
  0xfd   :  { %v11089_v11 = vpop.f32.mrf.mxu2 }
  0xfe   :  { %v11091_v12 = vpop.f32.mrf.mxu3 }
 0x103   :  { %826 = vmatmul.bf16.gmra.mxu1 %v10963_v22  ;;  %v454_v22 = vadd.f32 %v11089_v11, %v11209_v44  ;;  %v447_v11 = vadd.f32 %v11075_v4, %v11209_v44  ;;  %1175 = vmatmul.bf16.gmra.mxu3 %v10971_v25 }
 0x105   :  { %v11093_v13 = vpop.f32.mrf.mxu2 }
 0x106   :  { %v11095_v14 = vpop.f32.mrf.mxu3 }
 0x107   :  { %v516_v40 = vadd.f32 %v11095_v14, %v11157_v48  ;;  %v513_v14 = vadd.f32 %v11091_v12, %v11157_v48  ;;  %v508_v12 = vadd.f32 %v11082_v7, %v11157_v48 }
 0x10d   :  { %v11098_v15 = vpop.f32.mrf.mxu2 }
 0x10e   :  { %v11103_v17 = vpop.f32.mrf.mxu3 }
 0x10f   :  { %v518_v30 = vadd.f32 %v11103_v17, %v11157_v48 }
 0x113   :  { %831 = vmatmul.bf16.gmra.mxu1 %v10983_v28  ;;  %v444_v28 = vadd.f32 %v11071_v2, %v11209_v44  ;;  %1180 = vmatmul.bf16.gmra.mxu3 %v10991_v31 }
 0x115   :  { %v11108_v21 = vpop.f32.mrf.mxu2 }
 0x116   :  { %v520_v27 = vpop.f32.mrf.mxu3 }
 0x117   :  { %v521_v29 = vadd.f32 %v520_v27, %v11157_v48  ;;  %v881_v27 = vpack.c.bf16 %v518_v30, %v516_v40  ;;  %v496_v40 = vadd.f32 %v11059_v61, %v11157_v48  ;;  %v493_v61 = vadd.f32 %v11054_v59, %v11157_v48  ;;  %v241_v59 = vpop.f32.mrf.mxu0 }
 0x118   :  { %v242_v4 = vadd.f32 %v241_v59, %v11174_v55 }
 0x11d   :  { %v11123_v32 = vpop.f32.mrf.mxu2 }
 0x11e   :  { %v522_v36 = vpop.f32.mrf.mxu3  ;;  %v464_v30 = vadd.f32 %v11123_v32, %v11209_v44  ;;  %v459_v32 = vadd.f32 %v11098_v15, %v11209_v44  ;;  %v452_v15 = vadd.f32 %v11084_v8, %v11209_v44 }
 0x11f   :  { %v523_v33 = vadd.f32 %v522_v36, %v11157_v48  ;;  %v11195_v36 = vadd.f32 %v271_v38, %v11174_v55 }
 0x121   :  { %v882_v35 = vpack.c.bf16 %v523_v33, %v521_v29  ;;  %v536_v17 = vpack.c.bf16 %v11198_v58, %v11195_v36  ;;  %v501_v29 = vadd.f32 %v11068_v1, %v11157_v48  ;;  %v498_v1 = vadd.f32 %v11064_v63, %v11157_v48  ;;  %v89_v58 = vld [vmem:[%s16135_s1 + $0x8] sm:$0xff] }
 0x123   :  { %v877_v19 = vpack.c.bf16 %v498_v1, %v496_v40  ;;  %836 = vmatmul.bf16.gmra.mxu1 %v10971_v25  ;;  %1185 = vmatmul.bf16.gmra.mxu3 %v10892_v57 }
 0x125   :  { %v11137_v39 = vpop.f32.mrf.mxu2 }
 0x126   :  { %v525_v43 = vpop.f32.mrf.mxu3 }
 0x127   :  { %v526_v50 = vadd.f32 %v525_v43, %v11157_v48  ;;  %v511_v43 = vadd.f32 %v11086_v10, %v11157_v48  ;;  %v506_v10 = vadd.f32 %v11077_v5, %v11157_v48  ;;  %v503_v5 = vadd.f32 %v11073_v3, %v11157_v48 }
 0x129   :  { %v880_v38 = vpack.c.bf16 %v513_v14, %v511_v43  ;;  %v879_v45 = vpack.c.bf16 %v508_v12, %v506_v10  ;;  %v878_v7 = vpack.c.bf16 %v503_v5, %v501_v29 }
 0x12d   :  { %v11155_v46 = vpop.f32.mrf.mxu2 }
 0x12e   :  { %v527_v53 = vpop.f32.mrf.mxu3 }
 0x12f   :  { %v528_v54 = vadd.f32 %v527_v53, %v11157_v48 }
 0x131   :  { %v883_v16 = vpack.c.bf16 %v528_v54, %v526_v50 }
 0x133   :  { %884 = vmatpush.bf16.xpose.msra.mxu2 %v883_v16  ;;  %v11220_v16 = vpop.f32.mrf.mxu1 }
 0x135   :  { %v471_v20 = vpop.f32.mrf.mxu2 }
 0x136   :  { %v472_v54 = vadd.f32 %v471_v20, %v11209_v44  ;;  %v467_v20 = vadd.f32 %v11137_v39, %v11209_v44 }
 0x13b   :  { %885 = vmatpush.bf16.xpose.msra.mxu2 %v882_v35  ;;  %v469_v35 = vadd.f32 %v11155_v46, %v11209_v44  ;;  %v462_v46 = vadd.f32 %v11108_v21, %v11209_v44 }
 0x13d   :  { %v473_v37 = vpop.f32.mrf.mxu2  ;;  %v543_v3 = vpack.c.bf16 %v469_v35, %v467_v20  ;;  %v542_v63 = vpack.c.bf16 %v464_v30, %v462_v46 }
 0x13e   :  { %v474_v53 = vadd.f32 %v473_v37, %v11209_v44  ;;  %v302_v37 = vpop.f32.mrf.mxu1  ;;  %841 = vmatmul.bf16.gmra.mxu1 %v10991_v31 }
 0x140   :  { %v544_v33 = vpack.c.bf16 %v474_v53, %v472_v54 }
 0x143   :  { %886 = vmatpush.bf16.xpose.msra.mxu2 %v881_v27  ;;  %v491_v27 = vadd.f32 %v11051_v56, %v11157_v48  ;;  %v457_v56 = vadd.f32 %v11093_v13, %v11209_v44  ;;  %v449_v13 = vadd.f32 %v11080_v6, %v11209_v44  ;;  %v442_v6 = vadd.f32 %v11066_v0, %v11209_v44 }
 0x145   :  { %v476_v41 = vpop.f32.mrf.mxu2  ;;  %v876_v43 = vpack.c.bf16 %v493_v61, %v491_v27  ;;  %v539_v12 = vpack.c.bf16 %v449_v13, %v447_v11 }
 0x146   :  { %v477_v47 = vadd.f32 %v476_v41, %v11209_v44  ;;  %v305_v39 = vpop.f32.mrf.mxu1  ;;  %v11245_v41 = vperm.slane %v11169_v52, 1  ;;  %v541_v52 = vpack.c.bf16 %v459_v32, %v457_v56  ;;  %v11291_v32 = vpop.f32.mrf.mxu3 }
 0x148   :  { %v291_v21 = vadd.f32 %v11182_v26, %v11245_v41  ;;  %v293_v14 = vadd.f32 %v292_v18, %v11245_v41  ;;  %v540_v18 = vpack.c.bf16 %v454_v22, %v452_v15  ;;  %v301_v54 = vadd.f32 %v11220_v16, %v11245_v41 }
 0x149   :  { %v303_v29 = vadd.f32 %v302_v37, %v11245_v41  ;;  %v306_v35 = vadd.f32 %v305_v39, %v11245_v41 }
 0x14b   :  { %887 = vmatpush.bf16.xpose.msra.mxu2 %v880_v38  ;;  %v868_v38 = vpack.c.bf16 %v293_v14, %v291_v21 }
 0x14d   :  { %v478_v49 = vpop.f32.mrf.mxu2 }
 0x14e   :  { %v479_v50 = vadd.f32 %v478_v49, %v11209_v44  ;;  %v307_v48 = vpop.f32.mrf.mxu1  ;;  %v243_v49 = vpop.f32.mrf.mxu0  ;;  %846 = vmatmul.bf16.gmra.mxu1 %v10892_v57 }
 0x14f   :  { %v244_v53 = vadd.f32 %v243_v49, %v11174_v55  ;;  %v308_v16 = vadd.f32 %v307_v48, %v11245_v41  ;;  %v11297_v57 = vpop.f32.mrf.mxu3 }
 0x150   :  { %v545_v9 = vpack.c.bf16 %v479_v50, %v477_v47  ;;  %v296_v47 = vadd.f32 %v11200_v42, %v11245_v41  ;;  %v298_v50 = vadd.f32 %v297_v51, %v11245_v41 }
 0x151   :  { %v530_v2 = vpack.c.bf16 %v244_v53, %v242_v4  ;;  %v871_v1 = vpack.c.bf16 %v308_v16, %v306_v35 }
 0x152   :  { %546 = vmatpush.bf16.xpose.msrb.mxu0 %v545_v9  ;;  %v869_v9 = vpack.c.bf16 %v298_v50, %v296_v47 }
 0x153   :  { %888 = vmatpush.bf16.xpose.msra.mxu2 %v879_v45  ;;  %v538_v45 = vpack.c.bf16 %v444_v28, %v442_v6 }
 0x156   :  { %v310_v26 = vpop.f32.mrf.mxu1  ;;  %v246_v8 = vpop.f32.mrf.mxu0 }
 0x157   :  { %v247_v25 = vadd.f32 %v246_v8, %v11174_v55  ;;  %v311_v31 = vadd.f32 %v310_v26, %v11245_v41  ;;  %v11303_v26 = vpop.f32.mrf.mxu3 }
 0x15a   :  { %547 = vmatpush.bf16.xpose.msrb.mxu0 %v544_v33  ;;  %v870_v33 = vpack.c.bf16 %v303_v29, %v301_v54 }
 0x15b   :  { %889 = vmatpush.bf16.xpose.msra.mxu2 %v878_v7 }
 0x15e   :  { %v312_v10 = vpop.f32.mrf.mxu1  ;;  %v248_v51 = vpop.f32.mrf.mxu0 }
 0x15f   :  { %v249_v7 = vadd.f32 %v248_v51, %v11174_v55  ;;  %v313_v39 = vadd.f32 %v312_v10, %v11245_v41  ;;  %v11309_v50 = vpop.f32.mrf.mxu3 }
 0x161   :  { %v531_v20 = vpack.c.bf16 %v249_v7, %v247_v25 }
 0x162   :  { %548 = vmatpush.bf16.xpose.msrb.mxu0 %v543_v3 }
 0x163   :  { %890 = vmatpush.bf16.xpose.msra.mxu2 %v877_v19 }
 0x166   :  { %v315_v42 = vpop.f32.mrf.mxu1  ;;  %v251_v0 = vpop.f32.mrf.mxu0 }
 0x167   :  { %v252_v30 = vadd.f32 %v251_v0, %v11174_v55  ;;  %v316_v48 = vadd.f32 %v315_v42, %v11245_v41  ;;  %v11315_v28 = vpop.f32.mrf.mxu3  ;;  %v277_v0 = vadd.f32 %v11057_v60, %v11174_v55 }
 0x16a   :  { %549 = vmatpush.bf16.xpose.msrb.mxu0 %v542_v63  ;;  %v872_v63 = vpack.c.bf16 %v313_v39, %v311_v31  ;;  %v92_v39 = vld [vmem:[%s16135_s1 + $0x20] sm:$0xff] }
 0x16b   :  { %891 = vmatpush.bf16.xpose.msra.mxu2 %v876_v43 }
 0x16e   :  { %v317_v5 = vpop.f32.mrf.mxu1  ;;  %v253_v37 = vpop.f32.mrf.mxu0 }
 0x16f   :  { %v254_v46 = vadd.f32 %v253_v37, %v11174_v55  ;;  %v11319_v42 = vpop.f32.mrf.mxu3  ;;  %v91_v37 = vld [vmem:[%s16135_s1 + $0x18] sm:$0xff] }
 0x171   :  { %v532_v27 = vpack.c.bf16 %v254_v46, %v252_v30  ;;  %v90_v30 = vld [vmem:[%s16135_s1 + $0x10] sm:$0xff] }
 0x172   :  { %550 = vmatpush.bf16.xpose.msrb.mxu0 %v541_v52  ;;  %892 = vmatmul.bf16.vlgmr.msra.gmra.mxu2 %v868_v38  ;;  %v318_v52 = vadd.f32 %v317_v5, %v11245_v41 }
 0x174   :  { %v873_v15 = vpack.c.bf16 %v318_v52, %v316_v48 }
 0x176   :  { %v320_v44 = vpop.f32.mrf.mxu1  ;;  %v256_v19 = vpop.f32.mrf.mxu0 }
 0x177   :  { %v257_v14 = vadd.f32 %v256_v19, %v11174_v55  ;;  %v321_v11 = vadd.f32 %v320_v44, %v11245_v41  ;;  %v11328_v54 = vpop.f32.mrf.mxu3  ;;  %v279_v44 = vadd.f32 %v11062_v62, %v11174_v55 }
 0x17a   :  { %551 = vmatpush.bf16.xpose.msrb.mxu0 %v540_v18 }
 0x17e   :  { %v322_v40 = vpop.f32.mrf.mxu1  ;;  %v258_v43 = vpop.f32.mrf.mxu0 }
 0x17f   :  { %v259_v56 = vadd.f32 %v258_v43, %v11174_v55  ;;  %v323_v10 = vadd.f32 %v322_v40, %v11245_v41 }
 0x181   :  { %v533_v38 = vpack.c.bf16 %v259_v56, %v257_v14 }
 0x182   :  { %552 = vmatpush.bf16.xpose.msrb.mxu0 %v539_v12  ;;  %897 = vmatmul.bf16.gmra.mxu2 %v869_v9  ;;  %v874_v9 = vpack.c.bf16 %v323_v10, %v321_v11  ;;  %v93_v10 = vld [vmem:[%s16135_s1 + $0x28] sm:$0xff] }
 0x186   :  { %v325_v3 = vpop.f32.mrf.mxu1  ;;  %v261_v59 = vpop.f32.mrf.mxu0 }
 0x187   :  { %v262_v13 = vadd.f32 %v261_v59, %v11174_v55 }
 0x18a   :  { %553 = vmatpush.bf16.xpose.msrb.mxu0 %v538_v45  ;;  %v326_v45 = vadd.f32 %v325_v3, %v11245_v41 }
 0x18e   :  { %v327_v61 = vpop.f32.mrf.mxu1  ;;  %v263_v18 = vpop.f32.mrf.mxu0 }
 0x18f   :  { %v264_v47 = vadd.f32 %v263_v18, %v11174_v55  ;;  %v328_v51 = vadd.f32 %v327_v61, %v11245_v41 }
 0x191   :  { %554 = vmatmul.bf16.vlgmr.msrb.gmra.mxu0 %v530_v2  ;;  %v534_v12 = vpack.c.bf16 %v264_v47, %v262_v13  ;;  %v875_v53 = vpack.c.bf16 %v328_v51, %v326_v45  ;;  %v11332_v2 = vpop.f32.mrf.mxu3 }
 0x192   :  { %902 = vmatmul.bf16.gmra.mxu2 %v870_v33 }
 0x196   :  { %v11293_v21 = vpop.f32.mrf.mxu1 }
 0x199   :  { %v11339_v41 = vpop.f32.mrf.mxu3 }
 0x19e   :  { %v11301_v22 = vpop.f32.mrf.mxu1 }
 0x1a1   :  { %559 = vmatmul.bf16.gmra.mxu0 %v531_v20  ;;  %v11353_v36 = vpop.f32.mrf.mxu3 }
 0x1a2   :  { %907 = vmatmul.bf16.gmra.mxu2 %v871_v1 }
 0x1a6   :  { %v11305_v49 = vpop.f32.mrf.mxu1 }
 0x1a9   :  { %v1176_v60 = vpop.f32.mrf.mxu3 }
 0x1ae   :  { %v11313_v8 = vpop.f32.mrf.mxu1 }
 0x1b1   :  { %564 = vmatmul.bf16.gmra.mxu0 %v532_v27  ;;  %v1178_v55 = vpop.f32.mrf.mxu3 }
 0x1b2   :  { %912 = vmatmul.bf16.gmra.mxu2 %v872_v63 }
 0x1b6   :  { %v11317_v6 = vpop.f32.mrf.mxu1 }
 0x1b9   :  { %v1181_v46 = vpop.f32.mrf.mxu3 }
 0x1be   :  { %v11323_v4 = vpop.f32.mrf.mxu1 }
 0x1c1   :  { %569 = vmatmul.bf16.gmra.mxu0 %v533_v38  ;;  %v1183_v14 = vpop.f32.mrf.mxu3 }
 0x1c2   :  { %917 = vmatmul.bf16.gmra.mxu2 %v873_v15 }
 0x1c6   :  { %v11330_v29 = vpop.f32.mrf.mxu1 }
 0x1c9   :  { %v1186_v15 = vpop.f32.mrf.mxu3 }
 0x1ce   :  { %v11334_v5 = vpop.f32.mrf.mxu1 }
 0x1d1   :  { %574 = vmatmul.bf16.gmra.mxu0 %v534_v12  ;;  %v1188_v12 = vpop.f32.mrf.mxu3 }
 0x1d2   :  { %922 = vmatmul.bf16.gmra.mxu2 %v874_v9  ;;  %v1206_v9 = vpack.c.bf16 %v1188_v12, %v1186_v15 }
 0x1d4   :  { %1207 = vmatpush.bf16.msra.mxu0 %v1206_v9 }
 0x1d6   :  { %v11344_v24 = vpop.f32.mrf.mxu1 }
 0x1de   :  { %v11358_v25 = vpop.f32.mrf.mxu1 }
 0x1e1   :  { %579 = vmatmul.bf16.gmra.mxu0 %v535_v34 }
 0x1e2   :  { %927 = vmatmul.bf16.gmra.mxu2 %v875_v53  ;;  %v1205_v53 = vpack.c.bf16 %v1183_v14, %v1181_v46 }
 0x1e4   :  { %1208 = vmatpush.bf16.msra.mxu0 %v1205_v53 }
 0x1e6   :  { %v11363_v16 = vpop.f32.mrf.mxu1 }
 0x1ee   :  { %v839_v1 = vpop.f32.mrf.mxu1 }
 0x1f1   :  { %584 = vmatmul.bf16.gmra.mxu0 %v536_v17  ;;  %v537_v17 = vpack.c.bf16 %v279_v44, %v277_v0 }
 0x1f5   :  { %v893_v34 = vpop.f32.mrf.mxu2 }
 0x1f6   :  { %v11346_v33 = vadd.f32 %v893_v34, %v88_v23  ;;  %v842_v61 = vpop.f32.mrf.mxu1 }
 0x1f8   :  { %933 = vmax.xlane.f32.xlu1 %v11346_v33 }
 0x1fd   :  { %v895_v7 = vpop.f32.mrf.mxu2 }
 0x1fe   :  { %v11360_v35 = vadd.f32 %v895_v7, %v89_v58  ;;  %v844_v52 = vpop.f32.mrf.mxu1 }
 0x1ff   :  { %v866_v44 = vpack.c.bf16 %v844_v52, %v842_v61 }
 0x200   :  { %935 = vmax.xlane.f32.xlu1 %v11360_v35 }
 0x201   :  { %589 = vmatmul.bf16.gmra.mxu0 %v537_v17  ;;  %v865_v17 = vpack.c.bf16 %v839_v1, %v11363_v16  ;;  %v94_v16 = vld [vmem:[%s16135_s1 + $0x30] sm:$0xff] }
 0x205   :  { %v898_v62 = vpop.f32.mrf.mxu2 }
 0x206   :  { %v11380_v27 = vadd.f32 %v898_v62, %v90_v30  ;;  %v847_v47 = vpop.f32.mrf.mxu1  ;;  %v96_v62 = vld [vmem:[%s16135_s1 + $0x40] sm:$0xff] }
 0x20d   :  { %v900_v3 = vpop.f32.mrf.mxu2 }
 0x20e   :  { %v555_v20 = vpop.f32.mrf.mxu0  ;;  %v11371_v19 = vadd.f32 %v900_v3, %v91_v37 }
 0x20f   :  { %v11368_v40 = vadd.f32 %v555_v20, %v88_v23  ;;  %v849_v23 = vpop.f32.mrf.mxu1  ;;  %v1203_v20 = vpack.c.bf16 %v11353_v36, %v11339_v41  ;;  %v95_v41 = vld [vmem:[%s16135_s1 + $0x38] sm:$0xff]  ;;  %v1202_v36 = vpack.c.bf16 %v11332_v2, %v11328_v54  ;;  %v862_v54 = vpack.c.bf16 %v11323_v4, %v11317_v6 }
 0x210   :  { %939 = vmax.xlane.f32.xlu1 %v11371_v19  ;;  %v867_v0 = vpack.c.bf16 %v849_v23, %v847_v47  ;;  %v1199_v6 = vpack.c.bf16 %v11297_v57, %v11291_v32 }
 0x211   :  { %595 = vmax.xlane.f32.xlu0 %v11368_v40 }
 0x212   :  { %1256 = vmatpush.bf16.msrb.mxu1 %v867_v0 }
 0x215   :  { %v903_v63 = vpop.f32.mrf.mxu2 }
 0x216   :  { %v557_v31 = vpop.f32.mrf.mxu0  ;;  %v11382_v43 = vadd.f32 %v903_v63, %v92_v39  ;;  %1257 = vmatpush.bf16.msrb.mxu1 %v866_v44 }
 0x217   :  { %v11388_v48 = vadd.f32 %v557_v31, %v89_v58  ;;  %v1204_v58 = vpack.c.bf16 %v1178_v55, %v1176_v60  ;;  %v864_v60 = vpack.c.bf16 %v11358_v25, %v11344_v24  ;;  %v863_v24 = vpack.c.bf16 %v11334_v5, %v11330_v29 }
 0x218   :  { %941 = vmax.xlane.f32.xlu1 %v11382_v43  ;;  %v1201_v31 = vpack.c.bf16 %v11319_v42, %v11315_v28  ;;  %v1200_v29 = vpack.c.bf16 %v11309_v50, %v11303_v26  ;;  %v861_v28 = vpack.c.bf16 %v11313_v8, %v11305_v49  ;;  %v860_v26 = vpack.c.bf16 %v11301_v22, %v11293_v21  ;;  %v98_v8 = vld [vmem:[%s16135_s1 + $0x50] sm:$0xff] }
 0x219   :  { %937 = vmax.xlane.f32.xlu0 %v11380_v27  ;;  %1209 = vmatpush.bf16.msra.mxu0 %v1204_v58 }
 0x21a   :  { %1258 = vmatpush.bf16.msrb.mxu1 %v865_v17 }
 0x21d   :  { %v905_v38 = vpop.f32.mrf.mxu2  ;;  %1210 = vmatpush.bf16.msra.mxu0 %v1203_v20 }
 0x21e   :  { %v560_v56 = vpop.f32.mrf.mxu0  ;;  %v11398_v51 = vadd.f32 %v905_v38, %v93_v10  ;;  %1259 = vmatpush.bf16.msrb.mxu1 %v864_v60 }
 0x21f   :  { %v11386_v59 = vadd.f32 %v560_v56, %v90_v30 }
 0x221   :  { %599 = vmax.xlane.f32.xlu2 %v11386_v59  ;;  %597 = vmax.xlane.f32.xlu0 %v11388_v48 }
 0x222   :  { %1211 = vmatpush.bf16.msra.mxu0 %v1202_v36  ;;  %1260 = vmatpush.bf16.msrb.mxu1 %v863_v24 }
 0x225   :  { %v908_v11 = vpop.f32.mrf.mxu2 }
 0x226   :  { %v562_v18 = vpop.f32.mrf.mxu0  ;;  %v11426_v55 = vadd.f32 %v908_v11, %v94_v16  ;;  %1212 = vmatpush.bf16.msra.mxu0 %v1201_v31  ;;  %1261 = vmatpush.bf16.msrb.mxu1 %v862_v54 }
 0x227   :  { %v11392_v13 = vadd.f32 %v562_v18, %v91_v37 }
 0x229   :  { %601 = vmax.xlane.f32.xlu2 %v11392_v13 }
 0x22a   :  { %1213 = vmatpush.bf16.msra.mxu0 %v1200_v29  ;;  %1262 = vmatpush.bf16.msrb.mxu1 %v861_v28 }
 0x22d   :  { %v910_v34 = vpop.f32.mrf.mxu2 }
 0x22e   :  { %v565_v45 = vpop.f32.mrf.mxu0  ;;  %v11428_v1 = vadd.f32 %v910_v34, %v95_v41  ;;  %1214 = vmatpush.bf16.msra.mxu0 %v1199_v6  ;;  %1263 = vmatpush.bf16.msrb.mxu1 %v860_v26 }
 0x22f   :  { %v11407_v37 = vadd.f32 %v565_v45, %v92_v39  ;;  %v97_v39 = vld [vmem:[%s16135_s1 + $0x48] sm:$0xff] }
 0x231   :  { %943 = vmax.xlane.f32.xlu2 %v11398_v51 }
 0x235   :  { %v913_v30 = vpop.f32.mrf.mxu2 }
 0x236   :  { %v567_v7 = vpop.f32.mrf.mxu0  ;;  %v11411_v46 = vadd.f32 %v913_v30, %v96_v62 }
 0x237   :  { %v11409_v3 = vadd.f32 %v567_v7, %v93_v10 }
 0x238   :  { %949 = vmax.xlane.f32.xlu1 %v11411_v46 }
 0x239   :  { %603 = vmax.xlane.f32.xlu2 %v11407_v37  ;;  %605 = vmax.xlane.f32.xlu0 %v11409_v3 }
 0x23d   :  { %v915_v2 = vpop.f32.mrf.mxu2 }
 0x23e   :  { %v570_v25 = vpop.f32.mrf.mxu0  ;;  %v11443_v5 = vadd.f32 %v915_v2, %v97_v39 }
 0x23f   :  { %v11447_v42 = vadd.f32 %v570_v25, %v94_v16 }
 0x241   :  { %945 = vmax.xlane.f32.xlu2 %v11426_v55  ;;  %947 = vmax.xlane.f32.xlu0 %v11428_v1 }
 0x245   :  { %v918_v47 = vpop.f32.mrf.mxu2 }
 0x246   :  { %v572_v61 = vpop.f32.mrf.mxu0  ;;  %v11475_v11 = vadd.f32 %v918_v47, %v98_v8 }
 0x247   :  { %v11451_v4 = vadd.f32 %v572_v61, %v95_v41 }
 0x249   :  { %609 = vmax.xlane.f32.xlu1 %v11451_v4  ;;  %951 = vmax.xlane.f32.xlu2 %v11443_v5 }
 0x24a   :  { %607 = vmax.xlane.f32.xlu0 %v11447_v42 }
 0x24e   :  { %v575_v49 = vpop.f32.mrf.mxu0 }
 0x24f   :  { %v11458_v50 = vadd.f32 %v575_v49, %v96_v62 }
 0x251   :  { %611 = vmax.xlane.f32.xlu2 %v11458_v50 }
 0x256   :  { %v577_v32 = vpop.f32.mrf.mxu0 }
 0x257   :  { %v11461_v57 = vadd.f32 %v577_v32, %v97_v39  ;;  %v100_v39 = vld [vmem:[%s16135_s1 + $0x60] sm:$0xff] }
 0x259   :  { %613 = vmax.xlane.f32.xlu0 %v11461_v57 }
 0x25e   :  { %v580_v21 = vpop.f32.mrf.mxu0 }
 0x25f   :  { %v11467_v22 = vadd.f32 %v580_v21, %v98_v8 }
 0x261   :  { %615 = vmax.xlane.f32.xlu1 %v11467_v22 }
 0x266   :  { %v582_v41 = vpop.f32.mrf.mxu0 }
 0x26b   :  { %v934_v63 = vpop.xlane.xlu1 %933 }
 0x26c   :  { %v965_v14 = vsub.f32 %v11346_v33, %v934_v63 }
 0x26e   :  { %v981_v56 = vmul.f32 1.442695, %v965_v14  ;;  %v585_v29 = vpop.f32.mrf.mxu0  ;;  %v101_v14 = vld [vmem:[%s16135_s1 + $0x68] sm:$0xff] }
 0x26f   :  { %v11512_v61 = vadd.f32 %v585_v29, %v100_v39 }
 0x270   :  { %9910 = vpow2.f32 %v981_v56 }
 0x273   :  { %v936_v52 = vpop.xlane.xlu1 %935 }
 0x274   :  { %v966_v38 = vsub.f32 %v11360_v35, %v936_v52 }
 0x276   :  { %v11472_v15 = vpop.eup %9910  ;;  %v983_v18 = vmul.f32 1.442695, %v966_v38 }
 0x277   :  { %1013 = vadd.xlane.f32.xlu0 %v11472_v15 }
 0x278   :  { %9912 = vpow2.f32 %v983_v18 }
 0x27e   :  { %v11477_v10 = vpop.eup %9912 }
 0x27f   :  { %1015 = vadd.xlane.f32.xlu1 %v11477_v10  ;;  %953 = vmax.xlane.f32.xlu0 %v11475_v11 }
 0x283   :  { %v940_v9 = vpop.xlane.xlu1 %939 }
 0x284   :  { %v596_v33 = vpop.xlane.xlu0 %595  ;;  %v968_v45 = vsub.f32 %v11371_v19, %v940_v9 }
 0x285   :  { %v627_v12 = vsub.f32 %v11368_v40, %v596_v33  ;;  %v920_v40 = vpop.f32.mrf.mxu2 }
 0x286   :  { %v987_v53 = vmul.f32 1.442695, %v968_v45 }
 0x287   :  { %v643_v35 = vmul.f32 1.442695, %v627_v12 }
 0x289   :  { %9914 = vpow2.f32 %v643_v35 }
 0x28a   :  { %9916 = vpow2.f32 %v987_v53 }
 0x28b   :  { %v942_v36 = vpop.xlane.xlu1 %941 }
 0x28c   :  { %v938_v23 = vpop.xlane.xlu0 %937  ;;  %v969_v54 = vsub.f32 %v11382_v43, %v942_v36 }
 0x28d   :  { %v967_v34 = vsub.f32 %v11380_v27, %v938_v23  ;;  %v99_v27 = vld [vmem:[%s16135_s1 + $0x58] sm:$0xff]  ;;  %v923_v2 = vpop.f32.mrf.mxu2 }
 0x28e   :  { %v11495_v20 = vadd.f32 %v920_v40, %v99_v27  ;;  %v989_v28 = vmul.f32 1.442695, %v969_v54  ;;  %v11516_v26 = vadd.f32 %v582_v41, %v99_v27  ;;  %v11530_v38 = vadd.f32 %v923_v2, %v100_v39  ;;  %v102_v41 = vld [vmem:[%s16135_s1 + $0x70] sm:$0xff] }
 0x28f   :  { %v11484_v0 = vpop.eup %9914  ;;  %v985_v44 = vmul.f32 1.442695, %v967_v34 }
 0x290   :  { %675 = vadd.xlane.f32.xlu1 %v11484_v0  ;;  %v11487_v58 = vpop.eup %9916 }
 0x291   :  { %9918 = vpow2.f32 %v985_v44  ;;  %1019 = vadd.xlane.f32.xlu0 %v11487_v58 }
 0x294   :  { %v600_v17 = vpop.xlane.xlu2 %599  ;;  %v598_v7 = vpop.xlane.xlu0 %597 }
 0x295   :  { %v629_v19 = vsub.f32 %v11386_v59, %v600_v17  ;;  %v628_v62 = vsub.f32 %v11388_v48, %v598_v7  ;;  %v925_v49 = vpop.f32.mrf.mxu2 }
 0x296   :  { %v11526_v56 = vadd.f32 %v925_v49, %v101_v14 }
 0x297   :  { %v11497_v30 = vpop.eup %9918  ;;  %v647_v60 = vmul.f32 1.442695, %v629_v19  ;;  %v645_v16 = vmul.f32 1.442695, %v628_v62 }
 0x298   :  { %955 = vmax.xlane.f32.xlu1 %v11495_v20  ;;  %1017 = vadd.xlane.f32.xlu2 %v11497_v30 }
 0x299   :  { %9920 = vpow2.f32 %v647_v60 }
 0x29a   :  { %9922 = vpow2.f32 %v645_v16 }
 0x29c   :  { %v602_v59 = vpop.xlane.xlu2 %601 }
 0x29d   :  { %v630_v48 = vsub.f32 %v11392_v13, %v602_v59  ;;  %v928_v39 = vpop.f32.mrf.mxu2 }
 0x29e   :  { %v11576_v49 = vadd.f32 %v928_v39, %v102_v41 }
 0x29f   :  { %v11502_v24 = vpop.eup %9920  ;;  %v649_v25 = vmul.f32 1.442695, %v630_v48  ;;  %v103_v48 = vld [vmem:[%s16135_s1 + $0x78] sm:$0xff] }
 0x2a0   :  { %v11504_v31 = vpop.eup %9922  ;;  %679 = vadd.xlane.f32.xlu0 %v11502_v24 }
 0x2a1   :  { %9924 = vpow2.f32 %v649_v25  ;;  %677 = vadd.xlane.f32.xlu2 %v11504_v31 }
 0x2a2   :  { %9926 = vpow2.f32 %v989_v28 }
 0x2a4   :  { %v944_v13 = vpop.xlane.xlu2 %943 }
 0x2a5   :  { %v970_v43 = vsub.f32 %v11398_v51, %v944_v13  ;;  %v587_v51 = vpop.f32.mrf.mxu0 }
 0x2a6   :  { %v11538_v45 = vadd.f32 %v587_v51, %v101_v14 }
 0x2a7   :  { %v11514_v6 = vpop.eup %9924  ;;  %v991_v21 = vmul.f32 1.442695, %v970_v43 }
 0x2a8   :  { %619 = vmax.xlane.f32.xlu0 %v11512_v61  ;;  %681 = vadd.xlane.f32.xlu1 %v11514_v6  ;;  %v11528_v52 = vpop.eup %9926 }
 0x2a9   :  { %617 = vmax.xlane.f32.xlu2 %v11516_v26  ;;  %9928 = vpow2.f32 %v991_v21 }
 0x2ac   :  { %v604_v32 = vpop.xlane.xlu2 %603  ;;  %v606_v8 = vpop.xlane.xlu0 %605 }
 0x2ad   :  { %v632_v63 = vsub.f32 %v11409_v3, %v606_v8  ;;  %v631_v47 = vsub.f32 %v11407_v37, %v604_v32  ;;  %v950_v37 = vpop.xlane.xlu1 %949 }
 0x2af   :  { %v653_v18 = vmul.f32 1.442695, %v632_v63  ;;  %v651_v3 = vmul.f32 1.442695, %v631_v47  ;;  %v11540_v53 = vpop.eup %9928  ;;  %v930_v63 = vpop.f32.mrf.mxu2 }
 0x2b0   :  { %959 = vmax.xlane.f32.xlu0 %v11526_v56  ;;  %1021 = vadd.xlane.f32.xlu1 %v11528_v52 }
 0x2b1   :  { %957 = vmax.xlane.f32.xlu2 %v11530_v38  ;;  %9930 = vpow2.f32 %v653_v18  ;;  %v11587_v18 = vadd.f32 %v930_v63, %v103_v48 }
 0x2b2   :  { %9932 = vpow2.f32 %v651_v3 }
 0x2b4   :  { %v946_v33 = vpop.xlane.xlu2 %945  ;;  %v948_v12 = vpop.xlane.xlu0 %947 }
 0x2b5   :  { %v971_v9 = vsub.f32 %v11426_v55, %v946_v33  ;;  %v972_v35 = vsub.f32 %v11428_v1, %v948_v12  ;;  %v590_v55 = vpop.f32.mrf.mxu0 }
 0x2b6   :  { %v11565_v54 = vadd.f32 %v590_v55, %v102_v41 }
 0x2b7   :  { %v993_v23 = vmul.f32 1.442695, %v971_v9  ;;  %v995_v34 = vmul.f32 1.442695, %v972_v35  ;;  %v11542_v44 = vpop.eup %9930 }
 0x2b8   :  { %621 = vmax.xlane.f32.xlu1 %v11538_v45  ;;  %685 = vadd.xlane.f32.xlu0 %v11542_v44  ;;  %v11547_v17 = vpop.eup %9932 }
 0x2b9   :  { %9934 = vpow2.f32 %v993_v23  ;;  %1023 = vadd.xlane.f32.xlu2 %v11540_v53 }
 0x2ba   :  { %9936 = vpow2.f32 %v995_v34 }
 0x2bc   :  { %v952_v1 = vpop.xlane.xlu2 %951  ;;  %v610_v62 = vpop.xlane.xlu1 %609 }
 0x2bd   :  { %v608_v40 = vpop.xlane.xlu0 %607  ;;  %v634_v16 = vsub.f32 %v11451_v4, %v610_v62  ;;  %v974_v13 = vsub.f32 %v11443_v5, %v952_v1  ;;  %v973_v5 = vsub.f32 %v11411_v46, %v950_v37 }
 0x2be   :  { %v633_v7 = vsub.f32 %v11447_v42, %v608_v40  ;;  %v592_v42 = vpop.f32.mrf.mxu0 }
 0x2bf   :  { %v11550_v19 = vpop.eup %9934  ;;  %v657_v25 = vmul.f32 1.442695, %v634_v16  ;;  %v11567_v4 = vadd.f32 %v592_v42, %v103_v48  ;;  %v999_v43 = vmul.f32 1.442695, %v974_v13  ;;  %v997_v51 = vmul.f32 1.442695, %v973_v5 }
 0x2c0   :  { %v11552_v27 = vpop.eup %9936  ;;  %v655_v60 = vmul.f32 1.442695, %v633_v7  ;;  %1025 = vadd.xlane.f32.xlu0 %v11550_v19 }
 0x2c1   :  { %683 = vadd.xlane.f32.xlu2 %v11547_v17  ;;  %1027 = vadd.xlane.f32.xlu1 %v11552_v27 }
 0x2c2   :  { %9938 = vpow2.f32 %v655_v60 }
 0x2c4   :  { %v612_v59 = vpop.xlane.xlu2 %611 }
 0x2c5   :  { %v635_v36 = vsub.f32 %v11458_v50, %v612_v59 }
 0x2c7   :  { %v659_v2 = vmul.f32 1.442695, %v635_v36 }
 0x2c8   :  { %v11569_v29 = vpop.eup %9938  ;;  %625 = vmax.xlane.f32.xlu0 %v11567_v4 }
 0x2c9   :  { %9940 = vpow2.f32 %v659_v2  ;;  %623 = vmax.xlane.f32.xlu2 %v11565_v54  ;;  %687 = vadd.xlane.f32.xlu1 %v11569_v29 }
 0x2ca   :  { %9942 = vpow2.f32 %v657_v25 }
 0x2cc   :  { %v614_v50 = vpop.xlane.xlu0 %613 }
 0x2cd   :  { %v636_v28 = vsub.f32 %v11461_v57, %v614_v50 }
 0x2cf   :  { %v11578_v32 = vpop.eup %9940  ;;  %v661_v8 = vmul.f32 1.442695, %v636_v28 }
 0x2d0   :  { %v11580_v21 = vpop.eup %9942  ;;  %691 = vadd.xlane.f32.xlu0 %v11578_v32 }
 0x2d1   :  { %9944 = vpow2.f32 %v661_v8  ;;  %689 = vadd.xlane.f32.xlu2 %v11580_v21  ;;  %961 = vmax.xlane.f32.xlu1 %v11576_v49 }
 0x2d2   :  { %9946 = vpow2.f32 %v999_v43 }
 0x2d4   :  { %v616_v57 = vpop.xlane.xlu1 %615 }
 0x2d5   :  { %v637_v14 = vsub.f32 %v11467_v22, %v616_v57 }
 0x2d7   :  { %v11589_v47 = vpop.eup %9944  ;;  %v663_v3 = vmul.f32 1.442695, %v637_v14 }
 0x2d8   :  { %v11591_v33 = vpop.eup %9946 }
 0x2d9   :  { %9948 = vpow2.f32 %v663_v3  ;;  %963 = vmax.xlane.f32.xlu2 %v11587_v18  ;;  %1031 = vadd.xlane.f32.xlu0 %v11591_v33 }
 0x2da   :  { %9950 = vpow2.f32 %v997_v51  ;;  %693 = vadd.xlane.f32.xlu1 %v11589_v47 }
 0x2df   :  { %v11596_v46 = vpop.eup %9948 }
 0x2e0   :  { %v11598_v12 = vpop.eup %9950 }
 0x2e1   :  { %1029 = vadd.xlane.f32.xlu2 %v11598_v12 }
 0x2e2   :  { %695 = vadd.xlane.f32.xlu1 %v11596_v46 }
 0x2ea   :  { %v1014_v22 = vpop.xlane.xlu0 %1013 }
 0x2eb   :  { %9952 = vrcp.f32 %v1014_v22 }
 0x2f1   :  { %v9953_v34 = vpop.eup %9952 }
 0x2f2   :  { %v1016_v9 = vpop.xlane.xlu1 %1015  ;;  %v954_v35 = vpop.xlane.xlu0 %953  ;;  %v1061_v1 = vmul.f32 %v9953_v34, %v11472_v15 }
 0x2f3   :  { %9954 = vrcp.f32 %v1016_v9  ;;  %v975_v37 = vsub.f32 %v11475_v11, %v954_v35 }
 0x2f5   :  { %v1001_v23 = vmul.f32 1.442695, %v975_v37 }
 0x2f7   :  { %9956 = vpow2.f32 %v1001_v23 }
 0x2f9   :  { %v9955_v55 = vpop.eup %9954 }
 0x2fa   :  { %v1062_v40 = vmul.f32 %v9955_v55, %v11477_v10 }
 0x2fc   :  { %v1191_v7 = vpack.c.bf16 %v1062_v40, %v1061_v1 }
 0x2fd   :  { %v11605_v62 = vpop.eup %9956 }
 0x2fe   :  { %1215 = vmatmul.bf16.vlgmr.msra.gmra.mxu0 %v1191_v7  ;;  %1033 = vadd.xlane.f32.xlu0 %v11605_v62 }
 0x303   :  { %v676_v60 = vpop.xlane.xlu1 %675 }
 0x304   :  { %v1020_v16 = vpop.xlane.xlu0 %1019 }
 0x305   :  { %9958 = vrcp.f32 %v1020_v16 }
 0x30b   :  { %v956_v41 = vpop.xlane.xlu1 %955  ;;  %v1018_v42 = vpop.xlane.xlu2 %1017 }
 0x30c   :  { %v976_v11 = vsub.f32 %v11495_v20, %v956_v41  ;;  %9960 = vrcp.f32 %v1018_v42  ;;  %v9959_v48 = vpop.eup %9958 }
 0x30d   :  { %v1064_v25 = vmul.f32 %v9959_v48, %v11487_v58 }
 0x30e   :  { %v1003_v59 = vmul.f32 1.442695, %v976_v11 }
 0x310   :  { %9962 = vpow2.f32 %v1003_v59 }
 0x311   :  { %9964 = vrcp.f32 %v676_v60 }
 0x312   :  { %v9961_v15 = vpop.eup %9960 }
 0x313   :  { %v680_v10 = vpop.xlane.xlu0 %679  ;;  %v1063_v36 = vmul.f32 %v9961_v15, %v11497_v30 }
 0x314   :  { %v678_v2 = vpop.xlane.xlu2 %677 }
 0x315   :  { %9966 = vrcp.f32 %v678_v2  ;;  %v1192_v39 = vpack.c.bf16 %v1064_v25, %v1063_v36 }
 0x316   :  { %v11611_v13 = vpop.eup %9962 }
 0x317   :  { %1035 = vadd.xlane.f32.xlu1 %v11611_v13  ;;  %1220 = vmatmul.bf16.gmra.mxu0 %v1192_v39  ;;  %v9965_v20 = vpop.eup %9964 }
 0x318   :  { %v723_v8 = vmul.f32 %v9965_v20, %v11484_v0 }
 0x31b   :  { %v9967_v50 = vpop.eup %9966  ;;  %v682_v28 = vpop.xlane.xlu1 %681 }
 0x31c   :  { %v620_v43 = vpop.xlane.xlu0 %619  ;;  %v724_v5 = vmul.f32 %v9967_v50, %v11504_v31  ;;  %v618_v63 = vpop.xlane.xlu2 %617  ;;  %9968 = vrcp.f32 %v682_v28 }
 0x31d   :  { %v638_v30 = vsub.f32 %v11516_v26, %v618_v63  ;;  %v639_v14 = vsub.f32 %v11512_v61, %v620_v43 }
 0x31e   :  { %v852_v58 = vpack.c.bf16 %v724_v5, %v723_v8 }
 0x31f   :  { %v665_v57 = vmul.f32 1.442695, %v638_v30  ;;  %v667_v0 = vmul.f32 1.442695, %v639_v14 }
 0x320   :  { %1264 = vmatmul.bf16.vlgmr.msrb.gmra.mxu1 %v852_v58 }
 0x321   :  { %9970 = vpow2.f32 %v665_v57 }
 0x322   :  { %9972 = vrcp.f32 %v680_v10  ;;  %v9969_v35 = vpop.eup %9968 }
 0x323   :  { %v1022_v51 = vpop.xlane.xlu1 %1021  ;;  %v726_v61 = vmul.f32 %v9969_v35, %v11514_v6 }
 0x324   :  { %v960_v3 = vpop.xlane.xlu0 %959  ;;  %v958_v22 = vpop.xlane.xlu2 %957 }
 0x325   :  { %v977_v9 = vsub.f32 %v11530_v38, %v958_v22  ;;  %v978_v23 = vsub.f32 %v11526_v56, %v960_v3 }
 0x327   :  { %v11619_v37 = vpop.eup %9970  ;;  %v1005_v31 = vmul.f32 1.442695, %v977_v9  ;;  %v1007_v7 = vmul.f32 1.442695, %v978_v23 }
 0x328   :  { %697 = vadd.xlane.f32.xlu2 %v11619_v37  ;;  %v9973_v26 = vpop.eup %9972 }
 0x329   :  { %9974 = vpow2.f32 %v1005_v31  ;;  %v725_v40 = vmul.f32 %v9973_v26, %v11502_v24 }
 0x32a   :  { %9976 = vpow2.f32 %v667_v0 }
 0x32b   :  { %9978 = vrcp.f32 %v1022_v51  ;;  %v622_v34 = vpop.xlane.xlu1 %621  ;;  %v853_v16 = vpack.c.bf16 %v726_v61, %v725_v40 }
 0x32c   :  { %v640_v55 = vsub.f32 %v11538_v45, %v622_v34  ;;  %v1024_v1 = vpop.xlane.xlu2 %1023  ;;  %v686_v38 = vpop.xlane.xlu0 %685 }
 0x32d   :  { %9980 = vrcp.f32 %v1024_v1 }
 0x32e   :  { %v669_v60 = vmul.f32 1.442695, %v640_v55 }
 0x32f   :  { %v11626_v41 = vpop.eup %9974 }
 0x330   :  { %v11628_v42 = vpop.eup %9976  ;;  %9982 = vpow2.f32 %v669_v60  ;;  %1037 = vadd.xlane.f32.xlu1 %v11626_v41  ;;  %1269 = vmatmul.bf16.gmra.mxu1 %v853_v16 }
 0x331   :  { %v9979_v6 = vpop.eup %9978  ;;  %699 = vadd.xlane.f32.xlu2 %v11628_v42  ;;  %9984 = vpow2.f32 %v1007_v7 }
 0x332   :  { %9986 = vrcp.f32 %v686_v38  ;;  %v1065_v11 = vmul.f32 %v9979_v6, %v11528_v52 }
 0x333   :  { %v9981_v56 = vpop.eup %9980 }
 0x334   :  { %v684_v45 = vpop.xlane.xlu2 %683  ;;  %v1026_v24 = vpop.xlane.xlu0 %1025  ;;  %v1066_v59 = vmul.f32 %v9981_v56, %v11540_v53 }
 0x335   :  { %9988 = vrcp.f32 %v684_v45  ;;  %v1028_v48 = vpop.xlane.xlu1 %1027 }
 0x336   :  { %v11634_v15 = vpop.eup %9982  ;;  %v1193_v10 = vpack.c.bf16 %v1066_v59, %v1065_v11  ;;  %9990 = vrcp.f32 %v1028_v48 }
 0x337   :  { %701 = vadd.xlane.f32.xlu0 %v11634_v15  ;;  %v11637_v36 = vpop.eup %9984  ;;  %9992 = vrcp.f32 %v1026_v24 }
 0x338   :  { %1225 = vmatmul.bf16.gmra.mxu0 %v1193_v10  ;;  %v9987_v25 = vpop.eup %9986 }
 0x339   :  { %1039 = vadd.xlane.f32.xlu2 %v11637_v36  ;;  %v728_v20 = vmul.f32 %v9987_v25, %v11542_v44 }
 0x33b   :  { %v9989_v2 = vpop.eup %9988 }
 0x33c   :  { %v624_v39 = vpop.xlane.xlu2 %623  ;;  %v626_v52 = vpop.xlane.xlu0 %625  ;;  %v727_v53 = vmul.f32 %v9989_v2, %v11547_v17 }
 0x33d   :  { %v641_v50 = vsub.f32 %v11565_v54, %v624_v39  ;;  %v688_v28 = vpop.xlane.xlu1 %687  ;;  %v642_v43 = vsub.f32 %v11567_v4, %v626_v52  ;;  %v9991_v8 = vpop.eup %9990  ;;  %v11671_v52 = vld [vmem:[%s16081_s10] ss:$0 sm:$0xff] }
 0x33e   :  { %v854_v5 = vpack.c.bf16 %v728_v20, %v727_v53  ;;  %v9993_v63 = vpop.eup %9992  ;;  %v1068_v14 = vmul.f32 %v9991_v8, %v11552_v27 }
 0x33f   :  { %v671_v30 = vmul.f32 1.442695, %v641_v50  ;;  %v673_v58 = vmul.f32 1.442695, %v642_v43  ;;  %v1067_v57 = vmul.f32 %v9993_v63, %v11550_v19 }
 0x340   :  { %1274 = vmatmul.bf16.gmra.mxu1 %v854_v5 }
 0x341   :  { %9994 = vpow2.f32 %v671_v30  ;;  %v1194_v4 = vpack.c.bf16 %v1068_v14, %v1067_v57 }
 0x342   :  { %9996 = vpow2.f32 %v673_v58 }
 0x343   :  { %9998 = vrcp.f32 %v688_v28 }
 0x344   :  { %v690_v17 = vpop.xlane.xlu2 %689  ;;  %v692_v51 = vpop.xlane.xlu0 %691 }
 0x345   :  { %10000 = vrcp.f32 %v690_v17  ;;  %v962_v44 = vpop.xlane.xlu1 %961  ;;  %v10601_v17 = vld [vmem:[%s16131_s6 + $0x8] sm:$0xff] }
 0x346   :  { %v979_v54 = vsub.f32 %v11576_v49, %v962_v44 }
 0x347   :  { %v11647_v3 = vpop.eup %9994 }
 0x348   :  { %v11649_v22 = vpop.eup %9996  ;;  %v1009_v9 = vmul.f32 1.442695, %v979_v54  ;;  %703 = vadd.xlane.f32.xlu0 %v11647_v3  ;;  %1230 = vmatmul.bf16.gmra.mxu0 %v1194_v4 }
 0x349   :  { %v9999_v35 = vpop.eup %9998  ;;  %705 = vadd.xlane.f32.xlu1 %v11649_v22 }
 0x34a   :  { %10002 = vpow2.f32 %v1009_v9  ;;  %v729_v0 = vmul.f32 %v9999_v35, %v11569_v29 }
 0x34b   :  { %v10001_v19 = vpop.eup %10000 }
 0x34c   :  { %v964_v27 = vpop.xlane.xlu2 %963  ;;  %v730_v49 = vmul.f32 %v10001_v19, %v11580_v21  ;;  %v1032_v55 = vpop.xlane.xlu0 %1031  ;;  %v10602_v19 = vld [vmem:[%s16131_s6 + $0x10] sm:$0xff] }
 0x34d   :  { %v980_v31 = vsub.f32 %v11587_v18, %v964_v27  ;;  %v694_v26 = vpop.xlane.xlu1 %693 }
 0x34e   :  { %v855_v23 = vpack.c.bf16 %v730_v49, %v729_v0  ;;  %10004 = vrcp.f32 %v694_v26 }
 0x34f   :  { %v1011_v61 = vmul.f32 1.442695, %v980_v31 }
 0x350   :  { %v11656_v34 = vpop.eup %10002  ;;  %1279 = vmatmul.bf16.gmra.mxu1 %v855_v23 }
 0x351   :  { %10006 = vpow2.f32 %v1011_v61  ;;  %1041 = vadd.xlane.f32.xlu2 %v11656_v34 }
 0x352   :  { %10008 = vrcp.f32 %v692_v51 }
 0x353   :  { %10010 = vrcp.f32 %v1032_v55 }
 0x354   :  { %v1030_v1 = vpop.xlane.xlu2 %1029  ;;  %v10005_v29 = vpop.eup %10004 }
 0x355   :  { %10012 = vrcp.f32 %v1030_v1  ;;  %v732_v40 = vmul.f32 %v10005_v29, %v11589_v47  ;;  %v696_v24 = vpop.xlane.xlu1 %695 }
 0x357   :  { %v11659_v38 = vpop.eup %10006 }
 0x358   :  { %v10009_v21 = vpop.eup %10008  ;;  %1043 = vadd.xlane.f32.xlu0 %v11659_v38 }
 0x359   :  { %v10011_v18 = vpop.eup %10010  ;;  %v731_v6 = vmul.f32 %v10009_v21, %v11578_v32 }
 0x35a   :  { %v1070_v16 = vmul.f32 %v10011_v18, %v11591_v33 }
 0x35b   :  { %v10013_v7 = vpop.eup %10012  ;;  %v856_v45 = vpack.c.bf16 %v732_v40, %v731_v6 }
 0x35c   :  { %v1069_v60 = vmul.f32 %v10013_v7, %v11598_v12  ;;  %v10603_v7 = vld [vmem:[%s16131_s6 + $0x18] sm:$0xff] }
 0x35e   :  { %v1195_v56 = vpack.c.bf16 %v1070_v16, %v1069_v60 }
 0x360   :  { %1235 = vmatmul.bf16.gmra.mxu0 %v1195_v56  ;;  %1284 = vmatmul.bf16.gmra.mxu1 %v856_v45  ;;  %v10604_v56 = vld [vmem:[%s16131_s6 + $0x20] sm:$0xff] }
 0x371   :  { %v1034_v11 = vpop.xlane.xlu0 %1033 }
 0x372   :  { %10014 = vrcp.f32 %v1034_v11 }
 0x378   :  { %v10015_v48 = vpop.eup %10014 }
 0x379   :  { %v1071_v47 = vmul.f32 %v10015_v48, %v11605_v62  ;;  %v10600_v62 = vld [vmem:[%s16131_s6] sm:$0xff] }
 0x37b   :  { %v1216_v2 = vpop.f32.mrf.mxu0 }
 0x383   :  { %v1218_v53 = vpop.f32.mrf.mxu0 }
 0x38a   :  { %v1036_v59 = vpop.xlane.xlu1 %1035 }
 0x38b   :  { %10016 = vrcp.f32 %v1036_v59 }
 0x38c   :  { %10018 = vrcp.f32 %v696_v24 }
 0x391   :  { %v10017_v10 = vpop.eup %10016 }
 0x392   :  { %v1072_v25 = vmul.f32 %v10017_v10, %v11611_v13  ;;  %v10019_v20 = vpop.eup %10018 }
 0x393   :  { %v733_v43 = vmul.f32 %v10019_v20, %v11596_v46 }
 0x394   :  { %v1196_v12 = vpack.c.bf16 %v1072_v25, %v1071_v47  ;;  %v1221_v57 = vpop.f32.mrf.mxu0 }
 0x396   :  { %1240 = vmatmul.bf16.gmra.mxu0 %v1196_v12 }
 0x39b   :  { %v698_v32 = vpop.xlane.xlu2 %697 }
 0x39c   :  { %10020 = vrcp.f32 %v698_v32  ;;  %v1223_v49 = vpop.f32.mrf.mxu0 }
 0x39d   :  { %v1265_v33 = vpop.f32.mrf.mxu1 }
 0x39e   :  { %v1266_v39 = vadd.f32 %v1265_v33, %v1216_v2  ;;  %v10605_v33 = vld [vmem:[%s16131_s6 + $0x28] sm:$0xff] }
 0x3a0   :  { %v1305_v13 = vadd.f32 %v10600_v62, %v1266_v39 }
 0x3a2   :  { %v10021_v50 = vpop.eup %10020  ;;  %v11677_v28 = vadd.f32 %v11671_v52, %v1305_v13 }
 0x3a3   :  { %v734_v8 = vmul.f32 %v10021_v50, %v11619_v37  ;;  %v1038_v14 = vpop.xlane.xlu1 %1037  ;;  %v10606_v50 = vld [vmem:[%s16131_s6 + $0x30] sm:$0xff] }
 0x3a4   :  { %v700_v5 = vpop.xlane.xlu2 %699  ;;  %1341 = vadd.xlane.f32.xlu1 %v11677_v28 }
 0x3a5   :  { %v1267_v63 = vpop.f32.mrf.mxu1  ;;  %v857_v30 = vpack.c.bf16 %v734_v8, %v733_v43  ;;  %10022 = vrcp.f32 %v700_v5 }
 0x3a6   :  { %v1268_v58 = vadd.f32 %v1267_v63, %v1218_v53  ;;  %10024 = vrcp.f32 %v1038_v14 }
 0x3a7   :  { %1289 = vmatmul.bf16.gmra.mxu1 %v857_v30 }
 0x3a8   :  { %v1306_v44 = vadd.f32 %v10601_v17, %v1268_v58 }
 0x3aa   :  { %v702_v54 = vpop.xlane.xlu0 %701  ;;  %v11686_v46 = vadd.f32 %v11671_v52, %v1306_v44 }
 0x3ab   :  { %10026 = vrcp.f32 %v702_v54  ;;  %v10023_v9 = vpop.eup %10022 }
 0x3ac   :  { %v1040_v37 = vpop.xlane.xlu2 %1039  ;;  %1343 = vadd.xlane.f32.xlu2 %v11686_v46  ;;  %v10025_v35 = vpop.eup %10024  ;;  %v735_v26 = vmul.f32 %v10023_v9, %v11628_v42 }
 0x3ad   :  { %10028 = vrcp.f32 %v1040_v37  ;;  %v1270_v51 = vpop.f32.mrf.mxu1  ;;  %v1073_v55 = vmul.f32 %v10025_v35, %v11626_v41 }
 0x3ae   :  { %v1271_v4 = vadd.f32 %v1270_v51, %v1221_v57  ;;  %v10656_v57 = vmov 128.0  }
 0x3b0   :  { %v1307_v27 = vadd.f32 %v10602_v19, %v1271_v4 }
 0x3b1   :  { %v10027_v0 = vpop.eup %10026 }
 0x3b2   :  { %v11693_v31 = vadd.f32 %v11671_v52, %v1307_v27  ;;  %v736_v23 = vmul.f32 %v10027_v0, %v11634_v15 }
 0x3b3   :  { %v10029_v61 = vpop.eup %10028 }
 0x3b4   :  { %1345 = vadd.xlane.f32.xlu0 %v11693_v31  ;;  %v1074_v1 = vmul.f32 %v10029_v61, %v11637_v36  ;;  %v858_v29 = vpack.c.bf16 %v736_v23, %v735_v26  ;;  %v10607_v61 = vld [vmem:[%s16131_s6 + $0x38] sm:$0xff] }
 0x3b5   :  { %v1272_v21 = vpop.f32.mrf.mxu1  ;;  %v1226_v60 = vpop.f32.mrf.mxu0 }
 0x3b6   :  { %v1273_v18 = vadd.f32 %v1272_v21, %v1223_v49  ;;  %v1197_v40 = vpack.c.bf16 %v1074_v1, %v1073_v55 }
 0x3b7   :  { %1294 = vmatmul.bf16.gmra.mxu1 %v858_v29 }
 0x3b8   :  { %1245 = vmatmul.bf16.gmra.mxu0 %v1197_v40  ;;  %v1308_v42 = vadd.f32 %v10603_v7, %v1273_v18 }
 0x3ba   :  { %v11704_v15 = vadd.f32 %v11671_v52, %v1308_v42  ;;  %v10608_v42 = vld [vmem:[%s16131_s6 + $0x40] sm:$0xff] }
 0x3bb   :  { %v704_v16 = vpop.xlane.xlu0 %703 }
 0x3bc   :  { %v706_v6 = vpop.xlane.xlu1 %705  ;;  %10030 = vrcp.f32 %v704_v16  ;;  %1347 = vadd.xlane.f32.xlu1 %v11704_v15 }
 0x3bd   :  { %10032 = vrcp.f32 %v706_v6  ;;  %v1275_v41 = vpop.f32.mrf.mxu1  ;;  %v1228_v48 = vpop.f32.mrf.mxu0 }
 0x3be   :  { %v1276_v36 = vadd.f32 %v1275_v41, %v1226_v60 }
 0x3c0   :  { %v1309_v45 = vadd.f32 %v10604_v56, %v1276_v36 }
 0x3c2   :  { %v10031_v24 = vpop.eup %10030  ;;  %v11711_v11 = vadd.f32 %v11671_v52, %v1309_v45 }
 0x3c3   :  { %v10033_v59 = vpop.eup %10032  ;;  %v737_v10 = vmul.f32 %v10031_v24, %v11647_v3 }
 0x3c4   :  { %1349 = vadd.xlane.f32.xlu2 %v11711_v11  ;;  %v738_v47 = vmul.f32 %v10033_v59, %v11649_v22  ;;  %v1042_v32 = vpop.xlane.xlu2 %1041 }
 0x3c5   :  { %v1277_v25 = vpop.f32.mrf.mxu1  ;;  %10034 = vrcp.f32 %v1042_v32  ;;  %v1231_v3 = vpop.f32.mrf.mxu0 }
 0x3c6   :  { %v1278_v12 = vadd.f32 %v1277_v25, %v1228_v48  ;;  %v859_v2 = vpack.c.bf16 %v738_v47, %v737_v10  ;;  %v10609_v48 = vld [vmem:[%s16131_s6 + $0x48] sm:$0xff] }
 0x3c8   :  { %1299 = vmatmul.bf16.gmra.mxu1 %v859_v2  ;;  %v1310_v39 = vadd.f32 %v10605_v33, %v1278_v12 }
 0x3ca   :  { %v11720_v53 = vadd.f32 %v11671_v52, %v1310_v39  ;;  %v10610_v39 = vld [vmem:[%s16131_s6 + $0x50] sm:$0xff] }
 0x3cb   :  { %v1044_v20 = vpop.xlane.xlu0 %1043  ;;  %v10035_v13 = vpop.eup %10034 }
 0x3cc   :  { %10036 = vrcp.f32 %v1044_v20  ;;  %1351 = vadd.xlane.f32.xlu0 %v11720_v53  ;;  %v1075_v63 = vmul.f32 %v10035_v13, %v11656_v34 }
 0x3cd   :  { %v1280_v22 = vpop.f32.mrf.mxu1  ;;  %10038 = vrcp.f32 %v10656_v57  ;;  %v1233_v4 = vpop.f32.mrf.mxu0 }
 0x3ce   :  { %v1281_v62 = vadd.f32 %v1280_v22, %v1231_v3 }
 0x3d0   :  { %v1311_v43 = vadd.f32 %v10606_v50, %v1281_v62 }
 0x3d2   :  { %v10037_v8 = vpop.eup %10036  ;;  %v11727_v5 = vadd.f32 %v11671_v52, %v1311_v43 }
 0x3d3   :  { %v1076_v30 = vmul.f32 %v10037_v8, %v11659_v38  ;;  %v10039_v14 = vpop.eup %10038 }
 0x3d4   :  { %1353 = vadd.xlane.f32.xlu0 %v11727_v5  ;;  %v1374_v17 = vmul.f32 128.0, %v10039_v14  ;;  %vm1378_vm0 = vweird.f32 %v10039_v14 }
 0x3d5   :  { %v1198_v58 = vpack.c.bf16 %v1076_v30, %v1075_v63  ;;  %v1282_v37 = vpop.f32.mrf.mxu1 }
 0x3d6   :  { %v1375_v44 = vsub.f32 1.0, %v1374_v17  ;;  %v1283_v0 = vadd.f32 %v1282_v37, %v1233_v4 }
 0x3d7   :  { %1250 = vmatmul.bf16.gmra.mxu0 %v1198_v58 }
 0x3d8   :  { %v1376_v54 = vmul.f32 %v10039_v14, %v1375_v44  ;;  %v1312_v55 = vadd.f32 %v10607_v61, %v1283_v0  ;;  %v10613_v0 = vld [vmem:[%s16131_s6 + $0x68] sm:$0xff] }
 0x3da   :  { %v1377_v51 = vadd.f32 %v10039_v14, %v1376_v54  ;;  %v11750_v18 = vadd.f32 %v11671_v52, %v1312_v55  ;;  %v10612_v54 = vld [vmem:[%s16131_s6 + $0x60] sm:$0xff]  ;;  %v10614_v55 = vld [vmem:[%s16131_s6 + $0x70] sm:$0xff] }
 0x3dc   :  { %v11732_v9 = vsel %vm1378_vm0, %v10039_v14, %v1377_v51 }
 0x3dd   :  { %16136 = vst [vmem:[#allocation2_spill] sm:$0xff] %v11732_v9  ;;  %v1285_v34 = vpop.f32.mrf.mxu1  ;;  %v1236_v27 = vpop.f32.mrf.mxu0 }
 0x3e5   :  { %v1287_v1 = vpop.f32.mrf.mxu1  ;;  %v1238_v40 = vpop.f32.mrf.mxu0 }
 0x3e6   :  { %v1288_v41 = vadd.f32 %v1287_v1, %v1238_v40  ;;  %v9685_v40 = vld [vmem:[%s16082_s11 + $0x74] sm:$0xf0] }
 0x413   :  { %v1241_v45 = vpop.f32.mrf.mxu0 }
 0x417   :  { %v1342_v35 = vpop.xlane.xlu1 %1341 }
 0x418   :  { %v1380_v38 = vmul.f32 %v11732_v9, %v1342_v35 }
 0x41a   :  { %v11736_v19 = vsub.f32 %v11677_v28, %v1380_v38  ;;  %v1286_v28 = vadd.f32 %v1285_v34, %v1236_v27 }
 0x41b   :  { %v1243_v32 = vpop.f32.mrf.mxu0 }
 0x41c   :  { %v1412_v49 = vmul.f32 %v11736_v19, %v11736_v19  ;;  %v1313_v60 = vadd.f32 %v10608_v42, %v1286_v28 }
 0x41e   :  { %1428 = vadd.xlane.f32.xlu1 %v1412_v49  ;;  %v11761_v36 = vadd.f32 %v11671_v52, %v1313_v60  ;;  %v8597_v60 = vld [vmem:[%s16082_s11 + $0x78] sm:$0xf0] }
 0x41f   :  { %v1344_v26 = vpop.xlane.xlu2 %1343 }
 0x420   :  { %v1381_v23 = vmul.f32 %v11732_v9, %v1344_v26 }
 0x422   :  { %v11745_v29 = vsub.f32 %v11686_v46, %v1381_v23 }
 0x424   :  { %v1413_v21 = vmul.f32 %v11745_v29, %v11745_v29  ;;  %v1290_v16 = vpop.f32.mrf.mxu1 }
 0x425   :  { %v1291_v47 = vadd.f32 %v1290_v16, %v1241_v45  ;;  %v8587_v16 = vld [vmem:[%s16082_s11 + $0x60] sm:$0xf] }
 0x426   :  { %1430 = vadd.xlane.f32.xlu2 %v1413_v21  ;;  %1355 = vadd.xlane.f32.xlu1 %v11750_v18  ;;  %v8595_v21 = vld [vmem:[%s16082_s11 + $0x70] sm:$0xf] }
 0x427   :  { %v1346_v7 = vpop.xlane.xlu0 %1345  ;;  %v1315_v20 = vadd.f32 %v10610_v39, %v1291_v47  ;;  %v8596_v42 = vor.u32 %v9685_v40, %v8595_v21  ;;  %v9680_v47 = vld [vmem:[%s16082_s11 + $0x54] sm:$0xf]  ;;  %v9679_v39 = vld [vmem:[%s16082_s11 + $0x44] sm:$0xf0]  ;;  %v9670_v40 = vld [vmem:[%s16082_s11 + $0x4] sm:$0xf] }
 0x428   :  { %v1382_v46 = vmul.f32 %v11732_v9, %v1346_v7  ;;  %v9684_v7 = vld [vmem:[%s16082_s11 + $0x74] sm:$0xf] }
 0x429   :  { %v11789_v13 = vadd.f32 %v11671_v52, %v1315_v20  ;;  %1812 = vmatpush.bf16.msrb.mxu2 %v8596_v42  ;;  %v9678_v20 = vld [vmem:[%s16082_s11 + $0x44] sm:$0xf] }
 0x42a   :  { %v11758_v6 = vsub.f32 %v11693_v31, %v1382_v46  ;;  %v1314_v31 = vadd.f32 %v10609_v48, %v1288_v41  ;;  %v8600_v46 = vor.u32 %v9684_v7, %v8597_v60  ;;  %v9683_v41 = vld [vmem:[%s16082_s11 + $0x64] sm:$0xf0]  ;;  %v8579_v48 = vld [vmem:[%s16082_s11 + $0x50] sm:$0xf]  ;;  %v8541_v7 = vld [vmem:[%s16082_s11 + $0x8] sm:$0xf0] }
 0x42b   :  { %v8588_v45 = vor.u32 %v9683_v41, %v8587_v16  ;;  %v8544_v42 = vor.u32 %v9670_v40, %v8541_v7 }
 0x42c   :  { %v1414_v56 = vmul.f32 %v11758_v6, %v11758_v6  ;;  %v1292_v25 = vpop.f32.mrf.mxu1  ;;  %v11776_v2 = vadd.f32 %v11671_v52, %v1314_v31  ;;  %1861 = vmatpush.bf16.msra.mxu3 %v8600_v46  ;;  %v9681_v31 = vld [vmem:[%s16082_s11 + $0x54] sm:$0xf0] }
 0x42d   :  { %v1293_v22 = vadd.f32 %v1292_v25, %v1243_v32  ;;  %1813 = vmatpush.bf16.msrb.mxu2 %v8588_v45  ;;  %v8580_v25 = vor.u32 %v9681_v31, %v8579_v48 }
 0x42e   :  { %1357 = vadd.xlane.f32.xlu1 %v11761_v36  ;;  %1432 = vadd.xlane.f32.xlu2 %v1414_v56  ;;  %v9682_v56 = vld [vmem:[%s16082_s11 + $0x64] sm:$0xf] }
 0x42f   :  { %v1348_v24 = vpop.xlane.xlu1 %1347 }
 0x430   :  { %v1383_v59 = vmul.f32 %v11732_v9, %v1348_v24  ;;  %v8589_v24 = vld [vmem:[%s16082_s11 + $0x68] sm:$0xf0] }
 0x431   :  { %1814 = vmatpush.bf16.msrb.mxu2 %v8580_v25 }
 0x432   :  { %v11771_v10 = vsub.f32 %v11704_v15, %v1383_v59  ;;  %v8592_v59 = vor.u32 %v9682_v56, %v8589_v24 }
 0x434   :  { %v1415_v12 = vmul.f32 %v11771_v10, %v11771_v10  ;;  %v1295_v50 = vpop.f32.mrf.mxu1  ;;  %1862 = vmatpush.bf16.msra.mxu3 %v8592_v59 }
 0x435   :  { %v1246_v43 = vpop.f32.mrf.mxu0 }
 0x436   :  { %1434 = vadd.xlane.f32.xlu0 %v1415_v12  ;;  %1359 = vadd.xlane.f32.xlu2 %v11776_v2  ;;  %v1296_v57 = vadd.f32 %v1295_v50, %v1246_v43  ;;  %v8581_v12 = vld [vmem:[%s16082_s11 + $0x58] sm:$0xf0]  ;;  %v8563_v50 = vld [vmem:[%s16082_s11 + $0x30] sm:$0xf]  ;;  %v9677_v43 = vld [vmem:[%s16082_s11 + $0x34] sm:$0xf0] }
 0x437   :  { %v1350_v33 = vpop.xlane.xlu2 %1349  ;;  %v8584_v32 = vor.u32 %v9680_v47, %v8581_v12 }
 0x438   :  { %v1384_v15 = vmul.f32 %v11732_v9, %v1350_v33  ;;  %v1317_v37 = vadd.f32 %v10612_v54, %v1296_v57  ;;  %v8571_v33 = vld [vmem:[%s16082_s11 + $0x40] sm:$0xf] }
 0x439   :  { %1863 = vmatpush.bf16.msra.mxu3 %v8584_v32  ;;  %v8555_v57 = vld [vmem:[%s16082_s11 + $0x20] sm:$0xf] }
 0x43a   :  { %v11784_v3 = vsub.f32 %v11711_v11, %v1384_v15  ;;  %v10611_v11 = vld [vmem:[%s16131_s6 + $0x58] sm:$0xff]  ;;  %v11813_v38 = vadd.f32 %v11671_v52, %v1317_v37  ;;  %v8572_v15 = vor.u32 %v9679_v39, %v8571_v33  ;;  %v8557_v37 = vld [vmem:[%s16082_s11 + $0x28] sm:$0xf0] }
 0x43b   :  { %v1316_v30 = vadd.f32 %v10611_v11, %v1293_v22  ;;  %v8573_v22 = vld [vmem:[%s16082_s11 + $0x48] sm:$0xf0]  ;;  %v8565_v11 = vld [vmem:[%s16082_s11 + $0x38] sm:$0xf0] }
 0x43c   :  { %v1416_v62 = vmul.f32 %v11784_v3, %v11784_v3  ;;  %v1297_v4 = vpop.f32.mrf.mxu1  ;;  %1815 = vmatpush.bf16.msrb.mxu2 %v8572_v15 }
 0x43d   :  { %v11800_v14 = vadd.f32 %v11671_v52, %v1316_v30 }
 0x43e   :  { %1436 = vadd.xlane.f32.xlu0 %v1416_v62  ;;  %1361 = vadd.xlane.f32.xlu2 %v11789_v13  ;;  %v8576_v62 = vor.u32 %v9678_v20, %v8573_v22 }
 0x43f   :  { %v1352_v8 = vpop.xlane.xlu0 %1351 }
 0x440   :  { %v1385_v63 = vmul.f32 %v11732_v9, %v1352_v8  ;;  %1864 = vmatpush.bf16.msra.mxu3 %v8576_v62  ;;  %v9676_v8 = vld [vmem:[%s16082_s11 + $0x34] sm:$0xf] }
 0x441   :  { %v8568_v30 = vor.u32 %v9676_v8, %v8565_v11 }
 0x442   :  { %v11797_v58 = vsub.f32 %v11720_v53, %v1385_v63  ;;  %v1248_v53 = vpop.f32.mrf.mxu0  ;;  %v8564_v63 = vor.u32 %v9677_v43, %v8563_v50 }
 0x443   :  { %v1298_v34 = vadd.f32 %v1297_v4, %v1248_v53  ;;  %v8547_v53 = vld [vmem:[%s16082_s11 + $0x10] sm:$0xf]  ;;  %v9673_v4 = vld [vmem:[%s16082_s11 + $0x14] sm:$0xf0] }
 0x444   :  { %v1417_v17 = vmul.f32 %v11797_v58, %v11797_v58  ;;  %1816 = vmatpush.bf16.msrb.mxu2 %v8564_v63  ;;  %1865 = vmatpush.bf16.msra.mxu3 %v8568_v30 }
 0x445   :  { %v1318_v49 = vadd.f32 %v10613_v0, %v1298_v34  ;;  %v1300_v26 = vpop.f32.mrf.mxu1  ;;  %v9672_v34 = vld [vmem:[%s16082_s11 + $0x14] sm:$0xf]  ;;  %v8548_v0 = vor.u32 %v9673_v4, %v8547_v53  ;;  %v10615_v53 = vld [vmem:[%s16131_s6 + $0x78] sm:$0xff] }
 0x446   :  { %1363 = vadd.xlane.f32.xlu0 %v11800_v14  ;;  %1438 = vadd.xlane.f32.xlu1 %v1417_v17  ;;  %v9675_v17 = vld [vmem:[%s16082_s11 + $0x24] sm:$0xf0] }
 0x447   :  { %v1354_v44 = vpop.xlane.xlu0 %1353  ;;  %v8556_v54 = vor.u32 %v9675_v17, %v8555_v57 }
 0x448   :  { %v1386_v51 = vmul.f32 %v11732_v9, %v1354_v44  ;;  %v9674_v44 = vld [vmem:[%s16082_s11 + $0x24] sm:$0xf] }
 0x449   :  { %1817 = vmatpush.bf16.msrb.mxu2 %v8556_v54 }
 0x44a   :  { %v11810_v35 = vsub.f32 %v11727_v5, %v1386_v51  ;;  %v11822_v5 = vadd.f32 %v11671_v52, %v1318_v49  ;;  %v8560_v51 = vor.u32 %v9674_v44, %v8557_v37  ;;  %v8549_v49 = vld [vmem:[%s16082_s11 + $0x18] sm:$0xf0] }
 0x44c   :  { %v1418_v27 = vmul.f32 %v11810_v35, %v11810_v35  ;;  %1866 = vmatpush.bf16.msra.mxu3 %v8560_v51 }
 0x44d   :  { %1818 = vmatpush.bf16.msrb.mxu2 %v8548_v0  ;;  %v1302_v62 = vpop.f32.mrf.mxu1 }
 0x44e   :  { %1365 = vadd.xlane.f32.xlu0 %v11813_v38  ;;  %1440 = vadd.xlane.f32.xlu1 %v1418_v27 }
 0x454   :  { %v1251_v23 = vpop.f32.mrf.mxu0 }
 0x455   :  { %v1301_v61 = vadd.f32 %v1300_v26, %v1251_v23  ;;  %v8552_v23 = vor.u32 %v9672_v34, %v8549_v49 }
 0x456   :  { %1367 = vadd.xlane.f32.xlu1 %v11822_v5 }
 0x457   :  { %v1319_v1 = vadd.f32 %v10614_v55, %v1301_v61  ;;  %1867 = vmatpush.bf16.msra.mxu3 %v8552_v23  ;;  %v8539_v55 = vld [vmem:[%s16082_s11] sm:$0xf] }
 0x459   :  { %v11829_v28 = vadd.f32 %v11671_v52, %v1319_v1  ;;  %v9671_v1 = vld [vmem:[%s16082_s11 + $0x4] sm:$0xf0] }
 0x45a   :  { %v8540_v21 = vor.u32 %v9671_v1, %v8539_v55  ;;  %v121_v1 = vld [vmem:[%s16084_s19] sm:$0x7] }
 0x45b   :  { %1868 = vmatpush.bf16.msra.mxu3 %v8544_v42 }
 0x45c   :  { %1819 = vmatpush.bf16.msrb.mxu2 %v8540_v21  ;;  %v1253_v39 = vpop.f32.mrf.mxu0 }
 0x45d   :  { %v1303_v8 = vadd.f32 %v1302_v62, %v1253_v39 }
 0x45e   :  { %1369 = vadd.xlane.f32.xlu1 %v11829_v28 }
 0x45f   :  { %v1320_v4 = vadd.f32 %v10615_v53, %v1303_v8 }
 0x461   :  { %v11971_v21 = vadd.f32 %v11671_v52, %v1320_v4 }
 0x491   :  { %v1429_v27 = vpop.xlane.xlu1 %1428 }
 0x492   :  { %v1460_v26 = vmul.f32 %v1429_v27, %v11732_v9 }
 0x494   :  { %v1476_v61 = vadd.f32 1e-05, %v1460_v26 }
 0x496   :  { %10040 = vrsqrt.f32 %v1476_v61  ;;  %vm1498_vm2 = vweird.f32 %v1476_v61 }
 0x499   :  { %v1431_v60 = vpop.xlane.xlu2 %1430  ;;  %v1356_v46 = vpop.xlane.xlu1 %1355 }
 0x49a   :  { %v1461_v16 = vmul.f32 %v1431_v60, %v11732_v9  ;;  %v1387_v41 = vmul.f32 %v11732_v9, %v1356_v46  ;;  %v11978_v60 = vperm.slane %v121_v1, 0 }
 0x49c   :  { %v10041_v56 = vpop.eup %10040  ;;  %v1477_v45 = vadd.f32 1e-05, %v1461_v16  ;;  %v11932_v24 = vsub.f32 %v11750_v18, %v1387_v41 }
 0x49d   :  { %v1493_v59 = vmul.f32 %v10041_v56, %v1476_v61  ;;  %vm1499_vm1 = vweird.f32 %v10041_v56 }
 0x49e   :  { %10042 = vrsqrt.f32 %v1477_v45  ;;  %v1419_v48 = vmul.f32 %v11932_v24, %v11932_v24  ;;  %vm11946_vm3 = vmor %vm1498_vm2, %vm1499_vm1  ;;  %vm1508_vm5 = vweird.f32 %v1477_v45 }
 0x49f   :  { %v1494_v31 = vmul.f32 %v10041_v56, %v1493_v59 }
 0x4a0   :  { %1442 = vadd.xlane.f32.xlu2 %v1419_v48 }
 0x4a1   :  { %v1495_v47 = vmul.f32 0.5, %v1494_v31  ;;  %v1358_v25 = vpop.xlane.xlu1 %1357  ;;  %v1433_v12 = vpop.xlane.xlu2 %1432 }
 0x4a2   :  { %v1388_v32 = vmul.f32 %v11732_v9, %v1358_v25  ;;  %v1462_v33 = vmul.f32 %v1433_v12, %v11732_v9 }
 0x4a3   :  { %v1496_v20 = vsub.f32 1.5, %v1495_v47 }
 0x4a4   :  { %v10043_v15 = vpop.eup %10042  ;;  %v11938_v22 = vadd.f32 1e-05, %v1462_v33  ;;  %v11941_v18 = vsub.f32 %v11761_v36, %v1388_v32  ;;  %v120_v36 = vld [vmem:[%s16083_s18] sm:$0x7] }
 0x4a5   :  { %v1497_v50 = vmul.f32 %v10041_v56, %v1496_v20  ;;  %v1503_v43 = vmul.f32 %v10043_v15, %v1477_v45  ;;  %vm1509_vm4 = vweird.f32 %v10043_v15  ;;  %v11960_v0 = vperm.slane %v120_v36, 0 }
 0x4a6   :  { %10044 = vrsqrt.f32 %v11938_v22  ;;  %v1420_v63 = vmul.f32 %v11941_v18, %v11941_v18  ;;  %vm1510_vm6 = vmor %vm1508_vm5, %vm1509_vm4  ;;  %vm1518_vm8 = vweird.f32 %v11938_v22 }
 0x4a7   :  { %v1504_v11 = vmul.f32 %v10043_v15, %v1503_v43  ;;  %v1501_v57 = vsel %vm11946_vm3, %v10041_v56, %v1497_v50 }
 0x4a8   :  { %1444 = vadd.xlane.f32.xlu2 %v1420_v63  ;;  %v1652_v49 = vmul.f32 %v1501_v57, %v11736_v19 }
 0x4a9   :  { %v1505_v17 = vmul.f32 0.5, %v1504_v11  ;;  %v1360_v44 = vpop.xlane.xlu2 %1359  ;;  %v1435_v54 = vpop.xlane.xlu0 %1434 }
 0x4aa   :  { %v1389_v37 = vmul.f32 %v11732_v9, %v1360_v44  ;;  %v1463_v51 = vmul.f32 %v1435_v54, %v11732_v9 }
 0x4ab   :  { %v1506_v34 = vsub.f32 1.5, %v1505_v17 }
 0x4ac   :  { %v10045_v27 = vpop.eup %10044  ;;  %v1479_v26 = vadd.f32 1e-05, %v1463_v51  ;;  %v11964_v23 = vsub.f32 %v11776_v2, %v1389_v37  ;;  %v1669_v2 = vmul.f32 %v11960_v0, %v1652_v49 }
 0x4ad   :  { %v1507_v61 = vmul.f32 %v10043_v15, %v1506_v34  ;;  %v1513_v55 = vmul.f32 %v10045_v27, %v11938_v22  ;;  %vm1519_vm7 = vweird.f32 %v10045_v27 }
 0x4ae   :  { %10046 = vrsqrt.f32 %v1479_v26  ;;  %v1421_v19 = vmul.f32 %v11964_v23, %v11964_v23  ;;  %v11984_v47 = vadd.f32 %v11978_v60, %v1669_v2  ;;  %vm1520_vm9 = vmor %vm1518_vm8, %vm1519_vm7  ;;  %vm1528_vm11 = vweird.f32 %v1479_v26 }
 0x4af   :  { %v1511_v40 = vsel %vm1510_vm6, %v10043_v15, %v1507_v61  ;;  %v1514_v7 = vmul.f32 %v10045_v27, %v1513_v55 }
 0x4b0   :  { %v1653_v42 = vmul.f32 %v1511_v40, %v11745_v29  ;;  %1371 = vadd.xlane.f32.xlu2 %v11971_v21  ;;  %1446 = vadd.xlane.f32.xlu0 %v1421_v19 }
 0x4b1   :  { %v1515_v46 = vmul.f32 0.5, %v1514_v7  ;;  %v1362_v16 = vpop.xlane.xlu2 %1361  ;;  %v1437_v41 = vpop.xlane.xlu0 %1436 }
 0x4b2   :  { %v1670_v52 = vmul.f32 %v11960_v0, %v1653_v42  ;;  %v1390_v56 = vmul.f32 %v11732_v9, %v1362_v16  ;;  %v1464_v45 = vmul.f32 %v1437_v41, %v11732_v9 }
 0x4b3   :  { %v1516_v59 = vsub.f32 1.5, %v1515_v46 }
 0x4b4   :  { %v10047_v48 = vpop.eup %10046  ;;  %v1480_v31 = vadd.f32 1e-05, %v1464_v45  ;;  %v11987_v29 = vadd.f32 %v11978_v60, %v1670_v52  ;;  %v11990_v25 = vsub.f32 %v11789_v13, %v1390_v56 }
 0x4b5   :  { %v1517_v12 = vmul.f32 %v10045_v27, %v1516_v59  ;;  %v1523_v32 = vmul.f32 %v10047_v48, %v1479_v26  ;;  %vm1529_vm10 = vweird.f32 %v10047_v48 }
 0x4b6   :  { %10048 = vrsqrt.f32 %v1480_v31  ;;  %v1718_v33 = vpack.c.bf16 %v11987_v29, %v11984_v47  ;;  %v1422_v39 = vmul.f32 %v11990_v25, %v11990_v25  ;;  %vm1530_vm12 = vmor %vm1528_vm11, %vm1529_vm10  ;;  %vm1538_vm14 = vweird.f32 %v1480_v31 }
 0x4b7   :  { %v1524_v20 = vmul.f32 %v10047_v48, %v1523_v32  ;;  %v1521_v15 = vsel %vm1520_vm9, %v10045_v27, %v1517_v12 }
 0x4b8   :  { %1820 = vmatmul.bf16.vlgmr.msrb.gmra.mxu2 %v1718_v33  ;;  %1869 = vmatmul.bf16.vlgmr.msra.gmra.mxu3 %v1718_v33  ;;  %v1654_v22 = vmul.f32 %v1521_v15, %v11758_v6 }
 0x4b9   :  { %v1525_v62 = vmul.f32 0.5, %v1524_v20  ;;  %1448 = vadd.xlane.f32.xlu0 %v1422_v39  ;;  %v1439_v13 = vpop.xlane.xlu1 %1438  ;;  %v1364_v50 = vpop.xlane.xlu0 %1363 }
 0x4ba   :  { %v1465_v43 = vmul.f32 %v1439_v13, %v11732_v9  ;;  %v1391_v8 = vmul.f32 %v11732_v9, %v1364_v50  ;;  %v1671_v53 = vmul.f32 %v11960_v0, %v1654_v22  ;;  %v1910_v22 = vld [vmem:[%s16085_s3] sm:$0xff] }
 0x4bb   :  { %v1526_v63 = vsub.f32 1.5, %v1525_v62  ;;  %1926 = vmatpush.bf16.xpose.msrb.mxu0 %v1910_v22 }
 0x4bc   :  { %v10049_v11 = vpop.eup %10048  ;;  %v1481_v30 = vadd.f32 1e-05, %v1465_v43  ;;  %v12000_v36 = vsub.f32 %v11800_v14, %v1391_v8  ;;  %v12010_v61 = vadd.f32 %v11978_v60, %v1671_v53 }
 0x4bd   :  { %v1527_v57 = vmul.f32 %v10047_v48, %v1526_v63  ;;  %v1533_v17 = vmul.f32 %v10049_v11, %v1480_v31  ;;  %vm1539_vm13 = vweird.f32 %v10049_v11 }
 0x4be   :  { %10050 = vrsqrt.f32 %v1481_v30  ;;  %v1423_v44 = vmul.f32 %v12000_v36, %v12000_v36  ;;  %vm1540_vm15 = vmor %vm1538_vm14, %vm1539_vm13  ;;  %vm1548_vm1 = vweird.f32 %v1481_v30 }
 0x4bf   :  { %v1531_v54 = vsel %vm1530_vm12, %v10047_v48, %v1527_v57  ;;  %v1534_v37 = vmul.f32 %v10049_v11, %v1533_v17  ;;  %v2163_v57 = vunpack.c.h.b16 %v1910_v22 }
 0x4c0   :  { %1450 = vadd.xlane.f32.xlu1 %v1423_v44  ;;  %v1655_v51 = vmul.f32 %v1531_v54, %v11771_v10 }
 0x4c1   :  { %v1535_v4 = vmul.f32 0.5, %v1534_v37  ;;  %v1441_v14 = vpop.xlane.xlu1 %1440  ;;  %v1366_v34 = vpop.xlane.xlu0 %1365  ;;  %v2164_v37 = vpack.c.b16 %v2163_v57, %v2163_v57 }
 0x4c2   :  { %v1392_v6 = vmul.f32 %v11732_v9, %v1366_v34  ;;  %v1672_v27 = vmul.f32 %v11960_v0, %v1655_v51  ;;  %v1466_v62 = vmul.f32 %v1441_v14, %v11732_v9 }
 0x4c3   :  { %v1536_v49 = vsub.f32 1.5, %v1535_v4  ;;  %2173 = vmatpush.bf16.xpose.msra.mxu1 %v2164_v37 }
 0x4c4   :  { %v10051_v26 = vpop.eup %10050  ;;  %v12013_v55 = vadd.f32 %v11978_v60, %v1672_v27  ;;  %v12016_v1 = vsub.f32 %v11813_v38, %v1392_v6  ;;  %v1482_v13 = vadd.f32 1e-05, %v1466_v62 }
 0x4c5   :  { %v1537_v10 = vmul.f32 %v10049_v11, %v1536_v49  ;;  %v1543_v19 = vmul.f32 %v10051_v26, %v1481_v30  ;;  %vm1549_vm0 = vweird.f32 %v10051_v26 }
 0x4c6   :  { %v1719_v40 = vpack.c.bf16 %v12013_v55, %v12010_v61  ;;  %v1424_v7 = vmul.f32 %v12016_v1, %v12016_v1  ;;  %vm1550_vm2 = vmor %vm1548_vm1, %vm1549_vm0  ;;  %10052 = vrsqrt.f32 %v1482_v13  ;;  %vm1558_vm4 = vweird.f32 %v1482_v13 }
 0x4c7   :  { %v1544_v2 = vmul.f32 %v10051_v26, %v1543_v19  ;;  %v1541_v42 = vsel %vm1540_vm15, %v10049_v11, %v1537_v10 }
 0x4c8   :  { %1825 = vmatmul.bf16.gmra.mxu2 %v1719_v40  ;;  %1874 = vmatmul.bf16.gmra.mxu3 %v1719_v40  ;;  %v1656_v56 = vmul.f32 %v1541_v42, %v11784_v3 }
 0x4c9   :  { %v1545_v46 = vmul.f32 0.5, %v1544_v2  ;;  %1452 = vadd.xlane.f32.xlu2 %v1424_v7  ;;  %v1368_v16 = vpop.xlane.xlu1 %1367 }
 0x4ca   :  { %v1393_v38 = vmul.f32 %v11732_v9, %v1368_v16  ;;  %v1673_v12 = vmul.f32 %v11960_v0, %v1656_v56 }
 0x4cb   :  { %v1546_v41 = vsub.f32 1.5, %v1545_v46 }
 0x4cc   :  { %v12024_v52 = vsub.f32 %v11822_v5, %v1393_v38  ;;  %v12034_v39 = vadd.f32 %v11978_v60, %v1673_v12  ;;  %v10053_v50 = vpop.eup %10052 }
 0x4cd   :  { %v1547_v45 = vmul.f32 %v10051_v26, %v1546_v41  ;;  %v1553_v43 = vmul.f32 %v10053_v50, %v1482_v13  ;;  %vm1559_vm3 = vweird.f32 %v10053_v50 }
 0x4ce   :  { %v1425_v59 = vmul.f32 %v12024_v52, %v12024_v52  ;;  %vm1560_vm5 = vmor %vm1558_vm4, %vm1559_vm3 }
 0x4cf   :  { %v1551_v48 = vsel %vm1550_vm2, %v10051_v26, %v1547_v45  ;;  %v1554_v8 = vmul.f32 %v10053_v50, %v1553_v43 }
 0x4d0   :  { %1454 = vadd.xlane.f32.xlu0 %v1425_v59  ;;  %v1657_v31 = vmul.f32 %v1551_v48, %v11797_v58 }
 0x4d1   :  { %v1370_v32 = vpop.xlane.xlu1 %1369  ;;  %v1555_v30 = vmul.f32 0.5, %v1554_v8 }
 0x4d2   :  { %v1394_v33 = vmul.f32 %v11732_v9, %v1370_v32  ;;  %v1674_v5 = vmul.f32 %v11960_v0, %v1657_v31 }
 0x4d3   :  { %v1556_v17 = vsub.f32 1.5, %v1555_v30 }
 0x4d4   :  { %v12037_v3 = vadd.f32 %v11978_v60, %v1674_v5  ;;  %v12040_v20 = vsub.f32 %v11829_v28, %v1394_v33 }
 0x4d5   :  { %v1557_v4 = vmul.f32 %v10053_v50, %v1556_v17 }
 0x4d6   :  { %v1720_v15 = vpack.c.bf16 %v12037_v3, %v12034_v39  ;;  %v1426_v58 = vmul.f32 %v12040_v20, %v12040_v20 }
 0x4d7   :  { %v1561_v6 = vsel %vm1560_vm5, %v10053_v50, %v1557_v4 }
 0x4d8   :  { %1830 = vmatmul.bf16.gmra.mxu2 %v1720_v15  ;;  %1879 = vmatmul.bf16.gmra.mxu3 %v1720_v15  ;;  %v1658_v46 = vmul.f32 %v1561_v6, %v11810_v35 }
 0x4d9   :  { %1456 = vadd.xlane.f32.xlu1 %v1426_v58 }
 0x4da   :  { %v1675_v48 = vmul.f32 %v11960_v0, %v1658_v46 }
 0x4dc   :  { %v12065_v5 = vadd.f32 %v11978_v60, %v1675_v48 }
 0x513   :  { %v1443_v63 = vpop.xlane.xlu2 %1442 }
 0x514   :  { %v1467_v28 = vmul.f32 %v1443_v63, %v11732_v9 }
 0x516   :  { %v1483_v11 = vadd.f32 1e-05, %v1467_v28 }
 0x518   :  { %10054 = vrsqrt.f32 %v1483_v11  ;;  %vm1568_vm7 = vweird.f32 %v1483_v11 }
 0x51b   :  { %v1445_v44 = vpop.xlane.xlu2 %1444 }
 0x51c   :  { %v1468_v54 = vmul.f32 %v1445_v44, %v11732_v9 }
 0x51e   :  { %v10055_v51 = vpop.eup %10054  ;;  %v1484_v53 = vadd.f32 1e-05, %v1468_v54 }
 0x51f   :  { %v1563_v14 = vmul.f32 %v10055_v51, %v1483_v11  ;;  %vm1569_vm6 = vweird.f32 %v10055_v51 }
 0x520   :  { %10056 = vrsqrt.f32 %v1484_v53  ;;  %vm1570_vm8 = vmor %vm1568_vm7, %vm1569_vm6  ;;  %vm1578_vm10 = vweird.f32 %v1484_v53 }
 0x521   :  { %v1564_v34 = vmul.f32 %v10055_v51, %v1563_v14 }
 0x523   :  { %v1565_v27 = vmul.f32 0.5, %v1564_v34  ;;  %v1372_v49 = vpop.xlane.xlu2 %1371  ;;  %v1447_v26 = vpop.xlane.xlu0 %1446 }
 0x524   :  { %v1395_v10 = vmul.f32 %v11732_v9, %v1372_v49  ;;  %v1469_v19 = vmul.f32 %v1447_v26, %v11732_v9 }
 0x525   :  { %v1566_v40 = vsub.f32 1.5, %v1565_v27 }
 0x526   :  { %v10057_v7 = vpop.eup %10056  ;;  %v1485_v2 = vadd.f32 1e-05, %v1469_v19  ;;  %v12055_v42 = vsub.f32 %v11971_v21, %v1395_v10 }
 0x527   :  { %v1567_v16 = vmul.f32 %v10055_v51, %v1566_v40  ;;  %v1573_v38 = vmul.f32 %v10057_v7, %v1484_v53  ;;  %vm1579_vm9 = vweird.f32 %v10057_v7 }
 0x528   :  { %10058 = vrsqrt.f32 %v1485_v2  ;;  %v1427_v41 = vmul.f32 %v12055_v42, %v12055_v42  ;;  %vm1580_vm11 = vmor %vm1578_vm10, %vm1579_vm9  ;;  %vm1588_vm13 = vweird.f32 %v1485_v2 }
 0x529   :  { %v1571_v56 = vsel %vm1570_vm8, %v10055_v51, %v1567_v16  ;;  %v1574_v45 = vmul.f32 %v10057_v7, %v1573_v38 }
 0x52a   :  { %1458 = vadd.xlane.f32.xlu2 %v1427_v41  ;;  %v1659_v59 = vmul.f32 %v1571_v56, %v11932_v24 }
 0x52b   :  { %v1575_v31 = vmul.f32 0.5, %v1574_v45 }
 0x52c   :  { %v1449_v21 = vpop.xlane.xlu0 %1448  ;;  %v1676_v12 = vmul.f32 %v11960_v0, %v1659_v59 }
 0x52d   :  { %v1576_v35 = vsub.f32 1.5, %v1575_v31  ;;  %v1470_v32 = vmul.f32 %v1449_v21, %v11732_v9 }
 0x52e   :  { %v10059_v33 = vpop.eup %10058  ;;  %v12068_v15 = vadd.f32 %v11978_v60, %v1676_v12 }
 0x52f   :  { %v1577_v58 = vmul.f32 %v10057_v7, %v1576_v35  ;;  %v1583_v62 = vmul.f32 %v10059_v33, %v1485_v2  ;;  %v1486_v24 = vadd.f32 1e-05, %v1470_v32  ;;  %vm1589_vm12 = vweird.f32 %v10059_v33 }
 0x530   :  { %v1721_v13 = vpack.c.bf16 %v12068_v15, %v12065_v5  ;;  %vm1590_vm14 = vmor %vm1588_vm13, %vm1589_vm12 }
 0x531   :  { %v1584_v50 = vmul.f32 %v10059_v33, %v1583_v62  ;;  %10060 = vrsqrt.f32 %v1486_v24  ;;  %v1581_v43 = vsel %vm1580_vm11, %v10057_v7, %v1577_v58  ;;  %vm1598_vm0 = vweird.f32 %v1486_v24 }
 0x532   :  { %1835 = vmatmul.bf16.gmra.mxu2 %v1721_v13  ;;  %1884 = vmatmul.bf16.gmra.mxu3 %v1721_v13  ;;  %v1660_v22 = vmul.f32 %v1581_v43, %v11941_v18  ;;  %v1726_v18 = vld [vmem:[%s16086_s12] sm:$0x3] }
 0x533   :  { %v1585_v8 = vmul.f32 0.5, %v1584_v50  ;;  %v1451_v63 = vpop.xlane.xlu1 %1450  ;;  %v12087_v46 = vperm.slane %v1726_v18, 0  ;;  %v12089_v16 = vperm.slane %v1726_v18, 1 }
 0x534   :  { %v1471_v28 = vmul.f32 %v1451_v63, %v11732_v9  ;;  %v1677_v53 = vmul.f32 %v11960_v0, %v1660_v22 }
 0x535   :  { %v1586_v11 = vsub.f32 1.5, %v1585_v8 }
 0x536   :  { %v1487_v30 = vadd.f32 1e-05, %v1471_v28  ;;  %v12082_v19 = vadd.f32 %v11978_v60, %v1677_v53 }
 0x537   :  { %v10061_v57 = vpop.eup %10060  ;;  %v1587_v17 = vmul.f32 %v10059_v33, %v1586_v11 }
 0x538   :  { %v1593_v44 = vmul.f32 %v10061_v57, %v1486_v24  ;;  %10062 = vrsqrt.f32 %v1487_v30  ;;  %vm1599_vm15 = vweird.f32 %v10061_v57  ;;  %vm1608_vm3 = vweird.f32 %v1487_v30 }
 0x539   :  { %v1591_v54 = vsel %vm1590_vm14, %v10059_v33, %v1587_v17  ;;  %vm12093_vm1 = vmor %vm1598_vm0, %vm1599_vm15 }
 0x53a   :  { %v1594_v37 = vmul.f32 %v10061_v57, %v1593_v44  ;;  %v1661_v51 = vmul.f32 %v1591_v54, %v11964_v23 }
 0x53b   :  { %v1821_v4 = vpop.f32.mrf.mxu2  ;;  %v1870_v14 = vpop.f32.mrf.mxu3 }
 0x53c   :  { %v1595_v34 = vmul.f32 0.5, %v1594_v37  ;;  %v1453_v6 = vpop.xlane.xlu2 %1452  ;;  %v1678_v27 = vmul.f32 %v11960_v0, %v1661_v51  ;;  %v1822_v21 = vadd.f32 %v1821_v4, %v12087_v46  ;;  %v1871_v12 = vadd.f32 %v1870_v14, %v12089_v16 }
 0x53d   :  { %v1472_v49 = vmul.f32 %v1453_v6, %v11732_v9 }
 0x53e   :  { %v10063_v26 = vpop.eup %10062  ;;  %v1596_v10 = vsub.f32 1.5, %v1595_v34  ;;  %v12085_v23 = vadd.f32 %v11978_v60, %v1678_v27 }
 0x53f   :  { %v1603_v40 = vmul.f32 %v10063_v26, %v1487_v30  ;;  %v1488_v7 = vadd.f32 1e-05, %v1472_v49  ;;  %vm1609_vm2 = vweird.f32 %v10063_v26 }
 0x540   :  { %v1597_v2 = vmul.f32 %v10061_v57, %v1596_v10  ;;  %v1722_v38 = vpack.c.bf16 %v12085_v23, %v12082_v19  ;;  %vm1610_vm4 = vmor %vm1608_vm3, %vm1609_vm2  ;;  %vm2425_vm2 = vcmask 1043456  }
 0x541   :  { %v1604_v41 = vmul.f32 %v10063_v26, %v1603_v40  ;;  %10064 = vrsqrt.f32 %v1488_v7  ;;  %vm1618_vm6 = vweird.f32 %v1488_v7 }
 0x542   :  { %1840 = vmatmul.bf16.gmra.mxu2 %v1722_v38  ;;  %1889 = vmatmul.bf16.gmra.mxu3 %v1722_v38  ;;  %v1601_v45 = vsel %vm12093_vm1, %v10061_v57, %v1597_v2  ;;  %vm1968_vm1 = vcmask 64512  }
 0x543   :  { %v1605_v59 = vmul.f32 0.5, %v1604_v41  ;;  %v1823_v48 = vpop.f32.mrf.mxu2  ;;  %v1872_v31 = vpop.f32.mrf.mxu3  ;;  %v1662_v50 = vmul.f32 %v1601_v45, %v11990_v25 }
 0x544   :  { %v1824_v35 = vadd.f32 %v1823_v48, %v12087_v46  ;;  %v1873_v32 = vadd.f32 %v1872_v31, %v12089_v16  ;;  %v1455_v33 = vpop.xlane.xlu0 %1454 }
 0x545   :  { %v1606_v58 = vsub.f32 1.5, %v1605_v59  ;;  %v1473_v62 = vmul.f32 %v1455_v33, %v11732_v9  ;;  %v1679_v17 = vmul.f32 %v11960_v0, %v1662_v50 }
 0x546   :  { %v1911_v24 = vpack.c.bf16 %v1824_v35, %v1822_v21  ;;  %v2154_v13 = vpack.c.bf16 %v1873_v32, %v1871_v12 }
 0x547   :  { %v10065_v43 = vpop.eup %10064  ;;  %v1607_v8 = vmul.f32 %v10063_v26, %v1606_v58  ;;  %v1489_v63 = vadd.f32 1e-05, %v1473_v62  ;;  %v12109_v30 = vadd.f32 %v11978_v60, %v1679_v17 }
 0x548   :  { %v1613_v28 = vmul.f32 %v10065_v43, %v1488_v7  ;;  %1927 = vmatmul.bf16.vlgmr.msrb.gmra.mxu0 %v1911_v24  ;;  %2174 = vmatmul.bf16.vlgmr.msra.gmra.mxu1 %v2154_v13  ;;  %vm1619_vm5 = vweird.f32 %v10065_v43 }
 0x549   :  { %v1611_v11 = vsel %vm1610_vm4, %v10063_v26, %v1607_v8  ;;  %10066 = vrsqrt.f32 %v1489_v63  ;;  %vm1620_vm7 = vmor %vm1618_vm6, %vm1619_vm5  ;;  %vm1628_vm9 = vweird.f32 %v1489_v63 }
 0x54a   :  { %v1614_v22 = vmul.f32 %v10065_v43, %v1613_v28  ;;  %v1663_v57 = vmul.f32 %v1611_v11, %v12000_v36 }
 0x54b   :  { %v1826_v44 = vpop.f32.mrf.mxu2  ;;  %v1875_v54 = vpop.f32.mrf.mxu3 }
 0x54c   :  { %v1615_v37 = vmul.f32 0.5, %v1614_v22  ;;  %v1680_v25 = vmul.f32 %v11960_v0, %v1663_v57  ;;  %v1827_v27 = vadd.f32 %v1826_v44, %v12087_v46  ;;  %v1876_v18 = vadd.f32 %v1875_v54, %v12089_v16  ;;  %v1457_v28 = vpop.xlane.xlu1 %1456 }
 0x54d   :  { %v1474_v11 = vmul.f32 %v1457_v28, %v11732_v9 }
 0x54e   :  { %v1616_v51 = vsub.f32 1.5, %v1615_v37  ;;  %v12112_v53 = vadd.f32 %v11978_v60, %v1680_v25 }
 0x54f   :  { %v10067_v4 = vpop.eup %10066  ;;  %v1490_v22 = vadd.f32 1e-05, %v1474_v11 }
 0x550   :  { %v1617_v14 = vmul.f32 %v10065_v43, %v1616_v51  ;;  %v1623_v34 = vmul.f32 %v10067_v4, %v1489_v63  ;;  %v1723_v36 = vpack.c.bf16 %v12112_v53, %v12109_v30  ;;  %vm1629_vm8 = vweird.f32 %v10067_v4 }
 0x551   :  { %vm1630_vm10 = vmor %vm1628_vm9, %vm1629_vm8  ;;  %10068 = vrsqrt.f32 %v1490_v22  ;;  %vm1638_vm12 = vweird.f32 %v1490_v22 }
 0x552   :  { %v1624_v6 = vmul.f32 %v10067_v4, %v1623_v34  ;;  %1845 = vmatmul.bf16.gmra.mxu2 %v1723_v36  ;;  %1894 = vmatmul.bf16.gmra.mxu3 %v1723_v36  ;;  %v1621_v10 = vsel %vm1620_vm7, %v10065_v43, %v1617_v14 }
 0x553   :  { %v1828_v49 = vpop.f32.mrf.mxu2  ;;  %v1877_v26 = vpop.f32.mrf.mxu3  ;;  %v1664_v45 = vmul.f32 %v1621_v10, %v12016_v1 }
 0x554   :  { %v1625_v40 = vmul.f32 0.5, %v1624_v6  ;;  %v1829_v2 = vadd.f32 %v1828_v49, %v12087_v46  ;;  %v1878_v38 = vadd.f32 %v1877_v26, %v12089_v16 }
 0x555   :  { %v1681_v35 = vmul.f32 %v11960_v0, %v1664_v45 }
 0x556   :  { %v1626_v41 = vsub.f32 1.5, %v1625_v40  ;;  %v1912_v56 = vpack.c.bf16 %v1829_v2, %v1827_v27  ;;  %v2155_v7 = vpack.c.bf16 %v1878_v38, %v1876_v18 }
 0x557   :  { %v12125_v33 = vadd.f32 %v11978_v60, %v1681_v35  ;;  %v10069_v57 = vpop.eup %10068 }
 0x558   :  { %v1627_v59 = vmul.f32 %v10067_v4, %v1626_v41  ;;  %1932 = vmatmul.bf16.gmra.mxu0 %v1912_v56  ;;  %2179 = vmatmul.bf16.gmra.mxu1 %v2155_v7  ;;  %v1633_v17 = vmul.f32 %v10069_v57, %v1490_v22  ;;  %vm1639_vm11 = vweird.f32 %v10069_v57 }
 0x559   :  { %vm1640_vm13 = vmor %vm1638_vm12, %vm1639_vm11 }
 0x55a   :  { %v1631_v48 = vsel %vm1630_vm10, %v10067_v4, %v1627_v59  ;;  %v1634_v44 = vmul.f32 %v10069_v57, %v1633_v17 }
 0x55b   :  { %v1831_v31 = vpop.f32.mrf.mxu2  ;;  %v1880_v21 = vpop.f32.mrf.mxu3  ;;  %v1665_v12 = vmul.f32 %v1631_v48, %v12024_v52 }
 0x55c   :  { %v1832_v13 = vadd.f32 %v1831_v31, %v12087_v46  ;;  %v1881_v52 = vadd.f32 %v1880_v21, %v12089_v16  ;;  %v1635_v51 = vmul.f32 0.5, %v1634_v44 }
 0x55d   :  { %v1682_v32 = vmul.f32 %v11960_v0, %v1665_v12 }
 0x55e   :  { %v1636_v4 = vsub.f32 1.5, %v1635_v51 }
 0x55f   :  { %v12128_v58 = vadd.f32 %v11978_v60, %v1682_v32 }
 0x560   :  { %v1637_v34 = vmul.f32 %v10069_v57, %v1636_v4 }
 0x561   :  { %v1724_v1 = vpack.c.bf16 %v12128_v58, %v12125_v33 }
 0x562   :  { %v1641_v27 = vsel %vm1640_vm13, %v10069_v57, %v1637_v34 }
 0x563   :  { %1850 = vmatmul.bf16.gmra.mxu2 %v1724_v1  ;;  %1899 = vmatmul.bf16.gmra.mxu3 %v1724_v1  ;;  %v1833_v62 = vpop.f32.mrf.mxu2  ;;  %v1882_v24 = vpop.f32.mrf.mxu3  ;;  %v1666_v26 = vmul.f32 %v1641_v27, %v12040_v20 }
 0x564   :  { %v1834_v50 = vadd.f32 %v1833_v62, %v12087_v46  ;;  %v1883_v43 = vadd.f32 %v1882_v24, %v12089_v16 }
 0x565   :  { %v1683_v38 = vmul.f32 %v11960_v0, %v1666_v26 }
 0x566   :  { %v1913_v8 = vpack.c.bf16 %v1834_v50, %v1832_v13  ;;  %v2156_v63 = vpack.c.bf16 %v1883_v43, %v1881_v52 }
 0x567   :  { %v12143_v45 = vadd.f32 %v11978_v60, %v1683_v38 }
 0x568   :  { %1937 = vmatmul.bf16.gmra.mxu0 %v1913_v8  ;;  %2184 = vmatmul.bf16.gmra.mxu1 %v2156_v63  ;;  %v105_v63 = vld [vmem:[%s16087_s2 + $0x8] sm:$0xff] }
 0x59d   :  { %v1459_v54 = vpop.xlane.xlu2 %1458 }
 0x59e   :  { %v1475_v37 = vmul.f32 %v1459_v54, %v11732_v9 }
 0x5a0   :  { %v1491_v25 = vadd.f32 1e-05, %v1475_v37 }
 0x5a2   :  { %10070 = vrsqrt.f32 %v1491_v25  ;;  %vm1648_vm15 = vweird.f32 %v1491_v25 }
 0x5a8   :  { %v10071_v14 = vpop.eup %10070 }
 0x5a9   :  { %v1643_v36 = vmul.f32 %v10071_v14, %v1491_v25  ;;  %vm1649_vm14 = vweird.f32 %v10071_v14 }
 0x5aa   :  { %vm1650_vm0 = vmor %vm1648_vm15, %vm1649_vm14 }
 0x5ab   :  { %v1644_v6 = vmul.f32 %v10071_v14, %v1643_v36 }
 0x5ad   :  { %v1645_v18 = vmul.f32 0.5, %v1644_v6  ;;  %v106_v6 = vld [vmem:[%s16087_s2 + $0x10] sm:$0xff] }
 0x5af   :  { %v1646_v49 = vsub.f32 1.5, %v1645_v18 }
 0x5b1   :  { %v1647_v10 = vmul.f32 %v10071_v14, %v1646_v49 }
 0x5b3   :  { %v1651_v40 = vsel %vm1650_vm0, %v10071_v14, %v1647_v10 }
 0x5b4   :  { %v1667_v2 = vmul.f32 %v1651_v40, %v12055_v42 }
 0x5b5   :  { %v1836_v41 = vpop.f32.mrf.mxu2  ;;  %v1885_v56 = vpop.f32.mrf.mxu3 }
 0x5b6   :  { %v1684_v7 = vmul.f32 %v11960_v0, %v1667_v2  ;;  %v1837_v42 = vadd.f32 %v1836_v41, %v12087_v46  ;;  %v1886_v21 = vadd.f32 %v1885_v56, %v12089_v16  ;;  %v107_v41 = vld [vmem:[%s16087_s2 + $0x18] sm:$0xff] }
 0x5b8   :  { %v12146_v59 = vadd.f32 %v11978_v60, %v1684_v7  ;;  %v104_v60 = vld [vmem:[%s16087_s2] sm:$0xff] }
 0x5ba   :  { %v1725_v20 = vpack.c.bf16 %v12146_v59, %v12143_v45 }
 0x5bc   :  { %1855 = vmatmul.bf16.gmra.mxu2 %v1725_v20  ;;  %1904 = vmatmul.bf16.gmra.mxu3 %v1725_v20 }
 0x5bd   :  { %v1838_v48 = vpop.f32.mrf.mxu2  ;;  %v1887_v31 = vpop.f32.mrf.mxu3 }
 0x5be   :  { %v1839_v12 = vadd.f32 %v1838_v48, %v12087_v46  ;;  %v1888_v0 = vadd.f32 %v1887_v31, %v12089_v16 }
 0x5c0   :  { %v1914_v35 = vpack.c.bf16 %v1839_v12, %v1837_v42  ;;  %v2157_v32 = vpack.c.bf16 %v1888_v0, %v1886_v21 }
 0x5c2   :  { %1942 = vmatmul.bf16.gmra.mxu0 %v1914_v35  ;;  %2189 = vmatmul.bf16.gmra.mxu1 %v2157_v32 }
 0x5c5   :  { %v1841_v1 = vpop.f32.mrf.mxu2  ;;  %v1890_v62 = vpop.f32.mrf.mxu3 }
 0x5c6   :  { %v1928_v24 = vpop.f32.mrf.mxu0  ;;  %v2175_v13 = vpop.f32.mrf.mxu1  ;;  %v1842_v22 = vadd.f32 %v1841_v1, %v12087_v46  ;;  %v1891_v57 = vadd.f32 %v1890_v62, %v12089_v16 }
 0x5c7   :  { %v12157_v52 = vadd.f32 %v1928_v24, %v104_v60  ;;  %v12159_v50 = vadd.f32 %v2175_v13, %v104_v60  ;;  %v108_v24 = vld [vmem:[%s16087_s2 + $0x20] sm:$0xff] }
 0x5c9   :  { %v1969_v43 = vsel %vm1968_vm1, %v12157_v52, -inf  ;;  %v2215_v8 = vsel %vm1968_vm1, %v12159_v50, -inf }
 0x5ca   :  { %1970 = vmax.xlane.f32.xlu0 %v1969_v43  ;;  %2216 = vmax.xlane.f32.xlu2 %v2215_v8 }
 0x5cd   :  { %v1843_v28 = vpop.f32.mrf.mxu2  ;;  %v1892_v11 = vpop.f32.mrf.mxu3 }
 0x5ce   :  { %v1844_v17 = vadd.f32 %v1843_v28, %v12087_v46  ;;  %v1893_v44 = vadd.f32 %v1892_v11, %v12089_v16  ;;  %v1930_v54 = vpop.f32.mrf.mxu0  ;;  %v2177_v37 = vpop.f32.mrf.mxu1 }
 0x5cf   :  { %v12172_v25 = vadd.f32 %v1930_v54, %v105_v63  ;;  %v12174_v51 = vadd.f32 %v2177_v37, %v105_v63 }
 0x5d0   :  { %v1915_v4 = vpack.c.bf16 %v1844_v17, %v1842_v22  ;;  %v2158_v14 = vpack.c.bf16 %v1893_v44, %v1891_v57  ;;  %v109_v17 = vld [vmem:[%s16087_s2 + $0x28] sm:$0xff] }
 0x5d1   :  { %v2218_v34 = vsel %vm1968_vm1, %v12174_v51, -inf  ;;  %v1972_v36 = vsel %vm1968_vm1, %v12172_v25, -inf }
 0x5d2   :  { %2219 = vmax.xlane.f32.xlu0 %v2218_v34  ;;  %1973 = vmax.xlane.f32.xlu1 %v1972_v36 }
 0x5d3   :  { %1947 = vmatmul.bf16.gmra.mxu0 %v1915_v4  ;;  %2194 = vmatmul.bf16.gmra.mxu1 %v2158_v14 }
 0x5d5   :  { %v1846_v27 = vpop.f32.mrf.mxu2  ;;  %v1895_v18 = vpop.f32.mrf.mxu3 }
 0x5d6   :  { %v1933_v49 = vpop.f32.mrf.mxu0  ;;  %v2180_v26 = vpop.f32.mrf.mxu1  ;;  %v1847_v20 = vadd.f32 %v1846_v27, %v12087_v46  ;;  %v1896_v48 = vadd.f32 %v1895_v18, %v12089_v16 }
 0x5d7   :  { %v12183_v10 = vadd.f32 %v1933_v49, %v106_v6  ;;  %v12185_v40 = vadd.f32 %v2180_v26, %v106_v6 }
 0x5d9   :  { %v2221_v2 = vsel %vm1968_vm1, %v12185_v40, -inf  ;;  %v1975_v38 = vsel %vm1968_vm1, %v12183_v10, -inf }
 0x5da   :  { %2222 = vmax.xlane.f32.xlu0 %v2221_v2  ;;  %1976 = vmax.xlane.f32.xlu1 %v1975_v38 }
 0x5dd   :  { %v1848_v56 = vpop.f32.mrf.mxu2  ;;  %v1897_v7 = vpop.f32.mrf.mxu3 }
 0x5de   :  { %v1849_v31 = vadd.f32 %v1848_v56, %v12087_v46  ;;  %v1898_v42 = vadd.f32 %v1897_v7, %v12089_v16  ;;  %v1935_v21 = vpop.f32.mrf.mxu0  ;;  %v2182_v12 = vpop.f32.mrf.mxu1 }
 0x5df   :  { %v12198_v0 = vadd.f32 %v1935_v21, %v107_v41  ;;  %v12200_v35 = vadd.f32 %v2182_v12, %v107_v41  ;;  %v110_v41 = vld [vmem:[%s16087_s2 + $0x30] sm:$0xff] }
 0x5e0   :  { %v1916_v32 = vpack.c.bf16 %v1849_v31, %v1847_v20  ;;  %v2159_v60 = vpack.c.bf16 %v1898_v42, %v1896_v48 }
 0x5e1   :  { %v2224_v1 = vsel %vm1968_vm1, %v12200_v35, -inf  ;;  %v1978_v62 = vsel %vm1968_vm1, %v12198_v0, -inf }
 0x5e2   :  { %2225 = vmax.xlane.f32.xlu1 %v2224_v1  ;;  %1979 = vmax.xlane.f32.xlu2 %v1978_v62 }
 0x5e3   :  { %1952 = vmatmul.bf16.gmra.mxu0 %v1916_v32  ;;  %2199 = vmatmul.bf16.gmra.mxu1 %v2159_v60  ;;  %v111_v32 = vld [vmem:[%s16087_s2 + $0x38] sm:$0xff] }
 0x5e6   :  { %v1851_v13 = vpop.f32.mrf.mxu2  ;;  %v1900_v43 = vpop.f32.mrf.mxu3 }
 0x5e7   :  { %v1938_v8 = vpop.f32.mrf.mxu0  ;;  %v2185_v63 = vpop.f32.mrf.mxu1  ;;  %v1852_v37 = vadd.f32 %v1851_v13, %v12087_v46  ;;  %v1901_v4 = vadd.f32 %v1900_v43, %v12089_v16 }
 0x5e8   :  { %v12209_v28 = vadd.f32 %v1938_v8, %v108_v24  ;;  %v12211_v11 = vadd.f32 %v2185_v63, %v108_v24 }
 0x5ea   :  { %v2227_v22 = vsel %vm1968_vm1, %v12211_v11, -inf  ;;  %v1981_v57 = vsel %vm1968_vm1, %v12209_v28, -inf }
 0x5eb   :  { %2228 = vmax.xlane.f32.xlu1 %v2227_v22  ;;  %1982 = vmax.xlane.f32.xlu2 %v1981_v57 }
 0x5ee   :  { %v1853_v44 = vpop.f32.mrf.mxu2  ;;  %v1902_v54 = vpop.f32.mrf.mxu3 }
 0x5ef   :  { %v1854_v14 = vadd.f32 %v1853_v44, %v12087_v46  ;;  %v1903_v34 = vadd.f32 %v1902_v54, %v12089_v16  ;;  %v1940_v36 = vpop.f32.mrf.mxu0  ;;  %v2187_v6 = vpop.f32.mrf.mxu1 }
 0x5f0   :  { %v12224_v27 = vadd.f32 %v1940_v36, %v109_v17  ;;  %v12226_v18 = vadd.f32 %v2187_v6, %v109_v17 }
 0x5f1   :  { %v1917_v49 = vpack.c.bf16 %v1854_v14, %v1852_v37  ;;  %v2160_v26 = vpack.c.bf16 %v1903_v34, %v1901_v4 }
 0x5f2   :  { %v1984_v2 = vsel %vm1968_vm1, %v12224_v27, -inf  ;;  %v2230_v38 = vsel %vm1968_vm1, %v12226_v18, -inf }
 0x5f3   :  { %1985 = vmax.xlane.f32.xlu0 %v1984_v2  ;;  %2231 = vmax.xlane.f32.xlu2 %v2230_v38 }
 0x5f4   :  { %1957 = vmatmul.bf16.gmra.mxu0 %v1917_v49  ;;  %2204 = vmatmul.bf16.gmra.mxu1 %v2160_v26  ;;  %v113_v26 = vld [vmem:[%s16087_s2 + $0x48] sm:$0xff] }
 0x63d   :  { %v1971_v36 = vpop.xlane.xlu0 %1970  ;;  %v2217_v2 = vpop.xlane.xlu2 %2216 }
 0x63f   :  { %v1856_v56 = vpop.f32.mrf.mxu2  ;;  %v1905_v7 = vpop.f32.mrf.mxu3 }
 0x640   :  { %v1943_v20 = vpop.f32.mrf.mxu0  ;;  %v2190_v48 = vpop.f32.mrf.mxu1  ;;  %v1857_v62 = vadd.f32 %v1856_v56, %v12087_v46  ;;  %v1906_v24 = vadd.f32 %v1905_v7, %v12089_v16 }
 0x641   :  { %v12235_v31 = vadd.f32 %v1943_v20, %v110_v41  ;;  %v12237_v42 = vadd.f32 %v2190_v48, %v110_v41  ;;  %v2263_v20 = vsub.f32 %v12159_v50, %v2217_v2  ;;  %v2017_v48 = vsub.f32 %v12157_v52, %v1971_v36 }
 0x643   :  { %v1987_v21 = vsel %vm1968_vm1, %v12235_v31, -inf  ;;  %v2233_v12 = vsel %vm1968_vm1, %v12237_v42, -inf }
 0x644   :  { %1988 = vmax.xlane.f32.xlu0 %v1987_v21  ;;  %2234 = vmax.xlane.f32.xlu2 %v2233_v12 }
 0x645   :  { %v1974_v21 = vpop.xlane.xlu1 %1973 }
 0x647   :  { %v1858_v60 = vpop.f32.mrf.mxu2  ;;  %v1907_v1 = vpop.f32.mrf.mxu3 }
 0x648   :  { %v1859_v13 = vadd.f32 %v1858_v60, %v12087_v46  ;;  %v1908_v43 = vadd.f32 %v1907_v1, %v12089_v16  ;;  %v1945_v8 = vpop.f32.mrf.mxu0  ;;  %v2192_v63 = vpop.f32.mrf.mxu1  ;;  %v112_v46 = vld [vmem:[%s16087_s2 + $0x40] sm:$0xff]  ;;  %v2279_v1 = vmul.f32 1.442695, %v2263_v20 }
 0x649   :  { %v12250_v22 = vadd.f32 %v1945_v8, %v111_v32  ;;  %v12252_v57 = vadd.f32 %v2192_v63, %v111_v32  ;;  %v2220_v60 = vpop.xlane.xlu0 %2219  ;;  %v2018_v8 = vsub.f32 %v12172_v25, %v1974_v21 }
 0x64a   :  { %v1918_v17 = vpack.c.bf16 %v1859_v13, %v1857_v62  ;;  %v2161_v44 = vpack.c.bf16 %v1908_v43, %v1906_v24  ;;  %v114_v62 = vld [vmem:[%s16087_s2 + $0x50] sm:$0xff]  ;;  %v2033_v24 = vmul.f32 1.442695, %v2017_v48  ;;  %10072 = vpow2.f32 %v2279_v1 }
 0x64b   :  { %v2236_v54 = vsel %vm1968_vm1, %v12252_v57, -inf  ;;  %v1990_v37 = vsel %vm1968_vm1, %v12250_v22, -inf  ;;  %v2264_v63 = vsub.f32 %v12174_v51, %v2220_v60 }
 0x64c   :  { %2237 = vmax.xlane.f32.xlu0 %v2236_v54  ;;  %1991 = vmax.xlane.f32.xlu1 %v1990_v37  ;;  %10074 = vpow2.f32 %v2033_v24  ;;  %v2035_v37 = vmul.f32 1.442695, %v2018_v8 }
 0x64d   :  { %1962 = vmatmul.bf16.gmra.mxu0 %v1918_v17  ;;  %2209 = vmatmul.bf16.gmra.mxu1 %v2161_v44  ;;  %v1977_v54 = vpop.xlane.xlu1 %1976 }
 0x64e   :  { %10076 = vpow2.f32 %v2035_v37 }
 0x650   :  { %v1948_v16 = vpop.f32.mrf.mxu0  ;;  %v2195_v4 = vpop.f32.mrf.mxu1 }
 0x651   :  { %v12261_v14 = vadd.f32 %v1948_v16, %v112_v46  ;;  %v12263_v34 = vadd.f32 %v2195_v4, %v112_v46  ;;  %v115_v46 = vld [vmem:[%s16087_s2 + $0x58] sm:$0xff]  ;;  %v2281_v16 = vmul.f32 1.442695, %v2264_v63  ;;  %v2223_v4 = vpop.xlane.xlu0 %2222  ;;  %v12298_v25 = vpop.eup %10072 }
 0x652   :  { %v12300_v51 = vpop.eup %10074 }
 0x653   :  { %v2239_v6 = vsel %vm1968_vm1, %v12263_v34, -inf  ;;  %v1993_v49 = vsel %vm1968_vm1, %v12261_v14, -inf  ;;  %10078 = vpow2.f32 %v2281_v16  ;;  %v2065_v20 = vsel %vm1968_vm1, %v12300_v51, 0.0 }
 0x654   :  { %2240 = vmax.xlane.f32.xlu1 %v2239_v6  ;;  %1994 = vmax.xlane.f32.xlu2 %v1993_v49  ;;  %v2265_v49 = vsub.f32 %v12185_v40, %v2223_v4  ;;  %v12315_v40 = vpop.eup %10076 }
 0x655   :  { %v1980_v2 = vpop.xlane.xlu2 %1979 }
 0x656   :  { %v2283_v48 = vmul.f32 1.442695, %v2265_v49 }
 0x658   :  { %v1950_v38 = vpop.f32.mrf.mxu0  ;;  %v2197_v41 = vpop.f32.mrf.mxu1  ;;  %10080 = vpow2.f32 %v2283_v48 }
 0x659   :  { %v12272_v56 = vadd.f32 %v1950_v38, %v113_v26  ;;  %v12274_v7 = vadd.f32 %v2197_v41, %v113_v26  ;;  %v2019_v26 = vsub.f32 %v12183_v10, %v1977_v54  ;;  %v2311_v38 = vsel %vm1968_vm1, %v12298_v25, 0.0  ;;  %v116_v10 = vld [vmem:[%s16087_s2 + $0x60] sm:$0xff] }
 0x65b   :  { %v1996_v12 = vsel %vm1968_vm1, %v12272_v56, -inf  ;;  %v2242_v32 = vsel %vm1968_vm1, %v12274_v7, -inf  ;;  %v2037_v21 = vmul.f32 1.442695, %v2019_v26 }
 0x65c   :  { %1997 = vmax.xlane.f32.xlu0 %v1996_v12  ;;  %2243 = vmax.xlane.f32.xlu2 %v2242_v32  ;;  %v2226_v12 = vpop.xlane.xlu1 %2225  ;;  %v12317_v32 = vpop.eup %10078 }
 0x65d   :  { %10082 = vpow2.f32 %v2037_v21  ;;  %v2314_v63 = vsel %vm1968_vm1, %v12317_v32, 0.0 }
 0x65e   :  { %v12337_v4 = vpop.eup %10080 }
 0x660   :  { %v1953_v13 = vpop.f32.mrf.mxu0  ;;  %v2200_v50 = vpop.f32.mrf.mxu1 }
 0x661   :  { %v12285_v43 = vadd.f32 %v1953_v13, %v114_v62  ;;  %v12287_v52 = vadd.f32 %v2200_v50, %v114_v62  ;;  %v2266_v62 = vsub.f32 %v12200_v35, %v2226_v12  ;;  %v2020_v13 = vsub.f32 %v12198_v0, %v1980_v2  ;;  %v8601_v35 = vld [vmem:[%s16088_s4 + $0x4] sm:$0xf]  ;;  %v2145_v0 = vld [vmem:[%s16088_s4] sm:$0xf] }
 0x662   :  { %v2068_v50 = vsel %vm1968_vm1, %v12315_v40, 0.0  ;;  %v2427_v54 = vsel %vm2425_vm2, %v8601_v35, 0  ;;  %v2503_v37 = vsel %vm2425_vm2, %v2145_v0, 0 }
 0x663   :  { %v2245_v17 = vsel %vm1968_vm1, %v12287_v52, -inf  ;;  %v1999_v44 = vsel %vm1968_vm1, %v12285_v43, -inf  ;;  %v2039_v16 = vmul.f32 1.442695, %v2020_v13  ;;  %2436 = vmatpush.bf16.msra.mxu2 %v2427_v54  ;;  %2512 = vmatpush.bf16.msrb.mxu3 %v2503_v37  ;;  %v12341_v49 = vpop.eup %10082 }
 0x664   :  { %2246 = vmax.xlane.f32.xlu0 %v2245_v17  ;;  %2000 = vmax.xlane.f32.xlu1 %v1999_v44  ;;  %v1983_v17 = vpop.xlane.xlu2 %1982  ;;  %v2285_v44 = vmul.f32 1.442695, %v2266_v62 }
 0x665   :  { %v2021_v26 = vsub.f32 %v12209_v28, %v1983_v17 }
 0x666   :  { %10084 = vpow2.f32 %v2285_v44 }
 0x667   :  { %10086 = vpow2.f32 %v2039_v16  ;;  %v2041_v48 = vmul.f32 1.442695, %v2021_v26 }
 0x668   :  { %v1955_v36 = vpop.f32.mrf.mxu0  ;;  %v2202_v60 = vpop.f32.mrf.mxu1 }
 0x669   :  { %v12302_v6 = vadd.f32 %v1955_v36, %v115_v46  ;;  %v12339_v36 = vadd.f32 %v2202_v60, %v115_v46  ;;  %v2229_v46 = vpop.xlane.xlu1 %2228  ;;  %v1986_v60 = vpop.xlane.xlu0 %1985  ;;  %10088 = vpow2.f32 %v2041_v48 }
 0x66a   :  { %v2267_v62 = vsub.f32 %v12211_v11, %v2229_v46  ;;  %v117_v11 = vld [vmem:[%s16087_s2 + $0x68] sm:$0xff] }
 0x66b   :  { %v2002_v41 = vsel %vm1968_vm1, %v12302_v6, -inf }
 0x66c   :  { %2312 = vadd.xlane.f32.xlu0 %v2311_v38  ;;  %2003 = vmax.xlane.f32.xlu2 %v2002_v41  ;;  %v2317_v38 = vsel %vm1968_vm1, %v12337_v4, 0.0  ;;  %v2071_v41 = vsel %vm1968_vm1, %v12341_v49, 0.0  ;;  %v2232_v21 = vpop.xlane.xlu2 %2231  ;;  %v12352_v28 = vpop.eup %10084  ;;  %v2287_v17 = vmul.f32 1.442695, %v2267_v62 }
 0x66d   :  { %2066 = vadd.xlane.f32.xlu1 %v2065_v20  ;;  %v2248_v20 = vsel %vm1968_vm1, %v12339_v36, -inf  ;;  %v2268_v13 = vsub.f32 %v12226_v18, %v2232_v21 }
 0x66e   :  { %10090 = vpow2.f32 %v2287_v17 }
 0x671   :  { %v1958_v1 = vpop.f32.mrf.mxu0  ;;  %v2205_v2 = vpop.f32.mrf.mxu1 }
 0x672   :  { %v12320_v24 = vadd.f32 %v1958_v1, %v116_v10  ;;  %v12350_v12 = vadd.f32 %v2205_v2, %v116_v10  ;;  %v12354_v1 = vpop.eup %10086 }
 0x673   :  { %v2074_v10 = vsel %vm1968_vm1, %v12354_v1, 0.0  ;;  %v12368_v44 = vpop.eup %10088 }
 0x674   :  { %2069 = vadd.xlane.f32.xlu2 %v2068_v50  ;;  %v2005_v8 = vsel %vm1968_vm1, %v12320_v24, -inf  ;;  %v2022_v50 = vsub.f32 %v12224_v27, %v1986_v60  ;;  %v2289_v27 = vmul.f32 1.442695, %v2268_v13  ;;  %v2077_v16 = vsel %vm1968_vm1, %v12368_v44, 0.0 }
 0x675   :  { %2006 = vmax.xlane.f32.xlu0 %v2005_v8  ;;  %2315 = vadd.xlane.f32.xlu1 %v2314_v63  ;;  %v2251_v8 = vsel %vm1968_vm1, %v12350_v12, -inf  ;;  %v2320_v63 = vsel %vm1968_vm1, %v12352_v28, 0.0 }
 0x676   :  { %v2043_v18 = vmul.f32 1.442695, %v2022_v50  ;;  %10092 = vpow2.f32 %v2289_v27 }
 0x678   :  { %10094 = vpow2.f32 %v2043_v18 }
 0x679   :  { %v1960_v35 = vpop.f32.mrf.mxu0  ;;  %v2207_v0 = vpop.f32.mrf.mxu1 }
 0x67a   :  { %v12370_v54 = vadd.f32 %v1960_v35, %v117_v11  ;;  %v12372_v37 = vadd.f32 %v2207_v0, %v117_v11 }
 0x67c   :  { %2318 = vadd.xlane.f32.xlu2 %v2317_v38  ;;  %v2254_v26 = vsel %vm1968_vm1, %v12372_v37, -inf  ;;  %v2008_v2 = vsel %vm1968_vm1, %v12370_v54, -inf  ;;  %v12380_v38 = vpop.eup %10090 }
 0x67d   :  { %2072 = vadd.xlane.f32.xlu0 %v2071_v41  ;;  %2249 = vmax.xlane.f32.xlu1 %v2248_v20  ;;  %v12382_v41 = vpop.eup %10092  ;;  %v2323_v48 = vsel %vm1968_vm1, %v12380_v38, 0.0 }
 0x67e   :  { %v12384_v20 = vpop.eup %10094  ;;  %v2326_v46 = vsel %vm1968_vm1, %v12382_v41, 0.0 }
 0x67f   :  { %v2080_v21 = vsel %vm1968_vm1, %v12384_v20, 0.0 }
 0x684   :  { %2252 = vmax.xlane.f32.xlu2 %v2251_v8 }
 0x685   :  { %2321 = vadd.xlane.f32.xlu0 %v2320_v63  ;;  %2075 = vadd.xlane.f32.xlu1 %v2074_v10 }
 0x68c   :  { %2078 = vadd.xlane.f32.xlu2 %v2077_v16 }
 0x68d   :  { %2255 = vmax.xlane.f32.xlu0 %v2254_v26  ;;  %2009 = vmax.xlane.f32.xlu1 %v2008_v2 }
 0x694   :  { %2327 = vadd.xlane.f32.xlu2 %v2326_v46 }
 0x695   :  { %2324 = vadd.xlane.f32.xlu1 %v2323_v48  ;;  %2081 = vadd.xlane.f32.xlu0 %v2080_v21 }
 0x6b7   :  { %v1989_v60 = vpop.xlane.xlu0 %1988  ;;  %v2235_v11 = vpop.xlane.xlu2 %2234 }
 0x6b8   :  { %v2023_v62 = vsub.f32 %v12235_v31, %v1989_v60  ;;  %v118_v31 = vld [vmem:[%s16087_s2 + $0x70] sm:$0xff]  ;;  %v2269_v26 = vsub.f32 %v12237_v42, %v2235_v11  ;;  %v119_v42 = vld [vmem:[%s16087_s2 + $0x78] sm:$0xff] }
 0x6ba   :  { %v2045_v13 = vmul.f32 1.442695, %v2023_v62  ;;  %v2291_v62 = vmul.f32 1.442695, %v2269_v26 }
 0x6bc   :  { %10096 = vpow2.f32 %v2045_v13 }
 0x6bf   :  { %v2238_v50 = vpop.xlane.xlu0 %2237  ;;  %v1992_v63 = vpop.xlane.xlu1 %1991 }
 0x6c0   :  { %v2270_v8 = vsub.f32 %v12252_v57, %v2238_v50  ;;  %v2024_v35 = vsub.f32 %v12250_v22, %v1992_v63 }
 0x6c2   :  { %v2293_v10 = vmul.f32 1.442695, %v2270_v8  ;;  %v12394_v17 = vpop.eup %10096  ;;  %v2047_v27 = vmul.f32 1.442695, %v2024_v35 }
 0x6c3   :  { %v2083_v0 = vsel %vm1968_vm1, %v12394_v17, 0.0 }
 0x6c4   :  { %10098 = vpow2.f32 %v2293_v10  ;;  %2084 = vadd.xlane.f32.xlu1 %v2083_v0 }
 0x6c5   :  { %10100 = vpow2.f32 %v2047_v27 }
 0x6c6   :  { %10102 = vpow2.f32 %v2291_v62 }
 0x6c7   :  { %v1995_v2 = vpop.xlane.xlu2 %1994  ;;  %v2241_v21 = vpop.xlane.xlu1 %2240 }
 0x6c8   :  { %v2271_v63 = vsub.f32 %v12263_v34, %v2241_v21  ;;  %v2025_v35 = vsub.f32 %v12261_v14, %v1995_v2 }
 0x6ca   :  { %v1963_v18 = vpop.f32.mrf.mxu0  ;;  %v12402_v16 = vpop.eup %10098  ;;  %v2049_v14 = vmul.f32 1.442695, %v2025_v35 }
 0x6cb   :  { %v12404_v57 = vadd.f32 %v1963_v18, %v118_v31  ;;  %v2210_v22 = vpop.f32.mrf.mxu1  ;;  %v2332_v46 = vsel %vm1968_vm1, %v12402_v16, 0.0  ;;  %v12417_v8 = vpop.eup %10100  ;;  %v2295_v18 = vmul.f32 1.442695, %v2271_v63 }
 0x6cc   :  { %2333 = vadd.xlane.f32.xlu1 %v2332_v46  ;;  %v12411_v13 = vadd.f32 %v2210_v22, %v118_v31  ;;  %v12432_v21 = vpop.eup %10102 }
 0x6cd   :  { %v2011_v48 = vsel %vm1968_vm1, %v12404_v57, -inf }
 0x6ce   :  { %2012 = vmax.xlane.f32.xlu2 %v2011_v48  ;;  %v2257_v27 = vsel %vm1968_vm1, %v12411_v13, -inf }
 0x6cf   :  { %v1998_v60 = vpop.xlane.xlu0 %1997  ;;  %v2244_v34 = vpop.xlane.xlu2 %2243 }
 0x6d0   :  { %v2026_v50 = vsub.f32 %v12272_v56, %v1998_v60  ;;  %v2086_v56 = vsel %vm1968_vm1, %v12417_v8, 0.0 }
 0x6d2   :  { %v2051_v10 = vmul.f32 1.442695, %v2026_v50  ;;  %v1965_v11 = vpop.f32.mrf.mxu0  ;;  %v2272_v50 = vsub.f32 %v12274_v7, %v2244_v34 }
 0x6d3   :  { %v12421_v0 = vadd.f32 %v1965_v11, %v119_v42  ;;  %v2212_v26 = vpop.f32.mrf.mxu1 }
 0x6d4   :  { %10104 = vpow2.f32 %v2051_v10  ;;  %2258 = vmax.xlane.f32.xlu1 %v2257_v27  ;;  %v12430_v48 = vadd.f32 %v2212_v26, %v119_v42  ;;  %v2297_v42 = vmul.f32 1.442695, %v2272_v50 }
 0x6d5   :  { %v2014_v31 = vsel %vm1968_vm1, %v12421_v0, -inf  ;;  %10106 = vpow2.f32 %v2295_v18 }
 0x6d6   :  { %2087 = vadd.xlane.f32.xlu2 %v2086_v56  ;;  %2015 = vmax.xlane.f32.xlu0 %v2014_v31  ;;  %10108 = vpow2.f32 %v2049_v14  ;;  %v2260_v10 = vsel %vm1968_vm1, %v12430_v48, -inf }
 0x6d7   :  { %v2001_v2 = vpop.xlane.xlu1 %2000  ;;  %v2247_v22 = vpop.xlane.xlu0 %2246 }
 0x6d8   :  { %v2027_v46 = vsub.f32 %v12285_v43, %v2001_v2  ;;  %v2329_v43 = vsel %vm1968_vm1, %v12432_v21, 0.0  ;;  %v2273_v14 = vsub.f32 %v12287_v52, %v2247_v22 }
 0x6da   :  { %v2053_v60 = vmul.f32 1.442695, %v2027_v46  ;;  %v12434_v62 = vpop.eup %10104 }
 0x6db   :  { %v2092_v63 = vsel %vm1968_vm1, %v12434_v62, 0.0  ;;  %v12443_v27 = vpop.eup %10106 }
 0x6dc   :  { %10110 = vpow2.f32 %v2053_v60  ;;  %2093 = vadd.xlane.f32.xlu1 %v2092_v63  ;;  %v12446_v31 = vpop.eup %10108  ;;  %v2335_v2 = vsel %vm1968_vm1, %v12443_v27, 0.0  ;;  %v2299_v60 = vmul.f32 1.442695, %v2273_v14 }
 0x6dd   :  { %10112 = vpow2.f32 %v2297_v42 }
 0x6de   :  { %2261 = vmax.xlane.f32.xlu2 %v2260_v10  ;;  %2330 = vadd.xlane.f32.xlu0 %v2329_v43 }
 0x6df   :  { %v2004_v11 = vpop.xlane.xlu2 %2003  ;;  %v2313_v35 = vpop.xlane.xlu0 %2312 }
 0x6e0   :  { %v2028_v7 = vsub.f32 %v12302_v6, %v2004_v11  ;;  %v2067_v56 = vpop.xlane.xlu1 %2066  ;;  %v2089_v6 = vsel %vm1968_vm1, %v12446_v31, 0.0 }
 0x6e2   :  { %v12448_v18 = vpop.eup %10110  ;;  %v2055_v34 = vmul.f32 1.442695, %v2028_v7 }
 0x6e3   :  { %v2095_v26 = vsel %vm1968_vm1, %v12448_v18, 0.0  ;;  %v12457_v10 = vpop.eup %10112 }
 0x6e4   :  { %10114 = vpow2.f32 %v2055_v34  ;;  %2096 = vadd.xlane.f32.xlu1 %v2095_v26  ;;  %v2338_v7 = vsel %vm1968_vm1, %v12457_v10, 0.0 }
 0x6e5   :  { %10116 = vrcp.f32 %v2067_v56 }
 0x6e6   :  { %2336 = vadd.xlane.f32.xlu2 %v2335_v2  ;;  %2090 = vadd.xlane.f32.xlu0 %v2089_v6  ;;  %10118 = vrcp.f32 %v2313_v35 }
 0x6e7   :  { %v2070_v46 = vpop.xlane.xlu2 %2069 }
 0x6e8   :  { %10120 = vrcp.f32 %v2070_v46  ;;  %v2316_v50 = vpop.xlane.xlu1 %2315  ;;  %v2007_v63 = vpop.xlane.xlu0 %2006 }
 0x6e9   :  { %10122 = vrcp.f32 %v2316_v50  ;;  %v2029_v52 = vsub.f32 %v12320_v24, %v2007_v63 }
 0x6ea   :  { %v12460_v22 = vpop.eup %10114  ;;  %10124 = vpow2.f32 %v2299_v60 }
 0x6eb   :  { %v2057_v43 = vmul.f32 1.442695, %v2029_v52  ;;  %v10117_v42 = vpop.eup %10116  ;;  %v2098_v35 = vsel %vm1968_vm1, %v12460_v22, 0.0 }
 0x6ec   :  { %v10119_v11 = vpop.eup %10118  ;;  %v2129_v26 = vmul.f32 %v10117_v42, %v12300_v51 }
 0x6ed   :  { %10126 = vpow2.f32 %v2057_v43  ;;  %v2375_v2 = vmul.f32 %v10119_v11, %v12298_v25 }
 0x6ee   :  { %v10121_v56 = vpop.eup %10120  ;;  %2099 = vadd.xlane.f32.xlu2 %v2098_v35  ;;  %2339 = vadd.xlane.f32.xlu0 %v2338_v7 }
 0x6ef   :  { %v10123_v34 = vpop.eup %10122  ;;  %v2130_v24 = vmul.f32 %v10121_v56, %v12315_v40  ;;  %v2319_v14 = vpop.xlane.xlu2 %2318 }
 0x6f0   :  { %v2376_v6 = vmul.f32 %v10123_v34, %v12317_v32  ;;  %v2250_v46 = vpop.xlane.xlu1 %2249  ;;  %v2073_v60 = vpop.xlane.xlu0 %2072 }
 0x6f1   :  { %v2146_v50 = vpack.c.bf16 %v2130_v24, %v2129_v26  ;;  %v2274_v63 = vsub.f32 %v12339_v36, %v2250_v46  ;;  %v12471_v52 = vpop.eup %10124 }
 0x6f2   :  { %v2393_v43 = vpack.c.bf16 %v2376_v6, %v2375_v2  ;;  %v2341_v25 = vsel %vm1968_vm1, %v12471_v52, 0.0 }
 0x6f3   :  { %v12473_v35 = vpop.eup %10126  ;;  %v2301_v7 = vmul.f32 1.442695, %v2274_v63  ;;  %8610 = vmatmul.msk.bf16.vlgmr.msrb.gmra.mxu3 %vm1968_vm1, %v2146_v50 }
 0x6f4   :  { %8602 = vmatmul.msk.bf16.vlgmr.msra.gmra.mxu2 %vm1968_vm1, %v2393_v43  ;;  %v2101_v51 = vsel %vm1968_vm1, %v12473_v35, 0.0 }
 0x6f5   :  { %10128 = vpow2.f32 %v2301_v7 }
 0x6f6   :  { %2342 = vadd.xlane.f32.xlu0 %v2341_v25  ;;  %2102 = vadd.xlane.f32.xlu2 %v2101_v51  ;;  %10130 = vrcp.f32 %v2073_v60 }
 0x6f7   :  { %v2253_v40 = vpop.xlane.xlu2 %2252  ;;  %10132 = vrcp.f32 %v2319_v14 }
 0x6f8   :  { %v2076_v32 = vpop.xlane.xlu1 %2075  ;;  %v2275_v36 = vsub.f32 %v12350_v12, %v2253_v40  ;;  %v2322_v42 = vpop.xlane.xlu0 %2321 }
 0x6f9   :  { %10134 = vrcp.f32 %v2076_v32 }
 0x6fa   :  { %v2303_v11 = vmul.f32 1.442695, %v2275_v36  ;;  %10136 = vrcp.f32 %v2322_v42 }
 0x6fb   :  { %v12482_v56 = vpop.eup %10128 }
 0x6fc   :  { %10138 = vpow2.f32 %v2303_v11  ;;  %v2344_v34 = vsel %vm1968_vm1, %v12482_v56, 0.0  ;;  %v10131_v26 = vpop.eup %10130 }
 0x6fd   :  { %2345 = vadd.xlane.f32.xlu1 %v2344_v34  ;;  %v10133_v24 = vpop.eup %10132  ;;  %v2131_v14 = vmul.f32 %v10131_v26, %v12341_v49 }
 0x6fe   :  { %v2377_v63 = vmul.f32 %v10133_v24, %v12337_v4 }
 0x6ff   :  { %v10135_v2 = vpop.eup %10134  ;;  %v2079_v6 = vpop.xlane.xlu2 %2078 }
 0x700   :  { %v10137_v46 = vpop.eup %10136  ;;  %v2132_v12 = vmul.f32 %v10135_v2, %v12354_v1  ;;  %v2010_v60 = vpop.xlane.xlu1 %2009 }
 0x701   :  { %v2256_v50 = vpop.xlane.xlu0 %2255  ;;  %v2378_v43 = vmul.f32 %v10137_v46, %v12352_v28  ;;  %v2030_v7 = vsub.f32 %v12370_v54, %v2010_v60 }
 0x702   :  { %v2276_v25 = vsub.f32 %v12372_v37, %v2256_v50  ;;  %v12492_v51 = vpop.eup %10138  ;;  %v2147_v40 = vpack.c.bf16 %v2132_v12, %v2131_v14 }
 0x703   :  { %v2059_v32 = vmul.f32 1.442695, %v2030_v7  ;;  %v2394_v42 = vpack.c.bf16 %v2378_v43, %v2377_v63  ;;  %v2347_v49 = vsel %vm1968_vm1, %v12492_v51, 0.0 }
 0x704   :  { %v2305_v36 = vmul.f32 1.442695, %v2276_v25  ;;  %8611 = vmatmul.msk.bf16.gmra.mxu3 %vm1968_vm1, %v2147_v40 }
 0x705   :  { %10140 = vpow2.f32 %v2059_v32  ;;  %8603 = vmatmul.msk.bf16.gmra.mxu2 %vm1968_vm1, %v2394_v42  ;;  %2348 = vadd.xlane.f32.xlu1 %v2347_v49 }
 0x706   :  { %10142 = vpow2.f32 %v2305_v36 }
 0x707   :  { %10144 = vrcp.f32 %v2079_v6  ;;  %v2328_v4 = vpop.xlane.xlu2 %2327 }
 0x708   :  { %v2325_v28 = vpop.xlane.xlu1 %2324  ;;  %10146 = vrcp.f32 %v2328_v4 }
 0x709   :  { %v2082_v1 = vpop.xlane.xlu0 %2081  ;;  %10148 = vrcp.f32 %v2325_v28 }
 0x70a   :  { %10150 = vrcp.f32 %v2082_v1 }
 0x70b   :  { %v12498_v54 = vpop.eup %10140 }
 0x70c   :  { %v12500_v37 = vpop.eup %10142  ;;  %v2104_v11 = vsel %vm1968_vm1, %v12498_v54, 0.0 }
 0x70d   :  { %v10145_v34 = vpop.eup %10144  ;;  %2105 = vadd.xlane.f32.xlu0 %v2104_v11  ;;  %v2350_v26 = vsel %vm1968_vm1, %v12500_v37, 0.0 }
 0x70e   :  { %v10147_v24 = vpop.eup %10146  ;;  %2351 = vadd.xlane.f32.xlu2 %v2350_v26  ;;  %v2133_v12 = vmul.f32 %v10145_v34, %v12368_v44 }
 0x70f   :  { %v10149_v2 = vpop.eup %10148  ;;  %v2380_v6 = vmul.f32 %v10147_v24, %v12382_v41 }
 0x710   :  { %v10151_v46 = vpop.eup %10150  ;;  %v2379_v14 = vmul.f32 %v10149_v2, %v12380_v38 }
 0x711   :  { %v2134_v60 = vmul.f32 %v10151_v46, %v12384_v20 }
 0x712   :  { %v2395_v50 = vpack.c.bf16 %v2380_v6, %v2379_v14 }
 0x713   :  { %v2148_v63 = vpack.c.bf16 %v2134_v60, %v2133_v12 }
 0x715   :  { %8604 = vmatmul.msk.bf16.gmra.mxu2 %vm1968_vm1, %v2395_v50  ;;  %8612 = vmatmul.msk.bf16.gmra.mxu3 %vm1968_vm1, %v2148_v63 }
 0x737   :  { %v2085_v43 = vpop.xlane.xlu1 %2084 }
 0x73f   :  { %v2334_v7 = vpop.xlane.xlu1 %2333 }
 0x741   :  { %v2013_v25 = vpop.xlane.xlu2 %2012 }
 0x742   :  { %v2031_v40 = vsub.f32 %v12404_v57, %v2013_v25 }
 0x744   :  { %v2061_v32 = vmul.f32 1.442695, %v2031_v40 }
 0x746   :  { %10152 = vpow2.f32 %v2061_v32 }
 0x747   :  { %10154 = vrcp.f32 %v2085_v43  ;;  %v2259_v41 = vpop.xlane.xlu1 %2258 }
 0x748   :  { %v2277_v38 = vsub.f32 %v12411_v13, %v2259_v41 }
 0x749   :  { %v2088_v44 = vpop.xlane.xlu2 %2087  ;;  %v2016_v36 = vpop.xlane.xlu0 %2015 }
 0x74a   :  { %10156 = vrcp.f32 %v2088_v44  ;;  %v2032_v20 = vsub.f32 %v12421_v0, %v2016_v36  ;;  %v2307_v42 = vmul.f32 1.442695, %v2277_v38 }
 0x74c   :  { %v12515_v49 = vpop.eup %10152  ;;  %v2063_v4 = vmul.f32 1.442695, %v2032_v20  ;;  %10158 = vpow2.f32 %v2307_v42 }
 0x74d   :  { %v2107_v28 = vsel %vm1968_vm1, %v12515_v49, 0.0  ;;  %v10155_v57 = vpop.eup %10154 }
 0x74e   :  { %10160 = vpow2.f32 %v2063_v4  ;;  %2108 = vadd.xlane.f32.xlu0 %v2107_v28  ;;  %v2135_v13 = vmul.f32 %v10155_v57, %v12394_v17 }
 0x74f   :  { %10162 = vrcp.f32 %v2334_v7  ;;  %v2094_v12 = vpop.xlane.xlu1 %2093 }
 0x750   :  { %v10157_v1 = vpop.eup %10156 }
 0x751   :  { %v2136_v11 = vmul.f32 %v10157_v1, %v12417_v8  ;;  %v2262_v34 = vpop.xlane.xlu2 %2261  ;;  %v2331_v26 = vpop.xlane.xlu0 %2330 }
 0x752   :  { %v2278_v0 = vsub.f32 %v12430_v48, %v2262_v34  ;;  %10164 = vrcp.f32 %v2331_v26  ;;  %v12522_v24 = vpop.eup %10158 }
 0x753   :  { %v2149_v2 = vpack.c.bf16 %v2136_v11, %v2135_v13  ;;  %v2353_v14 = vsel %vm1968_vm1, %v12522_v24, 0.0 }
 0x754   :  { %v12524_v6 = vpop.eup %10160  ;;  %v2309_v46 = vmul.f32 1.442695, %v2278_v0  ;;  %2354 = vadd.xlane.f32.xlu2 %v2353_v14 }
 0x755   :  { %8613 = vmatmul.msk.bf16.gmra.mxu3 %vm1968_vm1, %v2149_v2  ;;  %v2110_v17 = vsel %vm1968_vm1, %v12524_v6, 0.0  ;;  %v10163_v8 = vpop.eup %10162 }
 0x756   :  { %10166 = vpow2.f32 %v2309_v46  ;;  %2111 = vadd.xlane.f32.xlu1 %v2110_v17  ;;  %v2382_v60 = vmul.f32 %v10163_v8, %v12402_v16  ;;  %v12551_v8 = vld [vmem:[%s16089_s13] ss:$0 sm:$0xff] }
 0x757   :  { %10168 = vrcp.f32 %v2094_v12  ;;  %v2097_v20 = vpop.xlane.xlu1 %2096 }
 0x758   :  { %v10165_v48 = vpop.eup %10164 }
 0x759   :  { %v2381_v50 = vmul.f32 %v10165_v48, %v12432_v21  ;;  %v2091_v63 = vpop.xlane.xlu0 %2090  ;;  %v2337_v43 = vpop.xlane.xlu2 %2336 }
 0x75a   :  { %10170 = vrcp.f32 %v2091_v63 }
 0x75b   :  { %v2396_v7 = vpack.c.bf16 %v2382_v60, %v2381_v50  ;;  %10172 = vrcp.f32 %v2337_v43 }
 0x75c   :  { %v12533_v25 = vpop.eup %10166 }
 0x75d   :  { %8605 = vmatmul.msk.bf16.gmra.mxu2 %vm1968_vm1, %v2396_v7  ;;  %v2356_v40 = vsel %vm1968_vm1, %v12533_v25, 0.0  ;;  %v10169_v32 = vpop.eup %10168 }
 0x75e   :  { %2357 = vadd.xlane.f32.xlu0 %v2356_v40  ;;  %v2138_v16 = vmul.f32 %v10169_v32, %v12434_v62 }
 0x760   :  { %v10171_v41 = vpop.eup %10170 }
 0x761   :  { %v2340_v38 = vpop.xlane.xlu0 %2339  ;;  %v2137_v21 = vmul.f32 %v10171_v41, %v12446_v31  ;;  %v2100_v44 = vpop.xlane.xlu2 %2099 }
 0x762   :  { %10174 = vrcp.f32 %v2340_v38  ;;  %v10173_v42 = vpop.eup %10172 }
 0x763   :  { %v2150_v36 = vpack.c.bf16 %v2138_v16, %v2137_v21  ;;  %10176 = vrcp.f32 %v2100_v44  ;;  %v2383_v28 = vmul.f32 %v10173_v42, %v12443_v27 }
 0x764   :  { %10178 = vrcp.f32 %v2097_v20 }
 0x765   :  { %8614 = vmatmul.msk.bf16.gmra.mxu3 %vm1968_vm1, %v2150_v36 }
 0x768   :  { %v10175_v4 = vpop.eup %10174 }
 0x769   :  { %v2384_v57 = vmul.f32 %v10175_v4, %v12457_v10  ;;  %v10177_v13 = vpop.eup %10176  ;;  %v2343_v11 = vpop.xlane.xlu0 %2342 }
 0x76a   :  { %v10179_v62 = vpop.eup %10178  ;;  %v2140_v31 = vmul.f32 %v10177_v13, %v12460_v22  ;;  %10180 = vrcp.f32 %v2343_v11  ;;  %v2103_v22 = vpop.xlane.xlu2 %2102 }
 0x76b   :  { %v2397_v1 = vpack.c.bf16 %v2384_v57, %v2383_v28  ;;  %v2139_v26 = vmul.f32 %v10179_v62, %v12448_v18 }
 0x76d   :  { %8606 = vmatmul.msk.bf16.gmra.mxu2 %vm1968_vm1, %v2397_v1  ;;  %v2151_v0 = vpack.c.bf16 %v2140_v31, %v2139_v26 }
 0x770   :  { %v2346_v34 = vpop.xlane.xlu1 %2345  ;;  %v10181_v2 = vpop.eup %10180 }
 0x771   :  { %10182 = vrcp.f32 %v2346_v34  ;;  %v2385_v12 = vmul.f32 %v10181_v2, %v12471_v52 }
 0x772   :  { %10184 = vrcp.f32 %v2103_v22 }
 0x775   :  { %8615 = vmatmul.msk.bf16.gmra.mxu3 %vm1968_vm1, %v2151_v0 }
 0x776   :  { %v2514_v27 = vpop.f32.mrf.mxu3 }
 0x777   :  { %v10183_v46 = vpop.eup %10182  ;;  %v2438_v10 = vpop.f32.mrf.mxu2 }
 0x778   :  { %v2386_v14 = vmul.f32 %v10183_v46, %v12482_v56  ;;  %v2515_v17 = vadd.f32 %v2514_v27, %v2438_v10  ;;  %v2349_v50 = vpop.xlane.xlu1 %2348  ;;  %v10185_v32 = vpop.eup %10184 }
 0x779   :  { %10186 = vrcp.f32 %v2349_v50  ;;  %v2141_v44 = vmul.f32 %v10185_v32, %v12473_v35 }
 0x77a   :  { %v2554_v18 = vadd.f32 %v2515_v17, %v11984_v47  ;;  %v2398_v60 = vpack.c.bf16 %v2386_v14, %v2385_v12 }
 0x77c   :  { %v12556_v48 = vadd.f32 %v12551_v8, %v2554_v18 }
 0x77d   :  { %8607 = vmatmul.msk.bf16.gmra.mxu2 %vm1968_vm1, %v2398_v60 }
 0x77e   :  { %2590 = vadd.xlane.f32.xlu1 %v12556_v48  ;;  %v2516_v56 = vpop.f32.mrf.mxu3 }
 0x77f   :  { %v2440_v63 = vpop.f32.mrf.mxu2  ;;  %v10187_v41 = vpop.eup %10186 }
 0x780   :  { %v2517_v43 = vadd.f32 %v2516_v56, %v2440_v63  ;;  %v2106_v7 = vpop.xlane.xlu0 %2105 }
 0x781   :  { %v2352_v40 = vpop.xlane.xlu2 %2351  ;;  %10188 = vrcp.f32 %v2106_v7 }
 0x782   :  { %v2555_v52 = vadd.f32 %v2517_v43, %v11987_v29  ;;  %10190 = vrcp.f32 %v2352_v40  ;;  %v2387_v29 = vmul.f32 %v10187_v41, %v12492_v51 }
 0x784   :  { %v12562_v47 = vadd.f32 %v12551_v8, %v2555_v52 }
 0x786   :  { %2592 = vadd.xlane.f32.xlu2 %v12562_v47 }
 0x787   :  { %v10189_v38 = vpop.eup %10188  ;;  %v2519_v16 = vpop.f32.mrf.mxu3 }
 0x788   :  { %v10191_v21 = vpop.eup %10190  ;;  %v2142_v36 = vmul.f32 %v10189_v38, %v12498_v54  ;;  %v2443_v20 = vpop.f32.mrf.mxu2 }
 0x789   :  { %v2388_v42 = vmul.f32 %v10191_v21, %v12500_v37  ;;  %v2520_v4 = vadd.f32 %v2519_v16, %v2443_v20 }
 0x78a   :  { %v2152_v28 = vpack.c.bf16 %v2142_v36, %v2141_v44 }
 0x78b   :  { %v2556_v57 = vadd.f32 %v2520_v4, %v12010_v61  ;;  %v2399_v1 = vpack.c.bf16 %v2388_v42, %v2387_v29 }
 0x78c   :  { %8616 = vmatmul.msk.bf16.gmra.mxu3 %vm1968_vm1, %v2152_v28 }
 0x78d   :  { %v12572_v13 = vadd.f32 %v12551_v8, %v2556_v57  ;;  %8608 = vmatmul.msk.bf16.gmra.mxu2 %vm1968_vm1, %v2399_v1 }
 0x78f   :  { %2594 = vadd.xlane.f32.xlu0 %v12572_v13  ;;  %v2521_v35 = vpop.f32.mrf.mxu3 }
 0x790   :  { %v2445_v54 = vpop.f32.mrf.mxu2 }
 0x791   :  { %v2522_v11 = vadd.f32 %v2521_v35, %v2445_v54 }
 0x793   :  { %v2557_v37 = vadd.f32 %v2522_v11, %v12013_v55 }
 0x795   :  { %v12578_v51 = vadd.f32 %v12551_v8, %v2557_v37 }
 0x797   :  { %2596 = vadd.xlane.f32.xlu1 %v12578_v51 }
 0x798   :  { %v2448_v61 = vpop.f32.mrf.mxu2  ;;  %v2524_v62 = vpop.f32.mrf.mxu3 }
 0x799   :  { %v2525_v31 = vadd.f32 %v2524_v62, %v2448_v61 }
 0x79b   :  { %v2558_v34 = vadd.f32 %v2525_v31, %v12034_v39 }
 0x79d   :  { %v12583_v26 = vadd.f32 %v12551_v8, %v2558_v34 }
 0x79f   :  { %2598 = vadd.xlane.f32.xlu2 %v12583_v26 }
 0x7a0   :  { %v2450_v0 = vpop.f32.mrf.mxu2  ;;  %v2526_v2 = vpop.f32.mrf.mxu3 }
 0x7a1   :  { %v2527_v27 = vadd.f32 %v2526_v2, %v2450_v0 }
 0x7a3   :  { %v2559_v55 = vadd.f32 %v2527_v27, %v12037_v3 }
 0x7a5   :  { %v12588_v46 = vadd.f32 %v12551_v8, %v2559_v55 }
 0x7a7   :  { %2600 = vadd.xlane.f32.xlu0 %v12588_v46 }
 0x7c1   :  { %v2109_v10 = vpop.xlane.xlu0 %2108 }
 0x7c2   :  { %10192 = vrcp.f32 %v2109_v10 }
 0x7c7   :  { %v2355_v39 = vpop.xlane.xlu2 %2354 }
 0x7c8   :  { %v10193_v17 = vpop.eup %10192 }
 0x7c9   :  { %v2112_v14 = vpop.xlane.xlu1 %2111  ;;  %v2143_v12 = vmul.f32 %v10193_v17, %v12515_v49 }
 0x7ca   :  { %10194 = vrcp.f32 %v2112_v14 }
 0x7cb   :  { %10196 = vrcp.f32 %v2355_v39 }
 0x7d0   :  { %v10195_v22 = vpop.eup %10194 }
 0x7d1   :  { %v2144_v18 = vmul.f32 %v10195_v22, %v12524_v6  ;;  %v2358_v60 = vpop.xlane.xlu0 %2357  ;;  %v10197_v50 = vpop.eup %10196 }
 0x7d2   :  { %10198 = vrcp.f32 %v2358_v60  ;;  %v2389_v63 = vmul.f32 %v10197_v50, %v12522_v24 }
 0x7d3   :  { %v2153_v3 = vpack.c.bf16 %v2144_v18, %v2143_v12 }
 0x7d5   :  { %8617 = vmatmul.msk.bf16.gmra.mxu3 %vm1968_vm1, %v2153_v3 }
 0x7d8   :  { %v10199_v56 = vpop.eup %10198  ;;  %v2529_v40 = vpop.f32.mrf.mxu3 }
 0x7d9   :  { %v2390_v43 = vmul.f32 %v10199_v56, %v12533_v25 }
 0x7db   :  { %v2400_v7 = vpack.c.bf16 %v2390_v43, %v2389_v63 }
 0x7dd   :  { %8609 = vmatmul.msk.bf16.gmra.mxu2 %vm1968_vm1, %v2400_v7 }
 0x7e0   :  { %v2453_v52 = vpop.f32.mrf.mxu2  ;;  %v2531_v38 = vpop.f32.mrf.mxu3 }
 0x7e1   :  { %v2530_v32 = vadd.f32 %v2529_v40, %v2453_v52 }
 0x7e3   :  { %v2560_v49 = vadd.f32 %v2530_v32, %v12065_v5  ;;  %v9716_v32 = vld [vmem:[%s16090_s14 + $0xec] sm:$0xf0] }
 0x7e5   :  { %v12599_v6 = vadd.f32 %v12551_v8, %v2560_v49  ;;  %v9714_v49 = vld [vmem:[%s16090_s14 + $0xe4] sm:$0xf] }
 0x7e7   :  { %2602 = vadd.xlane.f32.xlu0 %v12599_v6 }
 0x7e8   :  { %v2455_v41 = vpop.f32.mrf.mxu2  ;;  %v2534_v20 = vpop.f32.mrf.mxu3 }
 0x7e9   :  { %v2532_v44 = vadd.f32 %v2531_v38, %v2455_v41  ;;  %v8740_v38 = vld [vmem:[%s16090_s14 + $0xe8] sm:$0xf] }
 0x7eb   :  { %v2561_v42 = vadd.f32 %v2532_v44, %v12068_v15  ;;  %v9715_v44 = vld [vmem:[%s16090_s14 + $0xec] sm:$0xf] }
 0x7ed   :  { %v12616_v1 = vadd.f32 %v12551_v8, %v2561_v42  ;;  %v9712_v42 = vld [vmem:[%s16090_s14 + $0xcc] sm:$0xf0] }
 0x7f0   :  { %v2458_v21 = vpop.f32.mrf.mxu2  ;;  %v2536_v54 = vpop.f32.mrf.mxu3 }
 0x7f1   :  { %v2591_v16 = vpop.xlane.xlu1 %2590  ;;  %v2535_v28 = vadd.f32 %v2534_v20, %v2458_v21 }
 0x7f2   :  { %v2622_v24 = vmul.f32 %v2591_v16, %v11732_v9  ;;  %v9717_v16 = vld [vmem:[%s16090_s14 + $0xf4] sm:$0xf0] }
 0x7f3   :  { %v2562_v35 = vadd.f32 %v2535_v28, %v12082_v19  ;;  %v8741_v21 = vor.u32 %v9717_v16, %v8740_v38  ;;  %v9703_v38 = vld [vmem:[%s16090_s14 + $0x8c] sm:$0xf]  ;;  %v8694_v16 = vld [vmem:[%s16090_s14 + $0x98] sm:$0xf0] }
 0x7f4   :  { %v12604_v25 = vsub.f32 %v12556_v48, %v2622_v24 }
 0x7f5   :  { %v12625_v37 = vadd.f32 %v12551_v8, %v2562_v35  ;;  %3252 = vmatpush.bf16.msrb.mxu2 %v8741_v21  ;;  %v9713_v35 = vld [vmem:[%s16090_s14 + $0xd4] sm:$0xf0]  ;;  %v8668_v21 = vld [vmem:[%s16090_s14 + $0x60] sm:$0xf] }
 0x7f6   :  { %v2654_v36 = vmul.f32 %v12604_v25, %v12604_v25 }
 0x7f8   :  { %2670 = vadd.xlane.f32.xlu1 %v2654_v36  ;;  %v2460_v57 = vpop.f32.mrf.mxu2  ;;  %v2539_v2 = vpop.f32.mrf.mxu3  ;;  %v8742_v36 = vld [vmem:[%s16090_s14 + $0xf8] sm:$0xf0] }
 0x7f9   :  { %v2593_v5 = vpop.xlane.xlu2 %2592  ;;  %v2537_v61 = vadd.f32 %v2536_v54, %v2460_v57  ;;  %v8745_v20 = vor.u32 %v9715_v44, %v8742_v36  ;;  %v8718_v57 = vld [vmem:[%s16090_s14 + $0xd0] sm:$0xf0]  ;;  %v9700_v44 = vld [vmem:[%s16090_s14 + $0x6c] sm:$0xf0]  ;;  %v9698_v36 = vld [vmem:[%s16090_s14 + $0x64] sm:$0xf] }
 0x7fa   :  { %v2623_v4 = vmul.f32 %v2593_v5, %v11732_v9  ;;  %v8716_v5 = vld [vmem:[%s16090_s14 + $0xc0] sm:$0xf] }
 0x7fb   :  { %v2563_v19 = vadd.f32 %v2537_v61, %v12085_v23  ;;  %3301 = vmatpush.bf16.msra.mxu3 %v8745_v20  ;;  %v8717_v28 = vor.u32 %v9712_v42, %v8716_v5  ;;  %v8726_v61 = vld [vmem:[%s16090_s14 + $0xd8] sm:$0xf0]  ;;  %v8669_v20 = vor.u32 %v9700_v44, %v8668_v21  ;;  %v8670_v5 = vld [vmem:[%s16090_s14 + $0x70] sm:$0xf0]  ;;  %v8676_v42 = vld [vmem:[%s16090_s14 + $0x68] sm:$0xf] }
 0x7fc   :  { %v12611_v29 = vsub.f32 %v12562_v47, %v2623_v4  ;;  %v9710_v4 = vld [vmem:[%s16090_s14 + $0xc4] sm:$0xf]  ;;  %v8622_v44 = vld [vmem:[%s16090_s14 + $0x10] sm:$0xf0] }
 0x7fd   :  { %v12638_v10 = vadd.f32 %v12551_v8, %v2563_v19  ;;  %v8721_v54 = vor.u32 %v9710_v4, %v8718_v57  ;;  %v9706_v19 = vld [vmem:[%s16090_s14 + $0xa4] sm:$0xf]  ;;  %v9701_v4 = vld [vmem:[%s16090_s14 + $0x74] sm:$0xf0]  ;;  %v8673_v57 = vor.u32 %v9698_v36, %v8670_v5  ;;  %v8628_v36 = vld [vmem:[%s16090_s14 + $0x8] sm:$0xf] }
 0x7fe   :  { %v2655_v48 = vmul.f32 %v12611_v29, %v12611_v29 }
 0x800   :  { %2672 = vadd.xlane.f32.xlu2 %v2655_v48  ;;  %2604 = vadd.xlane.f32.xlu1 %v12616_v1  ;;  %v2463_v31 = vpop.f32.mrf.mxu2  ;;  %v8724_v48 = vld [vmem:[%s16090_s14 + $0xc8] sm:$0xf] }
 0x801   :  { %v2540_v27 = vadd.f32 %v2539_v2, %v2463_v31  ;;  %v8700_v31 = vld [vmem:[%s16090_s14 + $0xa0] sm:$0xf] }
 0x802   :  { %v2595_v15 = vpop.xlane.xlu0 %2594 }
 0x803   :  { %v2624_v11 = vmul.f32 %v2595_v15, %v11732_v9  ;;  %v2564_v23 = vadd.f32 %v2540_v27, %v12109_v30  ;;  %v8725_v15 = vor.u32 %v9713_v35, %v8724_v48  ;;  %v8702_v27 = vld [vmem:[%s16090_s14 + $0xb0] sm:$0xf0]  ;;  %v8677_v48 = vor.u32 %v9701_v4, %v8676_v42  ;;  %v9699_v35 = vld [vmem:[%s16090_s14 + $0x6c] sm:$0xf]  ;;  %v9689_v42 = vld [vmem:[%s16090_s14 + $0x14] sm:$0xf0] }
 0x804   :  { %v9687_v4 = vld [vmem:[%s16090_s14 + $0xc] sm:$0xf] }
 0x805   :  { %v12622_v47 = vsub.f32 %v12572_v13, %v2624_v11  ;;  %v12649_v60 = vadd.f32 %v12551_v8, %v2564_v23  ;;  %v9711_v11 = vld [vmem:[%s16090_s14 + $0xcc] sm:$0xf]  ;;  %3253 = vmatpush.bf16.msrb.mxu2 %v8725_v15  ;;  %v8705_v23 = vor.u32 %v9706_v19, %v8702_v27  ;;  %v8654_v19 = vld [vmem:[%s16090_s14 + $0x50] sm:$0xf0] }
 0x807   :  { %v2656_v62 = vmul.f32 %v12622_v47, %v12622_v47 }
 0x808   :  { %2606 = vadd.xlane.f32.xlu1 %v12625_v37  ;;  %v2465_v14 = vpop.f32.mrf.mxu2 }
 0x809   :  { %2674 = vadd.xlane.f32.xlu2 %v2656_v62  ;;  %v8729_v62 = vor.u32 %v9711_v11, %v8726_v61  ;;  %v8652_v61 = vld [vmem:[%s16090_s14 + $0x40] sm:$0xf] }
 0x80a   :  { %v2597_v34 = vpop.xlane.xlu1 %2596 }
 0x80b   :  { %v2625_v0 = vmul.f32 %v2597_v34, %v11732_v9  ;;  %v9708_v34 = vld [vmem:[%s16090_s14 + $0xac] sm:$0xf0]  ;;  %3302 = vmatpush.bf16.msra.mxu3 %v8729_v62  ;;  %v9694_v62 = vld [vmem:[%s16090_s14 + $0x44] sm:$0xf] }
 0x80c   :  { %v8701_v2 = vor.u32 %v9708_v34, %v8700_v31 }
 0x80d   :  { %v12633_v13 = vsub.f32 %v12578_v51, %v2625_v0  ;;  %v2541_v51 = vpop.f32.mrf.mxu3 }
 0x80e   :  { %v2542_v12 = vadd.f32 %v2541_v51, %v2465_v14  ;;  %v9709_v14 = vld [vmem:[%s16090_s14 + $0xb4] sm:$0xf0]  ;;  %v9707_v51 = vld [vmem:[%s16090_s14 + $0xac] sm:$0xf] }
 0x80f   :  { %v2657_v55 = vmul.f32 %v12633_v13, %v12633_v13 }
 0x810   :  { %v2565_v50 = vadd.f32 %v2542_v12, %v12112_v53  ;;  %v2468_v56 = vpop.f32.mrf.mxu2  ;;  %v8710_v12 = vld [vmem:[%s16090_s14 + $0xb8] sm:$0xf0] }
 0x811   :  { %2676 = vadd.xlane.f32.xlu0 %v2657_v55  ;;  %2608 = vadd.xlane.f32.xlu2 %v12638_v10  ;;  %v8708_v55 = vld [vmem:[%s16090_s14 + $0xa8] sm:$0xf] }
 0x812   :  { %v2599_v39 = vpop.xlane.xlu2 %2598  ;;  %v12658_v7 = vadd.f32 %v12551_v8, %v2565_v50 }
 0x813   :  { %v2626_v17 = vmul.f32 %v2599_v39, %v11732_v9 }
 0x815   :  { %v12644_v22 = vsub.f32 %v12583_v26, %v2626_v17  ;;  %v2544_v63 = vpop.f32.mrf.mxu3  ;;  %v8709_v17 = vor.u32 %v9709_v14, %v8708_v55  ;;  %v8657_v14 = vor.u32 %v9694_v62, %v8654_v19 }
 0x816   :  { %v2545_v43 = vadd.f32 %v2544_v63, %v2468_v56  ;;  %v9704_v56 = vld [vmem:[%s16090_s14 + $0x8c] sm:$0xf0]  ;;  %v9702_v63 = vld [vmem:[%s16090_s14 + $0x84] sm:$0xf] }
 0x817   :  { %v2658_v18 = vmul.f32 %v12644_v22, %v12644_v22  ;;  %3254 = vmatpush.bf16.msrb.mxu2 %v8709_v17  ;;  %v8662_v17 = vld [vmem:[%s16090_s14 + $0x58] sm:$0xf0] }
 0x818   :  { %v2566_v52 = vadd.f32 %v2545_v43, %v12125_v33  ;;  %v8734_v33 = vld [vmem:[%s16090_s14 + $0xf0] sm:$0xf0] }
 0x819   :  { %2678 = vadd.xlane.f32.xlu0 %v2658_v18  ;;  %2610 = vadd.xlane.f32.xlu2 %v12649_v60  ;;  %v8737_v24 = vor.u32 %v9714_v49, %v8734_v33  ;;  %v2470_v18 = vpop.f32.mrf.mxu2 }
 0x81a   :  { %v2601_v3 = vpop.xlane.xlu0 %2600  ;;  %v12665_v53 = vadd.f32 %v12551_v8, %v2566_v52  ;;  %v8692_v52 = vld [vmem:[%s16090_s14 + $0x88] sm:$0xf] }
 0x81b   :  { %v2627_v30 = vmul.f32 %v2601_v3, %v11732_v9  ;;  %3203 = vmatpush.bf16.msrb.mxu1 %v8737_v24  ;;  %v8713_v3 = vor.u32 %v9707_v51, %v8710_v12  ;;  %v8697_v24 = vor.u32 %v9703_v38, %v8694_v16  ;;  %v8636_v12 = vld [vmem:[%s16090_s14 + $0x20] sm:$0xf]  ;;  %v9688_v38 = vld [vmem:[%s16090_s14 + $0xc] sm:$0xf0]  ;;  %v9686_v16 = vld [vmem:[%s16090_s14 + $0x4] sm:$0xf] }
 0x81c   :  { %v8625_v5 = vor.u32 %v9686_v16, %v8622_v44 }
 0x81d   :  { %v12655_v26 = vsub.f32 %v12588_v46, %v2627_v30  ;;  %v8732_v46 = vld [vmem:[%s16090_s14 + $0xe0] sm:$0xf]  ;;  %v2546_v43 = vpop.f32.mrf.mxu3  ;;  %3303 = vmatpush.bf16.msra.mxu3 %v8713_v3  ;;  %v9690_v3 = vld [vmem:[%s16090_s14 + $0x24] sm:$0xf] }
 0x81e   :  { %v8733_v41 = vor.u32 %v9716_v32, %v8732_v46  ;;  %v8684_v30 = vld [vmem:[%s16090_s14 + $0x80] sm:$0xf]  ;;  %v9705_v46 = vld [vmem:[%s16090_s14 + $0x94] sm:$0xf0]  ;;  %v2547_v32 = vadd.f32 %v2546_v43, %v2470_v18  ;;  %v9692_v18 = vld [vmem:[%s16090_s14 + $0x2c] sm:$0xf0] }
 0x81f   :  { %v2659_v40 = vmul.f32 %v12655_v26, %v12655_v26  ;;  %3204 = vmatpush.bf16.msrb.mxu1 %v8721_v54  ;;  %v8693_v33 = vor.u32 %v9705_v46, %v8692_v52  ;;  %v8678_v54 = vld [vmem:[%s16090_s14 + $0x78] sm:$0xf0]  ;;  %v9693_v43 = vld [vmem:[%s16090_s14 + $0x34] sm:$0xf0] }
 0x820   :  { %3154 = vmatpush.bf16.msra.mxu0 %v8733_v41  ;;  %v8681_v11 = vor.u32 %v9699_v35, %v8678_v54 }
 0x821   :  { %2612 = vadd.xlane.f32.xlu0 %v12658_v7  ;;  %2680 = vadd.xlane.f32.xlu1 %v2659_v40  ;;  %v8685_v40 = vor.u32 %v9704_v56, %v8684_v30  ;;  %v8637_v30 = vor.u32 %v9692_v18, %v8636_v12  ;;  %v8638_v56 = vld [vmem:[%s16090_s14 + $0x30] sm:$0xf0] }
 0x822   :  { %3255 = vmatpush.bf16.msrb.mxu2 %v8693_v33  ;;  %3304 = vmatpush.bf16.msra.mxu3 %v8697_v24  ;;  %v8641_v52 = vor.u32 %v9690_v3, %v8638_v56 }
 0x823   :  { %3205 = vmatpush.bf16.msrb.mxu1 %v8705_v23  ;;  %v9695_v23 = vld [vmem:[%s16090_s14 + $0x4c] sm:$0xf] }
 0x824   :  { %3155 = vmatpush.bf16.msra.mxu0 %v8717_v28  ;;  %v2567_v28 = vadd.f32 %v2547_v32, %v12128_v58  ;;  %v9696_v58 = vld [vmem:[%s16090_s14 + $0x4c] sm:$0xf0]  ;;  %v8665_v51 = vor.u32 %v9695_v23, %v8662_v17  ;;  %v9691_v32 = vld [vmem:[%s16090_s14 + $0x2c] sm:$0xf] }
 0x825   :  { %v8653_v34 = vor.u32 %v9696_v58, %v8652_v61 }
 0x826   :  { %3256 = vmatpush.bf16.msrb.mxu2 %v8677_v48  ;;  %3305 = vmatpush.bf16.msra.mxu3 %v8681_v11  ;;  %v12814_v55 = vadd.f32 %v12551_v8, %v2567_v28  ;;  %v8630_v28 = vld [vmem:[%s16090_s14 + $0x18] sm:$0xf0] }
 0x827   :  { %v8633_v48 = vor.u32 %v9687_v4, %v8630_v28 }
 0x828   :  { %3156 = vmatpush.bf16.msra.mxu0 %v8701_v2  ;;  %v9697_v2 = vld [vmem:[%s16090_s14 + $0x54] sm:$0xf0] }
 0x829   :  { %2614 = vadd.xlane.f32.xlu0 %v12665_v53 }
 0x82a   :  { %3306 = vmatpush.bf16.msra.mxu3 %v8665_v51 }
 0x82c   :  { %3157 = vmatpush.bf16.msra.mxu0 %v8685_v40 }
 0x830   :  { %3158 = vmatpush.bf16.msra.mxu0 %v8669_v20 }
 0x834   :  { %3159 = vmatpush.bf16.msra.mxu0 %v8653_v34 }
 0x838   :  { %3160 = vmatpush.bf16.msra.mxu0 %v8637_v30 }
 0x858   :  { %v2549_v31 = vpop.f32.mrf.mxu3 }
 0x85a   :  { %v2603_v0 = vpop.xlane.xlu0 %2602 }
 0x85b   :  { %v2628_v39 = vmul.f32 %v2603_v0, %v11732_v9  ;;  %v8660_v0 = vld [vmem:[%s16090_s14 + $0x48] sm:$0xf] }
 0x85d   :  { %v12742_v50 = vsub.f32 %v12599_v6, %v2628_v39  ;;  %v8686_v6 = vld [vmem:[%s16090_s14 + $0x90] sm:$0xf0]  ;;  %v8661_v39 = vor.u32 %v9697_v2, %v8660_v0 }
 0x85e   :  { %v8689_v41 = vor.u32 %v9702_v63, %v8686_v6  ;;  %v8644_v63 = vld [vmem:[%s16090_s14 + $0x28] sm:$0xf] }
 0x85f   :  { %v2660_v49 = vmul.f32 %v12742_v50, %v12742_v50  ;;  %3257 = vmatpush.bf16.msrb.mxu2 %v8661_v39  ;;  %v8645_v46 = vor.u32 %v9693_v43, %v8644_v63 }
 0x860   :  { %3206 = vmatpush.bf16.msrb.mxu1 %v8689_v41  ;;  %v2473_v15 = vpop.f32.mrf.mxu2  ;;  %v2551_v12 = vpop.f32.mrf.mxu3 }
 0x861   :  { %2682 = vadd.xlane.f32.xlu1 %v2660_v49  ;;  %v2550_v27 = vadd.f32 %v2549_v31, %v2473_v15  ;;  %v8646_v49 = vld [vmem:[%s16090_s14 + $0x38] sm:$0xf0] }
 0x862   :  { %v8649_v33 = vor.u32 %v9691_v32, %v8646_v49 }
 0x863   :  { %v2568_v40 = vadd.f32 %v2550_v27, %v12143_v45  ;;  %v8620_v45 = vld [vmem:[%s16090_s14] sm:$0xf]  ;;  %3258 = vmatpush.bf16.msrb.mxu2 %v8645_v46 }
 0x864   :  { %3207 = vmatpush.bf16.msrb.mxu1 %v8673_v57  ;;  %3307 = vmatpush.bf16.msra.mxu3 %v8649_v33  ;;  %v8621_v21 = vor.u32 %v9688_v38, %v8620_v45  ;;  %v8629_v57 = vor.u32 %v9689_v42, %v8628_v36  ;;  %v10616_v33 = vld [vmem:[%s16083_s18] sm:$0x7] }
 0x865   :  { %v12865_v20 = vadd.f32 %v12551_v8, %v2568_v40  ;;  %v12897_v45 = vperm.slane %v10616_v33, 1 }
 0x866   :  { %3161 = vmatpush.bf16.msra.mxu0 %v8621_v21 }
 0x867   :  { %3259 = vmatpush.bf16.msrb.mxu2 %v8629_v57 }
 0x868   :  { %3208 = vmatpush.bf16.msrb.mxu1 %v8657_v14  ;;  %3308 = vmatpush.bf16.msra.mxu3 %v8633_v48  ;;  %v2475_v39 = vpop.f32.mrf.mxu2 }
 0x869   :  { %2616 = vadd.xlane.f32.xlu1 %v12814_v55  ;;  %v2552_v56 = vadd.f32 %v2551_v12, %v2475_v39 }
 0x86b   :  { %v2671_v6 = vpop.xlane.xlu1 %2670 }
 0x86c   :  { %v2702_v41 = vmul.f32 %v2671_v6, %v11732_v9  ;;  %3209 = vmatpush.bf16.msrb.mxu1 %v8641_v52  ;;  %v2569_v52 = vadd.f32 %v2552_v56, %v12146_v59 }
 0x86e   :  { %v2718_v24 = vadd.f32 1e-05, %v2702_v41  ;;  %v12904_v36 = vadd.f32 %v12551_v8, %v2569_v52 }
 0x870   :  { %10200 = vrsqrt.f32 %v2718_v24  ;;  %3210 = vmatpush.bf16.msrb.mxu1 %v8625_v5  ;;  %vm2740_vm4 = vweird.f32 %v2718_v24 }
 0x871   :  { %2618 = vadd.xlane.f32.xlu1 %v12865_v20 }
 0x873   :  { %v2673_v35 = vpop.xlane.xlu2 %2672  ;;  %v2605_v54 = vpop.xlane.xlu1 %2604 }
 0x874   :  { %v2703_v15 = vmul.f32 %v2673_v35, %v11732_v9  ;;  %v2629_v11 = vmul.f32 %v2605_v54, %v11732_v9 }
 0x876   :  { %v10201_v61 = vpop.eup %10200  ;;  %v2719_v58 = vadd.f32 1e-05, %v2703_v15  ;;  %v12880_v62 = vsub.f32 %v12616_v1, %v2629_v11 }
 0x877   :  { %v2735_v31 = vmul.f32 %v10201_v61, %v2718_v24  ;;  %vm2741_vm3 = vweird.f32 %v10201_v61 }
 0x878   :  { %10202 = vrsqrt.f32 %v2719_v58  ;;  %v2661_v34 = vmul.f32 %v12880_v62, %v12880_v62  ;;  %vm2742_vm5 = vmor %vm2740_vm4, %vm2741_vm3  ;;  %vm2750_vm7 = vweird.f32 %v2719_v58 }
 0x879   :  { %v2736_v19 = vmul.f32 %v10201_v61, %v2735_v31 }
 0x87a   :  { %2684 = vadd.xlane.f32.xlu2 %v2661_v34 }
 0x87b   :  { %v2737_v0 = vmul.f32 0.5, %v2736_v19  ;;  %v2607_v2 = vpop.xlane.xlu1 %2606 }
 0x87c   :  { %v2630_v27 = vmul.f32 %v2607_v2, %v11732_v9  ;;  %v2675_v14 = vpop.xlane.xlu2 %2674 }
 0x87d   :  { %v2738_v23 = vsub.f32 1.5, %v2737_v0  ;;  %v2704_v17 = vmul.f32 %v2675_v14, %v11732_v9 }
 0x87e   :  { %v10203_v51 = vpop.eup %10202  ;;  %v12887_v1 = vsub.f32 %v12625_v37, %v2630_v27 }
 0x87f   :  { %v2739_v18 = vmul.f32 %v10201_v61, %v2738_v23  ;;  %v2745_v3 = vmul.f32 %v10203_v51, %v2719_v58  ;;  %v2720_v30 = vadd.f32 1e-05, %v2704_v17  ;;  %vm2751_vm6 = vweird.f32 %v10203_v51 }
 0x880   :  { %v2662_v63 = vmul.f32 %v12887_v1, %v12887_v1  ;;  %vm2752_vm8 = vmor %vm2750_vm7, %vm2751_vm6 }
 0x881   :  { %v2746_v43 = vmul.f32 %v10203_v51, %v2745_v3  ;;  %10204 = vrsqrt.f32 %v2720_v30  ;;  %v2743_v40 = vsel %vm2742_vm5, %v10201_v61, %v2739_v18  ;;  %vm2760_vm10 = vweird.f32 %v2720_v30 }
 0x882   :  { %2686 = vadd.xlane.f32.xlu2 %v2662_v63  ;;  %v2894_v38 = vmul.f32 %v2743_v40, %v12604_v25 }
 0x883   :  { %v2747_v6 = vmul.f32 0.5, %v2746_v43 }
 0x884   :  { %v2609_v37 = vpop.xlane.xlu2 %2608  ;;  %v2677_v46 = vpop.xlane.xlu0 %2676  ;;  %v2911_v4 = vmul.f32 %v12897_v45, %v2894_v38 }
 0x885   :  { %v2748_v32 = vsub.f32 1.5, %v2747_v6  ;;  %v2631_v49 = vmul.f32 %v2609_v37, %v11732_v9  ;;  %v2705_v41 = vmul.f32 %v2677_v46, %v11732_v9 }
 0x887   :  { %v10205_v16 = vpop.eup %10204  ;;  %v2749_v24 = vmul.f32 %v10203_v51, %v2748_v32  ;;  %v12901_v59 = vsub.f32 %v12638_v10, %v2631_v49  ;;  %v2721_v21 = vadd.f32 1e-05, %v2705_v41  ;;  %v10617_v10 = vld [vmem:[%s16084_s19] sm:$0x7] }
 0x888   :  { %v2755_v44 = vmul.f32 %v10205_v16, %v2720_v30  ;;  %v12914_v57 = vperm.slane %v10617_v10, 1  ;;  %vm2761_vm9 = vweird.f32 %v10205_v16 }
 0x889   :  { %v2753_v5 = vsel %vm2752_vm8, %v10203_v51, %v2749_v24  ;;  %10206 = vrsqrt.f32 %v2721_v21  ;;  %v2663_v42 = vmul.f32 %v12901_v59, %v12901_v59  ;;  %vm2762_vm11 = vmor %vm2760_vm10, %vm2761_vm9  ;;  %vm2770_vm13 = vweird.f32 %v2721_v21 }
 0x88a   :  { %v2895_v25 = vmul.f32 %v2753_v5, %v12611_v29  ;;  %v2756_v28 = vmul.f32 %v10205_v16, %v2755_v44  ;;  %2620 = vadd.xlane.f32.xlu2 %v12904_v36  ;;  %v12920_v61 = vadd.f32 %v12914_v57, %v2911_v4 }
 0x88b   :  { %2688 = vadd.xlane.f32.xlu0 %v2663_v42 }
 0x88c   :  { %v2912_v8 = vmul.f32 %v12897_v45, %v2895_v25  ;;  %v2757_v48 = vmul.f32 0.5, %v2756_v28  ;;  %v2611_v35 = vpop.xlane.xlu2 %2610  ;;  %v2679_v54 = vpop.xlane.xlu0 %2678 }
 0x88d   :  { %v2632_v15 = vmul.f32 %v2611_v35, %v11732_v9  ;;  %v2706_v11 = vmul.f32 %v2679_v54, %v11732_v9 }
 0x88e   :  { %v2758_v29 = vsub.f32 1.5, %v2757_v48  ;;  %v12923_v58 = vadd.f32 %v12914_v57, %v2912_v8 }
 0x88f   :  { %v10207_v31 = vpop.eup %10206  ;;  %v12926_v34 = vsub.f32 %v12649_v60, %v2632_v15  ;;  %v2722_v19 = vadd.f32 1e-05, %v2706_v11 }
 0x890   :  { %v2759_v0 = vmul.f32 %v10205_v16, %v2758_v29  ;;  %v2765_v2 = vmul.f32 %v10207_v31, %v2721_v21  ;;  %v2976_v27 = vpack.c.bf16 %v12923_v58, %v12920_v61  ;;  %vm2771_vm12 = vweird.f32 %v10207_v31 }
 0x891   :  { %10208 = vrsqrt.f32 %v2722_v19  ;;  %v2664_v14 = vmul.f32 %v12926_v34, %v12926_v34  ;;  %vm2772_vm14 = vmor %vm2770_vm13, %vm2771_vm12  ;;  %vm2780_vm0 = vweird.f32 %v2722_v19 }
 0x892   :  { %v2766_v39 = vmul.f32 %v10207_v31, %v2765_v2  ;;  %3162 = vmatmul.bf16.vlgmr.msra.gmra.mxu0 %v2976_v27  ;;  %3211 = vmatmul.bf16.vlgmr.msrb.gmra.mxu1 %v2976_v27  ;;  %v2763_v60 = vsel %vm2762_vm11, %v10205_v16, %v2759_v0 }
 0x893   :  { %3260 = vmatmul.bf16.vlgmr.msrb.gmra.mxu2 %v2976_v27  ;;  %3309 = vmatmul.bf16.vlgmr.msra.gmra.mxu3 %v2976_v27  ;;  %v2896_v30 = vmul.f32 %v2763_v60, %v12622_v47 }
 0x894   :  { %v2767_v23 = vmul.f32 0.5, %v2766_v39  ;;  %2690 = vadd.xlane.f32.xlu0 %v2664_v14  ;;  %v2681_v17 = vpop.xlane.xlu1 %2680  ;;  %v2613_v51 = vpop.xlane.xlu0 %2612 }
 0x895   :  { %v2707_v12 = vmul.f32 %v2681_v17, %v11732_v9  ;;  %v2633_v18 = vmul.f32 %v2613_v51, %v11732_v9  ;;  %v2913_v49 = vmul.f32 %v12897_v45, %v2896_v30 }
 0x896   :  { %v2768_v3 = vsub.f32 1.5, %v2767_v23 }
 0x897   :  { %v10209_v56 = vpop.eup %10208  ;;  %v2723_v63 = vadd.f32 1e-05, %v2707_v12  ;;  %v12936_v43 = vsub.f32 %v12658_v7, %v2633_v18  ;;  %v12948_v21 = vadd.f32 %v12914_v57, %v2913_v49 }
 0x898   :  { %v2769_v40 = vmul.f32 %v10207_v31, %v2768_v3  ;;  %v2775_v6 = vmul.f32 %v10209_v56, %v2722_v19  ;;  %vm2781_vm15 = vweird.f32 %v10209_v56 }
 0x899   :  { %10210 = vrsqrt.f32 %v2723_v63  ;;  %v2665_v52 = vmul.f32 %v12936_v43, %v12936_v43  ;;  %vm2782_vm3 = vmor %vm2780_vm0, %vm2781_vm15  ;;  %vm2790_vm5 = vweird.f32 %v2723_v63 }
 0x89a   :  { %v2773_v37 = vsel %vm2772_vm14, %v10207_v31, %v2769_v40  ;;  %v2776_v46 = vmul.f32 %v10209_v56, %v2775_v6 }
 0x89b   :  { %v2897_v32 = vmul.f32 %v2773_v37, %v12633_v13  ;;  %2692 = vadd.xlane.f32.xlu1 %v2665_v52 }
 0x89c   :  { %v2777_v47 = vmul.f32 0.5, %v2776_v46  ;;  %v2615_v41 = vpop.xlane.xlu0 %2614 }
 0x89d   :  { %v2634_v7 = vmul.f32 %v2615_v41, %v11732_v9  ;;  %v2914_v33 = vmul.f32 %v12897_v45, %v2897_v32 }
 0x89e   :  { %v2778_v38 = vsub.f32 1.5, %v2777_v47 }
 0x89f   :  { %v10211_v16 = vpop.eup %10210  ;;  %v12945_v24 = vsub.f32 %v12665_v53, %v2634_v7  ;;  %v12951_v44 = vadd.f32 %v12914_v57, %v2914_v33 }
 0x8a0   :  { %v2779_v13 = vmul.f32 %v10209_v56, %v2778_v38  ;;  %v2785_v5 = vmul.f32 %v10211_v16, %v2723_v63  ;;  %vm2791_vm4 = vweird.f32 %v10211_v16 }
 0x8a1   :  { %v2977_v42 = vpack.c.bf16 %v12951_v44, %v12948_v21  ;;  %v2666_v4 = vmul.f32 %v12945_v24, %v12945_v24  ;;  %vm2792_vm6 = vmor %vm2790_vm5, %vm2791_vm4 }
 0x8a2   :  { %v2786_v25 = vmul.f32 %v10211_v16, %v2785_v5  ;;  %v2783_v53 = vsel %vm2782_vm3, %v10209_v56, %v2779_v13 }
 0x8a3   :  { %3167 = vmatmul.bf16.gmra.mxu0 %v2977_v42  ;;  %3216 = vmatmul.bf16.gmra.mxu1 %v2977_v42  ;;  %v2898_v8 = vmul.f32 %v2783_v53, %v12644_v22 }
 0x8a4   :  { %v2787_v28 = vmul.f32 0.5, %v2786_v25  ;;  %3265 = vmatmul.bf16.gmra.mxu2 %v2977_v42  ;;  %3314 = vmatmul.bf16.gmra.mxu3 %v2977_v42 }
 0x8a5   :  { %2694 = vadd.xlane.f32.xlu2 %v2666_v4  ;;  %v2915_v15 = vmul.f32 %v12897_v45, %v2898_v8 }
 0x8a6   :  { %v2788_v10 = vsub.f32 1.5, %v2787_v28 }
 0x8a7   :  { %v12962_v29 = vadd.f32 %v12914_v57, %v2915_v15 }
 0x8a8   :  { %v2789_v48 = vmul.f32 %v10211_v16, %v2788_v10 }
 0x8aa   :  { %v2793_v35 = vsel %vm2792_vm6, %v10211_v16, %v2789_v48 }
 0x8ab   :  { %v2899_v54 = vmul.f32 %v2793_v35, %v12655_v26 }
 0x8ad   :  { %v2916_v11 = vmul.f32 %v12897_v45, %v2899_v54 }
 0x8af   :  { %v12965_v31 = vadd.f32 %v12914_v57, %v2916_v11 }
 0x8b1   :  { %v2978_v19 = vpack.c.bf16 %v12965_v31, %v12962_v29 }
 0x8b3   :  { %3172 = vmatmul.bf16.gmra.mxu0 %v2978_v19  ;;  %3221 = vmatmul.bf16.gmra.mxu1 %v2978_v19 }
 0x8b4   :  { %3270 = vmatmul.bf16.gmra.mxu2 %v2978_v19  ;;  %3319 = vmatmul.bf16.gmra.mxu3 %v2978_v19 }
 0x8d4   :  { %v2683_v22 = vpop.xlane.xlu1 %2682 }
 0x8d5   :  { %v2708_v26 = vmul.f32 %v2683_v22, %v11732_v9 }
 0x8d7   :  { %v2724_v0 = vadd.f32 1e-05, %v2708_v26 }
 0x8d9   :  { %10212 = vrsqrt.f32 %v2724_v0  ;;  %vm2800_vm8 = vweird.f32 %v2724_v0 }
 0x8dc   :  { %v2617_v2 = vpop.xlane.xlu1 %2616 }
 0x8dd   :  { %v2635_v27 = vmul.f32 %v2617_v2, %v11732_v9 }
 0x8df   :  { %v12972_v14 = vsub.f32 %v12814_v55, %v2635_v27  ;;  %v10213_v17 = vpop.eup %10212 }
 0x8e0   :  { %v2795_v12 = vmul.f32 %v10213_v17, %v2724_v0  ;;  %vm2801_vm7 = vweird.f32 %v10213_v17 }
 0x8e1   :  { %v2667_v39 = vmul.f32 %v12972_v14, %v12972_v14  ;;  %vm2802_vm9 = vmor %vm2800_vm8, %vm2801_vm7 }
 0x8e2   :  { %v2796_v3 = vmul.f32 %v10213_v17, %v2795_v12 }
 0x8e3   :  { %2696 = vadd.xlane.f32.xlu0 %v2667_v39 }
 0x8e4   :  { %v2619_v60 = vpop.xlane.xlu1 %2618  ;;  %v2797_v63 = vmul.f32 0.5, %v2796_v3 }
 0x8e5   :  { %v2636_v23 = vmul.f32 %v2619_v60, %v11732_v9 }
 0x8e6   :  { %v2798_v40 = vsub.f32 1.5, %v2797_v63 }
 0x8e7   :  { %v12978_v51 = vsub.f32 %v12865_v20, %v2636_v23 }
 0x8e8   :  { %v2799_v20 = vmul.f32 %v10213_v17, %v2798_v40 }
 0x8e9   :  { %v2668_v18 = vmul.f32 %v12978_v51, %v12978_v51 }
 0x8ea   :  { %v2803_v47 = vsel %vm2802_vm9, %v10213_v17, %v2799_v20 }
 0x8eb   :  { %2698 = vadd.xlane.f32.xlu1 %v2668_v18  ;;  %v2900_v42 = vmul.f32 %v2803_v47, %v12742_v50 }
 0x8ed   :  { %v2685_v55 = vpop.xlane.xlu2 %2684  ;;  %v2917_v54 = vmul.f32 %v12897_v45, %v2900_v42 }
 0x8ee   :  { %v2709_v56 = vmul.f32 %v2685_v55, %v11732_v9 }
 0x8ef   :  { %v12997_v22 = vadd.f32 %v12914_v57, %v2917_v54 }
 0x8f0   :  { %v2725_v30 = vadd.f32 1e-05, %v2709_v56 }
 0x8f2   :  { %10214 = vrsqrt.f32 %v2725_v30  ;;  %vm2810_vm11 = vweird.f32 %v2725_v30 }
 0x8f5   :  { %v2687_v6 = vpop.xlane.xlu2 %2686 }
 0x8f6   :  { %v2710_v52 = vmul.f32 %v2687_v6, %v11732_v9 }
 0x8f8   :  { %v10215_v37 = vpop.eup %10214  ;;  %v2726_v46 = vadd.f32 1e-05, %v2710_v52 }
 0x8f9   :  { %v2805_v32 = vmul.f32 %v10215_v37, %v2725_v30  ;;  %vm2811_vm10 = vweird.f32 %v10215_v37 }
 0x8fa   :  { %10216 = vrsqrt.f32 %v2726_v46  ;;  %vm2812_vm12 = vmor %vm2810_vm11, %vm2811_vm10  ;;  %vm2820_vm14 = vweird.f32 %v2726_v46 }
 0x8fb   :  { %v2806_v49 = vmul.f32 %v10215_v37, %v2805_v32 }
 0x8fd   :  { %v2807_v41 = vmul.f32 0.5, %v2806_v49  ;;  %v2621_v7 = vpop.xlane.xlu2 %2620 }
 0x8fe   :  { %v2637_v33 = vmul.f32 %v2621_v7, %v11732_v9  ;;  %v2689_v38 = vpop.xlane.xlu0 %2688 }
 0x8ff   :  { %v2808_v16 = vsub.f32 1.5, %v2807_v41  ;;  %v2711_v13 = vmul.f32 %v2689_v38, %v11732_v9 }
 0x900   :  { %v10217_v5 = vpop.eup %10216  ;;  %v12988_v4 = vsub.f32 %v12904_v36, %v2637_v33 }
 0x901   :  { %v2809_v25 = vmul.f32 %v10215_v37, %v2808_v16  ;;  %v2815_v53 = vmul.f32 %v10217_v5, %v2726_v46  ;;  %v2727_v28 = vadd.f32 1e-05, %v2711_v13  ;;  %vm2821_vm13 = vweird.f32 %v10217_v5 }
 0x902   :  { %v2669_v10 = vmul.f32 %v12988_v4, %v12988_v4  ;;  %vm2822_vm15 = vmor %vm2820_vm14, %vm2821_vm13 }
 0x903   :  { %v2813_v8 = vsel %vm2812_vm12, %v10215_v37, %v2809_v25  ;;  %v2816_v48 = vmul.f32 %v10217_v5, %v2815_v53  ;;  %10218 = vrsqrt.f32 %v2727_v28  ;;  %vm2830_vm3 = vweird.f32 %v2727_v28 }
 0x904   :  { %v2901_v35 = vmul.f32 %v2813_v8, %v12880_v62  ;;  %2700 = vadd.xlane.f32.xlu2 %v2669_v10 }
 0x905   :  { %v2817_v50 = vmul.f32 0.5, %v2816_v48 }
 0x906   :  { %v2918_v36 = vmul.f32 %v12897_v45, %v2901_v35 }
 0x907   :  { %v2691_v15 = vpop.xlane.xlu0 %2690  ;;  %v2818_v11 = vsub.f32 1.5, %v2817_v50 }
 0x908   :  { %v2712_v19 = vmul.f32 %v2691_v15, %v11732_v9  ;;  %v13000_v26 = vadd.f32 %v12914_v57, %v2918_v36 }
 0x909   :  { %v10219_v0 = vpop.eup %10218  ;;  %v2819_v39 = vmul.f32 %v10217_v5, %v2818_v11  ;;  %v9741_v11 = vld [vmem:[%s16091_s16 + $0xb8] sm:$0xff] }
 0x90a   :  { %v2825_v2 = vmul.f32 %v10219_v0, %v2727_v28  ;;  %v2728_v27 = vadd.f32 1e-05, %v2712_v19  ;;  %v2979_v62 = vpack.c.bf16 %v13000_v26, %v12997_v22  ;;  %vm2831_vm0 = vweird.f32 %v10219_v0  ;;  %v9725_v19 = vld [vmem:[%s16091_s16 + $0x38] sm:$0xff]  ;;  %3804 = vmatpush.bf16.msra.mxu2 %v9741_v11 }
 0x90b   :  { %v2823_v18 = vsel %vm2822_vm15, %v10217_v5, %v2819_v39  ;;  %vm2832_vm4 = vmor %vm2830_vm3, %vm2831_vm0  ;;  %3706 = vmatpush.bf16.msrb.mxu0 %v9725_v19  ;;  %v9729_v11 = vld [vmem:[%s16091_s16 + $0x58] sm:$0xff] }
 0x90c   :  { %v2826_v60 = vmul.f32 %v10219_v0, %v2825_v2  ;;  %10220 = vrsqrt.f32 %v2728_v27  ;;  %3177 = vmatmul.bf16.gmra.mxu0 %v2979_v62  ;;  %3226 = vmatmul.bf16.gmra.mxu1 %v2979_v62  ;;  %v2902_v63 = vmul.f32 %v2823_v18, %v12887_v1  ;;  %vm2840_vm6 = vweird.f32 %v2728_v27  ;;  %v9737_v19 = vld [vmem:[%s16091_s16 + $0x98] sm:$0xff] }
 0x90d   :  { %3275 = vmatmul.bf16.gmra.mxu2 %v2979_v62  ;;  %3324 = vmatmul.bf16.gmra.mxu3 %v2979_v62  ;;  %v9733_v62 = vld [vmem:[%s16091_s16 + $0x78] sm:$0xff] }
 0x90e   :  { %v2827_v23 = vmul.f32 0.5, %v2826_v60  ;;  %v2693_v17 = vpop.xlane.xlu1 %2692  ;;  %v2919_v20 = vmul.f32 %v12897_v45, %v2902_v63  ;;  %v9740_v60 = vld [vmem:[%s16091_s16 + $0xb0] sm:$0xff]  ;;  %3755 = vmatpush.bf16.msra.mxu1 %v9733_v62 }
 0x90f   :  { %v2713_v12 = vmul.f32 %v2693_v17, %v11732_v9  ;;  %3805 = vmatpush.bf16.msra.mxu2 %v9740_v60  ;;  %v13113_v62 = vpop.f32.mrf.mxu0  ;;  %v9720_v60 = vld [vmem:[%s16091_s16 + $0x10] sm:$0xff] }
 0x910   :  { %v2828_v3 = vsub.f32 1.5, %v2827_v23  ;;  %v13010_v33 = vadd.f32 %v12914_v57, %v2919_v20 }
 0x911   :  { %v2729_v55 = vadd.f32 1e-05, %v2713_v12 }
 0x912   :  { %v10221_v56 = vpop.eup %10220  ;;  %v2829_v30 = vmul.f32 %v10219_v0, %v2828_v3 }
 0x913   :  { %v2835_v40 = vmul.f32 %v10221_v56, %v2728_v27  ;;  %10222 = vrsqrt.f32 %v2729_v55  ;;  %vm2841_vm5 = vweird.f32 %v10221_v56  ;;  %vm2850_vm9 = vweird.f32 %v2729_v55 }
 0x914   :  { %v2833_v6 = vsel %vm2832_vm4, %v10219_v0, %v2829_v30  ;;  %vm2842_vm7 = vmor %vm2840_vm6, %vm2841_vm5  ;;  %v9749_v0 = vld [vmem:[%s16091_s16 + $0xf8] sm:$0xff] }
 0x915   :  { %v2903_v52 = vmul.f32 %v2833_v6, %v12901_v59  ;;  %v2836_v37 = vmul.f32 %v10221_v56, %v2835_v40  ;;  %3853 = vmatpush.bf16.msrb.mxu3 %v9749_v0 }
 0x917   :  { %v2837_v46 = vmul.f32 0.5, %v2836_v37  ;;  %v2920_v32 = vmul.f32 %v12897_v45, %v2903_v52 }
 0x919   :  { %v10223_v49 = vpop.eup %10222  ;;  %v2838_v47 = vsub.f32 1.5, %v2837_v46  ;;  %v13013_v1 = vadd.f32 %v12914_v57, %v2920_v32 }
 0x91a   :  { %v2845_v41 = vmul.f32 %v10223_v49, %v2729_v55  ;;  %vm2851_vm8 = vweird.f32 %v10223_v49 }
 0x91b   :  { %v2839_v7 = vmul.f32 %v10221_v56, %v2838_v47  ;;  %v2980_v59 = vpack.c.bf16 %v13013_v1, %v13010_v33  ;;  %vm2852_vm10 = vmor %vm2850_vm9, %vm2851_vm8 }
 0x91c   :  { %v2846_v38 = vmul.f32 %v10223_v49, %v2845_v41  ;;  %v9724_v41 = vld [vmem:[%s16091_s16 + $0x30] sm:$0xff] }
 0x91d   :  { %v2843_v16 = vsel %vm2842_vm7, %v10221_v56, %v2839_v7  ;;  %3182 = vmatmul.bf16.gmra.mxu0 %v2980_v59  ;;  %3231 = vmatmul.bf16.gmra.mxu1 %v2980_v59  ;;  %v9748_v7 = vld [vmem:[%s16091_s16 + $0xf0] sm:$0xff] }
 0x91e   :  { %v2847_v13 = vmul.f32 0.5, %v2846_v38  ;;  %3280 = vmatmul.bf16.gmra.mxu2 %v2980_v59  ;;  %3329 = vmatmul.bf16.gmra.mxu3 %v2980_v59  ;;  %v2904_v42 = vmul.f32 %v2843_v16, %v12926_v34  ;;  %v2695_v34 = vpop.xlane.xlu2 %2694  ;;  %v9739_v38 = vld [vmem:[%s16091_s16 + $0xa8] sm:$0xff] }
 0x91f   :  { %3707 = vmatpush.bf16.msrb.mxu0 %v9724_v41  ;;  %3854 = vmatpush.bf16.msrb.mxu3 %v9748_v7  ;;  %v9723_v59 = vld [vmem:[%s16091_s16 + $0x28] sm:$0xff]  ;;  %v9742_v41 = vld [vmem:[%s16091_s16 + $0xc0] sm:$0xff]  ;;  %v3165_v7 = vpop.f32.mrf.mxu0 }
 0x920   :  { %v2848_v5 = vsub.f32 1.5, %v2847_v13  ;;  %v2921_v10 = vmul.f32 %v12897_v45, %v2904_v42  ;;  %v9747_v16 = vld [vmem:[%s16091_s16 + $0xe8] sm:$0xff]  ;;  %3806 = vmatpush.bf16.msra.mxu2 %v9739_v38 }
 0x922   :  { %v2849_v25 = vmul.f32 %v10223_v49, %v2848_v5  ;;  %v13022_v48 = vadd.f32 %v12914_v57, %v2921_v10  ;;  %v9731_v5 = vld [vmem:[%s16091_s16 + $0x68] sm:$0xff]  ;;  %v9722_v10 = vld [vmem:[%s16091_s16 + $0x20] sm:$0xff] }
 0x923   :  { %3708 = vmatpush.bf16.msrb.mxu0 %v9723_v59  ;;  %3855 = vmatpush.bf16.msrb.mxu3 %v9747_v16 }
 0x924   :  { %v2853_v53 = vsel %vm2852_vm10, %v10223_v49, %v2849_v25 }
 0x925   :  { %v2905_v28 = vmul.f32 %v2853_v53, %v12936_v43  ;;  %v2714_v43 = vmul.f32 %v2695_v34, %v11732_v9  ;;  %v9746_v34 = vld [vmem:[%s16091_s16 + $0xe0] sm:$0xff] }
 0x927   :  { %v2922_v8 = vmul.f32 %v12897_v45, %v2905_v28  ;;  %v2730_v50 = vadd.f32 1e-05, %v2714_v43  ;;  %3709 = vmatpush.bf16.msrb.mxu0 %v9722_v10  ;;  %3856 = vmatpush.bf16.msrb.mxu3 %v9746_v34 }
 0x929   :  { %v13025_v35 = vadd.f32 %v12914_v57, %v2922_v8  ;;  %10224 = vrsqrt.f32 %v2730_v50  ;;  %vm2860_vm12 = vweird.f32 %v2730_v50  ;;  %v9730_v8 = vld [vmem:[%s16091_s16 + $0x60] sm:$0xff] }
 0x92b   :  { %v2981_v54 = vpack.c.bf16 %v13025_v35, %v13022_v48 }
 0x92d   :  { %3187 = vmatmul.bf16.gmra.mxu0 %v2981_v54  ;;  %3236 = vmatmul.bf16.gmra.mxu1 %v2981_v54 }
 0x92e   :  { %3285 = vmatmul.bf16.gmra.mxu2 %v2981_v54  ;;  %3334 = vmatmul.bf16.gmra.mxu3 %v2981_v54  ;;  %v9738_v54 = vld [vmem:[%s16091_s16 + $0xa0] sm:$0xff] }
 0x92f   :  { %v10225_v36 = vpop.eup %10224  ;;  %3807 = vmatpush.bf16.msra.mxu2 %v9738_v54  ;;  %v3168_v54 = vpop.f32.mrf.mxu0 }
 0x930   :  { %v2855_v15 = vmul.f32 %v10225_v36, %v2730_v50  ;;  %vm2861_vm11 = vweird.f32 %v10225_v36 }
 0x931   :  { %vm2862_vm13 = vmor %vm2860_vm12, %vm2861_vm11 }
 0x932   :  { %v2856_v2 = vmul.f32 %v10225_v36, %v2855_v15  ;;  %v9721_v15 = vld [vmem:[%s16091_s16 + $0x18] sm:$0xff] }
 0x933   :  { %3710 = vmatpush.bf16.msrb.mxu0 %v9721_v15  ;;  %3808 = vmatpush.bf16.msra.mxu2 %v9737_v19 }
 0x934   :  { %v2857_v17 = vmul.f32 0.5, %v2856_v2  ;;  %v9745_v2 = vld [vmem:[%s16091_s16 + $0xd8] sm:$0xff] }
 0x935   :  { %3857 = vmatpush.bf16.msrb.mxu3 %v9745_v2 }
 0x936   :  { %v2858_v12 = vsub.f32 1.5, %v2857_v17  ;;  %v9736_v17 = vld [vmem:[%s16091_s16 + $0x90] sm:$0xff] }
 0x937   :  { %3711 = vmatpush.bf16.msrb.mxu0 %v9720_v60  ;;  %3809 = vmatpush.bf16.msra.mxu2 %v9736_v17 }
 0x938   :  { %v2859_v55 = vmul.f32 %v10225_v36, %v2858_v12  ;;  %v13126_v12 = vpop.f32.mrf.mxu2 }
 0x93a   :  { %v2863_v40 = vsel %vm2862_vm13, %v10225_v36, %v2859_v55 }
 0x93b   :  { %v2906_v46 = vmul.f32 %v2863_v40, %v12945_v24  ;;  %v9732_v24 = vld [vmem:[%s16091_s16 + $0x70] sm:$0xff] }
 0x93c   :  { %3756 = vmatpush.bf16.msra.mxu1 %v9732_v24 }
 0x93d   :  { %v2923_v47 = vmul.f32 %v12897_v45, %v2906_v46 }
 0x93f   :  { %v13078_v42 = vadd.f32 %v12914_v57, %v2923_v47  ;;  %v9734_v47 = vld [vmem:[%s16091_s16 + $0x80] sm:$0xff] }
 0x940   :  { %3757 = vmatpush.bf16.msra.mxu1 %v9731_v5 }
 0x944   :  { %3758 = vmatpush.bf16.msra.mxu1 %v9730_v8 }
 0x948   :  { %3759 = vmatpush.bf16.msra.mxu1 %v9729_v11 }
 0x956   :  { %v2697_v27 = vpop.xlane.xlu0 %2696 }
 0x957   :  { %v2715_v39 = vmul.f32 %v2697_v27, %v11732_v9 }
 0x959   :  { %v2731_v23 = vadd.f32 1e-05, %v2715_v39  ;;  %v13115_v39 = vpop.f32.mrf.mxu1 }
 0x95b   :  { %10226 = vrsqrt.f32 %v2731_v23  ;;  %vm2870_vm15 = vweird.f32 %v2731_v23 }
 0x95e   :  { %v2699_v18 = vpop.xlane.xlu1 %2698 }
 0x95f   :  { %v2716_v30 = vmul.f32 %v2699_v18, %v11732_v9  ;;  %v13128_v18 = vpop.f32.mrf.mxu3 }
 0x961   :  { %v10227_v3 = vpop.eup %10226  ;;  %v13047_v52 = vadd.f32 1e-05, %v2716_v30  ;;  %v9727_v30 = vld [vmem:[%s16091_s16 + $0x48] sm:$0xff] }
 0x962   :  { %v2865_v56 = vmul.f32 %v10227_v3, %v2731_v23  ;;  %vm2871_vm14 = vweird.f32 %v10227_v3  ;;  %v9728_v23 = vld [vmem:[%s16091_s16 + $0x50] sm:$0xff] }
 0x963   :  { %10228 = vrsqrt.f32 %v13047_v52  ;;  %vm2872_vm0 = vmor %vm2870_vm15, %vm2871_vm14  ;;  %3760 = vmatpush.bf16.msra.mxu1 %v9728_v23  ;;  %vm2880_vm4 = vweird.f32 %v13047_v52 }
 0x964   :  { %v2866_v63 = vmul.f32 %v10227_v3, %v2865_v56  ;;  %v9719_v56 = vld [vmem:[%s16091_s16 + $0x8] sm:$0xff] }
 0x965   :  { %3712 = vmatpush.bf16.msrb.mxu0 %v9719_v56 }
 0x966   :  { %v2867_v6 = vmul.f32 0.5, %v2866_v63  ;;  %v9735_v63 = vld [vmem:[%s16091_s16 + $0x88] sm:$0xff] }
 0x967   :  { %3810 = vmatpush.bf16.msra.mxu2 %v9735_v63  ;;  %3761 = vmatpush.bf16.msra.mxu1 %v9727_v30  ;;  %v3312_v59 = vpop.f32.mrf.mxu3 }
 0x968   :  { %v2868_v37 = vsub.f32 1.5, %v2867_v6  ;;  %v9743_v6 = vld [vmem:[%s16091_s16 + $0xc8] sm:$0xff] }
 0x969   :  { %v13072_v13 = vpop.eup %10228 }
 0x96a   :  { %v2869_v20 = vmul.f32 %v10227_v3, %v2868_v37  ;;  %v2875_v53 = vmul.f32 %v13072_v13, %v13047_v52  ;;  %vm2881_vm3 = vweird.f32 %v13072_v13  ;;  %v3214_v52 = vpop.f32.mrf.mxu1 }
 0x96b   :  { %vm2882_vm5 = vmor %vm2880_vm4, %vm2881_vm3  ;;  %3811 = vmatpush.bf16.msra.mxu2 %v9734_v47 }
 0x96c   :  { %v2873_v32 = vsel %vm2872_vm0, %v10227_v3, %v2869_v20  ;;  %v2876_v43 = vmul.f32 %v13072_v13, %v2875_v53  ;;  %v9744_v3 = vld [vmem:[%s16091_s16 + $0xd0] sm:$0xff] }
 0x96d   :  { %v2907_v49 = vmul.f32 %v2873_v32, %v12972_v14  ;;  %3858 = vmatpush.bf16.msrb.mxu3 %v9744_v3  ;;  %v9718_v32 = vld [vmem:[%s16091_s16] sm:$0xff] }
 0x96e   :  { %v2877_v27 = vmul.f32 0.5, %v2876_v43  ;;  %3713 = vmatpush.bf16.msrb.mxu0 %v9718_v32 }
 0x96f   :  { %v2924_v14 = vmul.f32 %v12897_v45, %v2907_v49  ;;  %v9726_v49 = vld [vmem:[%s16091_s16 + $0x40] sm:$0xff] }
 0x970   :  { %v2878_v55 = vsub.f32 1.5, %v2877_v27  ;;  %3762 = vmatpush.bf16.msra.mxu1 %v9726_v49 }
 0x971   :  { %v13081_v25 = vadd.f32 %v12914_v57, %v2924_v14  ;;  %3859 = vmatpush.bf16.msrb.mxu3 %v9743_v6  ;;  %v3263_v14 = vpop.f32.mrf.mxu2 }
 0x972   :  { %v2879_v37 = vmul.f32 %v13072_v13, %v2878_v55  ;;  %v3217_v34 = vpop.f32.mrf.mxu1 }
 0x973   :  { %v2982_v28 = vpack.c.bf16 %v13081_v25, %v13078_v42 }
 0x974   :  { %v2883_v24 = vsel %vm2882_vm5, %v13072_v13, %v2879_v37 }
 0x975   :  { %3192 = vmatmul.bf16.gmra.mxu0 %v2982_v28  ;;  %3241 = vmatmul.bf16.gmra.mxu1 %v2982_v28  ;;  %v2908_v5 = vmul.f32 %v2883_v24, %v12978_v51 }
 0x976   :  { %3290 = vmatmul.bf16.gmra.mxu2 %v2982_v28  ;;  %3339 = vmatmul.bf16.gmra.mxu3 %v2982_v28 }
 0x977   :  { %v2701_v50 = vpop.xlane.xlu2 %2700  ;;  %3860 = vmatpush.bf16.msrb.mxu3 %v9742_v41  ;;  %v2925_v8 = vmul.f32 %v12897_v45, %v2908_v5 }
 0x978   :  { %v2717_v36 = vmul.f32 %v2701_v50, %v11732_v9  ;;  %v3315_v50 = vpop.f32.mrf.mxu3 }
 0x979   :  { %v3266_v43 = vpop.f32.mrf.mxu2 }
 0x97a   :  { %v2733_v0 = vadd.f32 1e-05, %v2717_v36  ;;  %v13166_v36 = vadd.f32 %v12914_v57, %v2925_v8  ;;  %v3219_v2 = vpop.f32.mrf.mxu1 }
 0x97c   :  { %10230 = vrsqrt.f32 %v2733_v0  ;;  %vm2890_vm7 = vweird.f32 %v2733_v0 }
 0x980   :  { %v3317_v17 = vpop.f32.mrf.mxu3 }
 0x981   :  { %v3268_v23 = vpop.f32.mrf.mxu2 }
 0x982   :  { %v10231_v40 = vpop.eup %10230 }
 0x983   :  { %v2885_v46 = vmul.f32 %v10231_v40, %v2733_v0  ;;  %vm2891_vm6 = vweird.f32 %v10231_v40 }
 0x984   :  { %vm2892_vm8 = vmor %vm2890_vm7, %vm2891_vm6 }
 0x985   :  { %v2886_v20 = vmul.f32 %v10231_v40, %v2885_v46 }
 0x987   :  { %v2887_v38 = vmul.f32 0.5, %v2886_v20 }
 0x989   :  { %v2888_v16 = vsub.f32 1.5, %v2887_v38 }
 0x98b   :  { %v2889_v53 = vmul.f32 %v10231_v40, %v2888_v16 }
 0x98d   :  { %v2893_v28 = vsel %vm2892_vm8, %v10231_v40, %v2889_v53 }
 0x98e   :  { %v2909_v10 = vmul.f32 %v2893_v28, %v12988_v4  ;;  %v2984_v4 = vld [vmem:[%s16092_s15] sm:$0xf] }
 0x98f   :  { %v13178_v11 = vperm.slane %v2984_v4, 1  ;;  %v13180_v19 = vperm.slane %v2984_v4, 2  ;;  %v13182_v0 = vperm.slane %v2984_v4, 3 }
 0x990   :  { %v2926_v13 = vmul.f32 %v12897_v45, %v2909_v10  ;;  %v13176_v45 = vperm.slane %v2984_v4, 0 }
 0x991   :  { %v3215_v60 = vadd.f32 %v3214_v52, %v13178_v11  ;;  %v3264_v3 = vadd.f32 %v3263_v14, %v13180_v19  ;;  %v3313_v55 = vadd.f32 %v3312_v59, %v13182_v0  ;;  %v3213_v30 = vadd.f32 %v13115_v39, %v13178_v11  ;;  %v3222_v39 = vpop.f32.mrf.mxu1  ;;  %v3271_v14 = vpop.f32.mrf.mxu2 }
 0x992   :  { %v13169_v15 = vadd.f32 %v12914_v57, %v2926_v13  ;;  %v3170_v57 = vpop.f32.mrf.mxu0  ;;  %v3166_v27 = vadd.f32 %v3165_v7, %v13176_v45  ;;  %v3164_v56 = vadd.f32 %v13113_v62, %v13176_v45  ;;  %v3262_v63 = vadd.f32 %v13126_v12, %v13180_v19  ;;  %v3320_v59 = vpop.f32.mrf.mxu3 }
 0x993   :  { %v3311_v40 = vadd.f32 %v13128_v18, %v13182_v0  ;;  %v3355_v37 = vmax.f32 %v3215_v60, 0.0  ;;  %v3356_v46 = vmax.f32 %v3264_v3, 0.0  ;;  %v3357_v20 = vmax.f32 %v3313_v55, 0.0 }
 0x994   :  { %v2983_v51 = vpack.c.bf16 %v13169_v15, %v13166_v36  ;;  %v3354_v6 = vmax.f32 %v3166_v27, 0.0  ;;  %v3350_v32 = vmax.f32 %v3164_v56, 0.0  ;;  %v3351_v49 = vmax.f32 %v3213_v30, 0.0 }
 0x995   :  { %v3352_v47 = vmax.f32 %v3262_v63, 0.0  ;;  %v3353_v41 = vmax.f32 %v3311_v40, 0.0  ;;  %v3171_v12 = vadd.f32 %v3170_v57, %v13176_v45  ;;  %v3220_v18 = vadd.f32 %v3219_v2, %v13178_v11 }
 0x996   :  { %3197 = vmatmul.bf16.gmra.mxu0 %v2983_v51  ;;  %3246 = vmatmul.bf16.gmra.mxu1 %v2983_v51  ;;  %v3478_v7 = vpack.c.bf16 %v3354_v6, %v3350_v32  ;;  %v3479_v52 = vpack.c.bf16 %v3355_v37, %v3351_v49  ;;  %v3269_v16 = vadd.f32 %v3268_v23, %v13180_v19 }
 0x997   :  { %3295 = vmatmul.bf16.gmra.mxu2 %v2983_v51  ;;  %3344 = vmatmul.bf16.gmra.mxu3 %v2983_v51  ;;  %v3480_v62 = vpack.c.bf16 %v3356_v46, %v3352_v47  ;;  %v3481_v24 = vpack.c.bf16 %v3357_v20, %v3353_v41  ;;  %v3318_v5 = vadd.f32 %v3317_v17, %v13182_v0  ;;  %v3362_v4 = vmax.f32 %v3171_v12, 0.0 }
 0x998   :  { %v3169_v53 = vadd.f32 %v3168_v54, %v13176_v45  ;;  %v3218_v28 = vadd.f32 %v3217_v34, %v13178_v11  ;;  %v3267_v10 = vadd.f32 %v3266_v43, %v13180_v19  ;;  %v3316_v8 = vadd.f32 %v3315_v50, %v13182_v0 }
 0x999   :  { %v3224_v51 = vpop.f32.mrf.mxu1  ;;  %v3363_v27 = vmax.f32 %v3220_v18, 0.0  ;;  %v3273_v60 = vpop.f32.mrf.mxu2  ;;  %v3364_v3 = vmax.f32 %v3269_v16, 0.0  ;;  %v3365_v2 = vmax.f32 %v3318_v5, 0.0  ;;  %v3223_v47 = vadd.f32 %v3222_v39, %v13178_v11 }
 0x99a   :  { %v3173_v38 = vpop.f32.mrf.mxu0  ;;  %v3322_v57 = vpop.f32.mrf.mxu3  ;;  %v3358_v55 = vmax.f32 %v3169_v53, 0.0  ;;  %v3359_v23 = vmax.f32 %v3218_v28, 0.0  ;;  %v3360_v56 = vmax.f32 %v3267_v10, 0.0  ;;  %v3361_v17 = vmax.f32 %v3316_v8, 0.0 }
 0x99b   :  { %v3225_v46 = vadd.f32 %v3224_v51, %v13178_v11  ;;  %v3274_v20 = vadd.f32 %v3273_v60, %v13180_v19  ;;  %v3323_v32 = vadd.f32 %v3322_v57, %v13182_v0  ;;  %v3174_v49 = vadd.f32 %v3173_v38, %v13176_v45 }
 0x99c   :  { %v3482_v30 = vpack.c.bf16 %v3362_v4, %v3358_v55  ;;  %v3483_v54 = vpack.c.bf16 %v3363_v27, %v3359_v23  ;;  %v3484_v63 = vpack.c.bf16 %v3364_v3, %v3360_v56  ;;  %v3485_v34 = vpack.c.bf16 %v3365_v2, %v3361_v17 }
 0x99d   :  { %v3272_v41 = vadd.f32 %v3271_v14, %v13180_v19  ;;  %v3373_v12 = vmax.f32 %v3323_v32, 0.0  ;;  %v3366_v5 = vmax.f32 %v3174_v49, 0.0  ;;  %v3367_v53 = vmax.f32 %v3223_v47, 0.0 }
 0x99f   :  { %v3368_v8 = vmax.f32 %v3272_v41, 0.0 }
 0x9a1   :  { %v3227_v50 = vpop.f32.mrf.mxu1  ;;  %v3276_v40 = vpop.f32.mrf.mxu2 }
 0x9a2   :  { %v3175_v13 = vpop.f32.mrf.mxu0  ;;  %v3325_v6 = vpop.f32.mrf.mxu3  ;;  %v3228_v56 = vadd.f32 %v3227_v50, %v13178_v11  ;;  %v3277_v17 = vadd.f32 %v3276_v40, %v13180_v19 }
 0x9a3   :  { %v3176_v37 = vadd.f32 %v3175_v13, %v13176_v45 }
 0x9a4   :  { %v3376_v32 = vmax.f32 %v3277_v17, 0.0 }
 0x9a6   :  { %3714 = vmatmul.bf16.vlgmr.msrb.gmra.mxu0 %v3478_v7  ;;  %3763 = vmatmul.bf16.vlgmr.msra.gmra.mxu1 %v3479_v52  ;;  %v3321_v7 = vadd.f32 %v3320_v59, %v13182_v0  ;;  %v3370_v52 = vmax.f32 %v3176_v37, 0.0 }
 0x9a7   :  { %3812 = vmatmul.bf16.vlgmr.msra.gmra.mxu2 %v3480_v62  ;;  %3861 = vmatmul.bf16.vlgmr.msrb.gmra.mxu3 %v3481_v24  ;;  %v3371_v62 = vmax.f32 %v3225_v46, 0.0  ;;  %v3372_v24 = vmax.f32 %v3274_v20, 0.0  ;;  %v3375_v20 = vmax.f32 %v3228_v56, 0.0 }
 0x9a8   :  { %v3369_v13 = vmax.f32 %v3321_v7, 0.0  ;;  %v3486_v51 = vpack.c.bf16 %v3370_v52, %v3366_v5 }
 0x9a9   :  { %v3229_v16 = vpop.f32.mrf.mxu1  ;;  %v3278_v28 = vpop.f32.mrf.mxu2  ;;  %v3487_v38 = vpack.c.bf16 %v3371_v62, %v3367_v53  ;;  %v3488_v4 = vpack.c.bf16 %v3372_v24, %v3368_v8 }
 0x9aa   :  { %v3178_v43 = vpop.f32.mrf.mxu0  ;;  %v3327_v10 = vpop.f32.mrf.mxu3  ;;  %v3489_v39 = vpack.c.bf16 %v3373_v12, %v3369_v13  ;;  %v3230_v60 = vadd.f32 %v3229_v16, %v13178_v11  ;;  %v3279_v2 = vadd.f32 %v3278_v28, %v13180_v19 }
 0x9ab   :  { %v3328_v55 = vadd.f32 %v3327_v10, %v13182_v0  ;;  %v3179_v23 = vadd.f32 %v3178_v43, %v13176_v45 }
 0x9ad   :  { %v3381_v37 = vmax.f32 %v3328_v55, 0.0  ;;  %v3374_v46 = vmax.f32 %v3179_v23, 0.0 }
 0x9b1   :  { %v3232_v59 = vpop.f32.mrf.mxu1  ;;  %v3281_v57 = vpop.f32.mrf.mxu2 }
 0x9b2   :  { %v3180_v18 = vpop.f32.mrf.mxu0  ;;  %v3330_v3 = vpop.f32.mrf.mxu3  ;;  %v3233_v5 = vadd.f32 %v3232_v59, %v13178_v11  ;;  %v3282_v53 = vadd.f32 %v3281_v57, %v13180_v19 }
 0x9b3   :  { %v3181_v27 = vadd.f32 %v3180_v18, %v13176_v45  ;;  %v3331_v28 = vadd.f32 %v3330_v3, %v13182_v0 }
 0x9b4   :  { %v3384_v55 = vmax.f32 %v3282_v53, 0.0 }
 0x9b5   :  { %v3385_v23 = vmax.f32 %v3331_v28, 0.0 }
 0x9b6   :  { %3719 = vmatmul.bf16.gmra.mxu0 %v3482_v30  ;;  %3768 = vmatmul.bf16.gmra.mxu1 %v3483_v54  ;;  %v3326_v30 = vadd.f32 %v3325_v6, %v13182_v0  ;;  %v3378_v54 = vmax.f32 %v3181_v27, 0.0 }
 0x9b7   :  { %3817 = vmatmul.bf16.gmra.mxu2 %v3484_v63  ;;  %3866 = vmatmul.bf16.gmra.mxu3 %v3485_v34  ;;  %v3379_v63 = vmax.f32 %v3230_v60, 0.0  ;;  %v3380_v34 = vmax.f32 %v3279_v2, 0.0  ;;  %v3383_v2 = vmax.f32 %v3233_v5, 0.0 }
 0x9b8   :  { %v3377_v49 = vmax.f32 %v3326_v30, 0.0  ;;  %v3490_v47 = vpack.c.bf16 %v3378_v54, %v3374_v46 }
 0x9b9   :  { %v3491_v41 = vpack.c.bf16 %v3379_v63, %v3375_v20  ;;  %v3234_v52 = vpop.f32.mrf.mxu1  ;;  %v3492_v62 = vpack.c.bf16 %v3380_v34, %v3376_v32  ;;  %v3283_v24 = vpop.f32.mrf.mxu2 }
 0x9ba   :  { %v3183_v14 = vpop.f32.mrf.mxu0  ;;  %v3493_v43 = vpack.c.bf16 %v3381_v37, %v3377_v49  ;;  %v3332_v50 = vpop.f32.mrf.mxu3  ;;  %v3235_v6 = vadd.f32 %v3234_v52, %v13178_v11  ;;  %v3284_v12 = vadd.f32 %v3283_v24, %v13180_v19 }
 0x9bb   :  { %v3333_v18 = vadd.f32 %v3332_v50, %v13182_v0  ;;  %v3184_v16 = vadd.f32 %v3183_v14, %v13176_v45 }
 0x9bd   :  { %v3389_v27 = vmax.f32 %v3333_v18, 0.0  ;;  %v3382_v60 = vmax.f32 %v3184_v16, 0.0 }
 0x9bf   :  { %v3497_v59 = vpack.c.bf16 %v3389_v27, %v3385_v23 }
 0x9c1   :  { %v3237_v8 = vpop.f32.mrf.mxu1 }
 0x9c2   :  { %v3185_v7 = vpop.f32.mrf.mxu0  ;;  %v3238_v32 = vadd.f32 %v3237_v8, %v13178_v11 }
 0x9c3   :  { %v3186_v40 = vadd.f32 %v3185_v7, %v13176_v45 }
 0x9c4   :  { %v3391_v24 = vmax.f32 %v3238_v32, 0.0 }
 0x9c5   :  { %v3386_v13 = vmax.f32 %v3186_v40, 0.0 }
 0x9c6   :  { %3724 = vmatmul.bf16.gmra.mxu0 %v3486_v51  ;;  %3773 = vmatmul.bf16.gmra.mxu1 %v3487_v38  ;;  %v3387_v51 = vmax.f32 %v3235_v6, 0.0  ;;  %v3286_v38 = vpop.f32.mrf.mxu2 }
 0x9c7   :  { %3822 = vmatmul.bf16.gmra.mxu2 %v3488_v4  ;;  %3871 = vmatmul.bf16.gmra.mxu3 %v3489_v39  ;;  %v3335_v4 = vpop.f32.mrf.mxu3  ;;  %v3388_v39 = vmax.f32 %v3284_v12, 0.0  ;;  %v3494_v56 = vpack.c.bf16 %v3386_v13, %v3382_v60  ;;  %v3287_v49 = vadd.f32 %v3286_v38, %v13180_v19 }
 0x9c8   :  { %v3495_v14 = vpack.c.bf16 %v3387_v51, %v3383_v2 }
 0x9c9   :  { %v3496_v17 = vpack.c.bf16 %v3388_v39, %v3384_v55  ;;  %v3239_v3 = vpop.f32.mrf.mxu1  ;;  %v3392_v6 = vmax.f32 %v3287_v49, 0.0 }
 0x9ca   :  { %v3188_v10 = vpop.f32.mrf.mxu0  ;;  %v3240_v34 = vadd.f32 %v3239_v3, %v13178_v11 }
 0x9cb   :  { %v3189_v20 = vadd.f32 %v3188_v10, %v13176_v45 }
 0x9cc   :  { %v3395_v7 = vmax.f32 %v3240_v34, 0.0 }
 0x9ce   :  { %v3288_v30 = vpop.f32.mrf.mxu2  ;;  %v3499_v16 = vpack.c.bf16 %v3395_v7, %v3391_v24 }
 0x9cf   :  { %v3337_v54 = vpop.f32.mrf.mxu3  ;;  %v3289_v37 = vadd.f32 %v3288_v30, %v13180_v19 }
 0x9d0   :  { %v3338_v46 = vadd.f32 %v3337_v54, %v13182_v0 }
 0x9d1   :  { %v3396_v52 = vmax.f32 %v3289_v37, 0.0 }
 0x9d2   :  { %v3190_v57 = vpop.f32.mrf.mxu0 }
 0x9d3   :  { %v3191_v63 = vadd.f32 %v3190_v57, %v13176_v45  ;;  %v3500_v5 = vpack.c.bf16 %v3396_v52, %v3392_v6 }
 0x9d6   :  { %3729 = vmatmul.bf16.gmra.mxu0 %v3490_v47  ;;  %3778 = vmatmul.bf16.gmra.mxu1 %v3491_v41  ;;  %v3336_v47 = vadd.f32 %v3335_v4, %v13182_v0  ;;  %v3394_v41 = vmax.f32 %v3191_v63, 0.0 }
 0x9d7   :  { %3827 = vmatmul.bf16.gmra.mxu2 %v3492_v62  ;;  %3876 = vmatmul.bf16.gmra.mxu3 %v3493_v43  ;;  %v3397_v62 = vmax.f32 %v3338_v46, 0.0  ;;  %v3390_v43 = vmax.f32 %v3189_v20, 0.0 }
 0x9d8   :  { %v3393_v12 = vmax.f32 %v3336_v47, 0.0 }
 0x9d9   :  { %v3498_v18 = vpack.c.bf16 %v3394_v41, %v3390_v43 }
 0x9da   :  { %v3501_v53 = vpack.c.bf16 %v3397_v62, %v3393_v12 }
 0x9e6   :  { %3734 = vmatmul.bf16.gmra.mxu0 %v3494_v56  ;;  %3783 = vmatmul.bf16.gmra.mxu1 %v3495_v14 }
 0x9e7   :  { %3832 = vmatmul.bf16.gmra.mxu2 %v3496_v17  ;;  %3881 = vmatmul.bf16.gmra.mxu3 %v3497_v59 }
 0x9f2   :  { %v3193_v50 = vpop.f32.mrf.mxu0  ;;  %v3242_v40 = vpop.f32.mrf.mxu1 }
 0x9f3   :  { %v3194_v4 = vadd.f32 %v3193_v50, %v13176_v45  ;;  %v3243_v39 = vadd.f32 %v3242_v40, %v13178_v11 }
 0x9f5   :  { %v3398_v14 = vmax.f32 %v3194_v4, 0.0  ;;  %v3399_v17 = vmax.f32 %v3243_v39, 0.0 }
 0x9f6   :  { %3739 = vmatmul.bf16.gmra.mxu0 %v3498_v18  ;;  %3788 = vmatmul.bf16.gmra.mxu1 %v3499_v16 }
 0x9f7   :  { %3837 = vmatmul.bf16.gmra.mxu2 %v3500_v5  ;;  %3886 = vmatmul.bf16.gmra.mxu3 %v3501_v53 }
 0x9f9   :  { %v3291_v28 = vpop.f32.mrf.mxu2  ;;  %v3340_v10 = vpop.f32.mrf.mxu3 }
 0x9fa   :  { %v3195_v8 = vpop.f32.mrf.mxu0  ;;  %v3244_v13 = vpop.f32.mrf.mxu1  ;;  %v3292_v27 = vadd.f32 %v3291_v28, %v13180_v19  ;;  %v3341_v60 = vadd.f32 %v3340_v10, %v13182_v0  ;;  %v13253_v10 = vld [vmem:[%s16093_s17] ss:$0 sm:$0xff] }
 0x9fb   :  { %v3196_v51 = vadd.f32 %v3195_v8, %v13176_v45  ;;  %v3245_v38 = vadd.f32 %v3244_v13, %v13178_v11 }
 0x9fc   :  { %v3400_v3 = vmax.f32 %v3292_v27, 0.0  ;;  %v3401_v30 = vmax.f32 %v3341_v60, 0.0 }
 0x9fd   :  { %v3402_v2 = vmax.f32 %v3196_v51, 0.0  ;;  %v3403_v55 = vmax.f32 %v3245_v38, 0.0 }
 0x9ff   :  { %v3502_v34 = vpack.c.bf16 %v3402_v2, %v3398_v14  ;;  %v3503_v37 = vpack.c.bf16 %v3403_v55, %v3399_v17 }
 0xa01   :  { %v3293_v23 = vpop.f32.mrf.mxu2  ;;  %v3342_v56 = vpop.f32.mrf.mxu3 }
 0xa02   :  { %v3294_v59 = vadd.f32 %v3293_v23, %v13180_v19  ;;  %v3343_v57 = vadd.f32 %v3342_v56, %v13182_v0 }
 0xa04   :  { %v3404_v54 = vmax.f32 %v3294_v59, 0.0  ;;  %v3405_v63 = vmax.f32 %v3343_v57, 0.0 }
 0xa06   :  { %3744 = vmatmul.bf16.gmra.mxu0 %v3502_v34  ;;  %3793 = vmatmul.bf16.gmra.mxu1 %v3503_v37  ;;  %v3504_v46 = vpack.c.bf16 %v3404_v54, %v3400_v3  ;;  %v3505_v20 = vpack.c.bf16 %v3405_v63, %v3401_v30 }
 0xa08   :  { %3842 = vmatmul.bf16.gmra.mxu2 %v3504_v46  ;;  %3891 = vmatmul.bf16.gmra.mxu3 %v3505_v20 }
 0xa13   :  { %v3198_v32 = vpop.f32.mrf.mxu0  ;;  %v3247_v49 = vpop.f32.mrf.mxu1 }
 0xa14   :  { %v3199_v47 = vadd.f32 %v3198_v32, %v13176_v45  ;;  %v3248_v41 = vadd.f32 %v3247_v49, %v13178_v11 }
 0xa16   :  { %v3406_v40 = vmax.f32 %v3199_v47, 0.0  ;;  %v3407_v6 = vmax.f32 %v3248_v41, 0.0 }
 0xa1a   :  { %v3296_v7 = vpop.f32.mrf.mxu2  ;;  %v3345_v52 = vpop.f32.mrf.mxu3 }
 0xa1b   :  { %v3200_v62 = vpop.f32.mrf.mxu0  ;;  %v3249_v43 = vpop.f32.mrf.mxu1  ;;  %v3297_v16 = vadd.f32 %v3296_v7, %v13180_v19  ;;  %v3346_v28 = vadd.f32 %v3345_v52, %v13182_v0 }
 0xa1c   :  { %v3201_v24 = vadd.f32 %v3200_v62, %v13176_v45  ;;  %v3250_v50 = vadd.f32 %v3249_v43, %v13178_v11 }
 0xa1d   :  { %v3408_v4 = vmax.f32 %v3297_v16, 0.0  ;;  %v3409_v39 = vmax.f32 %v3346_v28, 0.0 }
 0xa1e   :  { %v3410_v12 = vmax.f32 %v3201_v24, 0.0  ;;  %v3411_v18 = vmax.f32 %v3250_v50, 0.0 }
 0xa20   :  { %v3506_v5 = vpack.c.bf16 %v3410_v12, %v3406_v40  ;;  %v3507_v53 = vpack.c.bf16 %v3411_v18, %v3407_v6 }
 0xa22   :  { %v3298_v8 = vpop.f32.mrf.mxu2  ;;  %v3347_v13 = vpop.f32.mrf.mxu3  ;;  %3749 = vmatmul.bf16.gmra.mxu0 %v3506_v5  ;;  %3798 = vmatmul.bf16.gmra.mxu1 %v3507_v53 }
 0xa23   :  { %v3299_v45 = vadd.f32 %v3298_v8, %v13180_v19  ;;  %v3348_v11 = vadd.f32 %v3347_v13, %v13182_v0  ;;  %v3715_v51 = vpop.f32.mrf.mxu0  ;;  %v3764_v38 = vpop.f32.mrf.mxu1 }
 0xa24   :  { %v3716_v2 = vadd.f32 %v13253_v10, %v3715_v51 }
 0xa25   :  { %v3412_v27 = vmax.f32 %v3299_v45, 0.0  ;;  %v3413_v60 = vmax.f32 %v3348_v11, 0.0 }
 0xa26   :  { %v3765_v56 = vadd.f32 %v3764_v38, %v3716_v2 }
 0xa27   :  { %v3508_v55 = vpack.c.bf16 %v3412_v27, %v3408_v4  ;;  %v3509_v23 = vpack.c.bf16 %v3413_v60, %v3409_v39 }
 0xa29   :  { %3847 = vmatmul.bf16.gmra.mxu2 %v3508_v55  ;;  %3896 = vmatmul.bf16.gmra.mxu3 %v3509_v23 }
 0xa2a   :  { %v3813_v14 = vpop.f32.mrf.mxu2  ;;  %v3862_v17 = vpop.f32.mrf.mxu3 }
 0xa2b   :  { %v3814_v59 = vadd.f32 %v3813_v14, %v3765_v56  ;;  %v3717_v57 = vpop.f32.mrf.mxu0  ;;  %v3766_v19 = vpop.f32.mrf.mxu1 }
 0xa2c   :  { %v3718_v0 = vadd.f32 %v13253_v10, %v3717_v57 }
 0xa2d   :  { %v3863_v3 = vadd.f32 %v3862_v17, %v3814_v59 }
 0xa2e   :  { %v3767_v54 = vadd.f32 %v3766_v19, %v3718_v0 }
 0xa2f   :  { %v13260_v30 = vadd.f32 %v3863_v3, %v12920_v61 }
 0xa31   :  { %3918 = vadd.xlane.f32.xlu0 %v13260_v30 }
 0xa32   :  { %v3815_v63 = vpop.f32.mrf.mxu2  ;;  %v3864_v34 = vpop.f32.mrf.mxu3 }
 0xa33   :  { %v3816_v37 = vadd.f32 %v3815_v63, %v3767_v54  ;;  %v3720_v46 = vpop.f32.mrf.mxu0  ;;  %v3769_v20 = vpop.f32.mrf.mxu1 }
 0xa34   :  { %v3721_v49 = vadd.f32 %v13253_v10, %v3720_v46 }
 0xa35   :  { %v3865_v32 = vadd.f32 %v3864_v34, %v3816_v37 }
 0xa36   :  { %v3770_v41 = vadd.f32 %v3769_v20, %v3721_v49 }
 0xa37   :  { %v13265_v47 = vadd.f32 %v3865_v32, %v12923_v58 }
 0xa39   :  { %3920 = vadd.xlane.f32.xlu1 %v13265_v47 }
 0xa3a   :  { %v3818_v7 = vpop.f32.mrf.mxu2  ;;  %v3867_v61 = vpop.f32.mrf.mxu3 }
 0xa3b   :  { %v3819_v52 = vadd.f32 %v3818_v7, %v3770_v41  ;;  %v3722_v62 = vpop.f32.mrf.mxu0  ;;  %v3771_v43 = vpop.f32.mrf.mxu1 }
 0xa3c   :  { %v3723_v50 = vadd.f32 %v13253_v10, %v3722_v62 }
 0xa3d   :  { %v3868_v24 = vadd.f32 %v3867_v61, %v3819_v52 }
 0xa3e   :  { %v3772_v6 = vadd.f32 %v3771_v43, %v3723_v50 }
 0xa3f   :  { %v13270_v40 = vadd.f32 %v3868_v24, %v12948_v21 }
 0xa41   :  { %3922 = vadd.xlane.f32.xlu2 %v13270_v40 }
 0xa42   :  { %v3820_v12 = vpop.f32.mrf.mxu2  ;;  %v3869_v58 = vpop.f32.mrf.mxu3 }
 0xa43   :  { %v3821_v18 = vadd.f32 %v3820_v12, %v3772_v6  ;;  %v3725_v16 = vpop.f32.mrf.mxu0  ;;  %v3774_v5 = vpop.f32.mrf.mxu1 }
 0xa44   :  { %v3726_v28 = vadd.f32 %v13253_v10, %v3725_v16 }
 0xa45   :  { %v3870_v53 = vadd.f32 %v3869_v58, %v3821_v18 }
 0xa46   :  { %v3775_v13 = vadd.f32 %v3774_v5, %v3726_v28 }
 0xa47   :  { %v13275_v8 = vadd.f32 %v3870_v53, %v12951_v44 }
 0xa49   :  { %3924 = vadd.xlane.f32.xlu0 %v13275_v8 }
 0xa4a   :  { %v3823_v45 = vpop.f32.mrf.mxu2  ;;  %v3872_v21 = vpop.f32.mrf.mxu3 }
 0xa4b   :  { %v3824_v11 = vadd.f32 %v3823_v45, %v3775_v13  ;;  %v3727_v51 = vpop.f32.mrf.mxu0  ;;  %v3776_v39 = vpop.f32.mrf.mxu1 }
 0xa4c   :  { %v3728_v4 = vadd.f32 %v13253_v10, %v3727_v51 }
 0xa4d   :  { %v3873_v38 = vadd.f32 %v3872_v21, %v3824_v11 }
 0xa4e   :  { %v3777_v60 = vadd.f32 %v3776_v39, %v3728_v4 }
 0xa4f   :  { %v13280_v27 = vadd.f32 %v3873_v38, %v12962_v29 }
 0xa51   :  { %3926 = vadd.xlane.f32.xlu1 %v13280_v27 }
 0xa52   :  { %v3825_v2 = vpop.f32.mrf.mxu2  ;;  %v3874_v44 = vpop.f32.mrf.mxu3 }
 0xa53   :  { %v3826_v55 = vadd.f32 %v3825_v2, %v3777_v60  ;;  %v3730_v23 = vpop.f32.mrf.mxu0  ;;  %v3779_v59 = vpop.f32.mrf.mxu1 }
 0xa54   :  { %v3731_v14 = vadd.f32 %v13253_v10, %v3730_v23 }
 0xa55   :  { %v3875_v56 = vadd.f32 %v3874_v44, %v3826_v55 }
 0xa56   :  { %v3780_v57 = vadd.f32 %v3779_v59, %v3731_v14 }
 0xa57   :  { %v13285_v17 = vadd.f32 %v3875_v56, %v12965_v31 }
 0xa59   :  { %3928 = vadd.xlane.f32.xlu2 %v13285_v17 }
 0xa5a   :  { %v3828_v19 = vpop.f32.mrf.mxu2  ;;  %v3877_v3 = vpop.f32.mrf.mxu3 }
 0xa5b   :  { %v3829_v29 = vadd.f32 %v3828_v19, %v3780_v57  ;;  %v3732_v63 = vpop.f32.mrf.mxu0  ;;  %v3781_v34 = vpop.f32.mrf.mxu1 }
 0xa5c   :  { %v3733_v31 = vadd.f32 %v13253_v10, %v3732_v63 }
 0xa5d   :  { %v3878_v0 = vadd.f32 %v3877_v3, %v3829_v29 }
 0xa5e   :  { %v3782_v61 = vadd.f32 %v3781_v34, %v3733_v31 }
 0xa5f   :  { %v13289_v54 = vadd.f32 %v3878_v0, %v12997_v22 }
 0xa61   :  { %3930 = vadd.xlane.f32.xlu2 %v13289_v54 }
 0xa62   :  { %v3830_v37 = vpop.f32.mrf.mxu2  ;;  %v3879_v20 = vpop.f32.mrf.mxu3 }
 0xa63   :  { %v3735_v46 = vpop.f32.mrf.mxu0  ;;  %v3784_v32 = vpop.f32.mrf.mxu1  ;;  %v3831_v62 = vadd.f32 %v3830_v37, %v3782_v61 }
 0xa64   :  { %v3736_v24 = vadd.f32 %v13253_v10, %v3735_v46 }
 0xa65   :  { %v3880_v6 = vadd.f32 %v3879_v20, %v3831_v62 }
 0xa66   :  { %v3785_v16 = vadd.f32 %v3784_v32, %v3736_v24 }
 0xa6a   :  { %v3833_v7 = vpop.f32.mrf.mxu2  ;;  %v3882_v50 = vpop.f32.mrf.mxu3 }
 0xa6b   :  { %v3737_v22 = vpop.f32.mrf.mxu0  ;;  %v3786_v12 = vpop.f32.mrf.mxu1  ;;  %v3834_v28 = vadd.f32 %v3833_v7, %v3785_v16 }
 0xa6c   :  { %v3738_v21 = vadd.f32 %v13253_v10, %v3737_v22 }
 0xa6d   :  { %v3883_v11 = vadd.f32 %v3882_v50, %v3834_v28 }
 0xa6e   :  { %v3787_v39 = vadd.f32 %v3786_v12, %v3738_v21 }
 0xa6f   :  { %v13316_v60 = vadd.f32 %v3883_v11, %v13010_v33 }
 0xa72   :  { %v3835_v5 = vpop.f32.mrf.mxu2  ;;  %v3884_v38 = vpop.f32.mrf.mxu3 }
 0xa73   :  { %v3740_v13 = vpop.f32.mrf.mxu0  ;;  %v3836_v2 = vadd.f32 %v3835_v5, %v3787_v39 }
 0xa74   :  { %v3741_v23 = vadd.f32 %v13253_v10, %v3740_v13 }
 0xa75   :  { %v3885_v57 = vadd.f32 %v3884_v38, %v3836_v2 }
 0xa77   :  { %v13329_v0 = vadd.f32 %v3885_v57, %v13013_v1 }
 0xa7a   :  { %v3838_v44 = vpop.f32.mrf.mxu2  ;;  %v3887_v19 = vpop.f32.mrf.mxu3 }
 0xa7b   :  { %v3742_v56 = vpop.f32.mrf.mxu0 }
 0xa7c   :  { %v3743_v34 = vadd.f32 %v13253_v10, %v3742_v56 }
 0xa82   :  { %v3840_v37 = vpop.f32.mrf.mxu2  ;;  %v3889_v61 = vpop.f32.mrf.mxu3 }
 0xa83   :  { %v3745_v31 = vpop.f32.mrf.mxu0 }
 0xa84   :  { %v3746_v22 = vadd.f32 %v13253_v10, %v3745_v31 }
 0xa8b   :  { %v3892_v5 = vpop.f32.mrf.mxu3 }
 0xaa4   :  { %v3919_v49 = vpop.xlane.xlu0 %3918 }
 0xaa5   :  { %v3950_v41 = vmul.f32 %v3919_v49, %v11732_v9 }
 0xaa7   :  { %v13295_v52 = vsub.f32 %v13260_v30, %v3950_v41  ;;  %v13305_v30 = vadd.f32 %v3880_v6, %v13000_v26 }
 0xaa9   :  { %v3982_v43 = vmul.f32 %v13295_v52, %v13295_v52 }
 0xaab   :  { %3998 = vadd.xlane.f32.xlu0 %v3982_v43  ;;  %v3843_v43 = vpop.f32.mrf.mxu2 }
 0xaac   :  { %v3921_v58 = vpop.xlane.xlu1 %3920 }
 0xaad   :  { %v3951_v18 = vmul.f32 %v3921_v58, %v11732_v9  ;;  %v3747_v58 = vpop.f32.mrf.mxu0 }
 0xaae   :  { %v3748_v28 = vadd.f32 %v13253_v10, %v3747_v58 }
 0xaaf   :  { %v13302_v53 = vsub.f32 %v13265_v47, %v3951_v18  ;;  %v3789_v47 = vpop.f32.mrf.mxu1 }
 0xab0   :  { %v3790_v33 = vadd.f32 %v3789_v47, %v3741_v23 }
 0xab1   :  { %v3983_v45 = vmul.f32 %v13302_v53, %v13302_v53 }
 0xab2   :  { %v3839_v63 = vadd.f32 %v3838_v44, %v3790_v33  ;;  %v3894_v44 = vpop.f32.mrf.mxu3 }
 0xab3   :  { %3932 = vadd.xlane.f32.xlu0 %v13305_v30  ;;  %4000 = vadd.xlane.f32.xlu1 %v3983_v45  ;;  %v3845_v11 = vpop.f32.mrf.mxu2 }
 0xab4   :  { %v3923_v51 = vpop.xlane.xlu2 %3922  ;;  %v3888_v20 = vadd.f32 %v3887_v19, %v3839_v63  ;;  %v8951_v19 = vld [vmem:[%s16129_s29 + $0xf0] sm:$0xf] }
 0xab5   :  { %v3952_v4 = vmul.f32 %v3923_v51, %v11732_v9  ;;  %v3750_v38 = vpop.f32.mrf.mxu0  ;;  %v9032_v63 = vld [vmem:[%s16130_s23 + $0xf0] sm:$0xf] }
 0xab6   :  { %v13340_v7 = vadd.f32 %v3888_v20, %v13022_v48  ;;  %v3751_v2 = vadd.f32 %v13253_v10, %v3750_v38  ;;  %v9034_v20 = vld [vmem:[%s16130_s23 + $0xf8] sm:$0xf0] }
 0xab7   :  { %v13313_v26 = vsub.f32 %v13270_v40, %v3952_v4  ;;  %v3791_v29 = vpop.f32.mrf.mxu1  ;;  %v9018_v38 = vld [vmem:[%s16130_s23 + $0xd8] sm:$0xf0] }
 0xab8   :  { %v3792_v32 = vadd.f32 %v3791_v29, %v3743_v34  ;;  %v9765_v29 = vld [vmem:[%s16129_s29 + $0xf4] sm:$0xf0] }
 0xab9   :  { %v3984_v55 = vmul.f32 %v13313_v26, %v13313_v26  ;;  %v9781_v34 = vld [vmem:[%s16130_s23 + $0xf4] sm:$0xf0] }
 0xaba   :  { %v3841_v41 = vadd.f32 %v3840_v37, %v3792_v32  ;;  %v8943_v32 = vld [vmem:[%s16129_s29 + $0xe0] sm:$0xf] }
 0xabb   :  { %3934 = vadd.xlane.f32.xlu0 %v13316_v60  ;;  %4002 = vadd.xlane.f32.xlu1 %v3984_v55  ;;  %v3848_v56 = vpop.f32.mrf.mxu2 }
 0xabc   :  { %v3925_v14 = vpop.xlane.xlu0 %3924  ;;  %v3890_v50 = vadd.f32 %v3889_v61, %v3841_v41  ;;  %v9763_v41 = vld [vmem:[%s16129_s29 + $0xe4] sm:$0xf0] }
 0xabd   :  { %v3953_v59 = vmul.f32 %v3925_v14, %v11732_v9  ;;  %v8944_v61 = vor.u32 %v9763_v41, %v8943_v32  ;;  %v9002_v32 = vld [vmem:[%s16130_s23 + $0xb8] sm:$0xf0] }
 0xabe   :  { %v13349_v48 = vadd.f32 %v3890_v50, %v13025_v35 }
 0xabf   :  { %v13324_v40 = vsub.f32 %v13275_v8, %v3953_v59  ;;  %v3794_v62 = vpop.f32.mrf.mxu1 }
 0xac0   :  { %v3795_v6 = vadd.f32 %v3794_v62, %v3746_v22  ;;  %v8945_v22 = vld [vmem:[%s16129_s29 + $0xe8] sm:$0xf0]  ;;  %v9024_v62 = vld [vmem:[%s16130_s23 + $0xe0] sm:$0xf] }
 0xac1   :  { %v3985_v3 = vmul.f32 %v13324_v40, %v13324_v40 }
 0xac2   :  { %v3844_v18 = vadd.f32 %v3843_v43, %v3795_v6  ;;  %v9779_v43 = vld [vmem:[%s16130_s23 + $0xe4] sm:$0xf0]  ;;  %v9026_v6 = vld [vmem:[%s16130_s23 + $0xe8] sm:$0xf0] }
 0xac3   :  { %4004 = vadd.xlane.f32.xlu2 %v3985_v3  ;;  %3936 = vadd.xlane.f32.xlu1 %v13329_v0  ;;  %v8952_v3 = vor.u32 %v9765_v29, %v8951_v19  ;;  %v9025_v50 = vor.u32 %v9779_v43, %v9024_v62  ;;  %v9010_v19 = vld [vmem:[%s16130_s23 + $0xc8] sm:$0xf0] }
 0xac4   :  { %v3927_v46 = vpop.xlane.xlu1 %3926  ;;  %v3893_v45 = vadd.f32 %v3892_v5, %v3844_v18  ;;  %v8935_v18 = vld [vmem:[%s16129_s29 + $0xd0] sm:$0xf]  ;;  %v9760_v5 = vld [vmem:[%s16129_s29 + $0xd4] sm:$0xf]  ;;  %v8913_v43 = vld [vmem:[%s16129_s29 + $0xa8] sm:$0xf0] }
 0xac5   :  { %v3954_v8 = vmul.f32 %v3927_v46, %v11732_v9  ;;  %v9033_v46 = vor.u32 %v9781_v34, %v9032_v63  ;;  %4388 = vmatpush.bf16.msra.mxu0 %v8952_v3  ;;  %v9757_v3 = vld [vmem:[%s16129_s29 + $0xb4] sm:$0xf0]  ;;  %v8921_v34 = vld [vmem:[%s16129_s29 + $0xb8] sm:$0xf0] }
 0xac6   :  { %v13360_v4 = vadd.f32 %v3893_v45, %v13078_v42  ;;  %v3897_v42 = vpop.f32.mrf.mxu3  ;;  %v9016_v45 = vld [vmem:[%s16130_s23 + $0xd0] sm:$0xf] }
 0xac7   :  { %v13335_v49 = vsub.f32 %v13280_v27, %v3954_v8  ;;  %v9780_v8 = vld [vmem:[%s16130_s23 + $0xf4] sm:$0xf]  ;;  %4590 = vmatpush.bf16.msrb.mxu2 %v9033_v46  ;;  %v9773_v46 = vld [vmem:[%s16130_s23 + $0xb4] sm:$0xf0] }
 0xac8   :  { %v9037_v31 = vor.u32 %v9780_v8, %v9034_v20 }
 0xac9   :  { %v3986_v1 = vmul.f32 %v13335_v49, %v13335_v49  ;;  %4389 = vmatpush.bf16.msra.mxu0 %v8944_v61  ;;  %v9755_v61 = vld [vmem:[%s16129_s29 + $0xa4] sm:$0xf0] }
 0xaca   :  { %4639 = vmatpush.bf16.msra.mxu3 %v9037_v31  ;;  %v9772_v31 = vld [vmem:[%s16130_s23 + $0xb4] sm:$0xf] }
 0xacb   :  { %4006 = vadd.xlane.f32.xlu2 %v3986_v1  ;;  %3938 = vadd.xlane.f32.xlu1 %v13340_v7  ;;  %v9762_v1 = vld [vmem:[%s16129_s29 + $0xe4] sm:$0xf]  ;;  %v9005_v41 = vor.u32 %v9772_v31, %v9002_v32  ;;  %v3752_v32 = vpop.f32.mrf.mxu0 }
 0xacc   :  { %v3929_v24 = vpop.xlane.xlu2 %3928  ;;  %4591 = vmatpush.bf16.msrb.mxu2 %v9025_v50  ;;  %v9771_v50 = vld [vmem:[%s16130_s23 + $0xa4] sm:$0xf0] }
 0xacd   :  { %v3955_v27 = vmul.f32 %v3929_v24, %v11732_v9  ;;  %v8948_v24 = vor.u32 %v9762_v1, %v8945_v22  ;;  %v8911_v1 = vld [vmem:[%s16129_s29 + $0xa0] sm:$0xf]  ;;  %v9754_v22 = vld [vmem:[%s16129_s29 + $0xa4] sm:$0xf] }
 0xace   :  { %v8912_v62 = vor.u32 %v9755_v61, %v8911_v1 }
 0xacf   :  { %v13346_v12 = vsub.f32 %v13285_v17, %v3955_v27  ;;  %v3796_v17 = vpop.f32.mrf.mxu1  ;;  %v9778_v27 = vld [vmem:[%s16130_s23 + $0xe4] sm:$0xf] }
 0xad0   :  { %v3797_v51 = vadd.f32 %v3796_v17, %v3748_v28  ;;  %v9029_v58 = vor.u32 %v9778_v27, %v9026_v6  ;;  %v8916_v27 = vor.u32 %v9754_v22, %v8913_v43 }
 0xad1   :  { %v3987_v16 = vmul.f32 %v13346_v12, %v13346_v12 }
 0xad2   :  { %v3846_v47 = vadd.f32 %v3845_v11, %v3797_v51  ;;  %4640 = vmatpush.bf16.msra.mxu3 %v9029_v58  ;;  %v9776_v51 = vld [vmem:[%s16130_s23 + $0xd4] sm:$0xf]  ;;  %v9770_v58 = vld [vmem:[%s16130_s23 + $0xa4] sm:$0xf] }
 0xad3   :  { %4008 = vadd.xlane.f32.xlu0 %v3987_v16  ;;  %3940 = vadd.xlane.f32.xlu2 %v13349_v48  ;;  %v9761_v16 = vld [vmem:[%s16129_s29 + $0xd4] sm:$0xf0] }
 0xad4   :  { %v3931_v13 = vpop.xlane.xlu2 %3930  ;;  %v3895_v55 = vadd.f32 %v3894_v44, %v3846_v47  ;;  %v8936_v28 = vor.u32 %v9761_v16, %v8935_v18  ;;  %v9021_v47 = vor.u32 %v9776_v51, %v9018_v38  ;;  %v9758_v44 = vld [vmem:[%s16129_s29 + $0xc4] sm:$0xf]  ;;  %v8994_v18 = vld [vmem:[%s16130_s23 + $0xa8] sm:$0xf0]  ;;  %v8984_v51 = vld [vmem:[%s16130_s23 + $0x90] sm:$0xf] }
 0xad5   :  { %v3956_v21 = vmul.f32 %v3931_v13, %v11732_v9  ;;  %v8937_v13 = vld [vmem:[%s16129_s29 + $0xd8] sm:$0xf0]  ;;  %v8997_v16 = vor.u32 %v9770_v58, %v8994_v18  ;;  %v9769_v38 = vld [vmem:[%s16130_s23 + $0x94] sm:$0xf0] }
 0xad6   :  { %v8940_v17 = vor.u32 %v9760_v5, %v8937_v13  ;;  %4390 = vmatpush.bf16.msra.mxu0 %v8936_v28  ;;  %4641 = vmatpush.bf16.msra.mxu3 %v9021_v47  ;;  %v8903_v28 = vld [vmem:[%s16129_s29 + $0x90] sm:$0xf]  ;;  %v9753_v13 = vld [vmem:[%s16129_s29 + $0x94] sm:$0xf0] }
 0xad7   :  { %v13357_v35 = vsub.f32 %v13289_v54, %v3956_v21  ;;  %v3799_v23 = vpop.f32.mrf.mxu1  ;;  %v13367_v54 = vadd.f32 %v3895_v55, %v13081_v25  ;;  %v9764_v25 = vld [vmem:[%s16129_s29 + $0xf4] sm:$0xf]  ;;  %v9777_v21 = vld [vmem:[%s16130_s23 + $0xd4] sm:$0xf0] }
 0xad8   :  { %v3800_v14 = vadd.f32 %v3799_v23, %v3751_v2  ;;  %v9017_v11 = vor.u32 %v9777_v21, %v9016_v45  ;;  %v9759_v2 = vld [vmem:[%s16129_s29 + $0xc4] sm:$0xf0]  ;;  %v8929_v23 = vld [vmem:[%s16129_s29 + $0xc8] sm:$0xf0]  ;;  %v9752_v45 = vld [vmem:[%s16129_s29 + $0x94] sm:$0xf] }
 0xad9   :  { %v3988_v39 = vmul.f32 %v13357_v35, %v13357_v35 }
 0xada   :  { %v3849_v59 = vadd.f32 %v3848_v56, %v3800_v14  ;;  %4592 = vmatpush.bf16.msrb.mxu2 %v9017_v11  ;;  %v9008_v56 = vld [vmem:[%s16130_s23 + $0xc0] sm:$0xf]  ;;  %v9775_v14 = vld [vmem:[%s16130_s23 + $0xc4] sm:$0xf0]  ;;  %v8905_v11 = vld [vmem:[%s16129_s29 + $0x98] sm:$0xf0] }
 0xadb   :  { %4010 = vadd.xlane.f32.xlu0 %v3988_v39  ;;  %3942 = vadd.xlane.f32.xlu2 %v13360_v4  ;;  %v8927_v39 = vld [vmem:[%s16129_s29 + $0xc0] sm:$0xf]  ;;  %v8908_v47 = vor.u32 %v9752_v45, %v8905_v11 }
 0xadc   :  { %v3898_v57 = vadd.f32 %v3897_v42, %v3849_v59  ;;  %v8928_v55 = vor.u32 %v9759_v2, %v8927_v39  ;;  %v8932_v59 = vor.u32 %v9758_v44, %v8929_v23  ;;  %v9009_v42 = vor.u32 %v9775_v14, %v9008_v56  ;;  %v9768_v2 = vld [vmem:[%s16130_s23 + $0x94] sm:$0xf]  ;;  %v8986_v44 = vld [vmem:[%s16130_s23 + $0x98] sm:$0xf0]  ;;  %v8895_v56 = vld [vmem:[%s16129_s29 + $0x80] sm:$0xf] }
 0xadd   :  { %v8985_v39 = vor.u32 %v9769_v38, %v8984_v51  ;;  %v8989_v23 = vor.u32 %v9768_v2, %v8986_v44  ;;  %v9751_v14 = vld [vmem:[%s16129_s29 + $0x84] sm:$0xf0]  ;;  %v3899_v51 = vpop.f32.mrf.mxu3 }
 0xade   :  { %v13371_v33 = vadd.f32 %v3898_v57, %v13166_v36  ;;  %v8953_v36 = vld [vmem:[%s16129_s29 + $0xf8] sm:$0xf0]  ;;  %v9774_v57 = vld [vmem:[%s16130_s23 + $0xc4] sm:$0xf]  ;;  %4391 = vmatpush.bf16.msra.mxu0 %v8928_v55  ;;  %4593 = vmatpush.bf16.msrb.mxu2 %v9009_v42  ;;  %v8896_v42 = vor.u32 %v9751_v14, %v8895_v56  ;;  %v10618_v56 = vld [vmem:[%s16083_s18] sm:$0x7] }
 0xadf   :  { %v8956_v37 = vor.u32 %v9764_v25, %v8953_v36  ;;  %v9013_v29 = vor.u32 %v9774_v57, %v9010_v19  ;;  %v8919_v25 = vld [vmem:[%s16129_s29 + $0xb0] sm:$0xf]  ;;  %v9756_v36 = vld [vmem:[%s16129_s29 + $0xb4] sm:$0xf]  ;;  %v8897_v57 = vld [vmem:[%s16129_s29 + $0x88] sm:$0xf0] }
 0xae0   :  { %v8920_v63 = vor.u32 %v9757_v3, %v8919_v25  ;;  %v8924_v8 = vor.u32 %v9756_v36, %v8921_v34  ;;  %v8976_v19 = vld [vmem:[%s16130_s23 + $0x80] sm:$0xf]  ;;  %v9766_v36 = vld [vmem:[%s16130_s23 + $0x84] sm:$0xf]  ;;  %v13586_v14 = vperm.slane %v10618_v56, 2 }
 0xae1   :  { %4437 = vmatpush.bf16.msrb.mxu1 %v8956_v37  ;;  %4642 = vmatpush.bf16.msra.mxu3 %v9013_v29  ;;  %v9000_v37 = vld [vmem:[%s16130_s23 + $0xb0] sm:$0xf]  ;;  %v9767_v29 = vld [vmem:[%s16130_s23 + $0x84] sm:$0xf0] }
 0xae2   :  { %v9001_v20 = vor.u32 %v9773_v46, %v9000_v37  ;;  %4392 = vmatpush.bf16.msra.mxu0 %v8920_v63  ;;  %v8977_v3 = vor.u32 %v9767_v29, %v8976_v19  ;;  %v8978_v63 = vld [vmem:[%s16130_s23 + $0x88] sm:$0xf0] }
 0xae3   :  { %3944 = vadd.xlane.f32.xlu0 %v13367_v54  ;;  %v8981_v34 = vor.u32 %v9766_v36, %v8978_v63 }
 0xae4   :  { %4594 = vmatpush.bf16.msrb.mxu2 %v9001_v20 }
 0xae5   :  { %4438 = vmatpush.bf16.msrb.mxu1 %v8948_v24  ;;  %4643 = vmatpush.bf16.msra.mxu3 %v9005_v41  ;;  %v8992_v24 = vld [vmem:[%s16130_s23 + $0xa0] sm:$0xf] }
 0xae6   :  { %v8993_v6 = vor.u32 %v9771_v50, %v8992_v24  ;;  %4393 = vmatpush.bf16.msra.mxu0 %v8912_v62  ;;  %v3753_v62 = vadd.f32 %v13253_v10, %v3752_v32  ;;  %v3801_v24 = vpop.f32.mrf.mxu1 }
 0xae8   :  { %4595 = vmatpush.bf16.msrb.mxu2 %v8993_v6  ;;  %v3850_v6 = vpop.f32.mrf.mxu2 }
 0xae9   :  { %4439 = vmatpush.bf16.msrb.mxu1 %v8940_v17  ;;  %4644 = vmatpush.bf16.msra.mxu3 %v8997_v16  ;;  %v8904_v17 = vor.u32 %v9753_v13, %v8903_v28  ;;  %v3802_v16 = vadd.f32 %v3801_v24, %v3753_v62 }
 0xaeb   :  { %3946 = vadd.xlane.f32.xlu0 %v13371_v33  ;;  %4394 = vmatpush.bf16.msra.mxu0 %v8904_v17  ;;  %v3851_v45 = vadd.f32 %v3850_v6, %v3802_v16 }
 0xaec   :  { %4596 = vmatpush.bf16.msrb.mxu2 %v8985_v39 }
 0xaed   :  { %4440 = vmatpush.bf16.msrb.mxu1 %v8932_v59  ;;  %v9750_v59 = vld [vmem:[%s16129_s29 + $0x84] sm:$0xf]  ;;  %4645 = vmatpush.bf16.msra.mxu3 %v8989_v23 }
 0xaee   :  { %v8900_v25 = vor.u32 %v9750_v59, %v8897_v57 }
 0xaef   :  { %4395 = vmatpush.bf16.msra.mxu0 %v8896_v42 }
 0xaf0   :  { %4597 = vmatpush.bf16.msrb.mxu2 %v8977_v3 }
 0xaf1   :  { %4441 = vmatpush.bf16.msrb.mxu1 %v8924_v8  ;;  %4646 = vmatpush.bf16.msra.mxu3 %v8981_v34 }
 0xaf5   :  { %4442 = vmatpush.bf16.msrb.mxu1 %v8916_v27 }
 0xaf9   :  { %4443 = vmatpush.bf16.msrb.mxu1 %v8908_v47  ;;  %v3900_v47 = vadd.f32 %v3899_v51, %v3851_v45 }
 0xafb   :  { %v13591_v29 = vadd.f32 %v3900_v47, %v13169_v15 }
 0xafd   :  { %4444 = vmatpush.bf16.msrb.mxu1 %v8900_v25 }
 0xb1e   :  { %v3999_v5 = vpop.xlane.xlu0 %3998 }
 0xb1f   :  { %v4030_v21 = vmul.f32 %v3999_v5, %v11732_v9 }
 0xb21   :  { %v4046_v55 = vadd.f32 1e-05, %v4030_v21 }
 0xb23   :  { %10232 = vrsqrt.f32 %v4046_v55  ;;  %vm4068_vm10 = vweird.f32 %v4046_v55 }
 0xb26   :  { %v3933_v37 = vpop.xlane.xlu0 %3932  ;;  %v4001_v46 = vpop.xlane.xlu1 %4000 }
 0xb27   :  { %v3957_v8 = vmul.f32 %v3933_v37, %v11732_v9  ;;  %v4031_v20 = vmul.f32 %v4001_v46, %v11732_v9 }
 0xb29   :  { %v10233_v31 = vpop.eup %10232  ;;  %v13570_v41 = vsub.f32 %v13305_v30, %v3957_v8  ;;  %v4047_v61 = vadd.f32 1e-05, %v4031_v20 }
 0xb2a   :  { %v4063_v1 = vmul.f32 %v10233_v31, %v4046_v55  ;;  %vm4069_vm9 = vweird.f32 %v10233_v31 }
 0xb2b   :  { %v3989_v22 = vmul.f32 %v13570_v41, %v13570_v41  ;;  %10234 = vrsqrt.f32 %v4047_v61  ;;  %vm4070_vm11 = vmor %vm4068_vm10, %vm4069_vm9  ;;  %vm4078_vm13 = vweird.f32 %v4047_v61 }
 0xb2c   :  { %v4064_v43 = vmul.f32 %v10233_v31, %v4063_v1 }
 0xb2d   :  { %4012 = vadd.xlane.f32.xlu1 %v3989_v22 }
 0xb2e   :  { %v4065_v50 = vmul.f32 0.5, %v4064_v43  ;;  %v3935_v27 = vpop.xlane.xlu0 %3934  ;;  %v4003_v58 = vpop.xlane.xlu1 %4002 }
 0xb2f   :  { %v3958_v18 = vmul.f32 %v3935_v27, %v11732_v9  ;;  %v4032_v5 = vmul.f32 %v4003_v58, %v11732_v9 }
 0xb30   :  { %v4066_v30 = vsub.f32 1.5, %v4065_v50 }
 0xb31   :  { %v13578_v28 = vsub.f32 %v13316_v60, %v3958_v18  ;;  %v10235_v13 = vpop.eup %10234  ;;  %v4048_v21 = vadd.f32 1e-05, %v4032_v5 }
 0xb32   :  { %v4067_v10 = vmul.f32 %v10233_v31, %v4066_v30  ;;  %v4073_v17 = vmul.f32 %v10235_v13, %v4047_v61  ;;  %vm4079_vm12 = vweird.f32 %v10235_v13 }
 0xb33   :  { %v3990_v11 = vmul.f32 %v13578_v28, %v13578_v28  ;;  %10236 = vrsqrt.f32 %v4048_v21  ;;  %vm4080_vm14 = vmor %vm4078_vm13, %vm4079_vm12  ;;  %vm4088_vm0 = vweird.f32 %v4048_v21 }
 0xb34   :  { %v4074_v38 = vmul.f32 %v10235_v13, %v4073_v17  ;;  %v4071_v39 = vsel %vm4070_vm11, %v10233_v31, %v4067_v10 }
 0xb35   :  { %4014 = vadd.xlane.f32.xlu1 %v3990_v11  ;;  %v4222_v59 = vmul.f32 %v4071_v39, %v13295_v52  ;;  %v10619_v52 = vld [vmem:[%s16084_s19] sm:$0x7] }
 0xb36   :  { %v4005_v2 = vpop.xlane.xlu2 %4004  ;;  %v4075_v60 = vmul.f32 0.5, %v4074_v38  ;;  %v3937_v44 = vpop.xlane.xlu1 %3936  ;;  %v13601_v34 = vperm.slane %v10619_v52, 2 }
 0xb37   :  { %v4033_v23 = vmul.f32 %v4005_v2, %v11732_v9  ;;  %v3959_v55 = vmul.f32 %v3937_v44, %v11732_v9  ;;  %v4239_v15 = vmul.f32 %v13586_v14, %v4222_v59 }
 0xb38   :  { %v4076_v42 = vsub.f32 1.5, %v4075_v60 }
 0xb39   :  { %v4049_v57 = vadd.f32 1e-05, %v4033_v23  ;;  %v10237_v19 = vpop.eup %10236  ;;  %v13594_v25 = vsub.f32 %v13329_v0, %v3959_v55  ;;  %v13610_v62 = vadd.f32 %v13601_v34, %v4239_v15 }
 0xb3a   :  { %v4077_v3 = vmul.f32 %v10235_v13, %v4076_v42  ;;  %v4083_v36 = vmul.f32 %v10237_v19, %v4048_v21  ;;  %vm4089_vm15 = vweird.f32 %v10237_v19 }
 0xb3b   :  { %10238 = vrsqrt.f32 %v4049_v57  ;;  %v3991_v63 = vmul.f32 %v13594_v25, %v13594_v25  ;;  %vm4090_vm3 = vmor %vm4088_vm0, %vm4089_vm15  ;;  %vm4098_vm5 = vweird.f32 %v4049_v57 }
 0xb3c   :  { %v4081_v37 = vsel %vm4080_vm14, %v10235_v13, %v4077_v3  ;;  %v4084_v46 = vmul.f32 %v10237_v19, %v4083_v36 }
 0xb3d   :  { %3948 = vadd.xlane.f32.xlu1 %v13591_v29  ;;  %v4223_v0 = vmul.f32 %v4081_v37, %v13302_v53  ;;  %4016 = vadd.xlane.f32.xlu2 %v3991_v63 }
 0xb3e   :  { %v4007_v8 = vpop.xlane.xlu2 %4006  ;;  %v4085_v20 = vmul.f32 0.5, %v4084_v46  ;;  %v3939_v31 = vpop.xlane.xlu1 %3938 }
 0xb3f   :  { %v4034_v32 = vmul.f32 %v4007_v8, %v11732_v9  ;;  %v4240_v1 = vmul.f32 %v13586_v14, %v4223_v0  ;;  %v3960_v61 = vmul.f32 %v3939_v31, %v11732_v9 }
 0xb40   :  { %v4086_v43 = vsub.f32 1.5, %v4085_v20 }
 0xb41   :  { %v10239_v22 = vpop.eup %10238  ;;  %v4050_v24 = vadd.f32 1e-05, %v4034_v32  ;;  %v13613_v50 = vadd.f32 %v13601_v34, %v4240_v1  ;;  %v13616_v27 = vsub.f32 %v13340_v7, %v3960_v61 }
 0xb42   :  { %v4093_v53 = vmul.f32 %v10239_v22, %v4049_v57  ;;  %v4087_v6 = vmul.f32 %v10237_v19, %v4086_v43  ;;  %vm4099_vm4 = vweird.f32 %v10239_v22 }
 0xb43   :  { %10240 = vrsqrt.f32 %v4050_v24  ;;  %v13620_v58 = vpack.c.bf16 %v13613_v50, %v13610_v62  ;;  %v3992_v16 = vmul.f32 %v13616_v27, %v13616_v27  ;;  %vm4100_vm6 = vmor %vm4098_vm5, %vm4099_vm4  ;;  %vm4108_vm8 = vweird.f32 %v4050_v24 }
 0xb44   :  { %v4094_v18 = vmul.f32 %v10239_v22, %v4093_v53  ;;  %v4091_v30 = vsel %vm4090_vm3, %v10237_v19, %v4087_v6 }
 0xb45   :  { %4396 = vmatmul.bf16.vlgmr.msra.gmra.mxu0 %v13620_v58  ;;  %4445 = vmatmul.bf16.vlgmr.msrb.gmra.mxu1 %v13620_v58  ;;  %v4224_v11 = vmul.f32 %v4091_v30, %v13313_v26 }
 0xb46   :  { %v4095_v5 = vmul.f32 0.5, %v4094_v18  ;;  %v3941_v7 = vpop.xlane.xlu2 %3940  ;;  %v4009_v13 = vpop.xlane.xlu0 %4008  ;;  %4598 = vmatmul.bf16.vlgmr.msrb.gmra.mxu2 %v13620_v58  ;;  %4647 = vmatmul.bf16.vlgmr.msra.gmra.mxu3 %v13620_v58 }
 0xb47   :  { %v3961_v45 = vmul.f32 %v3941_v7, %v11732_v9  ;;  %v4035_v10 = vmul.f32 %v4009_v13, %v11732_v9  ;;  %4018 = vadd.xlane.f32.xlu2 %v3992_v16  ;;  %v4241_v23 = vmul.f32 %v13586_v14, %v4224_v11 }
 0xb48   :  { %v4096_v21 = vsub.f32 1.5, %v4095_v5 }
 0xb49   :  { %v10241_v17 = vpop.eup %10240  ;;  %v13632_v51 = vsub.f32 %v13349_v48, %v3961_v45  ;;  %v4051_v38 = vadd.f32 1e-05, %v4035_v10  ;;  %v13641_v3 = vadd.f32 %v13601_v34, %v4241_v23 }
 0xb4a   :  { %v4097_v47 = vmul.f32 %v10239_v22, %v4096_v21  ;;  %v4103_v39 = vmul.f32 %v10241_v17, %v4050_v24  ;;  %vm4109_vm7 = vweird.f32 %v10241_v17 }
 0xb4b   :  { %10242 = vrsqrt.f32 %v4051_v38  ;;  %v3993_v2 = vmul.f32 %v13632_v51, %v13632_v51  ;;  %vm4110_vm9 = vmor %vm4108_vm8, %vm4109_vm7  ;;  %vm4118_vm11 = vweird.f32 %v4051_v38 }
 0xb4c   :  { %v4101_v60 = vsel %vm4100_vm6, %v10239_v22, %v4097_v47  ;;  %v4104_v44 = vmul.f32 %v10241_v17, %v4103_v39 }
 0xb4d   :  { %v4225_v56 = vmul.f32 %v4101_v60, %v13324_v40  ;;  %4020 = vadd.xlane.f32.xlu0 %v3993_v2 }
 0xb4e   :  { %v4105_v26 = vmul.f32 0.5, %v4104_v44  ;;  %v4011_v55 = vpop.xlane.xlu0 %4010  ;;  %v3943_v48 = vpop.xlane.xlu2 %3942 }
 0xb4f   :  { %v4242_v59 = vmul.f32 %v13586_v14, %v4225_v56  ;;  %v3962_v42 = vmul.f32 %v3943_v48, %v11732_v9  ;;  %v4036_v7 = vmul.f32 %v4011_v55, %v11732_v9 }
 0xb50   :  { %v4106_v57 = vsub.f32 1.5, %v4105_v26 }
 0xb51   :  { %v10243_v19 = vpop.eup %10242  ;;  %v13644_v36 = vadd.f32 %v13601_v34, %v4242_v59  ;;  %v13647_v63 = vsub.f32 %v13360_v4, %v3962_v42 }
 0xb52   :  { %v4107_v40 = vmul.f32 %v10241_v17, %v4106_v57  ;;  %v4113_v52 = vmul.f32 %v10243_v19, %v4051_v38  ;;  %vm4119_vm10 = vweird.f32 %v10243_v19 }
 0xb53   :  { %16141 = vst [vmem:[#allocation3_spill] sm:$0xff] %v13644_v36  ;;  %v13651_v15 = vpack.c.bf16 %v13644_v36, %v13641_v3  ;;  %v3994_v37 = vmul.f32 %v13647_v63, %v13647_v63  ;;  %vm4120_vm12 = vmor %vm4118_vm11, %vm4119_vm10 }
 0xb54   :  { %v4114_v46 = vmul.f32 %v10243_v19, %v4113_v52  ;;  %v4111_v0 = vsel %vm4110_vm9, %v10241_v17, %v4107_v40 }
 0xb55   :  { %4022 = vadd.xlane.f32.xlu1 %v3994_v37  ;;  %4401 = vmatmul.bf16.gmra.mxu0 %v13651_v15  ;;  %v4226_v32 = vmul.f32 %v4111_v0, %v13335_v49 }
 0xb56   :  { %v4115_v8 = vmul.f32 0.5, %v4114_v46  ;;  %4450 = vmatmul.bf16.gmra.mxu1 %v13651_v15  ;;  %v3945_v4 = vpop.xlane.xlu0 %3944  ;;  %4603 = vmatmul.bf16.gmra.mxu2 %v13651_v15 }
 0xb57   :  { %4652 = vmatmul.bf16.gmra.mxu3 %v13651_v15  ;;  %v3963_v20 = vmul.f32 %v3945_v4, %v11732_v9  ;;  %v4243_v24 = vmul.f32 %v13586_v14, %v4226_v32 }
 0xb58   :  { %v4116_v31 = vsub.f32 1.5, %v4115_v8 }
 0xb59   :  { %v13662_v1 = vsub.f32 %v13367_v54, %v3963_v20  ;;  %v13671_v54 = vadd.f32 %v13601_v34, %v4243_v24 }
 0xb5a   :  { %v4117_v61 = vmul.f32 %v10243_v19, %v4116_v31 }
 0xb5b   :  { %v3995_v22 = vmul.f32 %v13662_v1, %v13662_v1  ;;  %16142 = vst [vmem:[#allocation4_spill] sm:$0xff] %v13671_v54 }
 0xb5c   :  { %v4121_v43 = vsel %vm4120_vm12, %v10243_v19, %v4117_v61 }
 0xb5d   :  { %v4227_v53 = vmul.f32 %v4121_v43, %v13346_v12  ;;  %4024 = vadd.xlane.f32.xlu2 %v3995_v22 }
 0xb5e   :  { %v3947_v6 = vpop.xlane.xlu0 %3946 }
 0xb5f   :  { %v4244_v18 = vmul.f32 %v13586_v14, %v4227_v53  ;;  %v3964_v49 = vmul.f32 %v3947_v6, %v11732_v9 }
 0xb61   :  { %v13674_v16 = vadd.f32 %v13601_v34, %v4244_v18  ;;  %v13677_v30 = vsub.f32 %v13371_v33, %v3964_v49  ;;  %v4052_v33 = vadd.f32 1e-05, %v4036_v7 }
 0xb63   :  { %16143 = vst [vmem:[#allocation5_spill] sm:$0xff] %v13674_v16  ;;  %v13681_v5 = vpack.c.bf16 %v13674_v16, %v13671_v54  ;;  %v3996_v12 = vmul.f32 %v13677_v30, %v13677_v30  ;;  %10244 = vrsqrt.f32 %v4052_v33  ;;  %vm4128_vm14 = vweird.f32 %v4052_v33 }
 0xb65   :  { %4026 = vadd.xlane.f32.xlu0 %v3996_v12  ;;  %4406 = vmatmul.bf16.gmra.mxu0 %v13681_v5 }
 0xb66   :  { %4455 = vmatmul.bf16.gmra.mxu1 %v13681_v5  ;;  %4608 = vmatmul.bf16.gmra.mxu2 %v13681_v5 }
 0xb67   :  { %4657 = vmatmul.bf16.gmra.mxu3 %v13681_v5 }
 0xb69   :  { %v10245_v13 = vpop.eup %10244 }
 0xb6a   :  { %v4123_v45 = vmul.f32 %v10245_v13, %v4052_v33  ;;  %vm4129_vm13 = vweird.f32 %v10245_v13 }
 0xb6b   :  { %vm4130_vm15 = vmor %vm4128_vm14, %vm4129_vm13 }
 0xb6c   :  { %v4124_v10 = vmul.f32 %v10245_v13, %v4123_v45 }
 0xb6e   :  { %v4125_v38 = vmul.f32 0.5, %v4124_v10 }
 0xb70   :  { %v4126_v47 = vsub.f32 1.5, %v4125_v38 }
 0xb72   :  { %v4127_v23 = vmul.f32 %v10245_v13, %v4126_v47 }
 0xb74   :  { %v4131_v55 = vsel %vm4130_vm15, %v10245_v13, %v4127_v23 }
 0xb75   :  { %v4228_v37 = vmul.f32 %v4131_v55, %v13357_v35 }
 0xb77   :  { %v4245_v61 = vmul.f32 %v13586_v14, %v4228_v37 }
 0xb79   :  { %v13704_v24 = vadd.f32 %v13601_v34, %v4245_v61 }
 0xb7b   :  { %16144 = vst [vmem:[#allocation6_spill] sm:$0xff] %v13704_v24 }
 0xba0   :  { %v4013_v21 = vpop.xlane.xlu1 %4012 }
 0xba1   :  { %v4037_v17 = vmul.f32 %v4013_v21, %v11732_v9 }
 0xba3   :  { %v4053_v11 = vadd.f32 1e-05, %v4037_v17 }
 0xba5   :  { %10246 = vrsqrt.f32 %v4053_v11  ;;  %vm4138_vm3 = vweird.f32 %v4053_v11 }
 0xba8   :  { %v4015_v39 = vpop.xlane.xlu1 %4014 }
 0xba9   :  { %v4038_v2 = vmul.f32 %v4015_v39, %v11732_v9 }
 0xbab   :  { %v10247_v60 = vpop.eup %10246  ;;  %v4054_v44 = vadd.f32 1e-05, %v4038_v2 }
 0xbac   :  { %v4133_v56 = vmul.f32 %v10247_v60, %v4053_v11  ;;  %vm4139_vm0 = vweird.f32 %v10247_v60 }
 0xbad   :  { %10248 = vrsqrt.f32 %v4054_v44  ;;  %vm4140_vm4 = vmor %vm4138_vm3, %vm4139_vm0  ;;  %vm4148_vm6 = vweird.f32 %v4054_v44 }
 0xbae   :  { %v4134_v26 = vmul.f32 %v10247_v60, %v4133_v56 }
 0xbb0   :  { %v4135_v48 = vmul.f32 0.5, %v4134_v26  ;;  %v3949_v59 = vpop.xlane.xlu1 %3948  ;;  %v4017_v57 = vpop.xlane.xlu2 %4016 }
 0xbb1   :  { %v3965_v42 = vmul.f32 %v3949_v59, %v11732_v9  ;;  %v4039_v40 = vmul.f32 %v4017_v57, %v11732_v9 }
 0xbb2   :  { %v4136_v19 = vsub.f32 1.5, %v4135_v48 }
 0xbb3   :  { %v10249_v52 = vpop.eup %10248  ;;  %v13696_v46 = vsub.f32 %v13591_v29, %v3965_v42  ;;  %v4055_v4 = vadd.f32 1e-05, %v4039_v40 }
 0xbb4   :  { %v4137_v0 = vmul.f32 %v10247_v60, %v4136_v19  ;;  %v4143_v8 = vmul.f32 %v10249_v52, %v4054_v44  ;;  %vm4149_vm5 = vweird.f32 %v10249_v52 }
 0xbb5   :  { %v3997_v20 = vmul.f32 %v13696_v46, %v13696_v46  ;;  %10250 = vrsqrt.f32 %v4055_v4  ;;  %vm4150_vm7 = vmor %vm4148_vm6, %vm4149_vm5  ;;  %vm4158_vm9 = vweird.f32 %v4055_v4 }
 0xbb6   :  { %v4141_v31 = vsel %vm4140_vm4, %v10247_v60, %v4137_v0  ;;  %v4144_v32 = vmul.f32 %v10249_v52, %v4143_v8 }
 0xbb7   :  { %v4229_v22 = vmul.f32 %v4141_v31, %v13570_v41  ;;  %4028 = vadd.xlane.f32.xlu1 %v3997_v20 }
 0xbb8   :  { %v4145_v35 = vmul.f32 0.5, %v4144_v32 }
 0xbb9   :  { %v4246_v29 = vmul.f32 %v13586_v14, %v4229_v22 }
 0xbba   :  { %v4146_v43 = vsub.f32 1.5, %v4145_v35  ;;  %v4019_v6 = vpop.xlane.xlu2 %4018 }
 0xbbb   :  { %v13707_v53 = vadd.f32 %v13601_v34, %v4246_v29  ;;  %v10251_v18 = vpop.eup %10250  ;;  %v4040_v49 = vmul.f32 %v4019_v6, %v11732_v9 }
 0xbbc   :  { %v4147_v41 = vmul.f32 %v10249_v52, %v4146_v43  ;;  %v4153_v7 = vmul.f32 %v10251_v18, %v4055_v4  ;;  %vm4159_vm8 = vweird.f32 %v10251_v18 }
 0xbbd   :  { %16145 = vst [vmem:[#allocation7_spill] sm:$0xff] %v13707_v53  ;;  %v13712_v12 = vpack.c.bf16 %v13707_v53, %v13704_v24  ;;  %v4056_v33 = vadd.f32 1e-05, %v4040_v49  ;;  %vm4160_vm10 = vmor %vm4158_vm9, %vm4159_vm8 }
 0xbbe   :  { %v4154_v13 = vmul.f32 %v10251_v18, %v4153_v7  ;;  %v4151_v10 = vsel %vm4150_vm7, %v10249_v52, %v4147_v41 }
 0xbbf   :  { %4411 = vmatmul.bf16.gmra.mxu0 %v13712_v12  ;;  %4460 = vmatmul.bf16.gmra.mxu1 %v13712_v12  ;;  %10252 = vrsqrt.f32 %v4056_v33  ;;  %v4230_v47 = vmul.f32 %v4151_v10, %v13578_v28  ;;  %vm4168_vm12 = vweird.f32 %v4056_v33 }
 0xbc0   :  { %4613 = vmatmul.bf16.gmra.mxu2 %v13712_v12  ;;  %4662 = vmatmul.bf16.gmra.mxu3 %v13712_v12  ;;  %v4021_v45 = vpop.xlane.xlu0 %4020  ;;  %v4155_v21 = vmul.f32 0.5, %v4154_v13 }
 0xbc1   :  { %v4041_v17 = vmul.f32 %v4021_v45, %v11732_v9  ;;  %v4247_v23 = vmul.f32 %v13586_v14, %v4230_v47 }
 0xbc2   :  { %v4156_v11 = vsub.f32 1.5, %v4155_v21 }
 0xbc3   :  { %v4057_v38 = vadd.f32 1e-05, %v4041_v17  ;;  %v13725_v19 = vadd.f32 %v13601_v34, %v4247_v23 }
 0xbc4   :  { %v4157_v39 = vmul.f32 %v10251_v18, %v4156_v11 }
 0xbc5   :  { %10254 = vrsqrt.f32 %v4057_v38  ;;  %v10253_v2 = vpop.eup %10252  ;;  %16146 = vst [vmem:[#allocation8_spill] sm:$0xff] %v13725_v19  ;;  %vm4178_vm15 = vweird.f32 %v4057_v38 }
 0xbc6   :  { %v4161_v60 = vsel %vm4160_vm10, %v10251_v18, %v4157_v39  ;;  %v4163_v44 = vmul.f32 %v10253_v2, %v4056_v33  ;;  %vm4169_vm11 = vweird.f32 %v10253_v2 }
 0xbc7   :  { %v4231_v56 = vmul.f32 %v4161_v60, %v13594_v25  ;;  %vm4170_vm13 = vmor %vm4168_vm12, %vm4169_vm11 }
 0xbc8   :  { %v4023_v26 = vpop.xlane.xlu1 %4022  ;;  %v4164_v55 = vmul.f32 %v10253_v2, %v4163_v44 }
 0xbc9   :  { %v4042_v48 = vmul.f32 %v4023_v26, %v11732_v9  ;;  %v4248_v59 = vmul.f32 %v13586_v14, %v4231_v56 }
 0xbca   :  { %v4165_v57 = vmul.f32 0.5, %v4164_v55 }
 0xbcb   :  { %v10255_v42 = vpop.eup %10254  ;;  %v4058_v28 = vadd.f32 1e-05, %v4042_v48  ;;  %v13728_v40 = vadd.f32 %v13601_v34, %v4248_v59 }
 0xbcc   :  { %v4173_v52 = vmul.f32 %v10255_v42, %v4057_v38  ;;  %v4166_v37 = vsub.f32 1.5, %v4165_v57  ;;  %vm4179_vm14 = vweird.f32 %v10255_v42 }
 0xbcd   :  { %16147 = vst [vmem:[#allocation9_spill] sm:$0xff] %v13728_v40  ;;  %10256 = vrsqrt.f32 %v4058_v28  ;;  %v13732_v25 = vpack.c.bf16 %v13728_v40, %v13725_v19  ;;  %vm4180_vm0 = vmor %vm4178_vm15, %vm4179_vm14  ;;  %vm4188_vm4 = vweird.f32 %v4058_v28 }
 0xbce   :  { %v4174_v0 = vmul.f32 %v10255_v42, %v4173_v52  ;;  %v4167_v8 = vmul.f32 %v10253_v2, %v4166_v37  ;;  %v9797_v52 = vld [vmem:[%s16132_s28 + $0xf8] sm:$0xff]  ;;  %v9788_v37 = vld [vmem:[%s16132_s28 + $0xb0] sm:$0xff] }
 0xbcf   :  { %4416 = vmatmul.bf16.gmra.mxu0 %v13732_v25  ;;  %4465 = vmatmul.bf16.gmra.mxu1 %v13732_v25 }
 0xbd0   :  { %v4175_v4 = vmul.f32 0.5, %v4174_v0  ;;  %v4025_v20 = vpop.xlane.xlu2 %4024  ;;  %v4171_v31 = vsel %vm4170_vm13, %v10253_v2, %v4167_v8  ;;  %4618 = vmatmul.bf16.gmra.mxu2 %v13732_v25  ;;  %4667 = vmatmul.bf16.gmra.mxu3 %v13732_v25  ;;  %v9796_v0 = vld [vmem:[%s16132_s28 + $0xf0] sm:$0xff] }
 0xbd1   :  { %v4043_v32 = vmul.f32 %v4025_v20, %v11732_v9  ;;  %v4232_v35 = vmul.f32 %v4171_v31, %v13616_v27  ;;  %5301 = vmatpush.bf16.msrb.mxu3 %v9797_v52  ;;  %v9795_v20 = vld [vmem:[%s16132_s28 + $0xe8] sm:$0xff]  ;;  %v13833_v52 = vpop.f32.mrf.mxu3 }
 0xbd2   :  { %v4176_v61 = vsub.f32 1.5, %v4175_v4  ;;  %v9787_v4 = vld [vmem:[%s16132_s28 + $0xa8] sm:$0xff] }
 0xbd3   :  { %v10257_v22 = vpop.eup %10256  ;;  %v4059_v29 = vadd.f32 1e-05, %v4043_v32  ;;  %v4249_v41 = vmul.f32 %v13586_v14, %v4232_v35  ;;  %v9786_v32 = vld [vmem:[%s16132_s28 + $0xa0] sm:$0xff] }
 0xbd4   :  { %v4177_v43 = vmul.f32 %v10255_v42, %v4176_v61  ;;  %v4183_v6 = vmul.f32 %v10257_v22, %v4058_v28  ;;  %vm4189_vm3 = vweird.f32 %v10257_v22  ;;  %v9789_v28 = vld [vmem:[%s16132_s28 + $0xb8] sm:$0xff]  ;;  %v9794_v61 = vld [vmem:[%s16132_s28 + $0xe0] sm:$0xff] }
 0xbd5   :  { %10258 = vrsqrt.f32 %v4059_v29  ;;  %v13744_v21 = vadd.f32 %v13601_v34, %v4249_v41  ;;  %vm4190_vm5 = vmor %vm4188_vm4, %vm4189_vm3  ;;  %vm4198_vm7 = vweird.f32 %v4059_v29  ;;  %4962 = vmatpush.bf16.msra.mxu1 %v9789_v28  ;;  %5302 = vmatpush.bf16.msrb.mxu3 %v9796_v0  ;;  %v9784_v41 = vld [vmem:[%s16132_s28 + $0x90] sm:$0xff]  ;;  %v13831_v28 = vpop.f32.mrf.mxu2 }
 0xbd6   :  { %v4181_v18 = vsel %vm4180_vm0, %v10255_v42, %v4177_v43  ;;  %v4184_v49 = vmul.f32 %v10257_v22, %v4183_v6  ;;  %v9785_v43 = vld [vmem:[%s16132_s28 + $0x98] sm:$0xff] }
 0xbd7   :  { %v4233_v7 = vmul.f32 %v4181_v18, %v13632_v51  ;;  %16148 = vst [vmem:[#allocation10_spill] sm:$0xff] %v13744_v21  ;;  %v9793_v6 = vld [vmem:[%s16132_s28 + $0xd8] sm:$0xff] }
 0xbd8   :  { %v4185_v33 = vmul.f32 0.5, %v4184_v49 }
 0xbd9   :  { %v4250_v13 = vmul.f32 %v13586_v14, %v4233_v7  ;;  %4963 = vmatpush.bf16.msra.mxu1 %v9788_v37  ;;  %5303 = vmatpush.bf16.msrb.mxu3 %v9795_v20  ;;  %v9792_v7 = vld [vmem:[%s16132_s28 + $0xd0] sm:$0xff] }
 0xbda   :  { %v4186_v45 = vsub.f32 1.5, %v4185_v33 }
 0xbdb   :  { %v10259_v10 = vpop.eup %10258  ;;  %v13747_v27 = vadd.f32 %v13601_v34, %v4250_v13  ;;  %v9783_v13 = vld [vmem:[%s16132_s28 + $0x88] sm:$0xff] }
 0xbdc   :  { %v4187_v17 = vmul.f32 %v10257_v22, %v4186_v45  ;;  %v4193_v11 = vmul.f32 %v10259_v10, %v4059_v29  ;;  %vm4199_vm6 = vweird.f32 %v10259_v10  ;;  %v9791_v45 = vld [vmem:[%s16132_s28 + $0xc8] sm:$0xff] }
 0xbdd   :  { %16149 = vst [vmem:[#allocation11_spill] sm:$0xff] %v13747_v27  ;;  %v13751_v38 = vpack.c.bf16 %v13747_v27, %v13744_v21  ;;  %vm4200_vm8 = vmor %vm4198_vm7, %vm4199_vm6  ;;  %4964 = vmatpush.bf16.msra.mxu1 %v9787_v4  ;;  %5304 = vmatpush.bf16.msrb.mxu3 %v9794_v61 }
 0xbde   :  { %v4194_v51 = vmul.f32 %v10259_v10, %v4193_v11  ;;  %v4191_v47 = vsel %vm4190_vm5, %v10257_v22, %v4187_v17 }
 0xbdf   :  { %4421 = vmatmul.bf16.gmra.mxu0 %v13751_v38  ;;  %4470 = vmatmul.bf16.gmra.mxu1 %v13751_v38  ;;  %v4234_v60 = vmul.f32 %v4191_v47, %v13647_v63  ;;  %v4027_v63 = vpop.xlane.xlu0 %4026  ;;  %v9782_v47 = vld [vmem:[%s16132_s28 + $0x80] sm:$0xff] }
 0xbe0   :  { %v4195_v39 = vmul.f32 0.5, %v4194_v51  ;;  %4623 = vmatmul.bf16.gmra.mxu2 %v13751_v38  ;;  %4672 = vmatmul.bf16.gmra.mxu3 %v13751_v38 }
 0xbe1   :  { %v4251_v56 = vmul.f32 %v13586_v14, %v4234_v60  ;;  %4965 = vmatpush.bf16.msra.mxu1 %v9786_v32  ;;  %5305 = vmatpush.bf16.msrb.mxu3 %v9793_v6 }
 0xbe2   :  { %v4196_v2 = vsub.f32 1.5, %v4195_v39  ;;  %v9790_v39 = vld [vmem:[%s16132_s28 + $0xc0] sm:$0xff] }
 0xbe3   :  { %v13762_v48 = vadd.f32 %v13601_v34, %v4251_v56  ;;  %v13826_v56 = vpop.f32.mrf.mxu1 }
 0xbe4   :  { %v4197_v44 = vmul.f32 %v10259_v10, %v4196_v2 }
 0xbe5   :  { %16150 = vst [vmem:[#allocation12_spill] sm:$0xff] %v13762_v48  ;;  %4966 = vmatpush.bf16.msra.mxu1 %v9785_v43  ;;  %5306 = vmatpush.bf16.msrb.mxu3 %v9792_v7 }
 0xbe6   :  { %v4201_v23 = vsel %vm4200_vm8, %v10259_v10, %v4197_v44 }
 0xbe7   :  { %v4235_v26 = vmul.f32 %v4201_v23, %v13662_v1  ;;  %v4044_v1 = vmul.f32 %v4027_v63, %v11732_v9 }
 0xbe9   :  { %v4252_v55 = vmul.f32 %v13586_v14, %v4235_v26  ;;  %v4060_v57 = vadd.f32 1e-05, %v4044_v1  ;;  %4967 = vmatpush.bf16.msra.mxu1 %v9784_v41  ;;  %5307 = vmatpush.bf16.msrb.mxu3 %v9791_v45 }
 0xbeb   :  { %v13765_v59 = vadd.f32 %v13601_v34, %v4252_v55  ;;  %10260 = vrsqrt.f32 %v4060_v57  ;;  %vm4208_vm10 = vweird.f32 %v4060_v57 }
 0xbed   :  { %16151 = vst [vmem:[#allocation13_spill] sm:$0xff] %v13765_v59  ;;  %v13769_v42 = vpack.c.bf16 %v13765_v59, %v13762_v48  ;;  %4968 = vmatpush.bf16.msra.mxu1 %v9783_v13  ;;  %5308 = vmatpush.bf16.msrb.mxu3 %v9790_v39 }
 0xbef   :  { %4426 = vmatmul.bf16.gmra.mxu0 %v13769_v42  ;;  %4475 = vmatmul.bf16.gmra.mxu1 %v13769_v42 }
 0xbf0   :  { %4628 = vmatmul.bf16.gmra.mxu2 %v13769_v42  ;;  %4677 = vmatmul.bf16.gmra.mxu3 %v13769_v42 }
 0xbf1   :  { %v10261_v8 = vpop.eup %10260  ;;  %4969 = vmatpush.bf16.msra.mxu1 %v9782_v47 }
 0xbf2   :  { %v4203_v31 = vmul.f32 %v10261_v8, %v4060_v57  ;;  %vm4209_vm9 = vweird.f32 %v10261_v8 }
 0xbf3   :  { %vm4210_vm11 = vmor %vm4208_vm10, %vm4209_vm9 }
 0xbf4   :  { %v4204_v22 = vmul.f32 %v10261_v8, %v4203_v31 }
 0xbf6   :  { %v4205_v49 = vmul.f32 0.5, %v4204_v22 }
 0xbf8   :  { %v4206_v33 = vsub.f32 1.5, %v4205_v49 }
 0xbfa   :  { %v4207_v17 = vmul.f32 %v10261_v8, %v4206_v33 }
 0xbfc   :  { %v4211_v2 = vsel %vm4210_vm11, %v10261_v8, %v4207_v17  ;;  %v13843_v8 = vpop.f32.mrf.mxu1 }
 0xbfd   :  { %v4236_v23 = vmul.f32 %v4211_v2, %v13677_v30 }
 0xbff   :  { %v4253_v63 = vmul.f32 %v13586_v14, %v4236_v23 }
 0xc01   :  { %v13836_v37 = vadd.f32 %v13601_v34, %v4253_v63 }
 0xc03   :  { %16152 = vst [vmem:[#allocation14_spill] sm:$0xff] %v13836_v37 }
 0xc04   :  { %v13849_v4 = vpop.f32.mrf.mxu1 }
 0xc2a   :  { %v4029_v35 = vpop.xlane.xlu1 %4028 }
 0xc2b   :  { %v4045_v29 = vmul.f32 %v4029_v35, %v11732_v9 }
 0xc2d   :  { %v4061_v18 = vadd.f32 1e-05, %v4045_v29 }
 0xc2f   :  { %10262 = vrsqrt.f32 %v4061_v18  ;;  %vm4218_vm13 = vweird.f32 %v4061_v18 }
 0xc35   :  { %v10263_v10 = vpop.eup %10262 }
 0xc36   :  { %v4213_v11 = vmul.f32 %v10263_v10, %v4061_v18  ;;  %vm4219_vm12 = vweird.f32 %v10263_v10 }
 0xc37   :  { %vm4220_vm14 = vmor %vm4218_vm13, %vm4219_vm12 }
 0xc38   :  { %v4214_v51 = vmul.f32 %v10263_v10, %v4213_v11 }
 0xc3a   :  { %v4215_v60 = vmul.f32 0.5, %v4214_v51 }
 0xc3c   :  { %v4216_v44 = vsub.f32 1.5, %v4215_v60 }
 0xc3e   :  { %v4217_v26 = vmul.f32 %v10263_v10, %v4216_v44 }
 0xc40   :  { %v4221_v55 = vsel %vm4220_vm14, %v10263_v10, %v4217_v26 }
 0xc41   :  { %v4237_v1 = vmul.f32 %v4221_v55, %v13696_v46  ;;  %v13847_v46 = vpop.f32.mrf.mxu3 }
 0xc43   :  { %v4254_v57 = vmul.f32 %v13586_v14, %v4237_v1  ;;  %v13845_v14 = vpop.f32.mrf.mxu2 }
 0xc45   :  { %v13839_v30 = vadd.f32 %v13601_v34, %v4254_v57  ;;  %v13857_v34 = vpop.f32.mrf.mxu1 }
 0xc47   :  { %16153 = vst [vmem:[#allocation15_spill] sm:$0xff] %v13839_v30  ;;  %v4300_v0 = vpack.c.bf16 %v13839_v30, %v13836_v37  ;;  %v8973_v37 = vld [vmem:[%s16133_s25 + $0x2] sm:$0x3] }
 0xc48   :  { %v13922_v59 = vperm.slane %v8973_v37, 0 }
 0xc49   :  { %4431 = vmatmul.bf16.gmra.mxu0 %v4300_v0  ;;  %4480 = vmatmul.bf16.gmra.mxu1 %v4300_v0  ;;  %v13853_v31 = vpop.f32.mrf.mxu3 }
 0xc4a   :  { %4633 = vmatmul.bf16.gmra.mxu2 %v4300_v0  ;;  %4682 = vmatmul.bf16.gmra.mxu3 %v4300_v0 }
 0xc4b   :  { %v13851_v20 = vpop.f32.mrf.mxu2 }
 0xc4d   :  { %v13863_v22 = vpop.f32.mrf.mxu1 }
 0xc51   :  { %v13861_v61 = vpop.f32.mrf.mxu3 }
 0xc53   :  { %v13859_v32 = vpop.f32.mrf.mxu2 }
 0xc55   :  { %v13871_v43 = vpop.f32.mrf.mxu1 }
 0xc59   :  { %4970 = vmatmul.bf16.vlgmr.msra.gmra.mxu1 %v13620_v58  ;;  %v13869_v29 = vpop.f32.mrf.mxu3 }
 0xc5a   :  { %5309 = vmatmul.bf16.vlgmr.msrb.gmra.mxu3 %v13620_v58 }
 0xc5b   :  { %v13867_v35 = vpop.f32.mrf.mxu2 }
 0xc5d   :  { %v13877_v18 = vpop.f32.mrf.mxu1 }
 0xc61   :  { %v13875_v58 = vpop.f32.mrf.mxu3 }
 0xc63   :  { %v13873_v6 = vpop.f32.mrf.mxu2 }
 0xc69   :  { %4975 = vmatmul.bf16.gmra.mxu1 %v13651_v15  ;;  %v13883_v41 = vpop.f32.mrf.mxu3 }
 0xc6a   :  { %5314 = vmatmul.bf16.gmra.mxu3 %v13651_v15  ;;  %v13885_v15 = vpop.f32.mrf.mxu1 }
 0xc6b   :  { %v13881_v49 = vpop.f32.mrf.mxu2 }
 0xc71   :  { %v13889_v33 = vpop.f32.mrf.mxu3 }
 0xc72   :  { %v13893_v13 = vpop.f32.mrf.mxu1 }
 0xc73   :  { %v13887_v7 = vpop.f32.mrf.mxu2 }
 0xc79   :  { %4980 = vmatmul.bf16.gmra.mxu1 %v13681_v5  ;;  %v13897_v10 = vpop.f32.mrf.mxu3 }
 0xc7a   :  { %5319 = vmatmul.bf16.gmra.mxu3 %v13681_v5  ;;  %v13899_v5 = vpop.f32.mrf.mxu1 }
 0xc7b   :  { %v13895_v45 = vpop.f32.mrf.mxu2 }
 0xc81   :  { %v4670_v11 = vpop.f32.mrf.mxu3 }
 0xc82   :  { %v13903_v51 = vpop.f32.mrf.mxu1 }
 0xc83   :  { %v4621_v17 = vpop.f32.mrf.mxu2 }
 0xc89   :  { %4985 = vmatmul.bf16.gmra.mxu1 %v13712_v12  ;;  %v4673_v39 = vpop.f32.mrf.mxu3 }
 0xc8a   :  { %5324 = vmatmul.bf16.gmra.mxu3 %v13712_v12  ;;  %v13906_v12 = vpop.f32.mrf.mxu1 }
 0xc8b   :  { %v4624_v47 = vpop.f32.mrf.mxu2 }
 0xc91   :  { %v4675_v60 = vpop.f32.mrf.mxu3 }
 0xc92   :  { %v13909_v44 = vpop.f32.mrf.mxu1 }
 0xc93   :  { %v4626_v2 = vpop.f32.mrf.mxu2 }
 0xc99   :  { %4990 = vmatmul.bf16.gmra.mxu1 %v13732_v25  ;;  %v4678_v23 = vpop.f32.mrf.mxu3 }
 0xc9a   :  { %5329 = vmatmul.bf16.gmra.mxu3 %v13732_v25  ;;  %v13913_v26 = vpop.f32.mrf.mxu1 }
 0xc9b   :  { %v4629_v25 = vpop.f32.mrf.mxu2 }
 0xca1   :  { %v4680_v63 = vpop.f32.mrf.mxu3 }
 0xca3   :  { %v4631_v55 = vpop.f32.mrf.mxu2 }
 0xca4   :  { %v4632_v16 = vadd.f32 %v4631_v55, %v13922_v59 }
 0xca9   :  { %4995 = vmatmul.bf16.gmra.mxu1 %v13751_v38 }
 0xcaa   :  { %5334 = vmatmul.bf16.gmra.mxu3 %v13751_v38 }
 0xcb9   :  { %5000 = vmatmul.bf16.gmra.mxu1 %v13769_v42 }
 0xcba   :  { %5339 = vmatmul.bf16.gmra.mxu3 %v13769_v42  ;;  %v13924_v42 = vperm.slane %v8973_v37, 1 }
 0xcbc   :  { %v4681_v37 = vadd.f32 %v4680_v63, %v13924_v42  ;;  %v4671_v63 = vadd.f32 %v4670_v11, %v13924_v42  ;;  %v4666_v11 = vadd.f32 %v13889_v33, %v13924_v42  ;;  %v4661_v33 = vadd.f32 %v13875_v58, %v13924_v42 }
 0xcbd   :  { %v4656_v58 = vadd.f32 %v13861_v61, %v13924_v42  ;;  %v4651_v61 = vadd.f32 %v13847_v46, %v13924_v42 }
 0xcc6   :  { %v13915_v1 = vpop.f32.mrf.mxu1 }
 0xcc9   :  { %5005 = vmatmul.bf16.gmra.mxu1 %v4300_v0 }
 0xcca   :  { %5344 = vmatmul.bf16.gmra.mxu3 %v4300_v0 }
 0xccd   :  { %v4634_v57 = vpop.f32.mrf.mxu2  ;;  %v4683_v38 = vpop.f32.mrf.mxu3 }
 0xcce   :  { %v13917_v30 = vpop.f32.mrf.mxu1  ;;  %v4635_v21 = vadd.f32 %v4634_v57, %v13922_v59  ;;  %v4684_v40 = vadd.f32 %v4683_v38, %v13924_v42  ;;  %v4630_v57 = vadd.f32 %v4629_v25, %v13922_v59  ;;  %v4679_v38 = vadd.f32 %v4678_v23, %v13924_v42 }
 0xcd5   :  { %v4636_v48 = vpop.f32.mrf.mxu2  ;;  %v4685_v27 = vpop.f32.mrf.mxu3 }
 0xcd6   :  { %v4637_v0 = vadd.f32 %v4636_v48, %v13922_v59  ;;  %v4686_v19 = vadd.f32 %v4685_v27, %v13924_v42  ;;  %v13930_v53 = vpop.f32.mrf.mxu1  ;;  %v4702_v48 = vpack.c.bf16 %v4632_v16, %v4630_v57  ;;  %v5041_v27 = vpack.c.bf16 %v4681_v37, %v4679_v38 }
 0xcd7   :  { %v4622_v16 = vadd.f32 %v4621_v17, %v13922_v59  ;;  %v4617_v17 = vadd.f32 %v13887_v7, %v13922_v59  ;;  %v4612_v7 = vadd.f32 %v13873_v6, %v13922_v59  ;;  %v4607_v6 = vadd.f32 %v13859_v32, %v13922_v59 }
 0xcd8   :  { %v4703_v9 = vpack.c.bf16 %v4637_v0, %v4635_v21  ;;  %v5042_v24 = vpack.c.bf16 %v4686_v19, %v4684_v40  ;;  %v4627_v19 = vadd.f32 %v4626_v2, %v13922_v59  ;;  %v4625_v40 = vadd.f32 %v4624_v47, %v13922_v59  ;;  %v4397_v2 = vpop.f32.mrf.mxu0 }
 0xcd9   :  { %v4674_v21 = vadd.f32 %v4673_v39, %v13924_v42  ;;  %v4669_v47 = vadd.f32 %v13897_v10, %v13924_v42  ;;  %v4664_v10 = vadd.f32 %v13883_v41, %v13924_v42  ;;  %v4659_v41 = vadd.f32 %v13869_v29, %v13924_v42 }
 0xcda   :  { %4704 = vmatpush.bf16.xpose.msrb.mxu0 %v4703_v9  ;;  %5043 = vmatpush.bf16.xpose.msra.mxu2 %v5042_v24  ;;  %v4676_v9 = vadd.f32 %v4675_v60, %v13924_v42  ;;  %v4701_v25 = vpack.c.bf16 %v4627_v19, %v4625_v40  ;;  %v4620_v60 = vadd.f32 %v13895_v45, %v13922_v59 }
 0xcdb   :  { %v5039_v57 = vpack.c.bf16 %v4671_v63, %v4669_v47  ;;  %v4615_v45 = vadd.f32 %v13881_v49, %v13922_v59  ;;  %v4610_v49 = vadd.f32 %v13867_v35, %v13922_v59  ;;  %v4605_v35 = vadd.f32 %v13851_v20, %v13922_v59  ;;  %v8892_v20 = vld [vmem:[%s16134_s5 + $0x2] sm:$0x3] }
 0xcdc   :  { %v5040_v23 = vpack.c.bf16 %v4676_v9, %v4674_v21  ;;  %v4700_v37 = vpack.c.bf16 %v4622_v16, %v4620_v60  ;;  %v5038_v9 = vpack.c.bf16 %v4666_v11, %v4664_v10  ;;  %v4654_v29 = vadd.f32 %v13853_v31, %v13924_v42 }
 0xcdd   :  { %v13934_v54 = vpop.f32.mrf.mxu3  ;;  %v4699_v19 = vpack.c.bf16 %v4617_v17, %v4615_v45  ;;  %v4697_v47 = vpack.c.bf16 %v4607_v6, %v4605_v35  ;;  %v4602_v32 = vadd.f32 %v13845_v14, %v13922_v59  ;;  %v4600_v31 = vadd.f32 %v13831_v28, %v13922_v59 }
 0xcde   :  { %v13938_v36 = vpop.f32.mrf.mxu1  ;;  %v4649_v11 = vadd.f32 %v13833_v52, %v13924_v42  ;;  %v14011_v46 = vperm.slane %v8892_v20, 1 }
 0xcdf   :  { %v4696_v10 = vpack.c.bf16 %v4602_v32, %v4600_v31 }
 0xce0   :  { %v5035_v14 = vpack.c.bf16 %v4651_v61, %v4649_v11  ;;  %v4447_v28 = vadd.f32 %v13826_v56, %v14011_v46  ;;  %v4452_v6 = vadd.f32 %v13849_v4, %v14011_v46  ;;  %v4457_v4 = vadd.f32 %v13863_v22, %v14011_v46 }
 0xce2   :  { %4705 = vmatpush.bf16.xpose.msrb.mxu0 %v4702_v48  ;;  %5044 = vmatpush.bf16.xpose.msra.mxu2 %v5041_v27  ;;  %v4399_v27 = vpop.f32.mrf.mxu0 }
 0xce5   :  { %v13942_v24 = vpop.f32.mrf.mxu3 }
 0xce6   :  { %v13946_v55 = vpop.f32.mrf.mxu1 }
 0xcea   :  { %4706 = vmatpush.bf16.xpose.msrb.mxu0 %v4701_v25  ;;  %5045 = vmatpush.bf16.xpose.msra.mxu2 %v5040_v23  ;;  %v4698_v25 = vpack.c.bf16 %v4612_v7, %v4610_v49  ;;  %v5037_v23 = vpack.c.bf16 %v4661_v33, %v4659_v41  ;;  %v4402_v16 = vpop.f32.mrf.mxu0  ;;  %v4449_v7 = vadd.f32 %v13843_v8, %v14011_v46 }
 0xcec   :  { %v5027_v41 = vpack.c.bf16 %v4449_v7, %v4447_v28 }
 0xced   :  { %v13950_v0 = vpop.f32.mrf.mxu3 }
 0xcee   :  { %v13956_v39 = vpop.f32.mrf.mxu1 }
 0xcf2   :  { %4707 = vmatpush.bf16.xpose.msrb.mxu0 %v4700_v37  ;;  %5046 = vmatpush.bf16.xpose.msra.mxu2 %v5039_v57  ;;  %v5036_v37 = vpack.c.bf16 %v4656_v58, %v4654_v29  ;;  %v4404_v57 = vpop.f32.mrf.mxu0 }
 0xcf5   :  { %v13962_v38 = vpop.f32.mrf.mxu3 }
 0xcf6   :  { %v13968_v48 = vpop.f32.mrf.mxu1 }
 0xcfa   :  { %4708 = vmatpush.bf16.xpose.msrb.mxu0 %v4699_v19  ;;  %5047 = vmatpush.bf16.xpose.msra.mxu2 %v5038_v9  ;;  %v14009_v19 = vperm.slane %v8892_v20, 0  ;;  %v4407_v42 = vpop.f32.mrf.mxu0 }
 0xcfc   :  { %v4400_v9 = vadd.f32 %v4399_v27, %v14009_v19  ;;  %v4398_v59 = vadd.f32 %v4397_v2, %v14009_v19  ;;  %v4405_v8 = vadd.f32 %v4404_v57, %v14009_v19  ;;  %v4454_v2 = vadd.f32 %v13857_v34, %v14011_v46 }
 0xcfd   :  { %v13974_v40 = vpop.f32.mrf.mxu3  ;;  %v4403_v56 = vadd.f32 %v4402_v16, %v14009_v19  ;;  %v4459_v34 = vadd.f32 %v13871_v43, %v14011_v46  ;;  %v4408_v16 = vadd.f32 %v4407_v42, %v14009_v19  ;;  %v4462_v42 = vadd.f32 %v13877_v18, %v14011_v46 }
 0xcfe   :  { %v13980_v21 = vpop.f32.mrf.mxu1  ;;  %v4688_v49 = vpack.c.bf16 %v4400_v9, %v4398_v59 }
 0xcff   :  { %v4689_v29 = vpack.c.bf16 %v4405_v8, %v4403_v56 }
 0xd02   :  { %4709 = vmatpush.bf16.xpose.msrb.mxu0 %v4698_v25  ;;  %5048 = vmatpush.bf16.xpose.msra.mxu2 %v5037_v23  ;;  %v4409_v23 = vpop.f32.mrf.mxu0 }
 0xd03   :  { %v4410_v57 = vadd.f32 %v4409_v23, %v14009_v19 }
 0xd05   :  { %v13986_v63 = vpop.f32.mrf.mxu3 }
 0xd06   :  { %v13992_v60 = vpop.f32.mrf.mxu1 }
 0xd0a   :  { %4710 = vmatpush.bf16.xpose.msrb.mxu0 %v4697_v47  ;;  %5049 = vmatpush.bf16.xpose.msra.mxu2 %v5036_v37  ;;  %v5028_v47 = vpack.c.bf16 %v4454_v2, %v4452_v6  ;;  %v4412_v37 = vpop.f32.mrf.mxu0 }
 0xd0b   :  { %v4413_v43 = vadd.f32 %v4412_v37, %v14009_v19 }
 0xd0d   :  { %v13998_v17 = vpop.f32.mrf.mxu3 }
 0xd0e   :  { %v14007_v45 = vpop.f32.mrf.mxu1 }
 0xd12   :  { %4711 = vmatpush.bf16.xpose.msrb.mxu0 %v4696_v10  ;;  %5050 = vmatpush.bf16.xpose.msra.mxu2 %v5035_v14  ;;  %v4414_v20 = vpop.f32.mrf.mxu0  ;;  %v4690_v10 = vpack.c.bf16 %v4410_v57, %v4408_v16  ;;  %v5029_v14 = vpack.c.bf16 %v4459_v34, %v4457_v4  ;;  %v4467_v57 = vadd.f32 %v13893_v13, %v14011_v46 }
 0xd13   :  { %v4415_v28 = vadd.f32 %v4414_v20, %v14009_v19  ;;  %v5022_v13 = vpack.c.bf16 %v14007_v45, %v13992_v60  ;;  %v4472_v60 = vadd.f32 %v13903_v51, %v14011_v46 }
 0xd15   :  { %v14019_v52 = vpop.f32.mrf.mxu3  ;;  %v4691_v8 = vpack.c.bf16 %v4415_v28, %v4413_v43  ;;  %v10620_v43 = vld [vmem:[%s16135_s1] sm:$0xff] }
 0xd16   :  { %v14021_v33 = vpop.f32.mrf.mxu1  ;;  %v5361_v45 = vpack.c.bf16 %v14019_v52, %v13998_v17  ;;  %v4479_v17 = vadd.f32 %v13913_v26, %v14011_v46  ;;  %v4482_v26 = vadd.f32 %v13915_v1, %v14011_v46  ;;  %v10621_v1 = vld [vmem:[%s16135_s1 + $0x8] sm:$0xff] }
 0xd19   :  { %4712 = vmatmul.bf16.vlgmr.msrb.gmra.mxu0 %v4688_v49  ;;  %5051 = vmatmul.bf16.vlgmr.msra.gmra.mxu2 %v5027_v41  ;;  %v4464_v49 = vadd.f32 %v13885_v15, %v14011_v46  ;;  %v4469_v15 = vadd.f32 %v13899_v5, %v14011_v46 }
 0xd1a   :  { %v4417_v9 = vpop.f32.mrf.mxu0 }
 0xd1b   :  { %v5030_v2 = vpack.c.bf16 %v4464_v49, %v4462_v42  ;;  %v4418_v18 = vadd.f32 %v4417_v9, %v14009_v19 }
 0xd1d   :  { %v14023_v25 = vpop.f32.mrf.mxu3 }
 0xd1e   :  { %v14025_v27 = vpop.f32.mrf.mxu1 }
 0xd1f   :  { %v5023_v5 = vpack.c.bf16 %v14025_v27, %v14021_v33  ;;  %v5021_v33 = vpack.c.bf16 %v13980_v21, %v13968_v48  ;;  %v5019_v48 = vpack.c.bf16 %v13938_v36, %v13930_v53  ;;  %v5359_v21 = vpack.c.bf16 %v13962_v38, %v13950_v0 }
 0xd20   :  { %v4477_v36 = vadd.f32 %v13909_v44, %v14011_v46 }
 0xd22   :  { %v4419_v41 = vpop.f32.mrf.mxu0  ;;  %v5033_v52 = vpack.c.bf16 %v4479_v17, %v4477_v36 }
 0xd23   :  { %v4420_v20 = vadd.f32 %v4419_v41, %v14009_v19 }
 0xd25   :  { %v14033_v58 = vpop.f32.mrf.mxu3  ;;  %v4692_v4 = vpack.c.bf16 %v4420_v20, %v4418_v18  ;;  %v10623_v20 = vld [vmem:[%s16135_s1 + $0x18] sm:$0xff] }
 0xd26   :  { %v4996_v35 = vpop.f32.mrf.mxu1  ;;  %v5362_v9 = vpack.c.bf16 %v14033_v58, %v14023_v25 }
 0xd29   :  { %4717 = vmatmul.bf16.gmra.mxu0 %v4689_v29  ;;  %5056 = vmatmul.bf16.gmra.mxu2 %v5028_v47 }
 0xd2a   :  { %v4422_v47 = vpop.f32.mrf.mxu0 }
 0xd2b   :  { %v4423_v27 = vadd.f32 %v4422_v47, %v14009_v19 }
 0xd2d   :  { %v5335_v32 = vpop.f32.mrf.mxu3 }
 0xd2e   :  { %v4998_v61 = vpop.f32.mrf.mxu1 }
 0xd32   :  { %v4424_v28 = vpop.f32.mrf.mxu0 }
 0xd35   :  { %v5337_v31 = vpop.f32.mrf.mxu3 }
 0xd36   :  { %v5001_v11 = vpop.f32.mrf.mxu1 }
 0xd39   :  { %4722 = vmatmul.bf16.gmra.mxu0 %v4690_v10  ;;  %5061 = vmatmul.bf16.gmra.mxu2 %v5029_v14  ;;  %v5031_v10 = vpack.c.bf16 %v4469_v15, %v4467_v57  ;;  %v5024_v14 = vpack.c.bf16 %v4998_v61, %v4996_v35  ;;  %v4425_v35 = vadd.f32 %v4424_v28, %v14009_v19  ;;  %v10625_v28 = vld [vmem:[%s16135_s1 + $0x28] sm:$0xff] }
 0xd3a   :  { %v4474_v61 = vadd.f32 %v13906_v12, %v14011_v46  ;;  %v5360_v12 = vpack.c.bf16 %v13986_v63, %v13974_v40 }
 0xd3b   :  { %v4693_v25 = vpack.c.bf16 %v4425_v35, %v4423_v27  ;;  %v10627_v27 = vld [vmem:[%s16135_s1 + $0x38] sm:$0xff] }
 0xd3c   :  { %v5032_v58 = vpack.c.bf16 %v4474_v61, %v4472_v60 }
 0xd3d   :  { %v5340_v7 = vpop.f32.mrf.mxu3 }
 0xd3e   :  { %v5003_v59 = vpop.f32.mrf.mxu1 }
 0xd3f   :  { %v5025_v37 = vpack.c.bf16 %v5003_v59, %v5001_v11  ;;  %v5363_v11 = vpack.c.bf16 %v5337_v31, %v5335_v32  ;;  %v5020_v32 = vpack.c.bf16 %v13956_v39, %v13946_v55  ;;  %v5358_v55 = vpack.c.bf16 %v13942_v24, %v13934_v54 }
 0xd40   :  { %v4484_v54 = vadd.f32 %v13917_v30, %v14011_v46 }
 0xd42   :  { %v5034_v59 = vpack.c.bf16 %v4484_v54, %v4482_v26  ;;  %v10631_v54 = vld [vmem:[%s16135_s1 + $0x58] sm:$0xff] }
 0xd45   :  { %v5342_v22 = vpop.f32.mrf.mxu3 }
 0xd46   :  { %v5006_v23 = vpop.f32.mrf.mxu1  ;;  %v5364_v49 = vpack.c.bf16 %v5342_v22, %v5340_v7  ;;  %v4427_v7 = vpop.f32.mrf.mxu0 }
 0xd47   :  { %v4428_v40 = vadd.f32 %v4427_v7, %v14009_v19 }
 0xd49   :  { %4727 = vmatmul.bf16.gmra.mxu0 %v4691_v8  ;;  %5066 = vmatmul.bf16.gmra.mxu2 %v5030_v2  ;;  %v10622_v2 = vld [vmem:[%s16135_s1 + $0x10] sm:$0xff] }
 0xd4d   :  { %v5345_v56 = vpop.f32.mrf.mxu3 }
 0xd4e   :  { %v5008_v6 = vpop.f32.mrf.mxu1  ;;  %v4429_v51 = vpop.f32.mrf.mxu0 }
 0xd4f   :  { %v5026_v29 = vpack.c.bf16 %v5008_v6, %v5006_v23  ;;  %v4430_v39 = vadd.f32 %v4429_v51, %v14009_v19 }
 0xd51   :  { %5415 = vmatpush.bf16.msrb.mxu1 %v5026_v29  ;;  %v4694_v63 = vpack.c.bf16 %v4430_v39, %v4428_v40 }
 0xd55   :  { %v5347_v34 = vpop.f32.mrf.mxu3  ;;  %5416 = vmatpush.bf16.msrb.mxu1 %v5025_v37 }
 0xd56   :  { %v5365_v16 = vpack.c.bf16 %v5347_v34, %v5345_v56  ;;  %v4432_v53 = vpop.f32.mrf.mxu0  ;;  %v10624_v34 = vld [vmem:[%s16135_s1 + $0x20] sm:$0xff] }
 0xd57   :  { %v4433_v24 = vadd.f32 %v4432_v53, %v14009_v19  ;;  %v10630_v53 = vld [vmem:[%s16135_s1 + $0x50] sm:$0xff] }
 0xd58   :  { %5366 = vmatpush.bf16.msra.mxu0 %v5365_v16 }
 0xd59   :  { %4732 = vmatmul.bf16.gmra.mxu0 %v4692_v4  ;;  %5071 = vmatmul.bf16.gmra.mxu2 %v5031_v10 }
 0xd5a   :  { %5417 = vmatpush.bf16.msrb.mxu1 %v5024_v14 }
 0xd5c   :  { %5367 = vmatpush.bf16.msra.mxu0 %v5364_v49 }
 0xd5e   :  { %5418 = vmatpush.bf16.msrb.mxu1 %v5023_v5  ;;  %v4434_v0 = vpop.f32.mrf.mxu0 }
 0xd5f   :  { %v4435_v38 = vadd.f32 %v4434_v0, %v14009_v19 }
 0xd60   :  { %5368 = vmatpush.bf16.msra.mxu0 %v5363_v11 }
 0xd61   :  { %v4695_v31 = vpack.c.bf16 %v4435_v38, %v4433_v24 }
 0xd62   :  { %5419 = vmatpush.bf16.msrb.mxu1 %v5022_v13 }
 0xd64   :  { %5369 = vmatpush.bf16.msra.mxu0 %v5362_v9  ;;  %v10626_v9 = vld [vmem:[%s16135_s1 + $0x30] sm:$0xff] }
 0xd66   :  { %5420 = vmatpush.bf16.msrb.mxu1 %v5021_v33 }
 0xd68   :  { %5370 = vmatpush.bf16.msra.mxu0 %v5361_v45 }
 0xd69   :  { %4737 = vmatmul.bf16.gmra.mxu0 %v4693_v25  ;;  %5076 = vmatmul.bf16.gmra.mxu2 %v5032_v58 }
 0xd6a   :  { %5421 = vmatpush.bf16.msrb.mxu1 %v5020_v32  ;;  %v10628_v32 = vld [vmem:[%s16135_s1 + $0x40] sm:$0xff] }
 0xd6c   :  { %5371 = vmatpush.bf16.msra.mxu0 %v5360_v12 }
 0xd6e   :  { %5422 = vmatpush.bf16.msrb.mxu1 %v5019_v48 }
 0xd70   :  { %5372 = vmatpush.bf16.msra.mxu0 %v5359_v21 }
 0xd74   :  { %5373 = vmatpush.bf16.msra.mxu0 %v5358_v55  ;;  %v10629_v55 = vld [vmem:[%s16135_s1 + $0x48] sm:$0xff] }
 0xd79   :  { %4742 = vmatmul.bf16.gmra.mxu0 %v4694_v63  ;;  %5081 = vmatmul.bf16.gmra.mxu2 %v5033_v52 }
 0xd89   :  { %4747 = vmatmul.bf16.gmra.mxu0 %v4695_v31  ;;  %5086 = vmatmul.bf16.gmra.mxu2 %v5034_v59 }
 0xd96   :  { %v4713_v44 = vpop.f32.mrf.mxu0 }
 0xd97   :  { %v14094_v42 = vadd.f32 %v10620_v43, %v4713_v44 }
 0xd99   :  { %4753 = vmax.xlane.f32.xlu2 %v14094_v42 }
 0xd9c   :  { %v5052_v22 = vpop.f32.mrf.mxu2 }
 0xd9d   :  { %v14097_v30 = vadd.f32 %v10620_v43, %v5052_v22 }
 0xd9e   :  { %v4715_v19 = vpop.f32.mrf.mxu0 }
 0xd9f   :  { %v14102_v46 = vadd.f32 %v10621_v1, %v4715_v19  ;;  %5092 = vmax.xlane.f32.xlu1 %v14097_v30 }
 0xda1   :  { %4755 = vmax.xlane.f32.xlu0 %v14102_v46 }
 0xda4   :  { %v5054_v41 = vpop.f32.mrf.mxu2 }
 0xda5   :  { %v14106_v23 = vadd.f32 %v10621_v1, %v5054_v41 }
 0xda6   :  { %v4718_v8 = vpop.f32.mrf.mxu0 }
 0xda7   :  { %v14111_v56 = vadd.f32 %v10622_v2, %v4718_v8  ;;  %5094 = vmax.xlane.f32.xlu2 %v14106_v23 }
 0xda9   :  { %4757 = vmax.xlane.f32.xlu0 %v14111_v56 }
 0xdac   :  { %v5057_v6 = vpop.f32.mrf.mxu2 }
 0xdad   :  { %v14115_v29 = vadd.f32 %v10622_v2, %v5057_v6 }
 0xdae   :  { %v4720_v47 = vpop.f32.mrf.mxu0 }
 0xdaf   :  { %v14120_v15 = vadd.f32 %v10623_v20, %v4720_v47  ;;  %5096 = vmax.xlane.f32.xlu2 %v14115_v29 }
 0xdb1   :  { %4759 = vmax.xlane.f32.xlu1 %v14120_v15 }
 0xdb4   :  { %v5059_v37 = vpop.f32.mrf.mxu2 }
 0xdb5   :  { %v14124_v18 = vadd.f32 %v10623_v20, %v5059_v37 }
 0xdb6   :  { %v4723_v57 = vpop.f32.mrf.mxu0 }
 0xdb7   :  { %v14129_v16 = vadd.f32 %v10624_v34, %v4723_v57  ;;  %5098 = vmax.xlane.f32.xlu0 %v14124_v18 }
 0xdb9   :  { %4761 = vmax.xlane.f32.xlu1 %v14129_v16 }
 0xdbc   :  { %v5062_v4 = vpop.f32.mrf.mxu2 }
 0xdbd   :  { %v14133_v10 = vadd.f32 %v10624_v34, %v5062_v4 }
 0xdbe   :  { %v4725_v14 = vpop.f32.mrf.mxu0 }
 0xdbf   :  { %v14138_v49 = vadd.f32 %v10625_v28, %v4725_v14  ;;  %5100 = vmax.xlane.f32.xlu0 %v14133_v10 }
 0xdc1   :  { %4763 = vmax.xlane.f32.xlu2 %v14138_v49 }
 0xdc4   :  { %v5064_v5 = vpop.f32.mrf.mxu2 }
 0xdc5   :  { %v14142_v11 = vadd.f32 %v10625_v28, %v5064_v5 }
 0xdc6   :  { %v4728_v13 = vpop.f32.mrf.mxu0 }
 0xdc7   :  { %v14147_v35 = vadd.f32 %v10626_v9, %v4728_v13  ;;  %5102 = vmax.xlane.f32.xlu1 %v14142_v11 }
 0xdc9   :  { %4765 = vmax.xlane.f32.xlu2 %v14147_v35 }
 0xdcc   :  { %v5067_v61 = vpop.f32.mrf.mxu2 }
 0xdcd   :  { %v14151_v7 = vadd.f32 %v10626_v9, %v5067_v61 }
 0xdce   :  { %v4730_v33 = vpop.f32.mrf.mxu0 }
 0xdcf   :  { %v14156_v60 = vadd.f32 %v10627_v27, %v4730_v33  ;;  %5104 = vmax.xlane.f32.xlu1 %v14151_v7 }
 0xdd1   :  { %4767 = vmax.xlane.f32.xlu0 %v14156_v60 }
 0xdd4   :  { %v5069_v45 = vpop.f32.mrf.mxu2 }
 0xdd5   :  { %v14160_v25 = vadd.f32 %v10627_v27, %v5069_v45 }
 0xdd6   :  { %v4733_v58 = vpop.f32.mrf.mxu0 }
 0xdd7   :  { %v14165_v12 = vadd.f32 %v10628_v32, %v4733_v58  ;;  %5106 = vmax.xlane.f32.xlu2 %v14160_v25 }
 0xdd9   :  { %4769 = vmax.xlane.f32.xlu1 %v14165_v12 }
 0xddc   :  { %v5072_v48 = vpop.f32.mrf.mxu2 }
 0xddd   :  { %v14169_v51 = vadd.f32 %v10628_v32, %v5072_v48 }
 0xdde   :  { %v4735_v21 = vpop.f32.mrf.mxu0 }
 0xddf   :  { %v14174_v39 = vadd.f32 %v10629_v55, %v4735_v21  ;;  %5108 = vmax.xlane.f32.xlu0 %v14169_v51 }
 0xde1   :  { %4771 = vmax.xlane.f32.xlu2 %v14174_v39 }
 0xde4   :  { %v5074_v17 = vpop.f32.mrf.mxu2 }
 0xde5   :  { %v14178_v40 = vadd.f32 %v10629_v55, %v5074_v17 }
 0xde6   :  { %v4738_v36 = vpop.f32.mrf.mxu0 }
 0xde7   :  { %v14183_v63 = vadd.f32 %v10630_v53, %v4738_v36  ;;  %5110 = vmax.xlane.f32.xlu1 %v14178_v40 }
 0xde9   :  { %4773 = vmax.xlane.f32.xlu0 %v14183_v63 }
 0xdec   :  { %v5077_v52 = vpop.f32.mrf.mxu2 }
 0xded   :  { %v14187_v0 = vadd.f32 %v10630_v53, %v5077_v52 }
 0xdee   :  { %v4740_v38 = vpop.f32.mrf.mxu0 }
 0xdef   :  { %v14192_v24 = vadd.f32 %v10631_v54, %v4740_v38  ;;  %5112 = vmax.xlane.f32.xlu2 %v14187_v0 }
 0xdf1   :  { %4775 = vmax.xlane.f32.xlu1 %v14192_v24 }
 0xdf4   :  { %v5079_v9 = vpop.f32.mrf.mxu2 }
 0xdf5   :  { %v14222_v27 = vadd.f32 %v10631_v54, %v5079_v9  ;;  %v10634_v9 = vld [vmem:[%s16135_s1 + $0x70] sm:$0xff] }
 0xdf6   :  { %v4743_v37 = vpop.f32.mrf.mxu0 }
 0xdfc   :  { %v5082_v21 = vpop.f32.mrf.mxu2 }
 0xdfe   :  { %v4745_v38 = vpop.f32.mrf.mxu0 }
 0xe0c   :  { %v4754_v26 = vpop.xlane.xlu2 %4753 }
 0xe0d   :  { %v4785_v31 = vsub.f32 %v14094_v42, %v4754_v26  ;;  %v5084_v26 = vpop.f32.mrf.mxu2 }
 0xe0f   :  { %v4801_v59 = vmul.f32 1.442695, %v4785_v31 }
 0xe11   :  { %10264 = vpow2.f32 %v4801_v59 }
 0xe12   :  { %v5093_v44 = vpop.xlane.xlu1 %5092 }
 0xe13   :  { %v5124_v43 = vsub.f32 %v14097_v30, %v5093_v44 }
 0xe14   :  { %v4756_v22 = vpop.xlane.xlu0 %4755 }
 0xe15   :  { %v5140_v19 = vmul.f32 1.442695, %v5124_v43  ;;  %v4786_v1 = vsub.f32 %v14102_v46, %v4756_v22  ;;  %v10633_v43 = vld [vmem:[%s16135_s1 + $0x68] sm:$0xff] }
 0xe16   :  { %v14247_v22 = vadd.f32 %v10633_v43, %v4745_v38 }
 0xe17   :  { %v14199_v41 = vpop.eup %10264  ;;  %10266 = vpow2.f32 %v5140_v19  ;;  %v4803_v8 = vmul.f32 1.442695, %v4786_v1 }
 0xe18   :  { %4833 = vadd.xlane.f32.xlu0 %v14199_v41 }
 0xe19   :  { %10268 = vpow2.f32 %v4803_v8  ;;  %v14251_v8 = vadd.f32 %v10633_v43, %v5084_v26 }
 0xe1a   :  { %v5095_v2 = vpop.xlane.xlu2 %5094 }
 0xe1b   :  { %v5125_v6 = vsub.f32 %v14106_v23, %v5095_v2  ;;  %v10632_v23 = vld [vmem:[%s16135_s1 + $0x60] sm:$0xff] }
 0xe1c   :  { %v4758_v20 = vpop.xlane.xlu0 %4757  ;;  %v14214_v4 = vadd.f32 %v10632_v23, %v4743_v37  ;;  %v14234_v36 = vadd.f32 %v10632_v23, %v5082_v21 }
 0xe1d   :  { %v14203_v42 = vpop.eup %10266  ;;  %v5142_v47 = vmul.f32 1.442695, %v5125_v6  ;;  %v4787_v46 = vsub.f32 %v14111_v56, %v4758_v20 }
 0xe1e   :  { %5172 = vadd.xlane.f32.xlu2 %v14203_v42 }
 0xe1f   :  { %v14206_v30 = vpop.eup %10268  ;;  %10270 = vpow2.f32 %v5142_v47  ;;  %v4805_v14 = vmul.f32 1.442695, %v4787_v46 }
 0xe20   :  { %4835 = vadd.xlane.f32.xlu1 %v14206_v30 }
 0xe22   :  { %v5097_v57 = vpop.xlane.xlu2 %5096 }
 0xe23   :  { %v5126_v34 = vsub.f32 %v14115_v29, %v5097_v57 }
 0xe24   :  { %v4760_v28 = vpop.xlane.xlu1 %4759 }
 0xe25   :  { %v14216_v5 = vpop.eup %10270  ;;  %v5144_v13 = vmul.f32 1.442695, %v5126_v34  ;;  %v4788_v56 = vsub.f32 %v14120_v15, %v4760_v28 }
 0xe26   :  { %5174 = vadd.xlane.f32.xlu0 %v14216_v5  ;;  %4777 = vmax.xlane.f32.xlu2 %v14214_v4 }
 0xe27   :  { %10272 = vpow2.f32 %v5144_v13  ;;  %v4807_v29 = vmul.f32 1.442695, %v4788_v56 }
 0xe28   :  { %10274 = vpow2.f32 %v4805_v14 }
 0xe29   :  { %10276 = vpow2.f32 %v4807_v29 }
 0xe2a   :  { %v5099_v61 = vpop.xlane.xlu0 %5098 }
 0xe2b   :  { %v5127_v33 = vsub.f32 %v14124_v18, %v5099_v61  ;;  %v10635_v61 = vld [vmem:[%s16135_s1 + $0x78] sm:$0xff] }
 0xe2c   :  { %v4762_v45 = vpop.xlane.xlu1 %4761 }
 0xe2d   :  { %v14224_v58 = vpop.eup %10272  ;;  %v5146_v32 = vmul.f32 1.442695, %v5127_v33  ;;  %v4789_v15 = vsub.f32 %v14129_v16, %v4762_v45 }
 0xe2e   :  { %v14226_v48 = vpop.eup %10274  ;;  %5114 = vmax.xlane.f32.xlu0 %v14222_v27  ;;  %5176 = vadd.xlane.f32.xlu1 %v14224_v58 }
 0xe2f   :  { %10278 = vpow2.f32 %v5146_v32  ;;  %4837 = vadd.xlane.f32.xlu2 %v14226_v48  ;;  %v4809_v18 = vmul.f32 1.442695, %v4789_v15  ;;  %v14232_v17 = vpop.eup %10276 }
 0xe31   :  { %10280 = vpow2.f32 %v4809_v18 }
 0xe32   :  { %v5101_v55 = vpop.xlane.xlu0 %5100 }
 0xe33   :  { %v5128_v54 = vsub.f32 %v14133_v10, %v5101_v55 }
 0xe34   :  { %v4764_v53 = vpop.xlane.xlu2 %4763 }
 0xe35   :  { %v14236_v52 = vpop.eup %10278  ;;  %v4790_v16 = vsub.f32 %v14138_v49, %v4764_v53  ;;  %v5148_v31 = vmul.f32 1.442695, %v5128_v54 }
 0xe36   :  { %4839 = vadd.xlane.f32.xlu0 %v14232_v17  ;;  %5116 = vmax.xlane.f32.xlu1 %v14234_v36 }
 0xe37   :  { %5178 = vadd.xlane.f32.xlu2 %v14236_v52  ;;  %v4811_v10 = vmul.f32 1.442695, %v4790_v16  ;;  %v14249_v1 = vpop.eup %10280  ;;  %10282 = vpow2.f32 %v5148_v31 }
 0xe3a   :  { %v5103_v59 = vpop.xlane.xlu1 %5102 }
 0xe3b   :  { %v5129_v44 = vsub.f32 %v14142_v11, %v5103_v59  ;;  %v4748_v11 = vpop.f32.mrf.mxu0 }
 0xe3c   :  { %v4766_v19 = vpop.xlane.xlu2 %4765  ;;  %v14272_v56 = vadd.f32 %v10634_v9, %v4748_v11 }
 0xe3d   :  { %v5150_v2 = vmul.f32 1.442695, %v5129_v44  ;;  %v4791_v49 = vsub.f32 %v14147_v35, %v4766_v19  ;;  %v14257_v47 = vpop.eup %10282 }
 0xe3e   :  { %4841 = vadd.xlane.f32.xlu1 %v14249_v1  ;;  %4779 = vmax.xlane.f32.xlu0 %v14247_v22 }
 0xe3f   :  { %10284 = vpow2.f32 %v5150_v2  ;;  %5118 = vmax.xlane.f32.xlu2 %v14251_v8  ;;  %v4813_v6 = vmul.f32 1.442695, %v4791_v49 }
 0xe40   :  { %10286 = vpow2.f32 %v4811_v10 }
 0xe41   :  { %10288 = vpow2.f32 %v4813_v6 }
 0xe42   :  { %v5105_v37 = vpop.xlane.xlu1 %5104 }
 0xe43   :  { %v5130_v35 = vsub.f32 %v14151_v7, %v5105_v37  ;;  %v4750_v23 = vpop.f32.mrf.mxu0 }
 0xe44   :  { %v4768_v20 = vpop.xlane.xlu0 %4767  ;;  %v14279_v33 = vadd.f32 %v10635_v61, %v4750_v23 }
 0xe45   :  { %v14259_v46 = vpop.eup %10284  ;;  %v4792_v34 = vsub.f32 %v14156_v60, %v4768_v20  ;;  %v5152_v60 = vmul.f32 1.442695, %v5130_v35 }
 0xe46   :  { %v14261_v57 = vpop.eup %10286  ;;  %5182 = vadd.xlane.f32.xlu1 %v14259_v46  ;;  %5180 = vadd.xlane.f32.xlu0 %v14257_v47 }
 0xe47   :  { %4843 = vadd.xlane.f32.xlu2 %v14261_v57  ;;  %v4815_v14 = vmul.f32 1.442695, %v4792_v34  ;;  %v14274_v29 = vpop.eup %10288 }
 0xe49   :  { %10290 = vpow2.f32 %v4815_v14 }
 0xe4a   :  { %v5107_v28 = vpop.xlane.xlu2 %5106 }
 0xe4b   :  { %v5131_v13 = vsub.f32 %v14160_v25, %v5107_v28  ;;  %v5087_v25 = vpop.f32.mrf.mxu2 }
 0xe4c   :  { %v4770_v45 = vpop.xlane.xlu1 %4769  ;;  %v14297_v43 = vadd.f32 %v10634_v9, %v5087_v25 }
 0xe4d   :  { %v5154_v7 = vmul.f32 1.442695, %v5131_v13  ;;  %v4793_v32 = vsub.f32 %v14165_v12, %v4770_v45 }
 0xe4e   :  { %4781 = vmax.xlane.f32.xlu1 %v14272_v56  ;;  %4845 = vadd.xlane.f32.xlu0 %v14274_v29 }
 0xe4f   :  { %10292 = vpow2.f32 %v5154_v7  ;;  %4783 = vmax.xlane.f32.xlu2 %v14279_v33  ;;  %v14285_v21 = vpop.eup %10290  ;;  %v4817_v18 = vmul.f32 1.442695, %v4793_v32 }
 0xe50   :  { %10294 = vpow2.f32 %v5152_v60 }
 0xe51   :  { %10296 = vpow2.f32 %v4817_v18 }
 0xe52   :  { %v5109_v15 = vpop.xlane.xlu0 %5108 }
 0xe53   :  { %v5132_v38 = vsub.f32 %v14169_v51, %v5109_v15  ;;  %v5089_v12 = vpop.f32.mrf.mxu2 }
 0xe54   :  { %v4772_v55 = vpop.xlane.xlu2 %4771  ;;  %v14299_v51 = vadd.f32 %v10635_v61, %v5089_v12 }
 0xe55   :  { %v14287_v53 = vpop.eup %10292  ;;  %v4794_v16 = vsub.f32 %v14174_v39, %v4772_v55  ;;  %v5156_v26 = vmul.f32 1.442695, %v5132_v38 }
 0xe56   :  { %v14290_v54 = vpop.eup %10294  ;;  %4847 = vadd.xlane.f32.xlu1 %v14285_v21  ;;  %5186 = vadd.xlane.f32.xlu0 %v14287_v53 }
 0xe57   :  { %5184 = vadd.xlane.f32.xlu2 %v14290_v54  ;;  %v4819_v31 = vmul.f32 1.442695, %v4794_v16  ;;  %10298 = vpow2.f32 %v5156_v26  ;;  %v14301_v19 = vpop.eup %10296 }
 0xe59   :  { %10300 = vpow2.f32 %v4819_v31 }
 0xe5a   :  { %v5111_v59 = vpop.xlane.xlu1 %5110 }
 0xe5b   :  { %v5133_v44 = vsub.f32 %v14178_v40, %v5111_v59 }
 0xe5c   :  { %v4774_v10 = vpop.xlane.xlu0 %4773 }
 0xe5d   :  { %v5158_v39 = vmul.f32 1.442695, %v5133_v44  ;;  %v4795_v2 = vsub.f32 %v14183_v63, %v4774_v10  ;;  %v14307_v11 = vpop.eup %10298 }
 0xe5e   :  { %5122 = vmax.xlane.f32.xlu1 %v14299_v51  ;;  %5120 = vmax.xlane.f32.xlu0 %v14297_v43 }
 0xe5f   :  { %10302 = vpow2.f32 %v5158_v39  ;;  %4849 = vadd.xlane.f32.xlu2 %v14301_v19  ;;  %v4821_v40 = vmul.f32 1.442695, %v4795_v2  ;;  %v14310_v20 = vpop.eup %10300 }
 0xe61   :  { %10304 = vpow2.f32 %v4821_v40 }
 0xe62   :  { %v5113_v49 = vpop.xlane.xlu2 %5112 }
 0xe63   :  { %v5134_v6 = vsub.f32 %v14187_v0, %v5113_v49 }
 0xe64   :  { %v4776_v37 = vpop.xlane.xlu1 %4775 }
 0xe65   :  { %v14312_v34 = vpop.eup %10302  ;;  %v5160_v35 = vmul.f32 1.442695, %v5134_v6  ;;  %v4796_v63 = vsub.f32 %v14192_v24, %v4776_v37 }
 0xe66   :  { %5188 = vadd.xlane.f32.xlu1 %v14307_v11  ;;  %4851 = vadd.xlane.f32.xlu0 %v14310_v20 }
 0xe67   :  { %10306 = vpow2.f32 %v5160_v35  ;;  %v4823_v23 = vmul.f32 1.442695, %v4796_v63  ;;  %5190 = vadd.xlane.f32.xlu2 %v14312_v34  ;;  %v14318_v14 = vpop.eup %10304 }
 0xe69   :  { %10308 = vpow2.f32 %v4823_v23 }
 0xe6d   :  { %v14320_v0 = vpop.eup %10306 }
 0xe6e   :  { %4853 = vadd.xlane.f32.xlu0 %v14318_v14 }
 0xe6f   :  { %v14323_v28 = vpop.eup %10308  ;;  %5192 = vadd.xlane.f32.xlu2 %v14320_v0 }
 0xe70   :  { %4855 = vadd.xlane.f32.xlu1 %v14323_v28 }
 0xe8b   :  { %v4834_v24 = vpop.xlane.xlu0 %4833 }
 0xe8c   :  { %10310 = vrcp.f32 %v4834_v24 }
 0xe91   :  { %v5173_v13 = vpop.xlane.xlu2 %5172 }
 0xe92   :  { %v10311_v60 = vpop.eup %10310 }
 0xe93   :  { %v4836_v9 = vpop.xlane.xlu1 %4835  ;;  %v4881_v32 = vmul.f32 %v10311_v60, %v14199_v41 }
 0xe94   :  { %10312 = vrcp.f32 %v4836_v9 }
 0xe95   :  { %10314 = vrcp.f32 %v5173_v13 }
 0xe99   :  { %v5175_v61 = vpop.xlane.xlu0 %5174  ;;  %v4778_v7 = vpop.xlane.xlu2 %4777 }
 0xe9a   :  { %v10313_v45 = vpop.eup %10312  ;;  %10316 = vrcp.f32 %v5175_v61  ;;  %v4797_v25 = vsub.f32 %v14214_v4, %v4778_v7 }
 0xe9b   :  { %v4882_v15 = vmul.f32 %v10313_v45, %v14206_v30  ;;  %v10315_v38 = vpop.eup %10314 }
 0xe9c   :  { %v4825_v18 = vmul.f32 1.442695, %v4797_v25  ;;  %v5220_v12 = vmul.f32 %v10315_v38, %v14203_v42 }
 0xe9d   :  { %v5011_v55 = vpack.c.bf16 %v4882_v15, %v4881_v32 }
 0xe9e   :  { %10318 = vpow2.f32 %v4825_v18 }
 0xe9f   :  { %5423 = vmatmul.bf16.vlgmr.msrb.gmra.mxu1 %v5011_v55 }
 0xea0   :  { %v10317_v16 = vpop.eup %10316 }
 0xea1   :  { %v5221_v26 = vmul.f32 %v10317_v16, %v14216_v5  ;;  %v5115_v31 = vpop.xlane.xlu0 %5114  ;;  %v5177_v59 = vpop.xlane.xlu1 %5176 }
 0xea2   :  { %v5135_v44 = vsub.f32 %v14222_v27, %v5115_v31  ;;  %v4838_v10 = vpop.xlane.xlu2 %4837 }
 0xea3   :  { %v5350_v4 = vpack.c.bf16 %v5221_v26, %v5220_v12 }
 0xea4   :  { %v14333_v39 = vpop.eup %10318  ;;  %v5162_v41 = vmul.f32 1.442695, %v5135_v44 }
 0xea5   :  { %5374 = vmatmul.bf16.vlgmr.msra.gmra.mxu0 %v5350_v4  ;;  %4857 = vadd.xlane.f32.xlu1 %v14333_v39 }
 0xea6   :  { %10320 = vpow2.f32 %v5162_v41 }
 0xea7   :  { %10322 = vrcp.f32 %v4838_v10 }
 0xea8   :  { %10324 = vrcp.f32 %v5177_v59 }
 0xea9   :  { %v4840_v30 = vpop.xlane.xlu0 %4839  ;;  %v5117_v2 = vpop.xlane.xlu1 %5116 }
 0xeaa   :  { %10326 = vrcp.f32 %v4840_v30  ;;  %v5136_v42 = vsub.f32 %v14234_v36, %v5117_v2  ;;  %v5179_v5 = vpop.xlane.xlu2 %5178 }
 0xeab   :  { %10328 = vrcp.f32 %v5179_v5 }
 0xeac   :  { %v14337_v40 = vpop.eup %10320  ;;  %v5164_v27 = vmul.f32 1.442695, %v5136_v42 }
 0xead   :  { %5194 = vadd.xlane.f32.xlu0 %v14337_v40  ;;  %v10323_v49 = vpop.eup %10322 }
 0xeae   :  { %10330 = vpow2.f32 %v5164_v27  ;;  %v10325_v6 = vpop.eup %10324  ;;  %v4883_v24 = vmul.f32 %v10323_v49, %v14226_v48 }
 0xeaf   :  { %v5222_v60 = vmul.f32 %v10325_v6, %v14224_v58 }
 0xeb0   :  { %v10327_v37 = vpop.eup %10326 }
 0xeb1   :  { %v10329_v35 = vpop.eup %10328  ;;  %v4842_v63 = vpop.xlane.xlu1 %4841  ;;  %v4884_v13 = vmul.f32 %v10327_v37, %v14232_v17 }
 0xeb2   :  { %v4780_v23 = vpop.xlane.xlu0 %4779  ;;  %v5119_v9 = vpop.xlane.xlu2 %5118  ;;  %v5223_v61 = vmul.f32 %v10329_v35, %v14236_v52 }
 0xeb3   :  { %v4798_v36 = vsub.f32 %v14247_v22, %v4780_v23  ;;  %v5137_v7 = vsub.f32 %v14251_v8, %v5119_v9  ;;  %v5012_v45 = vpack.c.bf16 %v4884_v13, %v4883_v24 }
 0xeb4   :  { %v14346_v25 = vpop.eup %10330  ;;  %v5351_v15 = vpack.c.bf16 %v5223_v61, %v5222_v60 }
 0xeb5   :  { %v4827_v32 = vmul.f32 1.442695, %v4798_v36  ;;  %v5166_v18 = vmul.f32 1.442695, %v5137_v7  ;;  %5196 = vadd.xlane.f32.xlu0 %v14346_v25  ;;  %5428 = vmatmul.bf16.gmra.mxu1 %v5012_v45 }
 0xeb6   :  { %5379 = vmatmul.bf16.gmra.mxu0 %v5351_v15 }
 0xeb7   :  { %10332 = vpow2.f32 %v4827_v32 }
 0xeb8   :  { %10334 = vpow2.f32 %v5166_v18 }
 0xeb9   :  { %10336 = vrcp.f32 %v4842_v63  ;;  %v5183_v48 = vpop.xlane.xlu1 %5182 }
 0xeba   :  { %v5181_v17 = vpop.xlane.xlu0 %5180  ;;  %10338 = vrcp.f32 %v5183_v48  ;;  %v4844_v58 = vpop.xlane.xlu2 %4843 }
 0xebb   :  { %10340 = vrcp.f32 %v5181_v17 }
 0xebc   :  { %10342 = vrcp.f32 %v4844_v58 }
 0xebd   :  { %v14349_v52 = vpop.eup %10332 }
 0xebe   :  { %v14351_v22 = vpop.eup %10334  ;;  %4859 = vadd.xlane.f32.xlu2 %v14349_v52 }
 0xebf   :  { %5198 = vadd.xlane.f32.xlu1 %v14351_v22  ;;  %v10337_v8 = vpop.eup %10336 }
 0xec0   :  { %v10339_v55 = vpop.eup %10338  ;;  %v4885_v41 = vmul.f32 %v10337_v8, %v14249_v1 }
 0xec1   :  { %v10341_v38 = vpop.eup %10340  ;;  %v4782_v16 = vpop.xlane.xlu1 %4781  ;;  %v5225_v26 = vmul.f32 %v10339_v55, %v14259_v46 }
 0xec2   :  { %v4846_v12 = vpop.xlane.xlu0 %4845  ;;  %v10343_v31 = vpop.eup %10342  ;;  %v4799_v59 = vsub.f32 %v14272_v56, %v4782_v16  ;;  %v5224_v10 = vmul.f32 %v10341_v38, %v14257_v47 }
 0xec3   :  { %v4784_v44 = vpop.xlane.xlu2 %4783  ;;  %v4886_v30 = vmul.f32 %v10343_v31, %v14261_v57 }
 0xec4   :  { %v4800_v4 = vsub.f32 %v14279_v33, %v4784_v44  ;;  %v4829_v2 = vmul.f32 1.442695, %v4799_v59  ;;  %v5352_v42 = vpack.c.bf16 %v5225_v26, %v5224_v10 }
 0xec5   :  { %v5013_v27 = vpack.c.bf16 %v4886_v30, %v4885_v41 }
 0xec6   :  { %v4831_v5 = vmul.f32 1.442695, %v4800_v4  ;;  %10344 = vpow2.f32 %v4829_v2  ;;  %5384 = vmatmul.bf16.gmra.mxu0 %v5352_v42  ;;  %v14388_v2 = vld [vmem:[%s16081_s10 + $0x1] ss:$0 sm:$0xff] }
 0xec7   :  { %5433 = vmatmul.bf16.gmra.mxu1 %v5013_v27 }
 0xec8   :  { %10346 = vpow2.f32 %v4831_v5 }
 0xec9   :  { %10348 = vrcp.f32 %v4846_v12  ;;  %v4848_v46 = vpop.xlane.xlu1 %4847 }
 0xeca   :  { %v5187_v56 = vpop.xlane.xlu0 %5186  ;;  %10350 = vrcp.f32 %v4848_v46 }
 0xecb   :  { %v5185_v49 = vpop.xlane.xlu2 %5184  ;;  %10352 = vrcp.f32 %v5187_v56 }
 0xecc   :  { %v14361_v47 = vpop.eup %10344  ;;  %10354 = vrcp.f32 %v5185_v49 }
 0xecd   :  { %4861 = vadd.xlane.f32.xlu2 %v14361_v47 }
 0xece   :  { %v14363_v1 = vpop.eup %10346 }
 0xecf   :  { %v10349_v57 = vpop.eup %10348  ;;  %4863 = vadd.xlane.f32.xlu0 %v14363_v1 }
 0xed0   :  { %v10351_v33 = vpop.eup %10350  ;;  %v4887_v63 = vmul.f32 %v10349_v57, %v14274_v29 }
 0xed1   :  { %v10353_v6 = vpop.eup %10352  ;;  %v5123_v37 = vpop.xlane.xlu1 %5122  ;;  %v4888_v23 = vmul.f32 %v10351_v33, %v14285_v21 }
 0xed2   :  { %v5121_v35 = vpop.xlane.xlu0 %5120  ;;  %v10355_v24 = vpop.eup %10354  ;;  %v5139_v13 = vsub.f32 %v14299_v51, %v5123_v37  ;;  %v5227_v60 = vmul.f32 %v10353_v6, %v14287_v53 }
 0xed3   :  { %v5138_v36 = vsub.f32 %v14297_v43, %v5121_v35  ;;  %v4850_v9 = vpop.xlane.xlu2 %4849  ;;  %v5226_v61 = vmul.f32 %v10355_v24, %v14290_v54  ;;  %v5014_v7 = vpack.c.bf16 %v4888_v23, %v4887_v63 }
 0xed4   :  { %v5170_v45 = vmul.f32 1.442695, %v5139_v13 }
 0xed5   :  { %v5168_v32 = vmul.f32 1.442695, %v5138_v36  ;;  %v5353_v15 = vpack.c.bf16 %v5227_v60, %v5226_v61 }
 0xed6   :  { %10356 = vpow2.f32 %v5170_v45 }
 0xed7   :  { %10358 = vpow2.f32 %v5168_v32  ;;  %5389 = vmatmul.bf16.gmra.mxu0 %v5353_v15  ;;  %5438 = vmatmul.bf16.gmra.mxu1 %v5014_v7 }
 0xed8   :  { %10360 = vrcp.f32 %v4850_v9 }
 0xed9   :  { %v5189_v29 = vpop.xlane.xlu1 %5188 }
 0xeda   :  { %v4852_v21 = vpop.xlane.xlu0 %4851  ;;  %10362 = vrcp.f32 %v5189_v29 }
 0xedb   :  { %v5191_v51 = vpop.xlane.xlu2 %5190  ;;  %10364 = vrcp.f32 %v4852_v21 }
 0xedc   :  { %v14373_v43 = vpop.eup %10356  ;;  %10366 = vrcp.f32 %v5191_v51 }
 0xedd   :  { %v14375_v53 = vpop.eup %10358  ;;  %5202 = vadd.xlane.f32.xlu2 %v14373_v43 }
 0xede   :  { %5200 = vadd.xlane.f32.xlu1 %v14375_v53  ;;  %v10361_v54 = vpop.eup %10360 }
 0xedf   :  { %v4889_v8 = vmul.f32 %v10361_v54, %v14301_v19 }
 0xee0   :  { %v10363_v18 = vpop.eup %10362 }
 0xee1   :  { %v10365_v48 = vpop.eup %10364  ;;  %v5228_v17 = vmul.f32 %v10363_v18, %v14307_v11  ;;  %v16154_v18 = vld [vmem:[#allocation3_spill] sm:$0xff] }
 0xee2   :  { %v10367_v58 = vpop.eup %10366  ;;  %v4890_v55 = vmul.f32 %v10365_v48, %v14310_v20  ;;  %v4854_v31 = vpop.xlane.xlu0 %4853 }
 0xee3   :  { %v5229_v38 = vmul.f32 %v10367_v58, %v14312_v34  ;;  %v4856_v12 = vpop.xlane.xlu1 %4855  ;;  %v5193_v19 = vpop.xlane.xlu2 %5192 }
 0xee4   :  { %v5015_v16 = vpack.c.bf16 %v4890_v55, %v4889_v8  ;;  %10368 = vrcp.f32 %v4856_v12  ;;  %v16155_v55 = vld [vmem:[#allocation4_spill] sm:$0xff] }
 0xee5   :  { %v5354_v26 = vpack.c.bf16 %v5229_v38, %v5228_v17  ;;  %10370 = vrcp.f32 %v4854_v31 }
 0xee6   :  { %10372 = vrcp.f32 %v5193_v19 }
 0xee7   :  { %5394 = vmatmul.bf16.gmra.mxu0 %v5354_v26  ;;  %5443 = vmatmul.bf16.gmra.mxu1 %v5015_v16 }
 0xeea   :  { %v10369_v59 = vpop.eup %10368 }
 0xeeb   :  { %v10371_v44 = vpop.eup %10370  ;;  %v4892_v10 = vmul.f32 %v10369_v59, %v14323_v28 }
 0xeec   :  { %v4891_v11 = vmul.f32 %v10371_v44, %v14318_v14  ;;  %v10373_v42 = vpop.eup %10372 }
 0xeed   :  { %v5230_v27 = vmul.f32 %v10373_v42, %v14320_v0 }
 0xeee   :  { %v5016_v4 = vpack.c.bf16 %v4892_v10, %v4891_v11 }
 0xef7   :  { %5448 = vmatmul.bf16.gmra.mxu1 %v5016_v4  ;;  %v16156_v4 = vld [vmem:[#allocation5_spill] sm:$0xff] }
 0xf18   :  { %v4858_v56 = vpop.xlane.xlu1 %4857 }
 0xf1c   :  { %v5424_v20 = vpop.f32.mrf.mxu1 }
 0xf20   :  { %v5195_v34 = vpop.xlane.xlu0 %5194 }
 0xf21   :  { %10374 = vrcp.f32 %v5195_v34 }
 0xf22   :  { %v5375_v41 = vpop.f32.mrf.mxu0  ;;  %10376 = vrcp.f32 %v4858_v56 }
 0xf23   :  { %v5425_v30 = vadd.f32 %v5424_v20, %v5375_v41 }
 0xf24   :  { %v5426_v49 = vpop.f32.mrf.mxu1 }
 0xf25   :  { %v5464_v5 = vadd.f32 %v5425_v30, %v13610_v62 }
 0xf27   :  { %v10375_v28 = vpop.eup %10374  ;;  %v14392_v14 = vadd.f32 %v14388_v2, %v5464_v5  ;;  %v16157_v5 = vld [vmem:[#allocation6_spill] sm:$0xff] }
 0xf28   :  { %v5231_v46 = vmul.f32 %v10375_v28, %v14337_v40  ;;  %v5197_v37 = vpop.xlane.xlu0 %5196  ;;  %v10377_v13 = vpop.eup %10376 }
 0xf29   :  { %5501 = vadd.xlane.f32.xlu0 %v14392_v14  ;;  %10378 = vrcp.f32 %v5197_v37  ;;  %v4893_v7 = vmul.f32 %v10377_v13, %v14333_v39  ;;  %v16159_v13 = vld [vmem:[#allocation7_spill] sm:$0xff] }
 0xf2a   :  { %v5377_v57 = vpop.f32.mrf.mxu0  ;;  %v5355_v33 = vpack.c.bf16 %v5231_v46, %v5230_v27 }
 0xf2b   :  { %v5427_v6 = vadd.f32 %v5426_v49, %v5377_v57 }
 0xf2c   :  { %5399 = vmatmul.bf16.gmra.mxu0 %v5355_v33 }
 0xf2d   :  { %v5465_v35 = vadd.f32 %v5427_v6, %v13613_v50 }
 0xf2f   :  { %v14399_v62 = vadd.f32 %v14388_v2, %v5465_v35  ;;  %v10379_v36 = vpop.eup %10378  ;;  %v16158_v35 = vld [vmem:[#allocation2_spill] sm:$0xff] }
 0xf30   :  { %v5232_v32 = vmul.f32 %v10379_v36, %v14346_v25 }
 0xf31   :  { %v4860_v63 = vpop.xlane.xlu2 %4859  ;;  %5503 = vadd.xlane.f32.xlu1 %v14399_v62 }
 0xf32   :  { %v5199_v0 = vpop.xlane.xlu1 %5198  ;;  %10380 = vrcp.f32 %v4860_v63  ;;  %v5429_v40 = vpop.f32.mrf.mxu1 }
 0xf33   :  { %10382 = vrcp.f32 %v5199_v0  ;;  %v5380_v23 = vpop.f32.mrf.mxu0 }
 0xf34   :  { %v5430_v24 = vadd.f32 %v5429_v40, %v5380_v23 }
 0xf36   :  { %v5466_v9 = vadd.f32 %v5430_v24, %v13641_v3 }
 0xf38   :  { %v10381_v60 = vpop.eup %10380  ;;  %v14404_v61 = vadd.f32 %v14388_v2, %v5466_v9 }
 0xf39   :  { %v10383_v50 = vpop.eup %10382  ;;  %v4894_v45 = vmul.f32 %v10381_v60, %v14349_v52 }
 0xf3a   :  { %v5233_v15 = vmul.f32 %v10383_v50, %v14351_v22  ;;  %5505 = vadd.xlane.f32.xlu2 %v14404_v61  ;;  %v5431_v29 = vpop.f32.mrf.mxu1 }
 0xf3b   :  { %v5017_v21 = vpack.c.bf16 %v4894_v45, %v4893_v7  ;;  %v5382_v51 = vpop.f32.mrf.mxu0 }
 0xf3c   :  { %v5356_v54 = vpack.c.bf16 %v5233_v15, %v5232_v32  ;;  %v5432_v3 = vadd.f32 %v5431_v29, %v5382_v51  ;;  %v16160_v15 = vld [vmem:[#allocation8_spill] sm:$0xff] }
 0xf3d   :  { %5453 = vmatmul.bf16.gmra.mxu1 %v5017_v21 }
 0xf3e   :  { %5404 = vmatmul.bf16.gmra.mxu0 %v5356_v54  ;;  %v5467_v48 = vadd.f32 %v5432_v3, %v16154_v18 }
 0xf40   :  { %v4862_v17 = vpop.xlane.xlu2 %4861  ;;  %v14413_v39 = vadd.f32 %v14388_v2, %v5467_v48 }
 0xf41   :  { %10384 = vrcp.f32 %v4862_v17 }
 0xf42   :  { %v4864_v52 = vpop.xlane.xlu0 %4863  ;;  %5507 = vadd.xlane.f32.xlu0 %v14413_v39 }
 0xf43   :  { %10386 = vrcp.f32 %v4864_v52  ;;  %v5385_v25 = vpop.f32.mrf.mxu0 }
 0xf44   :  { %v5434_v22 = vpop.f32.mrf.mxu1 }
 0xf45   :  { %v5435_v58 = vadd.f32 %v5434_v22, %v5385_v25  ;;  %v16161_v25 = vld [vmem:[#allocation9_spill] sm:$0xff] }
 0xf47   :  { %v10385_v8 = vpop.eup %10384  ;;  %v5468_v38 = vadd.f32 %v5435_v58, %v16155_v55 }
 0xf48   :  { %v4895_v12 = vmul.f32 %v10385_v8, %v14361_v47 }
 0xf49   :  { %v10387_v16 = vpop.eup %10386  ;;  %v14419_v26 = vadd.f32 %v14388_v2, %v5468_v38 }
 0xf4a   :  { %v4896_v31 = vmul.f32 %v10387_v16, %v14363_v1 }
 0xf4b   :  { %5509 = vadd.xlane.f32.xlu1 %v14419_v26  ;;  %v5387_v59 = vpop.f32.mrf.mxu0 }
 0xf4c   :  { %v5018_v44 = vpack.c.bf16 %v4896_v31, %v4895_v12  ;;  %v5436_v10 = vpop.f32.mrf.mxu1  ;;  %v16162_v31 = vld [vmem:[#allocation10_spill] sm:$0xff] }
 0xf4d   :  { %v5437_v11 = vadd.f32 %v5436_v10, %v5387_v59 }
 0xf4e   :  { %5458 = vmatmul.bf16.gmra.mxu1 %v5018_v44 }
 0xf4f   :  { %v5469_v19 = vadd.f32 %v5437_v11, %v16156_v4 }
 0xf50   :  { %v5203_v20 = vpop.xlane.xlu2 %5202 }
 0xf51   :  { %v5201_v34 = vpop.xlane.xlu1 %5200  ;;  %10388 = vrcp.f32 %v5203_v20  ;;  %v14425_v41 = vadd.f32 %v14388_v2, %v5469_v19 }
 0xf52   :  { %10390 = vrcp.f32 %v5201_v34 }
 0xf53   :  { %5511 = vadd.xlane.f32.xlu2 %v14425_v41 }
 0xf54   :  { %v5390_v47 = vpop.f32.mrf.mxu0  ;;  %v5439_v1 = vpop.f32.mrf.mxu1 }
 0xf55   :  { %v5440_v30 = vadd.f32 %v5439_v1, %v5390_v47  ;;  %v16163_v1 = vld [vmem:[#allocation11_spill] sm:$0xff] }
 0xf57   :  { %v10389_v42 = vpop.eup %10388  ;;  %v5470_v28 = vadd.f32 %v5440_v30, %v16157_v5 }
 0xf58   :  { %v10391_v27 = vpop.eup %10390  ;;  %v5235_v46 = vmul.f32 %v10389_v42, %v14373_v43 }
 0xf59   :  { %v14431_v56 = vadd.f32 %v14388_v2, %v5470_v28  ;;  %v5234_v49 = vmul.f32 %v10391_v27, %v14375_v53 }
 0xf5b   :  { %5513 = vadd.xlane.f32.xlu2 %v14431_v56  ;;  %v5357_v57 = vpack.c.bf16 %v5235_v46, %v5234_v49  ;;  %v16164_v49 = vld [vmem:[#allocation12_spill] sm:$0xff] }
 0xf5c   :  { %v5441_v33 = vpop.f32.mrf.mxu1  ;;  %v5392_v6 = vpop.f32.mrf.mxu0 }
 0xf5d   :  { %5409 = vmatmul.bf16.gmra.mxu0 %v5357_v57  ;;  %v5442_v43 = vadd.f32 %v5441_v33, %v5392_v6 }
 0xf5f   :  { %v5471_v36 = vadd.f32 %v5442_v43, %v16159_v13  ;;  %v16165_v43 = vld [vmem:[#allocation13_spill] sm:$0xff] }
 0xf61   :  { %v14449_v45 = vadd.f32 %v14388_v2, %v5471_v36 }
 0xf64   :  { %v5444_v0 = vpop.f32.mrf.mxu1  ;;  %v5395_v23 = vpop.f32.mrf.mxu0 }
 0xf65   :  { %v5445_v50 = vadd.f32 %v5444_v0, %v5395_v23 }
 0xf67   :  { %v5472_v29 = vadd.f32 %v5445_v50, %v16160_v15  ;;  %v9812_v15 = vld [vmem:[%s16082_s11 + $0xf4] sm:$0xf] }
 0xf69   :  { %v14458_v54 = vadd.f32 %v14388_v2, %v5472_v29 }
 0xf6c   :  { %v5446_v7 = vpop.f32.mrf.mxu1  ;;  %v5397_v32 = vpop.f32.mrf.mxu0 }
 0xf6d   :  { %v5447_v3 = vadd.f32 %v5446_v7, %v5397_v32  ;;  %v9813_v32 = vld [vmem:[%s16082_s11 + $0xf4] sm:$0xf0] }
 0xf6f   :  { %v5473_v22 = vadd.f32 %v5447_v3, %v16161_v25  ;;  %v9202_v3 = vld [vmem:[%s16082_s11 + $0xe0] sm:$0xf] }
 0xf71   :  { %v14471_v38 = vadd.f32 %v14388_v2, %v5473_v22  ;;  %v9194_v22 = vld [vmem:[%s16082_s11 + $0xd0] sm:$0xf] }
 0xf74   :  { %v5449_v17 = vpop.f32.mrf.mxu1 }
 0xf7c   :  { %v5451_v12 = vpop.f32.mrf.mxu1 }
 0xf9c   :  { %v5502_v37 = vpop.xlane.xlu0 %5501 }
 0xf9d   :  { %v5533_v63 = vmul.f32 %v5502_v37, %v16158_v35 }
 0xf9f   :  { %v14437_v40 = vsub.f32 %v14392_v14, %v5533_v63 }
 0xfa1   :  { %v5565_v24 = vmul.f32 %v14437_v40, %v14437_v40 }
 0xfa3   :  { %5581 = vadd.xlane.f32.xlu0 %v5565_v24 }
 0xfa4   :  { %v5504_v53 = vpop.xlane.xlu1 %5503 }
 0xfa5   :  { %v5534_v9 = vmul.f32 %v5504_v53, %v16158_v35 }
 0xfa7   :  { %v14444_v60 = vsub.f32 %v14399_v62, %v5534_v9 }
 0xfa9   :  { %v5566_v14 = vmul.f32 %v14444_v60, %v14444_v60  ;;  %v5400_v18 = vpop.f32.mrf.mxu0 }
 0xfaa   :  { %v5450_v8 = vadd.f32 %v5449_v17, %v5400_v18  ;;  %v9811_v18 = vld [vmem:[%s16082_s11 + $0xe4] sm:$0xf0] }
 0xfab   :  { %5583 = vadd.xlane.f32.xlu1 %v5566_v14  ;;  %5515 = vadd.xlane.f32.xlu0 %v14449_v45  ;;  %v9210_v14 = vld [vmem:[%s16082_s11 + $0xf0] sm:$0xf]  ;;  %v9203_v17 = vor.u32 %v9811_v18, %v9202_v3 }
 0xfac   :  { %v5474_v59 = vadd.f32 %v5450_v8, %v16162_v31  ;;  %v9211_v29 = vor.u32 %v9813_v32, %v9210_v14  ;;  %v9808_v8 = vld [vmem:[%s16082_s11 + $0xd4] sm:$0xf]  ;;  %v9186_v31 = vld [vmem:[%s16082_s11 + $0xc0] sm:$0xf]  ;;  %v9798_v14 = vld [vmem:[%s16082_s11 + $0x84] sm:$0xf] }
 0xfad   :  { %v5506_v21 = vpop.xlane.xlu2 %5505 }
 0xfae   :  { %v5535_v51 = vmul.f32 %v5506_v21, %v16158_v35  ;;  %v14480_v11 = vadd.f32 %v14388_v2, %v5474_v59  ;;  %v9212_v21 = vld [vmem:[%s16082_s11 + $0xf8] sm:$0xf0]  ;;  %5967 = vmatpush.bf16.msrb.mxu2 %v9211_v29  ;;  %v9807_v59 = vld [vmem:[%s16082_s11 + $0xc4] sm:$0xf0] }
 0xfb0   :  { %v14455_v62 = vsub.f32 %v14404_v61, %v5535_v51  ;;  %v9215_v51 = vor.u32 %v9812_v15, %v9212_v21  ;;  %v9156_v15 = vld [vmem:[%s16082_s11 + $0x88] sm:$0xf0] }
 0xfb1   :  { %v5402_v16 = vpop.f32.mrf.mxu0  ;;  %v9159_v29 = vor.u32 %v9798_v14, %v9156_v15 }
 0xfb2   :  { %v5567_v48 = vmul.f32 %v14455_v62, %v14455_v62  ;;  %v5452_v4 = vadd.f32 %v5451_v12, %v5402_v16  ;;  %6016 = vmatpush.bf16.msra.mxu3 %v9215_v51  ;;  %5968 = vmatpush.bf16.msrb.mxu2 %v9203_v17  ;;  %v9196_v16 = vld [vmem:[%s16082_s11 + $0xd8] sm:$0xf0] }
 0xfb3   :  { %5517 = vadd.xlane.f32.xlu0 %v14458_v54  ;;  %v9199_v12 = vor.u32 %v9808_v8, %v9196_v16 }
 0xfb4   :  { %5585 = vadd.xlane.f32.xlu1 %v5567_v48  ;;  %v5475_v30 = vadd.f32 %v5452_v4, %v16163_v1  ;;  %v9810_v48 = vld [vmem:[%s16082_s11 + $0xe4] sm:$0xf]  ;;  %v9188_v4 = vld [vmem:[%s16082_s11 + $0xc8] sm:$0xf0] }
 0xfb5   :  { %v5508_v52 = vpop.xlane.xlu0 %5507 }
 0xfb6   :  { %v5536_v58 = vmul.f32 %v5508_v52, %v16158_v35  ;;  %v14491_v28 = vadd.f32 %v14388_v2, %v5475_v30  ;;  %v9204_v52 = vld [vmem:[%s16082_s11 + $0xe8] sm:$0xf0]  ;;  %v9180_v30 = vld [vmem:[%s16082_s11 + $0xb8] sm:$0xf0] }
 0xfb7   :  { %v9207_v25 = vor.u32 %v9810_v48, %v9204_v52 }
 0xfb8   :  { %v14466_v61 = vsub.f32 %v14413_v39, %v5536_v58  ;;  %v9809_v58 = vld [vmem:[%s16082_s11 + $0xd4] sm:$0xf0] }
 0xfb9   :  { %6017 = vmatpush.bf16.msra.mxu3 %v9207_v25 }
 0xfba   :  { %v5568_v55 = vmul.f32 %v14466_v61, %v14466_v61  ;;  %v5454_v20 = vpop.f32.mrf.mxu1 }
 0xfbb   :  { %v5405_v34 = vpop.f32.mrf.mxu0 }
 0xfbc   :  { %5587 = vadd.xlane.f32.xlu2 %v5568_v55  ;;  %5519 = vadd.xlane.f32.xlu1 %v14471_v38  ;;  %v5455_v5 = vadd.f32 %v5454_v20, %v5405_v34  ;;  %v9195_v55 = vor.u32 %v9809_v58, %v9194_v22  ;;  %v9178_v20 = vld [vmem:[%s16082_s11 + $0xb0] sm:$0xf]  ;;  %v9805_v34 = vld [vmem:[%s16082_s11 + $0xb4] sm:$0xf0] }
 0xfbd   :  { %6018 = vmatpush.bf16.msra.mxu3 %v9199_v12  ;;  %v9179_v1 = vor.u32 %v9805_v34, %v9178_v20 }
 0xfbe   :  { %v5510_v44 = vpop.xlane.xlu1 %5509  ;;  %v5476_v57 = vadd.f32 %v5455_v5, %v16164_v49  ;;  %5969 = vmatpush.bf16.msrb.mxu2 %v9195_v55  ;;  %v9170_v5 = vld [vmem:[%s16082_s11 + $0xa0] sm:$0xf] }
 0xfbf   :  { %v5537_v10 = vmul.f32 %v5510_v44, %v16158_v35  ;;  %v9806_v44 = vld [vmem:[%s16082_s11 + $0xc4] sm:$0xf] }
 0xfc0   :  { %v14502_v0 = vadd.f32 %v14388_v2, %v5476_v57  ;;  %v9172_v57 = vld [vmem:[%s16082_s11 + $0xa8] sm:$0xf0] }
 0xfc1   :  { %v14477_v39 = vsub.f32 %v14419_v26, %v5537_v10  ;;  %v9187_v10 = vor.u32 %v9807_v59, %v9186_v31 }
 0xfc2   :  { %v5456_v37 = vpop.f32.mrf.mxu1 }
 0xfc3   :  { %v5569_v19 = vmul.f32 %v14477_v39, %v14477_v39  ;;  %v5407_v6 = vpop.f32.mrf.mxu0  ;;  %5970 = vmatpush.bf16.msrb.mxu2 %v9187_v10 }
 0xfc4   :  { %5521 = vadd.xlane.f32.xlu1 %v14480_v11  ;;  %v5457_v63 = vadd.f32 %v5456_v37, %v5407_v6  ;;  %v9162_v37 = vld [vmem:[%s16082_s11 + $0x90] sm:$0xf] }
 0xfc5   :  { %5589 = vadd.xlane.f32.xlu2 %v5569_v19  ;;  %v9191_v19 = vor.u32 %v9806_v44, %v9188_v4 }
 0xfc6   :  { %v5512_v47 = vpop.xlane.xlu2 %5511  ;;  %v5477_v24 = vadd.f32 %v5457_v63, %v16165_v43  ;;  %v9801_v63 = vld [vmem:[%s16082_s11 + $0x94] sm:$0xf0] }
 0xfc7   :  { %v5538_v42 = vmul.f32 %v5512_v47, %v16158_v35  ;;  %6019 = vmatpush.bf16.msra.mxu3 %v9191_v19  ;;  %v9804_v47 = vld [vmem:[%s16082_s11 + $0xb4] sm:$0xf]  ;;  %5971 = vmatpush.bf16.msrb.mxu2 %v9179_v1 }
 0xfc8   :  { %v14509_v9 = vadd.f32 %v14388_v2, %v5477_v24  ;;  %v9163_v24 = vor.u32 %v9801_v63, %v9162_v37 }
 0xfc9   :  { %v14488_v26 = vsub.f32 %v14425_v41, %v5538_v42  ;;  %v9183_v42 = vor.u32 %v9804_v47, %v9180_v30 }
 0xfcb   :  { %v5570_v27 = vmul.f32 %v14488_v26, %v14488_v26  ;;  %v5459_v53 = vpop.f32.mrf.mxu1  ;;  %6020 = vmatpush.bf16.msra.mxu3 %v9183_v42  ;;  %v8874_v42 = vld [vmem:[%s16083_s18 + $0x4] sm:$0x7] }
 0xfcc   :  { %v14634_v63 = vperm.slane %v8874_v42, 0 }
 0xfcd   :  { %5523 = vadd.xlane.f32.xlu2 %v14491_v28  ;;  %5591 = vadd.xlane.f32.xlu0 %v5570_v27  ;;  %v9803_v27 = vld [vmem:[%s16082_s11 + $0xa4] sm:$0xf0] }
 0xfce   :  { %v5514_v46 = vpop.xlane.xlu2 %5513  ;;  %v9171_v49 = vor.u32 %v9803_v27, %v9170_v5  ;;  %v16167_v5 = vld [vmem:[#allocation15_spill] sm:$0xff] }
 0xfcf   :  { %v5539_v33 = vmul.f32 %v5514_v46, %v16158_v35  ;;  %v9802_v46 = vld [vmem:[%s16082_s11 + $0xa4] sm:$0xf] }
 0xfd0   :  { %5972 = vmatpush.bf16.msrb.mxu2 %v9171_v49 }
 0xfd1   :  { %v14499_v41 = vsub.f32 %v14431_v56, %v5539_v33  ;;  %v16166_v56 = vld [vmem:[#allocation14_spill] sm:$0xff]  ;;  %v9175_v33 = vor.u32 %v9802_v46, %v9172_v57 }
 0xfd3   :  { %v5571_v23 = vmul.f32 %v14499_v41, %v14499_v41  ;;  %6021 = vmatpush.bf16.msra.mxu3 %v9175_v33  ;;  %v5461_v4 = vpop.f32.mrf.mxu1 }
 0xfd4   :  { %5973 = vmatpush.bf16.msrb.mxu2 %v9163_v24 }
 0xfd5   :  { %5525 = vadd.xlane.f32.xlu2 %v14502_v0  ;;  %5593 = vadd.xlane.f32.xlu0 %v5571_v23  ;;  %v9800_v23 = vld [vmem:[%s16082_s11 + $0x94] sm:$0xf] }
 0xfda   :  { %v5410_v13 = vpop.f32.mrf.mxu0 }
 0xfdb   :  { %v5460_v36 = vadd.f32 %v5459_v53, %v5410_v13  ;;  %v9164_v53 = vld [vmem:[%s16082_s11 + $0x98] sm:$0xf0] }
 0xfdc   :  { %v9167_v13 = vor.u32 %v9800_v23, %v9164_v53 }
 0xfdd   :  { %5527 = vadd.xlane.f32.xlu0 %v14509_v9  ;;  %v5478_v50 = vadd.f32 %v5460_v36, %v16166_v56  ;;  %v9154_v56 = vld [vmem:[%s16082_s11 + $0x80] sm:$0xf] }
 0xfde   :  { %6022 = vmatpush.bf16.msra.mxu3 %v9167_v13 }
 0xfdf   :  { %v14514_v7 = vadd.f32 %v14388_v2, %v5478_v50  ;;  %v9799_v50 = vld [vmem:[%s16082_s11 + $0x84] sm:$0xf0] }
 0xfe0   :  { %v9155_v32 = vor.u32 %v9799_v50, %v9154_v56 }
 0xfe2   :  { %5974 = vmatpush.bf16.msrb.mxu2 %v9155_v32  ;;  %6023 = vmatpush.bf16.msra.mxu3 %v9159_v29  ;;  %v5412_v31 = vpop.f32.mrf.mxu0 }
 0xfe3   :  { %v5462_v34 = vadd.f32 %v5461_v4, %v5412_v31 }
 0xfe5   :  { %5529 = vadd.xlane.f32.xlu0 %v14514_v7  ;;  %v5479_v27 = vadd.f32 %v5462_v34, %v16167_v5 }
 0xfe7   :  { %v14644_v50 = vadd.f32 %v14388_v2, %v5479_v27 }
0x1016   :  { %v5582_v6 = vpop.xlane.xlu0 %5581 }
0x1017   :  { %v5613_v43 = vmul.f32 %v5582_v6, %v16158_v35 }
0x1019   :  { %v5629_v36 = vadd.f32 1e-05, %v5613_v43 }
0x101b   :  { %10392 = vrsqrt.f32 %v5629_v36  ;;  %vm5651_vm0 = vweird.f32 %v5629_v36 }
0x101e   :  { %v5584_v21 = vpop.xlane.xlu1 %5583  ;;  %v5516_v51 = vpop.xlane.xlu0 %5515 }
0x101f   :  { %v5614_v3 = vmul.f32 %v5584_v21, %v16158_v35  ;;  %v5540_v18 = vmul.f32 %v5516_v51, %v16158_v35 }
0x1021   :  { %v10393_v48 = vpop.eup %10392  ;;  %v5630_v17 = vadd.f32 1e-05, %v5614_v3  ;;  %v14617_v52 = vsub.f32 %v14449_v45, %v5540_v18 }
0x1022   :  { %v5646_v25 = vmul.f32 %v10393_v48, %v5629_v36  ;;  %vm5652_vm15 = vweird.f32 %v10393_v48  ;;  %v8875_v36 = vld [vmem:[%s16084_s19 + $0x4] sm:$0x7] }
0x1023   :  { %10394 = vrsqrt.f32 %v5630_v17  ;;  %v5572_v22 = vmul.f32 %v14617_v52, %v14617_v52  ;;  %vm5653_vm3 = vmor %vm5651_vm0, %vm5652_vm15  ;;  %vm5661_vm5 = vweird.f32 %v5630_v17 }
0x1024   :  { %v5647_v58 = vmul.f32 %v10393_v48, %v5646_v25 }
0x1025   :  { %5595 = vadd.xlane.f32.xlu1 %v5572_v22 }
0x1026   :  { %v5648_v8 = vmul.f32 0.5, %v5647_v58  ;;  %v5518_v55 = vpop.xlane.xlu0 %5517 }
0x1027   :  { %v5541_v16 = vmul.f32 %v5518_v55, %v16158_v35  ;;  %v5586_v12 = vpop.xlane.xlu1 %5585 }
0x1028   :  { %v5649_v59 = vsub.f32 1.5, %v5648_v8  ;;  %v5615_v44 = vmul.f32 %v5586_v12, %v16158_v35 }
0x1029   :  { %v10395_v10 = vpop.eup %10394  ;;  %v14624_v45 = vsub.f32 %v14458_v54, %v5541_v16 }
0x102a   :  { %v5656_v19 = vmul.f32 %v10395_v10, %v5630_v17  ;;  %v5631_v20 = vadd.f32 1e-05, %v5615_v44  ;;  %v5650_v47 = vmul.f32 %v10393_v48, %v5649_v59  ;;  %vm5662_vm4 = vweird.f32 %v10395_v10 }
0x102b   :  { %v5573_v1 = vmul.f32 %v14624_v45, %v14624_v45  ;;  %vm5663_vm6 = vmor %vm5661_vm5, %vm5662_vm4 }
0x102c   :  { %v5657_v30 = vmul.f32 %v10395_v10, %v5656_v19  ;;  %10396 = vrsqrt.f32 %v5631_v20  ;;  %v5654_v46 = vsel %vm5653_vm3, %v10393_v48, %v5650_v47  ;;  %vm5671_vm8 = vweird.f32 %v5631_v20 }
0x102d   :  { %5597 = vadd.xlane.f32.xlu1 %v5573_v1  ;;  %v5805_v43 = vmul.f32 %v5654_v46, %v14437_v40 }
0x102e   :  { %v5658_v54 = vmul.f32 0.5, %v5657_v30 }
0x102f   :  { %v5520_v49 = vpop.xlane.xlu1 %5519  ;;  %v5588_v57 = vpop.xlane.xlu2 %5587  ;;  %v5822_v29 = vmul.f32 %v14634_v63, %v5805_v43 }
0x1030   :  { %v5659_v33 = vsub.f32 1.5, %v5658_v54  ;;  %v5542_v6 = vmul.f32 %v5520_v49, %v16158_v35  ;;  %v5616_v37 = vmul.f32 %v5588_v57, %v16158_v35 }
0x1032   :  { %v10397_v23 = vpop.eup %10396  ;;  %v5660_v24 = vmul.f32 %v10395_v10, %v5659_v33  ;;  %v14638_v53 = vsub.f32 %v14471_v38, %v5542_v6  ;;  %v5632_v13 = vadd.f32 1e-05, %v5616_v37  ;;  %v14650_v38 = vperm.slane %v8875_v36, 0 }
0x1033   :  { %v5666_v56 = vmul.f32 %v10397_v23, %v5631_v20  ;;  %vm5672_vm7 = vweird.f32 %v10397_v23 }
0x1034   :  { %v5664_v14 = vsel %vm5663_vm6, %v10395_v10, %v5660_v24  ;;  %10398 = vrsqrt.f32 %v5632_v13  ;;  %v5574_v32 = vmul.f32 %v14638_v53, %v14638_v53  ;;  %v14660_v22 = vadd.f32 %v14650_v38, %v5822_v29  ;;  %vm5673_vm9 = vmor %vm5671_vm8, %vm5672_vm7 }
0x1035   :  { %v5806_v40 = vmul.f32 %v5664_v14, %v14444_v60  ;;  %v5667_v15 = vmul.f32 %v10397_v23, %v5666_v56  ;;  %5531 = vadd.xlane.f32.xlu1 %v14644_v50  ;;  %vm5681_vm11 = vweird.f32 %v5632_v13 }
0x1036   :  { %5599 = vadd.xlane.f32.xlu2 %v5574_v32 }
0x1037   :  { %v5823_v21 = vmul.f32 %v14634_v63, %v5806_v40  ;;  %v5668_v51 = vmul.f32 0.5, %v5667_v15  ;;  %v5522_v2 = vpop.xlane.xlu1 %5521 }
0x1038   :  { %v5543_v3 = vmul.f32 %v5522_v2, %v16158_v35  ;;  %v5590_v18 = vpop.xlane.xlu2 %5589 }
0x1039   :  { %v14656_v48 = vadd.f32 %v14650_v38, %v5823_v21  ;;  %v5669_v17 = vsub.f32 1.5, %v5668_v51  ;;  %v5617_v60 = vmul.f32 %v5590_v18, %v16158_v35 }
0x103a   :  { %v10399_v25 = vpop.eup %10398  ;;  %v14663_v58 = vsub.f32 %v14480_v11, %v5543_v3 }
0x103b   :  { %v5670_v8 = vmul.f32 %v10397_v23, %v5669_v17  ;;  %v5676_v55 = vmul.f32 %v10399_v25, %v5632_v13  ;;  %v5633_v16 = vadd.f32 1e-05, %v5617_v60  ;;  %v5872_v12 = vpack.c.bf16 %v14656_v48, %v14660_v22 }
0x103c   :  { %v5575_v31 = vmul.f32 %v14663_v58, %v14663_v58  ;;  %vm5682_vm10 = vweird.f32 %v10399_v25 }
0x103d   :  { %v5677_v59 = vmul.f32 %v10399_v25, %v5676_v55  ;;  %10400 = vrsqrt.f32 %v5633_v16  ;;  %5975 = vmatmul.bf16.vlgmr.msrb.gmra.mxu2 %v5872_v12  ;;  %6024 = vmatmul.bf16.vlgmr.msra.gmra.mxu3 %v5872_v12  ;;  %v5674_v44 = vsel %vm5673_vm9, %v10397_v23, %v5670_v8  ;;  %vm5683_vm12 = vmor %vm5681_vm11, %vm5682_vm10  ;;  %vm5691_vm14 = vweird.f32 %v5633_v16 }
0x103e   :  { %5601 = vadd.xlane.f32.xlu2 %v5575_v31  ;;  %v5807_v1 = vmul.f32 %v5674_v44, %v14455_v62 }
0x103f   :  { %v5678_v10 = vmul.f32 0.5, %v5677_v59 }
0x1040   :  { %v5592_v11 = vpop.xlane.xlu0 %5591  ;;  %v5524_v4 = vpop.xlane.xlu2 %5523  ;;  %v5824_v33 = vmul.f32 %v14634_v63, %v5807_v1 }
0x1041   :  { %v5679_v19 = vsub.f32 1.5, %v5678_v10  ;;  %v5618_v34 = vmul.f32 %v5592_v11, %v16158_v35  ;;  %v5544_v47 = vmul.f32 %v5524_v4, %v16158_v35 }
0x1042   :  { %v14682_v24 = vadd.f32 %v14650_v38, %v5824_v33 }
0x1043   :  { %v10401_v30 = vpop.eup %10400  ;;  %v5680_v20 = vmul.f32 %v10399_v25, %v5679_v19  ;;  %v5634_v42 = vadd.f32 1e-05, %v5618_v34  ;;  %v14673_v54 = vsub.f32 %v14491_v28, %v5544_v47 }
0x1044   :  { %v5686_v5 = vmul.f32 %v10401_v30, %v5633_v16  ;;  %vm5692_vm13 = vweird.f32 %v10401_v30 }
0x1045   :  { %v5684_v27 = vsel %vm5683_vm12, %v10399_v25, %v5680_v20  ;;  %10402 = vrsqrt.f32 %v5634_v42  ;;  %v5576_v46 = vmul.f32 %v14673_v54, %v14673_v54  ;;  %vm5693_vm15 = vmor %vm5691_vm14, %vm5692_vm13  ;;  %vm5701_vm3 = vweird.f32 %v5634_v42 }
0x1046   :  { %v5808_v49 = vmul.f32 %v5684_v27, %v14466_v61  ;;  %v5687_v57 = vmul.f32 %v10401_v30, %v5686_v5  ;;  %v9216_v5 = vld [vmem:[%s16085_s3 + $0x8] sm:$0xff] }
0x1047   :  { %5603 = vadd.xlane.f32.xlu0 %v5576_v46  ;;  %6082 = vmatpush.bf16.xpose.msrb.mxu0 %v9216_v5  ;;  %v6319_v46 = vunpack.c.h.b16 %v9216_v5 }
0x1048   :  { %v5688_v62 = vmul.f32 0.5, %v5687_v57  ;;  %v5594_v6 = vpop.xlane.xlu0 %5593  ;;  %v5526_v37 = vpop.xlane.xlu2 %5525  ;;  %v5825_v23 = vmul.f32 %v14634_v63, %v5808_v49 }
0x1049   :  { %v5545_v28 = vmul.f32 %v5526_v37, %v16158_v35  ;;  %v5619_v10 = vmul.f32 %v5594_v6, %v16158_v35  ;;  %v6320_v33 = vpack.c.b16 %v6319_v46, %v6319_v46 }
0x104a   :  { %v5689_v43 = vsub.f32 1.5, %v5688_v62  ;;  %v14685_v13 = vadd.f32 %v14650_v38, %v5825_v23 }
0x104b   :  { %v10403_v36 = vpop.eup %10402  ;;  %v14688_v61 = vsub.f32 %v14502_v0, %v5545_v28  ;;  %v5635_v11 = vadd.f32 1e-05, %v5619_v10  ;;  %6329 = vmatpush.bf16.xpose.msra.mxu1 %v6320_v33 }
0x104c   :  { %v5690_v56 = vmul.f32 %v10401_v30, %v5689_v43  ;;  %v5696_v14 = vmul.f32 %v10403_v36, %v5634_v42  ;;  %v5873_v32 = vpack.c.bf16 %v14685_v13, %v14682_v24  ;;  %vm5702_vm0 = vweird.f32 %v10403_v36 }
0x104d   :  { %v5577_v40 = vmul.f32 %v14688_v61, %v14688_v61  ;;  %vm5703_vm4 = vmor %vm5701_vm3, %vm5702_vm0  ;;  %10404 = vrsqrt.f32 %v5635_v11  ;;  %vm5711_vm6 = vweird.f32 %v5635_v11 }
0x104e   :  { %v5697_v15 = vmul.f32 %v10403_v36, %v5696_v14  ;;  %5980 = vmatmul.bf16.gmra.mxu2 %v5873_v32  ;;  %6029 = vmatmul.bf16.gmra.mxu3 %v5873_v32  ;;  %v5694_v29 = vsel %vm5693_vm15, %v10401_v30, %v5690_v56 }
0x104f   :  { %5605 = vadd.xlane.f32.xlu1 %v5577_v40  ;;  %v5809_v3 = vmul.f32 %v5694_v29, %v14477_v39 }
0x1050   :  { %v5698_v21 = vmul.f32 0.5, %v5697_v15  ;;  %v5528_v51 = vpop.xlane.xlu0 %5527 }
0x1051   :  { %v5546_v0 = vmul.f32 %v5528_v51, %v16158_v35  ;;  %v5826_v55 = vmul.f32 %v14634_v63, %v5809_v3 }
0x1052   :  { %v5699_v2 = vsub.f32 1.5, %v5698_v21 }
0x1053   :  { %v14697_v18 = vsub.f32 %v14509_v9, %v5546_v0  ;;  %v14709_v31 = vadd.f32 %v14650_v38, %v5826_v55 }
0x1054   :  { %v5700_v17 = vmul.f32 %v10403_v36, %v5699_v2 }
0x1055   :  { %v5578_v60 = vmul.f32 %v14697_v18, %v14697_v18 }
0x1056   :  { %v5704_v25 = vsel %vm5703_vm4, %v10403_v36, %v5700_v17 }
0x1057   :  { %v5810_v8 = vmul.f32 %v5704_v25, %v14488_v26  ;;  %5607 = vadd.xlane.f32.xlu2 %v5578_v60 }
0x1058   :  { %v5530_v16 = vpop.xlane.xlu0 %5529 }
0x1059   :  { %v5547_v12 = vmul.f32 %v5530_v16, %v16158_v35  ;;  %v5827_v39 = vmul.f32 %v14634_v63, %v5810_v8 }
0x105b   :  { %v14706_v9 = vsub.f32 %v14514_v7, %v5547_v12  ;;  %v14712_v59 = vadd.f32 %v14650_v38, %v5827_v39  ;;  %v10405_v7 = vpop.eup %10404 }
0x105c   :  { %v5706_v4 = vmul.f32 %v10405_v7, %v5635_v11  ;;  %vm5712_vm5 = vweird.f32 %v10405_v7 }
0x105d   :  { %v5874_v26 = vpack.c.bf16 %v14712_v59, %v14709_v31  ;;  %v5579_v44 = vmul.f32 %v14706_v9, %v14706_v9  ;;  %vm5713_vm7 = vmor %vm5711_vm6, %vm5712_vm5 }
0x105e   :  { %v5707_v19 = vmul.f32 %v10405_v7, %v5706_v4 }
0x105f   :  { %5985 = vmatmul.bf16.gmra.mxu2 %v5874_v26  ;;  %6034 = vmatmul.bf16.gmra.mxu3 %v5874_v26 }
0x1060   :  { %5609 = vadd.xlane.f32.xlu0 %v5579_v44  ;;  %v5708_v30 = vmul.f32 0.5, %v5707_v19 }
0x1062   :  { %v5709_v20 = vsub.f32 1.5, %v5708_v30 }
0x1064   :  { %v5710_v62 = vmul.f32 %v10405_v7, %v5709_v20 }
0x1066   :  { %v5714_v23 = vsel %vm5713_vm7, %v10405_v7, %v5710_v62 }
0x1067   :  { %v5811_v15 = vmul.f32 %v5714_v23, %v14499_v41 }
0x1069   :  { %v5828_v25 = vmul.f32 %v14634_v63, %v5811_v15 }
0x106b   :  { %v14737_v12 = vadd.f32 %v14650_v38, %v5828_v25 }
0x1098   :  { %v5596_v34 = vpop.xlane.xlu1 %5595 }
0x1099   :  { %v5620_v47 = vmul.f32 %v5596_v34, %v16158_v35 }
0x109b   :  { %v5636_v1 = vadd.f32 1e-05, %v5620_v47 }
0x109d   :  { %10406 = vrsqrt.f32 %v5636_v1  ;;  %vm5721_vm9 = vweird.f32 %v5636_v1 }
0x10a0   :  { %v5598_v42 = vpop.xlane.xlu1 %5597 }
0x10a1   :  { %v5621_v27 = vmul.f32 %v5598_v42, %v16158_v35 }
0x10a3   :  { %v10407_v49 = vpop.eup %10406  ;;  %v5637_v57 = vadd.f32 1e-05, %v5621_v27 }
0x10a4   :  { %v5716_v6 = vmul.f32 %v10407_v49, %v5636_v1  ;;  %vm5722_vm8 = vweird.f32 %v10407_v49 }
0x10a5   :  { %10408 = vrsqrt.f32 %v5637_v57  ;;  %vm5723_vm10 = vmor %vm5721_vm9, %vm5722_vm8  ;;  %vm5731_vm12 = vweird.f32 %v5637_v57 }
0x10a6   :  { %v5717_v37 = vmul.f32 %v10407_v49, %v5716_v6 }
0x10a8   :  { %v5718_v28 = vmul.f32 0.5, %v5717_v37  ;;  %v5532_v43 = vpop.xlane.xlu1 %5531 }
0x10a9   :  { %v5548_v36 = vmul.f32 %v5532_v43, %v16158_v35  ;;  %v5600_v56 = vpop.xlane.xlu2 %5599 }
0x10aa   :  { %v5719_v14 = vsub.f32 1.5, %v5718_v28  ;;  %v5622_v32 = vmul.f32 %v5600_v56, %v16158_v35 }
0x10ab   :  { %v10409_v40 = vpop.eup %10408  ;;  %v14728_v29 = vsub.f32 %v14644_v50, %v5548_v36 }
0x10ac   :  { %v5720_v21 = vmul.f32 %v10407_v49, %v5719_v14  ;;  %v5726_v51 = vmul.f32 %v10409_v40, %v5637_v57  ;;  %v5638_v0 = vadd.f32 1e-05, %v5622_v32  ;;  %vm5732_vm11 = vweird.f32 %v10409_v40 }
0x10ad   :  { %v5580_v2 = vmul.f32 %v14728_v29, %v14728_v29  ;;  %vm5733_vm13 = vmor %vm5731_vm12, %vm5732_vm11 }
0x10ae   :  { %v5724_v3 = vsel %vm5723_vm10, %v10407_v49, %v5720_v21  ;;  %v5727_v17 = vmul.f32 %v10409_v40, %v5726_v51  ;;  %10410 = vrsqrt.f32 %v5638_v0  ;;  %vm5741_vm15 = vweird.f32 %v5638_v0 }
0x10af   :  { %v5812_v60 = vmul.f32 %v5724_v3, %v14617_v52  ;;  %5611 = vadd.xlane.f32.xlu1 %v5580_v2 }
0x10b0   :  { %v5728_v41 = vmul.f32 0.5, %v5727_v17 }
0x10b1   :  { %v5829_v50 = vmul.f32 %v14634_v63, %v5812_v60  ;;  %v5602_v55 = vpop.xlane.xlu2 %5601 }
0x10b2   :  { %v5729_v8 = vsub.f32 1.5, %v5728_v41  ;;  %v5623_v16 = vmul.f32 %v5602_v55, %v16158_v35 }
0x10b3   :  { %v14740_v39 = vadd.f32 %v14650_v38, %v5829_v50 }
0x10b4   :  { %v10411_v26 = vpop.eup %10410  ;;  %v5730_v44 = vmul.f32 %v10409_v40, %v5729_v8  ;;  %v5639_v10 = vadd.f32 1e-05, %v5623_v16 }
0x10b5   :  { %v5736_v52 = vmul.f32 %v10411_v26, %v5638_v0  ;;  %v5875_v11 = vpack.c.bf16 %v14740_v39, %v14737_v12  ;;  %vm5742_vm14 = vweird.f32 %v10411_v26 }
0x10b6   :  { %10412 = vrsqrt.f32 %v5639_v10  ;;  %v5734_v4 = vsel %vm5733_vm13, %v10409_v40, %v5730_v44  ;;  %vm5743_vm0 = vmor %vm5741_vm15, %vm5742_vm14  ;;  %vm5751_vm4 = vweird.f32 %v5639_v10 }
0x10b7   :  { %v5737_v7 = vmul.f32 %v10411_v26, %v5736_v52  ;;  %5990 = vmatmul.bf16.gmra.mxu2 %v5875_v11  ;;  %6039 = vmatmul.bf16.gmra.mxu3 %v5875_v11  ;;  %v5813_v30 = vmul.f32 %v5734_v4, %v14624_v45  ;;  %v9151_v45 = vld [vmem:[%s16086_s12 + $0x2] sm:$0x3] }
0x10b8   :  { %v14759_v32 = vperm.slane %v9151_v45, 0  ;;  %v14761_v40 = vperm.slane %v9151_v45, 1 }
0x10b9   :  { %v5738_v19 = vmul.f32 0.5, %v5737_v7  ;;  %v5830_v33 = vmul.f32 %v14634_v63, %v5813_v30 }
0x10ba   :  { %v5604_v34 = vpop.xlane.xlu0 %5603 }
0x10bb   :  { %v5739_v47 = vsub.f32 1.5, %v5738_v19  ;;  %v5624_v1 = vmul.f32 %v5604_v34, %v16158_v35  ;;  %v14754_v56 = vadd.f32 %v14650_v38, %v5830_v33 }
0x10bc   :  { %v10413_v20 = vpop.eup %10412 }
0x10bd   :  { %v5740_v42 = vmul.f32 %v10411_v26, %v5739_v47  ;;  %v5640_v5 = vadd.f32 1e-05, %v5624_v1  ;;  %v5746_v27 = vmul.f32 %v10413_v20, %v5639_v10  ;;  %vm5752_vm3 = vweird.f32 %v10413_v20 }
0x10be   :  { %vm14765_vm5 = vmor %vm5751_vm4, %vm5752_vm3 }
0x10bf   :  { %v5744_v46 = vsel %vm5743_vm0, %v10411_v26, %v5740_v42  ;;  %10414 = vrsqrt.f32 %v5640_v5  ;;  %v5747_v57 = vmul.f32 %v10413_v20, %v5746_v27  ;;  %vm5761_vm7 = vweird.f32 %v5640_v5 }
0x10c0   :  { %v5814_v49 = vmul.f32 %v5744_v46, %v14638_v53  ;;  %v5976_v62 = vpop.f32.mrf.mxu2  ;;  %v6025_v6 = vpop.f32.mrf.mxu3 }
0x10c1   :  { %v5748_v37 = vmul.f32 0.5, %v5747_v57  ;;  %v5977_v17 = vadd.f32 %v5976_v62, %v14759_v32  ;;  %v6026_v60 = vadd.f32 %v6025_v6, %v14761_v40 }
0x10c2   :  { %v5606_v23 = vpop.xlane.xlu1 %5605  ;;  %v5831_v28 = vmul.f32 %v14634_v63, %v5814_v49 }
0x10c3   :  { %v5625_v43 = vmul.f32 %v5606_v23, %v16158_v35  ;;  %v5749_v36 = vsub.f32 1.5, %v5748_v37 }
0x10c4   :  { %v14757_v53 = vadd.f32 %v14650_v38, %v5831_v28 }
0x10c5   :  { %v10415_v14 = vpop.eup %10414  ;;  %v5641_v15 = vadd.f32 1e-05, %v5625_v43  ;;  %v5750_v21 = vmul.f32 %v10413_v20, %v5749_v36 }
0x10c6   :  { %v5756_v51 = vmul.f32 %v10415_v14, %v5640_v5  ;;  %v5876_v0 = vpack.c.bf16 %v14757_v53, %v14754_v56  ;;  %vm5762_vm6 = vweird.f32 %v10415_v14 }
0x10c7   :  { %10416 = vrsqrt.f32 %v5641_v15  ;;  %v5754_v50 = vsel %vm14765_vm5, %v10413_v20, %v5750_v21  ;;  %vm5763_vm8 = vmor %vm5761_vm7, %vm5762_vm6  ;;  %vm5771_vm10 = vweird.f32 %v5641_v15 }
0x10c8   :  { %v5757_v2 = vmul.f32 %v10415_v14, %v5756_v51  ;;  %5995 = vmatmul.bf16.gmra.mxu2 %v5876_v0  ;;  %6044 = vmatmul.bf16.gmra.mxu3 %v5876_v0  ;;  %v5978_v25 = vpop.f32.mrf.mxu2  ;;  %v6027_v41 = vpop.f32.mrf.mxu3  ;;  %v5815_v4 = vmul.f32 %v5754_v50, %v14663_v58 }
0x10c9   :  { %v5979_v55 = vadd.f32 %v5978_v25, %v14759_v32  ;;  %v6028_v16 = vadd.f32 %v6027_v41, %v14761_v40 }
0x10ca   :  { %v5758_v8 = vmul.f32 0.5, %v5757_v2  ;;  %v5608_v26 = vpop.xlane.xlu2 %5607  ;;  %v5832_v46 = vmul.f32 %v14634_v63, %v5815_v4 }
0x10cb   :  { %v5626_v44 = vmul.f32 %v5608_v26, %v16158_v35  ;;  %v6067_v10 = vpack.c.bf16 %v5979_v55, %v5977_v17  ;;  %v6310_v11 = vpack.c.bf16 %v6028_v16, %v6026_v60 }
0x10cc   :  { %v5759_v52 = vsub.f32 1.5, %v5758_v8  ;;  %v14781_v5 = vadd.f32 %v14650_v38, %v5832_v46 }
0x10cd   :  { %v10417_v7 = vpop.eup %10416  ;;  %v5642_v19 = vadd.f32 1e-05, %v5626_v44  ;;  %6083 = vmatmul.bf16.vlgmr.msrb.gmra.mxu0 %v6067_v10  ;;  %6330 = vmatmul.bf16.vlgmr.msra.gmra.mxu1 %v6310_v11 }
0x10ce   :  { %v5760_v34 = vmul.f32 %v10415_v14, %v5759_v52  ;;  %v5766_v47 = vmul.f32 %v10417_v7, %v5641_v15  ;;  %vm5772_vm9 = vweird.f32 %v10417_v7 }
0x10cf   :  { %10418 = vrsqrt.f32 %v5642_v19  ;;  %vm5773_vm11 = vmor %vm5771_vm10, %vm5772_vm9  ;;  %vm5781_vm13 = vweird.f32 %v5642_v19 }
0x10d0   :  { %v5764_v1 = vsel %vm5763_vm8, %v10415_v14, %v5760_v34  ;;  %v5767_v30 = vmul.f32 %v10417_v7, %v5766_v47 }
0x10d1   :  { %v5816_v20 = vmul.f32 %v5764_v1, %v14673_v54  ;;  %v5981_v42 = vpop.f32.mrf.mxu2  ;;  %v6030_v27 = vpop.f32.mrf.mxu3 }
0x10d2   :  { %v5768_v49 = vmul.f32 0.5, %v5767_v30  ;;  %v5982_v23 = vadd.f32 %v5981_v42, %v14759_v32  ;;  %v6031_v28 = vadd.f32 %v6030_v27, %v14761_v40 }
0x10d3   :  { %v5833_v57 = vmul.f32 %v14634_v63, %v5816_v20  ;;  %v5610_v47 = vpop.xlane.xlu0 %5609 }
0x10d4   :  { %v5769_v58 = vsub.f32 1.5, %v5768_v49  ;;  %v5627_v1 = vmul.f32 %v5610_v47, %v16158_v35 }
0x10d5   :  { %v10419_v33 = vpop.eup %10418  ;;  %v14784_v62 = vadd.f32 %v14650_v38, %v5833_v57 }
0x10d6   :  { %v5770_v6 = vmul.f32 %v10417_v7, %v5769_v58  ;;  %v5776_v37 = vmul.f32 %v10419_v33, %v5642_v19  ;;  %vm5782_vm12 = vweird.f32 %v10419_v33  ;;  %v5643_v30 = vadd.f32 1e-05, %v5627_v1 }
0x10d7   :  { %v5877_v54 = vpack.c.bf16 %v14784_v62, %v14781_v5  ;;  %vm5783_vm14 = vmor %vm5781_vm13, %vm5782_vm12 }
0x10d8   :  { %v5777_v45 = vmul.f32 %v10419_v33, %v5776_v37  ;;  %v5774_v14 = vsel %vm5773_vm11, %v10417_v7, %v5770_v6  ;;  %10420 = vrsqrt.f32 %v5643_v30  ;;  %vm5791_vm0 = vweird.f32 %v5643_v30 }
0x10d9   :  { %6000 = vmatmul.bf16.gmra.mxu2 %v5877_v54  ;;  %6049 = vmatmul.bf16.gmra.mxu3 %v5877_v54  ;;  %v5983_v43 = vpop.f32.mrf.mxu2  ;;  %v6032_v36 = vpop.f32.mrf.mxu3  ;;  %v5817_v17 = vmul.f32 %v5774_v14, %v14688_v61 }
0x10da   :  { %v5778_v21 = vmul.f32 0.5, %v5777_v45  ;;  %v5984_v51 = vadd.f32 %v5983_v43, %v14759_v32  ;;  %v6033_v0 = vadd.f32 %v6032_v36, %v14761_v40 }
0x10db   :  { %v5834_v50 = vmul.f32 %v14634_v63, %v5817_v17 }
0x10dc   :  { %v5779_v2 = vsub.f32 1.5, %v5778_v21  ;;  %v6068_v3 = vpack.c.bf16 %v5984_v51, %v5982_v23  ;;  %v6311_v15 = vpack.c.bf16 %v6033_v0, %v6031_v28 }
0x10dd   :  { %v14797_v26 = vadd.f32 %v14650_v38, %v5834_v50 }
0x10de   :  { %v5780_v60 = vmul.f32 %v10419_v33, %v5779_v2  ;;  %6088 = vmatmul.bf16.gmra.mxu0 %v6068_v3  ;;  %6335 = vmatmul.bf16.gmra.mxu1 %v6311_v15  ;;  %v10421_v20 = vpop.eup %10420 }
0x10df   :  { %v5786_v42 = vmul.f32 %v10421_v20, %v5643_v30  ;;  %vm5792_vm15 = vweird.f32 %v10421_v20 }
0x10e0   :  { %v5784_v25 = vsel %vm5783_vm14, %v10419_v33, %v5780_v60  ;;  %vm5793_vm3 = vmor %vm5791_vm0, %vm5792_vm15 }
0x10e1   :  { %v5818_v41 = vmul.f32 %v5784_v25, %v14697_v18  ;;  %v5787_v27 = vmul.f32 %v10421_v20, %v5786_v42 }
0x10e2   :  { %v5986_v8 = vpop.f32.mrf.mxu2  ;;  %v6035_v55 = vpop.f32.mrf.mxu3 }
0x10e3   :  { %v5835_v16 = vmul.f32 %v14634_v63, %v5818_v41  ;;  %v5987_v18 = vadd.f32 %v5986_v8, %v14759_v32  ;;  %v6036_v11 = vadd.f32 %v6035_v55, %v14761_v40  ;;  %v5788_v58 = vmul.f32 0.5, %v5787_v27 }
0x10e5   :  { %v14800_v44 = vadd.f32 %v14650_v38, %v5835_v16  ;;  %v5789_v33 = vsub.f32 1.5, %v5788_v58 }
0x10e7   :  { %v5878_v61 = vpack.c.bf16 %v14800_v44, %v14797_v26  ;;  %v5790_v37 = vmul.f32 %v10421_v20, %v5789_v33 }
0x10e9   :  { %6005 = vmatmul.bf16.gmra.mxu2 %v5878_v61  ;;  %6054 = vmatmul.bf16.gmra.mxu3 %v5878_v61  ;;  %v5794_v23 = vsel %vm5793_vm3, %v10421_v20, %v5790_v37 }
0x10ea   :  { %v5988_v52 = vpop.f32.mrf.mxu2  ;;  %v6037_v10 = vpop.f32.mrf.mxu3  ;;  %v5819_v36 = vmul.f32 %v5794_v23, %v14706_v9 }
0x10eb   :  { %v5989_v7 = vadd.f32 %v5988_v52, %v14759_v32  ;;  %v6038_v4 = vadd.f32 %v6037_v10, %v14761_v40 }
0x10ec   :  { %v5836_v0 = vmul.f32 %v14634_v63, %v5819_v36  ;;  %v10638_v36 = vld [vmem:[%s16087_s2 + $0x10] sm:$0xff] }
0x10ed   :  { %v6069_v19 = vpack.c.bf16 %v5989_v7, %v5987_v18  ;;  %v6312_v34 = vpack.c.bf16 %v6038_v4, %v6036_v11  ;;  %v10636_v18 = vld [vmem:[%s16087_s2] sm:$0xff] }
0x10ee   :  { %v14815_v17 = vadd.f32 %v14650_v38, %v5836_v0 }
0x10ef   :  { %6093 = vmatmul.bf16.gmra.mxu0 %v6069_v19  ;;  %6340 = vmatmul.bf16.gmra.mxu1 %v6312_v34 }
0x1122   :  { %v5612_v46 = vpop.xlane.xlu1 %5611 }
0x1123   :  { %v5628_v49 = vmul.f32 %v5612_v46, %v16158_v35 }
0x1125   :  { %v5644_v57 = vadd.f32 1e-05, %v5628_v49  ;;  %v10637_v49 = vld [vmem:[%s16087_s2 + $0x8] sm:$0xff] }
0x1127   :  { %10422 = vrsqrt.f32 %v5644_v57  ;;  %vm5801_vm5 = vweird.f32 %v5644_v57 }
0x112d   :  { %v10423_v6 = vpop.eup %10422 }
0x112e   :  { %v5796_v54 = vmul.f32 %v10423_v6, %v5644_v57  ;;  %vm5802_vm4 = vweird.f32 %v10423_v6 }
0x112f   :  { %vm5803_vm6 = vmor %vm5801_vm5, %vm5802_vm4 }
0x1130   :  { %v5797_v45 = vmul.f32 %v10423_v6, %v5796_v54 }
0x1132   :  { %v5798_v28 = vmul.f32 0.5, %v5797_v45 }
0x1134   :  { %v5799_v43 = vsub.f32 1.5, %v5798_v28 }
0x1136   :  { %v5800_v14 = vmul.f32 %v10423_v6, %v5799_v43 }
0x1138   :  { %v5804_v21 = vsel %vm5803_vm6, %v10423_v6, %v5800_v14 }
0x1139   :  { %v5820_v51 = vmul.f32 %v5804_v21, %v14728_v29 }
0x113a   :  { %v5991_v2 = vpop.f32.mrf.mxu2  ;;  %v6040_v3 = vpop.f32.mrf.mxu3 }
0x113b   :  { %v5837_v15 = vmul.f32 %v14634_v63, %v5820_v51  ;;  %v5992_v29 = vadd.f32 %v5991_v2, %v14759_v32  ;;  %v6041_v50 = vadd.f32 %v6040_v3, %v14761_v40 }
0x113d   :  { %v14818_v60 = vadd.f32 %v14650_v38, %v5837_v15 }
0x113f   :  { %v5879_v9 = vpack.c.bf16 %v14818_v60, %v14815_v17 }
0x1141   :  { %6010 = vmatmul.bf16.gmra.mxu2 %v5879_v9  ;;  %6059 = vmatmul.bf16.gmra.mxu3 %v5879_v9 }
0x1142   :  { %v5993_v25 = vpop.f32.mrf.mxu2  ;;  %v6042_v41 = vpop.f32.mrf.mxu3 }
0x1143   :  { %v5994_v8 = vadd.f32 %v5993_v25, %v14759_v32  ;;  %v6043_v63 = vadd.f32 %v6042_v41, %v14761_v40 }
0x1145   :  { %v6070_v55 = vpack.c.bf16 %v5994_v8, %v5992_v29  ;;  %v6313_v16 = vpack.c.bf16 %v6043_v63, %v6041_v50  ;;  %v10639_v8 = vld [vmem:[%s16087_s2 + $0x18] sm:$0xff] }
0x1147   :  { %6098 = vmatmul.bf16.gmra.mxu0 %v6070_v55  ;;  %6345 = vmatmul.bf16.gmra.mxu1 %v6313_v16 }
0x114a   :  { %v6084_v52 = vpop.f32.mrf.mxu0  ;;  %v6331_v10 = vpop.f32.mrf.mxu1 }
0x114b   :  { %v5996_v38 = vpop.f32.mrf.mxu2  ;;  %v6045_v61 = vpop.f32.mrf.mxu3  ;;  %v14829_v11 = vadd.f32 %v10636_v18, %v6084_v52  ;;  %v14831_v7 = vadd.f32 %v10636_v18, %v6331_v10 }
0x114c   :  { %v5997_v1 = vadd.f32 %v5996_v38, %v14759_v32  ;;  %v6046_v30 = vadd.f32 %v6045_v61, %v14761_v40 }
0x114d   :  { %v6124_v4 = vsel %vm1968_vm1, %v14829_v11, -inf  ;;  %v6371_v19 = vsel %vm1968_vm1, %v14831_v7, -inf }
0x114e   :  { %6125 = vmax.xlane.f32.xlu2 %v6124_v4  ;;  %6372 = vmax.xlane.f32.xlu1 %v6371_v19 }
0x1152   :  { %v6086_v27 = vpop.f32.mrf.mxu0  ;;  %v6333_v46 = vpop.f32.mrf.mxu1 }
0x1153   :  { %v5998_v34 = vpop.f32.mrf.mxu2  ;;  %v6047_v47 = vpop.f32.mrf.mxu3  ;;  %v14844_v57 = vadd.f32 %v10637_v49, %v6086_v27  ;;  %v14846_v58 = vadd.f32 %v10637_v49, %v6333_v46 }
0x1154   :  { %v5999_v20 = vadd.f32 %v5998_v34, %v14759_v32  ;;  %v6048_v42 = vadd.f32 %v6047_v47, %v14761_v40  ;;  %v10640_v34 = vld [vmem:[%s16087_s2 + $0x20] sm:$0xff] }
0x1155   :  { %v6374_v37 = vsel %vm1968_vm1, %v14846_v58, -inf  ;;  %v6127_v54 = vsel %vm1968_vm1, %v14844_v57, -inf }
0x1156   :  { %v6071_v33 = vpack.c.bf16 %v5999_v20, %v5997_v1  ;;  %v6314_v6 = vpack.c.bf16 %v6048_v42, %v6046_v30  ;;  %6375 = vmax.xlane.f32.xlu2 %v6374_v37  ;;  %6128 = vmax.xlane.f32.xlu0 %v6127_v54 }
0x1158   :  { %6103 = vmatmul.bf16.gmra.mxu0 %v6071_v33  ;;  %6350 = vmatmul.bf16.gmra.mxu1 %v6314_v6 }
0x115b   :  { %v6089_v28 = vpop.f32.mrf.mxu0  ;;  %v6336_v43 = vpop.f32.mrf.mxu1 }
0x115c   :  { %v6001_v45 = vpop.f32.mrf.mxu2  ;;  %v6050_v23 = vpop.f32.mrf.mxu3  ;;  %v14855_v14 = vadd.f32 %v10638_v36, %v6089_v28  ;;  %v14857_v21 = vadd.f32 %v10638_v36, %v6336_v43 }
0x115d   :  { %v6002_v15 = vadd.f32 %v6001_v45, %v14759_v32  ;;  %v6051_v9 = vadd.f32 %v6050_v23, %v14761_v40  ;;  %v10641_v45 = vld [vmem:[%s16087_s2 + $0x28] sm:$0xff] }
0x115e   :  { %v6377_v51 = vsel %vm1968_vm1, %v14857_v21, -inf  ;;  %v6130_v0 = vsel %vm1968_vm1, %v14855_v14, -inf }
0x115f   :  { %6378 = vmax.xlane.f32.xlu2 %v6377_v51  ;;  %6131 = vmax.xlane.f32.xlu0 %v6130_v0 }
0x1163   :  { %v6091_v29 = vpop.f32.mrf.mxu0  ;;  %v6338_v50 = vpop.f32.mrf.mxu1 }
0x1164   :  { %v6003_v2 = vpop.f32.mrf.mxu2  ;;  %v6052_v3 = vpop.f32.mrf.mxu3  ;;  %v14870_v63 = vadd.f32 %v10639_v8, %v6091_v29  ;;  %v14872_v55 = vadd.f32 %v10639_v8, %v6338_v50 }
0x1165   :  { %v6004_v25 = vadd.f32 %v6003_v2, %v14759_v32  ;;  %v6053_v41 = vadd.f32 %v6052_v3, %v14761_v40 }
0x1166   :  { %v6380_v61 = vsel %vm1968_vm1, %v14872_v55, -inf  ;;  %v6133_v52 = vsel %vm1968_vm1, %v14870_v63, -inf }
0x1167   :  { %v6072_v16 = vpack.c.bf16 %v6004_v25, %v6002_v15  ;;  %v6315_v38 = vpack.c.bf16 %v6053_v41, %v6051_v9  ;;  %6381 = vmax.xlane.f32.xlu0 %v6380_v61  ;;  %6134 = vmax.xlane.f32.xlu1 %v6133_v52  ;;  %v10642_v25 = vld [vmem:[%s16087_s2 + $0x30] sm:$0xff] }
0x1169   :  { %6108 = vmatmul.bf16.gmra.mxu0 %v6072_v16  ;;  %6355 = vmatmul.bf16.gmra.mxu1 %v6315_v38 }
0x116c   :  { %v6006_v10 = vpop.f32.mrf.mxu2  ;;  %v6055_v18 = vpop.f32.mrf.mxu3 }
0x116d   :  { %v6094_v4 = vpop.f32.mrf.mxu0  ;;  %v6341_v19 = vpop.f32.mrf.mxu1  ;;  %v6007_v46 = vadd.f32 %v6006_v10, %v14759_v32  ;;  %v6056_v49 = vadd.f32 %v6055_v18, %v14761_v40 }
0x116e   :  { %v14881_v47 = vadd.f32 %v10640_v34, %v6094_v4  ;;  %v14883_v1 = vadd.f32 %v10640_v34, %v6341_v19  ;;  %v10643_v34 = vld [vmem:[%s16087_s2 + $0x38] sm:$0xff] }
0x1170   :  { %v6383_v30 = vsel %vm1968_vm1, %v14883_v1, -inf  ;;  %v6136_v20 = vsel %vm1968_vm1, %v14881_v47, -inf }
0x1171   :  { %6384 = vmax.xlane.f32.xlu0 %v6383_v30  ;;  %6137 = vmax.xlane.f32.xlu1 %v6136_v20 }
0x1174   :  { %v6008_v42 = vpop.f32.mrf.mxu2  ;;  %v6057_v27 = vpop.f32.mrf.mxu3 }
0x1175   :  { %v6009_v33 = vadd.f32 %v6008_v42, %v14759_v32  ;;  %v6058_v6 = vadd.f32 %v6057_v27, %v14761_v40  ;;  %v6096_v37 = vpop.f32.mrf.mxu0  ;;  %v6343_v54 = vpop.f32.mrf.mxu1 }
0x1176   :  { %v14896_v23 = vadd.f32 %v10641_v45, %v6096_v37  ;;  %v14898_v28 = vadd.f32 %v10641_v45, %v6343_v54 }
0x1177   :  { %v6073_v43 = vpack.c.bf16 %v6009_v33, %v6007_v46  ;;  %v6316_v36 = vpack.c.bf16 %v6058_v6, %v6056_v49  ;;  %v10644_v33 = vld [vmem:[%s16087_s2 + $0x40] sm:$0xff] }
0x1178   :  { %v6139_v51 = vsel %vm1968_vm1, %v14896_v23, -inf  ;;  %v6386_v0 = vsel %vm1968_vm1, %v14898_v28, -inf }
0x1179   :  { %6140 = vmax.xlane.f32.xlu2 %v6139_v51  ;;  %6387 = vmax.xlane.f32.xlu1 %v6386_v0 }
0x117a   :  { %6113 = vmatmul.bf16.gmra.mxu0 %v6073_v43  ;;  %6360 = vmatmul.bf16.gmra.mxu1 %v6316_v36 }
0x11c1   :  { %v6126_v43 = vpop.xlane.xlu2 %6125  ;;  %v6373_v36 = vpop.xlane.xlu1 %6372 }
0x11c4   :  { %v6011_v2 = vpop.f32.mrf.mxu2  ;;  %v6060_v3 = vpop.f32.mrf.mxu3 }
0x11c5   :  { %v6099_v15 = vpop.f32.mrf.mxu0  ;;  %v6346_v9 = vpop.f32.mrf.mxu1  ;;  %v6012_v61 = vadd.f32 %v6011_v2, %v14759_v32  ;;  %v6061_v52 = vadd.f32 %v6060_v3, %v14761_v40  ;;  %v10645_v2 = vld [vmem:[%s16087_s2 + $0x48] sm:$0xff] }
0x11c6   :  { %v14907_v41 = vadd.f32 %v10642_v25, %v6099_v15  ;;  %v14909_v29 = vadd.f32 %v10642_v25, %v6346_v9  ;;  %v6419_v9 = vsub.f32 %v14831_v7, %v6373_v36  ;;  %v10646_v7 = vld [vmem:[%s16087_s2 + $0x50] sm:$0xff] }
0x11c8   :  { %v6142_v50 = vsel %vm1968_vm1, %v14907_v41, -inf  ;;  %v6389_v8 = vsel %vm1968_vm1, %v14909_v29, -inf }
0x11c9   :  { %6143 = vmax.xlane.f32.xlu2 %v6142_v50  ;;  %6390 = vmax.xlane.f32.xlu1 %v6389_v8  ;;  %v6172_v8 = vsub.f32 %v14829_v11, %v6126_v43 }
0x11cc   :  { %v6013_v16 = vpop.f32.mrf.mxu2  ;;  %v6062_v38 = vpop.f32.mrf.mxu3 }
0x11cd   :  { %v6014_v10 = vadd.f32 %v6013_v16, %v14759_v32  ;;  %v6063_v18 = vadd.f32 %v6062_v38, %v14761_v40  ;;  %v6101_v4 = vpop.f32.mrf.mxu0  ;;  %v6348_v19 = vpop.f32.mrf.mxu1 }
0x11ce   :  { %v14922_v30 = vadd.f32 %v10643_v34, %v6101_v4  ;;  %v14924_v20 = vadd.f32 %v10643_v34, %v6348_v19  ;;  %v6129_v16 = vpop.xlane.xlu0 %6128  ;;  %v6376_v38 = vpop.xlane.xlu2 %6375 }
0x11cf   :  { %v6074_v42 = vpack.c.bf16 %v6014_v10, %v6012_v61  ;;  %v6317_v27 = vpack.c.bf16 %v6063_v18, %v6061_v52  ;;  %v6435_v61 = vmul.f32 1.442695, %v6419_v9  ;;  %v6188_v52 = vmul.f32 1.442695, %v6172_v8 }
0x11d0   :  { %v6392_v46 = vsel %vm1968_vm1, %v14924_v20, -inf  ;;  %v6145_v32 = vsel %vm1968_vm1, %v14922_v30, -inf  ;;  %v6173_v34 = vsub.f32 %v14844_v57, %v6129_v16  ;;  %v6420_v11 = vsub.f32 %v14846_v58, %v6376_v38  ;;  %v10647_v58 = vld [vmem:[%s16087_s2 + $0x58] sm:$0xff] }
0x11d1   :  { %6393 = vmax.xlane.f32.xlu2 %v6392_v46  ;;  %6146 = vmax.xlane.f32.xlu0 %v6145_v32  ;;  %10424 = vpow2.f32 %v6435_v61  ;;  %v10648_v61 = vld [vmem:[%s16087_s2 + $0x60] sm:$0xff] }
0x11d2   :  { %6118 = vmatmul.bf16.gmra.mxu0 %v6074_v42  ;;  %6365 = vmatmul.bf16.gmra.mxu1 %v6317_v27  ;;  %10426 = vpow2.f32 %v6188_v52  ;;  %v6190_v32 = vmul.f32 1.442695, %v6173_v34 }
0x11d4   :  { %10428 = vpow2.f32 %v6190_v32 }
0x11d5   :  { %v6104_v40 = vpop.f32.mrf.mxu0  ;;  %v6351_v49 = vpop.f32.mrf.mxu1 }
0x11d6   :  { %v14933_v6 = vadd.f32 %v10644_v33, %v6104_v40  ;;  %v14935_v37 = vadd.f32 %v10644_v33, %v6351_v49  ;;  %v6132_v46 = vpop.xlane.xlu0 %6131  ;;  %v6437_v40 = vmul.f32 1.442695, %v6420_v11  ;;  %v6379_v49 = vpop.xlane.xlu2 %6378 }
0x11d7   :  { %v14967_v33 = vpop.eup %10424  ;;  %v6174_v57 = vsub.f32 %v14855_v14, %v6132_v46  ;;  %v6421_v36 = vsub.f32 %v14857_v21, %v6379_v49 }
0x11d8   :  { %v6395_v54 = vsel %vm1968_vm1, %v14935_v37, -inf  ;;  %v6148_v45 = vsel %vm1968_vm1, %v14933_v6, -inf  ;;  %10430 = vpow2.f32 %v6437_v40 }
0x11d9   :  { %6396 = vmax.xlane.f32.xlu0 %v6395_v54  ;;  %6149 = vmax.xlane.f32.xlu1 %v6148_v45  ;;  %v14969_v45 = vpop.eup %10426  ;;  %v6192_v9 = vmul.f32 1.442695, %v6174_v57 }
0x11da   :  { %v6220_v14 = vsel %vm1968_vm1, %v14969_v45, 0.0  ;;  %v14984_v8 = vpop.eup %10428 }
0x11db   :  { %10432 = vpow2.f32 %v6192_v9 }
0x11dd   :  { %v6106_v51 = vpop.f32.mrf.mxu0  ;;  %v6353_v0 = vpop.f32.mrf.mxu1 }
0x11de   :  { %v14944_v3 = vadd.f32 %v10645_v2, %v6106_v51  ;;  %v14946_v15 = vadd.f32 %v10645_v2, %v6353_v0  ;;  %v6135_v51 = vpop.xlane.xlu1 %6134  ;;  %v6467_v0 = vsel %vm1968_vm1, %v14967_v33, 0.0  ;;  %v14986_v38 = vpop.eup %10430 }
0x11e0   :  { %v6151_v25 = vsel %vm1968_vm1, %v14944_v3, -inf  ;;  %v6398_v50 = vsel %vm1968_vm1, %v14946_v15, -inf }
0x11e1   :  { %6152 = vmax.xlane.f32.xlu2 %v6151_v25  ;;  %6399 = vmax.xlane.f32.xlu1 %v6398_v50  ;;  %v6439_v25 = vmul.f32 1.442695, %v6421_v36  ;;  %v6382_v50 = vpop.xlane.xlu0 %6381  ;;  %v15009_v40 = vpop.eup %10432 }
0x11e3   :  { %10434 = vpow2.f32 %v6439_v25 }
0x11e6   :  { %v6109_v10 = vpop.f32.mrf.mxu0  ;;  %v6356_v18 = vpop.f32.mrf.mxu1 }
0x11e7   :  { %v14957_v4 = vadd.f32 %v10646_v7, %v6109_v10  ;;  %v14959_v19 = vadd.f32 %v10646_v7, %v6356_v18  ;;  %v6422_v10 = vsub.f32 %v14872_v55, %v6382_v50  ;;  %v6175_v18 = vsub.f32 %v14870_v63, %v6135_v51  ;;  %v6138_v11 = vpop.xlane.xlu1 %6137  ;;  %v9217_v63 = vld [vmem:[%s16088_s4 + $0x8] sm:$0xf] }
0x11e8   :  { %v6223_v7 = vsel %vm1968_vm1, %v14984_v8, 0.0  ;;  %v6658_v32 = vsel %vm2425_vm2, %v9217_v63, 0  ;;  %v6176_v36 = vsub.f32 %v14881_v47, %v6138_v11 }
0x11e9   :  { %v6401_v42 = vsel %vm1968_vm1, %v14959_v19, -inf  ;;  %v6154_v27 = vsel %vm1968_vm1, %v14957_v4, -inf  ;;  %v6441_v55 = vmul.f32 1.442695, %v6422_v10  ;;  %v6194_v49 = vmul.f32 1.442695, %v6175_v18  ;;  %6667 = vmatpush.bf16.msrb.mxu3 %v6658_v32 }
0x11ea   :  { %6402 = vmax.xlane.f32.xlu2 %v6401_v42  ;;  %6155 = vmax.xlane.f32.xlu0 %v6154_v27  ;;  %v6470_v42 = vsel %vm1968_vm1, %v14986_v38, 0.0  ;;  %v9218_v27 = vld [vmem:[%s16088_s4 + $0xc] sm:$0xf]  ;;  %v6196_v9 = vmul.f32 1.442695, %v6176_v36 }
0x11eb   :  { %v6582_v46 = vsel %vm2425_vm2, %v9218_v27, 0  ;;  %10436 = vpow2.f32 %v6441_v55 }
0x11ec   :  { %6591 = vmatpush.bf16.msra.mxu2 %v6582_v46  ;;  %10438 = vpow2.f32 %v6194_v49  ;;  %v6141_v25 = vpop.xlane.xlu2 %6140 }
0x11ed   :  { %10440 = vpow2.f32 %v6196_v9  ;;  %v6177_v18 = vsub.f32 %v14896_v23, %v6141_v25 }
0x11ee   :  { %v6111_v54 = vpop.f32.mrf.mxu0  ;;  %v6358_v21 = vpop.f32.mrf.mxu1 }
0x11ef   :  { %v14975_v43 = vadd.f32 %v10647_v58, %v6111_v54  ;;  %v15011_v54 = vpop.eup %10434  ;;  %v15013_v57 = vadd.f32 %v10647_v58, %v6358_v21  ;;  %v6388_v58 = vpop.xlane.xlu1 %6387 }
0x11f0   :  { %v6385_v21 = vpop.xlane.xlu0 %6384  ;;  %v6424_v10 = vsub.f32 %v14898_v28, %v6388_v58  ;;  %v6198_v28 = vmul.f32 1.442695, %v6177_v18 }
0x11f1   :  { %v6157_v2 = vsel %vm1968_vm1, %v14975_v43, -inf  ;;  %v15024_v47 = vpop.eup %10436 }
0x11f2   :  { %6468 = vadd.xlane.f32.xlu2 %v6467_v0  ;;  %6158 = vmax.xlane.f32.xlu1 %v6157_v2  ;;  %v6226_v0 = vsel %vm1968_vm1, %v15009_v40, 0.0  ;;  %v6473_v2 = vsel %vm1968_vm1, %v15011_v54, 0.0  ;;  %v6445_v27 = vmul.f32 1.442695, %v6424_v10 }
0x11f3   :  { %6221 = vadd.xlane.f32.xlu0 %v6220_v14  ;;  %v6404_v14 = vsel %vm1968_vm1, %v15013_v57, -inf }
0x11f4   :  { %10442 = vpow2.f32 %v6445_v27 }
0x11f5   :  { %10444 = vpow2.f32 %v6198_v28 }
0x11f7   :  { %v6114_v16 = vpop.f32.mrf.mxu0  ;;  %v6361_v51 = vpop.f32.mrf.mxu1 }
0x11f8   :  { %v14991_v52 = vadd.f32 %v10648_v61, %v6114_v16  ;;  %v15022_v50 = vadd.f32 %v10648_v61, %v6361_v51  ;;  %v15026_v16 = vpop.eup %10438 }
0x11f9   :  { %v15042_v46 = vpop.eup %10440 }
0x11fa   :  { %v6160_v34 = vsel %vm1968_vm1, %v14991_v52, -inf  ;;  %6224 = vadd.xlane.f32.xlu1 %v6223_v7  ;;  %v6423_v7 = vsub.f32 %v14883_v1, %v6385_v21  ;;  %v6407_v11 = vsel %vm1968_vm1, %v15022_v50, -inf  ;;  %v10649_v1 = vld [vmem:[%s16087_s2 + $0x68] sm:$0xff]  ;;  %v6232_v36 = vsel %vm1968_vm1, %v15042_v46, 0.0 }
0x11fb   :  { %6161 = vmax.xlane.f32.xlu2 %v6160_v34  ;;  %6471 = vadd.xlane.f32.xlu0 %v6470_v42  ;;  %v6476_v34 = vsel %vm1968_vm1, %v15024_v47, 0.0  ;;  %v6229_v42 = vsel %vm1968_vm1, %v15026_v16, 0.0 }
0x11fc   :  { %v6443_v55 = vmul.f32 1.442695, %v6423_v7 }
0x11fe   :  { %10446 = vpow2.f32 %v6443_v55 }
0x11ff   :  { %v6363_v61 = vpop.f32.mrf.mxu1  ;;  %v6116_v63 = vpop.f32.mrf.mxu0 }
0x1200   :  { %v15040_v23 = vadd.f32 %v10649_v1, %v6363_v61  ;;  %v15044_v32 = vadd.f32 %v10649_v1, %v6116_v63 }
0x1202   :  { %6474 = vadd.xlane.f32.xlu1 %v6473_v2  ;;  %v6410_v49 = vsel %vm1968_vm1, %v15040_v23, -inf  ;;  %v6163_v51 = vsel %vm1968_vm1, %v15044_v32, -inf }
0x1203   :  { %6227 = vadd.xlane.f32.xlu2 %v6226_v0  ;;  %6405 = vmax.xlane.f32.xlu0 %v6404_v14  ;;  %v15052_v0 = vpop.eup %10442 }
0x1204   :  { %v15054_v2 = vpop.eup %10444  ;;  %v6482_v9 = vsel %vm1968_vm1, %v15052_v0, 0.0 }
0x1205   :  { %v15056_v14 = vpop.eup %10446  ;;  %v6235_v58 = vsel %vm1968_vm1, %v15054_v2, 0.0 }
0x1206   :  { %v6479_v25 = vsel %vm1968_vm1, %v15056_v14, 0.0 }
0x120a   :  { %6408 = vmax.xlane.f32.xlu1 %v6407_v11 }
0x120b   :  { %6477 = vadd.xlane.f32.xlu2 %v6476_v34  ;;  %6230 = vadd.xlane.f32.xlu0 %v6229_v42 }
0x1212   :  { %6233 = vadd.xlane.f32.xlu1 %v6232_v36 }
0x1213   :  { %6411 = vmax.xlane.f32.xlu2 %v6410_v49  ;;  %6164 = vmax.xlane.f32.xlu0 %v6163_v51 }
0x121a   :  { %6483 = vadd.xlane.f32.xlu1 %v6482_v9 }
0x121b   :  { %6236 = vadd.xlane.f32.xlu2 %v6235_v58  ;;  %6480 = vadd.xlane.f32.xlu0 %v6479_v25 }
0x123c   :  { %v6144_v21 = vpop.xlane.xlu2 %6143  ;;  %v6391_v28 = vpop.xlane.xlu1 %6390 }
0x123d   :  { %v6178_v10 = vsub.f32 %v14907_v41, %v6144_v21  ;;  %v6425_v51 = vsub.f32 %v14909_v29, %v6391_v28  ;;  %v10651_v29 = vld [vmem:[%s16087_s2 + $0x78] sm:$0xff] }
0x123f   :  { %v6200_v18 = vmul.f32 1.442695, %v6178_v10  ;;  %v6447_v10 = vmul.f32 1.442695, %v6425_v51 }
0x1241   :  { %10448 = vpow2.f32 %v6200_v18 }
0x1244   :  { %v6394_v7 = vpop.xlane.xlu2 %6393  ;;  %v6147_v11 = vpop.xlane.xlu0 %6146 }
0x1245   :  { %v6426_v34 = vsub.f32 %v14924_v20, %v6394_v7  ;;  %v6179_v27 = vsub.f32 %v14922_v30, %v6147_v11  ;;  %v10650_v20 = vld [vmem:[%s16087_s2 + $0x70] sm:$0xff] }
0x1247   :  { %v6449_v61 = vmul.f32 1.442695, %v6426_v34  ;;  %v15066_v42 = vpop.eup %10448  ;;  %v6202_v55 = vmul.f32 1.442695, %v6179_v27 }
0x1248   :  { %v6238_v63 = vsel %vm1968_vm1, %v15066_v42, 0.0 }
0x1249   :  { %10450 = vpow2.f32 %v6449_v61  ;;  %6239 = vadd.xlane.f32.xlu0 %v6238_v63 }
0x124a   :  { %10452 = vpow2.f32 %v6202_v55 }
0x124b   :  { %10454 = vpow2.f32 %v6447_v10 }
0x124c   :  { %v6150_v58 = vpop.xlane.xlu1 %6149  ;;  %v6397_v18 = vpop.xlane.xlu0 %6396 }
0x124d   :  { %v6427_v63 = vsub.f32 %v14935_v37, %v6397_v18  ;;  %v6180_v55 = vsub.f32 %v14933_v6, %v6150_v58 }
0x124f   :  { %v6119_v1 = vpop.f32.mrf.mxu0  ;;  %v15071_v41 = vpop.eup %10450  ;;  %v6204_v37 = vmul.f32 1.442695, %v6180_v55 }
0x1250   :  { %v15076_v49 = vadd.f32 %v10650_v20, %v6119_v1  ;;  %v6366_v36 = vpop.f32.mrf.mxu1  ;;  %v6488_v30 = vsel %vm1968_vm1, %v15071_v41, 0.0  ;;  %v15086_v34 = vpop.eup %10452 }
0x1251   :  { %6489 = vadd.xlane.f32.xlu0 %v6488_v30  ;;  %v15083_v25 = vadd.f32 %v10650_v20, %v6366_v36  ;;  %v6451_v36 = vmul.f32 1.442695, %v6427_v63  ;;  %v15104_v58 = vpop.eup %10454 }
0x1252   :  { %v6166_v9 = vsel %vm1968_vm1, %v15076_v49, -inf }
0x1253   :  { %6167 = vmax.xlane.f32.xlu1 %v6166_v9  ;;  %v6413_v28 = vsel %vm1968_vm1, %v15083_v25, -inf }
0x1254   :  { %v6153_v21 = vpop.xlane.xlu2 %6152  ;;  %v6400_v30 = vpop.xlane.xlu1 %6399 }
0x1255   :  { %v6181_v7 = vsub.f32 %v14944_v3, %v6153_v21  ;;  %v6241_v3 = vsel %vm1968_vm1, %v15086_v34, 0.0 }
0x1257   :  { %v6121_v11 = vpop.f32.mrf.mxu0  ;;  %v6206_v61 = vmul.f32 1.442695, %v6181_v7  ;;  %v6428_v7 = vsub.f32 %v14946_v15, %v6400_v30 }
0x1258   :  { %v15091_v27 = vadd.f32 %v10651_v29, %v6121_v11  ;;  %v6368_v20 = vpop.f32.mrf.mxu1 }
0x1259   :  { %6414 = vmax.xlane.f32.xlu0 %v6413_v28  ;;  %10456 = vpow2.f32 %v6206_v61  ;;  %v15101_v51 = vadd.f32 %v10651_v29, %v6368_v20  ;;  %v6453_v29 = vmul.f32 1.442695, %v6428_v7 }
0x125a   :  { %v6169_v1 = vsel %vm1968_vm1, %v15091_v27, -inf  ;;  %10458 = vpow2.f32 %v6451_v36 }
0x125b   :  { %6242 = vadd.xlane.f32.xlu1 %v6241_v3  ;;  %6170 = vmax.xlane.f32.xlu2 %v6169_v1  ;;  %10460 = vpow2.f32 %v6204_v37  ;;  %v6416_v61 = vsel %vm1968_vm1, %v15101_v51, -inf }
0x125d   :  { %v6156_v9 = vpop.xlane.xlu0 %6155  ;;  %v6403_v21 = vpop.xlane.xlu2 %6402 }
0x125e   :  { %v6182_v6 = vsub.f32 %v14957_v4, %v6156_v9  ;;  %v6485_v4 = vsel %vm1968_vm1, %v15104_v58, 0.0  ;;  %v6429_v30 = vsub.f32 %v14959_v19, %v6403_v21 }
0x125f   :  { %v15106_v10 = vpop.eup %10456 }
0x1260   :  { %v6208_v18 = vmul.f32 1.442695, %v6182_v6  ;;  %v6247_v11 = vsel %vm1968_vm1, %v15106_v10, 0.0  ;;  %v15115_v55 = vpop.eup %10458  ;;  %v6455_v6 = vmul.f32 1.442695, %v6429_v30 }
0x1261   :  { %6248 = vadd.xlane.f32.xlu0 %v6247_v11  ;;  %v15118_v1 = vpop.eup %10460  ;;  %v6491_v9 = vsel %vm1968_vm1, %v15115_v55, 0.0 }
0x1262   :  { %10462 = vpow2.f32 %v6208_v18 }
0x1263   :  { %6417 = vmax.xlane.f32.xlu1 %v6416_v61  ;;  %6486 = vadd.xlane.f32.xlu2 %v6485_v4  ;;  %10464 = vpow2.f32 %v6453_v29 }
0x1265   :  { %v6159_v63 = vpop.xlane.xlu1 %6158  ;;  %v6469_v28 = vpop.xlane.xlu2 %6468 }
0x1266   :  { %v6183_v15 = vsub.f32 %v14975_v43, %v6159_v63  ;;  %v6222_v3 = vpop.xlane.xlu0 %6221  ;;  %v6244_v43 = vsel %vm1968_vm1, %v15118_v1, 0.0 }
0x1268   :  { %v15120_v20 = vpop.eup %10462  ;;  %v6210_v36 = vmul.f32 1.442695, %v6183_v15 }
0x1269   :  { %v6250_v37 = vsel %vm1968_vm1, %v15120_v20, 0.0  ;;  %v15130_v11 = vpop.eup %10464 }
0x126a   :  { %10466 = vpow2.f32 %v6210_v36  ;;  %6251 = vadd.xlane.f32.xlu0 %v6250_v37 }
0x126b   :  { %6492 = vadd.xlane.f32.xlu1 %v6491_v9  ;;  %6245 = vadd.xlane.f32.xlu2 %v6244_v43  ;;  %10468 = vrcp.f32 %v6222_v3 }
0x126c   :  { %10470 = vrcp.f32 %v6469_v28  ;;  %v6494_v28 = vsel %vm1968_vm1, %v15130_v11, 0.0 }
0x126d   :  { %v6225_v18 = vpop.xlane.xlu1 %6224 }
0x126e   :  { %v6162_v7 = vpop.xlane.xlu2 %6161  ;;  %10472 = vrcp.f32 %v6225_v18  ;;  %v6472_v19 = vpop.xlane.xlu0 %6471 }
0x126f   :  { %v6184_v21 = vsub.f32 %v14991_v52, %v6162_v7  ;;  %10474 = vrcp.f32 %v6472_v19 }
0x1270   :  { %v15132_v61 = vpop.eup %10466  ;;  %10476 = vpow2.f32 %v6455_v6 }
0x1271   :  { %v6212_v4 = vmul.f32 1.442695, %v6184_v21  ;;  %v6253_v29 = vsel %vm1968_vm1, %v15132_v61, 0.0  ;;  %v10469_v63 = vpop.eup %10468 }
0x1272   :  { %v10471_v15 = vpop.eup %10470  ;;  %v6284_v36 = vmul.f32 %v10469_v63, %v14969_v45 }
0x1273   :  { %10478 = vpow2.f32 %v6212_v4  ;;  %6254 = vadd.xlane.f32.xlu1 %v6253_v29  ;;  %6495 = vadd.xlane.f32.xlu2 %v6494_v28  ;;  %v6531_v43 = vmul.f32 %v10471_v15, %v14967_v33 }
0x1274   :  { %v10473_v3 = vpop.eup %10472 }
0x1275   :  { %v10475_v52 = vpop.eup %10474  ;;  %v6285_v30 = vmul.f32 %v10473_v3, %v14984_v8  ;;  %v6475_v37 = vpop.xlane.xlu1 %6474 }
0x1276   :  { %v6228_v9 = vpop.xlane.xlu2 %6227  ;;  %v6532_v6 = vmul.f32 %v10475_v52, %v14986_v38  ;;  %v6406_v18 = vpop.xlane.xlu0 %6405 }
0x1277   :  { %v15142_v7 = vpop.eup %10476  ;;  %v6302_v19 = vpack.c.bf16 %v6285_v30, %v6284_v36  ;;  %v6430_v21 = vsub.f32 %v15013_v57, %v6406_v18 }
0x1278   :  { %v6549_v29 = vpack.c.bf16 %v6532_v6, %v6531_v43  ;;  %v6497_v33 = vsel %vm1968_vm1, %v15142_v7, 0.0 }
0x1279   :  { %v15145_v4 = vpop.eup %10478  ;;  %v6457_v28 = vmul.f32 1.442695, %v6430_v21  ;;  %9227 = vmatmul.msk.bf16.vlgmr.msrb.gmra.mxu3 %vm1968_vm1, %v6302_v19 }
0x127a   :  { %v6256_v45 = vsel %vm1968_vm1, %v15145_v4, 0.0  ;;  %9219 = vmatmul.msk.bf16.vlgmr.msra.gmra.mxu2 %vm1968_vm1, %v6549_v29 }
0x127b   :  { %6257 = vadd.xlane.f32.xlu1 %v6256_v45  ;;  %10480 = vpow2.f32 %v6457_v28  ;;  %6498 = vadd.xlane.f32.xlu2 %v6497_v33 }
0x127c   :  { %10482 = vrcp.f32 %v6475_v37 }
0x127d   :  { %10484 = vrcp.f32 %v6228_v9  ;;  %v6409_v8 = vpop.xlane.xlu1 %6408 }
0x127e   :  { %v6478_v38 = vpop.xlane.xlu2 %6477  ;;  %v6231_v57 = vpop.xlane.xlu0 %6230  ;;  %v6431_v63 = vsub.f32 %v15022_v50, %v6409_v8 }
0x127f   :  { %10486 = vrcp.f32 %v6478_v38 }
0x1280   :  { %10488 = vrcp.f32 %v6231_v57  ;;  %v6459_v15 = vmul.f32 1.442695, %v6431_v63 }
0x1281   :  { %v15154_v3 = vpop.eup %10480 }
0x1282   :  { %v10483_v52 = vpop.eup %10482  ;;  %10490 = vpow2.f32 %v6459_v15  ;;  %v6500_v36 = vsel %vm1968_vm1, %v15154_v3, 0.0 }
0x1283   :  { %v10485_v30 = vpop.eup %10484  ;;  %6501 = vadd.xlane.f32.xlu0 %v6500_v36  ;;  %v6533_v9 = vmul.f32 %v10483_v52, %v15011_v54 }
0x1284   :  { %v6286_v19 = vmul.f32 %v10485_v30, %v15009_v40 }
0x1285   :  { %v10487_v43 = vpop.eup %10486  ;;  %v6234_v18 = vpop.xlane.xlu1 %6233 }
0x1286   :  { %v10489_v37 = vpop.eup %10488  ;;  %v6534_v6 = vmul.f32 %v10487_v43, %v15024_v47  ;;  %v6412_v50 = vpop.xlane.xlu2 %6411 }
0x1287   :  { %v6287_v21 = vmul.f32 %v10489_v37, %v15026_v16  ;;  %v6165_v29 = vpop.xlane.xlu0 %6164  ;;  %v6432_v28 = vsub.f32 %v15040_v23, %v6412_v50 }
0x1288   :  { %v6185_v45 = vsub.f32 %v15044_v32, %v6165_v29  ;;  %v6550_v33 = vpack.c.bf16 %v6534_v6, %v6533_v9  ;;  %v15164_v8 = vpop.eup %10490 }
0x1289   :  { %v6461_v38 = vmul.f32 1.442695, %v6432_v28  ;;  %v6303_v57 = vpack.c.bf16 %v6287_v21, %v6286_v19  ;;  %v6503_v54 = vsel %vm1968_vm1, %v15164_v8, 0.0 }
0x128a   :  { %v6214_v63 = vmul.f32 1.442695, %v6185_v45  ;;  %9220 = vmatmul.msk.bf16.gmra.mxu2 %vm1968_vm1, %v6550_v33 }
0x128b   :  { %10492 = vpow2.f32 %v6461_v38  ;;  %9228 = vmatmul.msk.bf16.gmra.mxu3 %vm1968_vm1, %v6303_v57  ;;  %6504 = vadd.xlane.f32.xlu0 %v6503_v54 }
0x128c   :  { %10494 = vpow2.f32 %v6214_v63 }
0x128d   :  { %10496 = vrcp.f32 %v6234_v18  ;;  %v6484_v40 = vpop.xlane.xlu1 %6483 }
0x128e   :  { %v6237_v47 = vpop.xlane.xlu2 %6236  ;;  %10498 = vrcp.f32 %v6484_v40 }
0x128f   :  { %v6481_v16 = vpop.xlane.xlu0 %6480 }
0x1290   :  { %10500 = vrcp.f32 %v6481_v16 }
0x1291   :  { %v15170_v23 = vpop.eup %10492  ;;  %10502 = vrcp.f32 %v6237_v47 }
0x1292   :  { %v15172_v32 = vpop.eup %10494  ;;  %v6506_v15 = vsel %vm1968_vm1, %v15170_v23, 0.0 }
0x1293   :  { %v6259_v52 = vsel %vm1968_vm1, %v15172_v32, 0.0  ;;  %6507 = vadd.xlane.f32.xlu1 %v6506_v15  ;;  %v10497_v36 = vpop.eup %10496 }
0x1294   :  { %6260 = vadd.xlane.f32.xlu2 %v6259_v52  ;;  %v10499_v30 = vpop.eup %10498  ;;  %v6288_v18 = vmul.f32 %v10497_v36, %v15042_v46 }
0x1295   :  { %v6536_v37 = vmul.f32 %v10499_v30, %v15052_v0 }
0x1296   :  { %v10501_v43 = vpop.eup %10500 }
0x1297   :  { %v10503_v9 = vpop.eup %10502  ;;  %v6535_v6 = vmul.f32 %v10501_v43, %v15056_v14 }
0x1298   :  { %v6289_v50 = vmul.f32 %v10503_v9, %v15054_v2 }
0x1299   :  { %v6551_v19 = vpack.c.bf16 %v6536_v37, %v6535_v6 }
0x129a   :  { %v6304_v21 = vpack.c.bf16 %v6289_v50, %v6288_v18 }
0x129b   :  { %9221 = vmatmul.msk.bf16.gmra.mxu2 %vm1968_vm1, %v6551_v19 }
0x129c   :  { %9229 = vmatmul.msk.bf16.gmra.mxu3 %vm1968_vm1, %v6304_v21 }
0x12bc   :  { %v6240_v29 = vpop.xlane.xlu0 %6239 }
0x12c4   :  { %v6490_v28 = vpop.xlane.xlu0 %6489 }
0x12c6   :  { %v6168_v45 = vpop.xlane.xlu1 %6167 }
0x12c7   :  { %v6186_v33 = vsub.f32 %v15076_v49, %v6168_v45 }
0x12c9   :  { %v6216_v38 = vmul.f32 1.442695, %v6186_v33 }
0x12cb   :  { %10504 = vpow2.f32 %v6216_v38 }
0x12cc   :  { %10506 = vrcp.f32 %v6240_v29  ;;  %v6415_v0 = vpop.xlane.xlu0 %6414 }
0x12cd   :  { %v6433_v14 = vsub.f32 %v15083_v25, %v6415_v0 }
0x12ce   :  { %v6243_v46 = vpop.xlane.xlu1 %6242  ;;  %v6171_v57 = vpop.xlane.xlu2 %6170 }
0x12cf   :  { %10508 = vrcp.f32 %v6243_v46  ;;  %v6187_v2 = vsub.f32 %v15091_v27, %v6171_v57  ;;  %v6463_v63 = vmul.f32 1.442695, %v6433_v14 }
0x12d1   :  { %v15187_v54 = vpop.eup %10504  ;;  %v6218_v40 = vmul.f32 1.442695, %v6187_v2  ;;  %10510 = vpow2.f32 %v6463_v63 }
0x12d2   :  { %v6262_v47 = vsel %vm1968_vm1, %v15187_v54, 0.0  ;;  %v10507_v49 = vpop.eup %10506 }
0x12d3   :  { %10512 = vpow2.f32 %v6218_v40  ;;  %6263 = vadd.xlane.f32.xlu2 %v6262_v47  ;;  %v6290_v15 = vmul.f32 %v10507_v49, %v15066_v42 }
0x12d4   :  { %10514 = vrcp.f32 %v6490_v28 }
0x12d5   :  { %v10509_v16 = vpop.eup %10508 }
0x12d6   :  { %v6291_v25 = vmul.f32 %v10509_v16, %v15086_v34  ;;  %v6418_v52 = vpop.xlane.xlu1 %6417  ;;  %v6487_v36 = vpop.xlane.xlu2 %6486 }
0x12d7   :  { %v6434_v27 = vsub.f32 %v15101_v51, %v6418_v52  ;;  %v15194_v30 = vpop.eup %10510  ;;  %10516 = vrcp.f32 %v6487_v36  ;;  %v6249_v51 = vpop.xlane.xlu0 %6248 }
0x12d8   :  { %v6305_v43 = vpack.c.bf16 %v6291_v25, %v6290_v15  ;;  %v6509_v6 = vsel %vm1968_vm1, %v15194_v30, 0.0 }
0x12d9   :  { %v15196_v37 = vpop.eup %10512  ;;  %v6465_v9 = vmul.f32 1.442695, %v6434_v27  ;;  %6510 = vadd.xlane.f32.xlu1 %v6509_v6 }
0x12da   :  { %9230 = vmatmul.msk.bf16.gmra.mxu3 %vm1968_vm1, %v6305_v43  ;;  %v6265_v42 = vsel %vm1968_vm1, %v15196_v37, 0.0  ;;  %v10515_v34 = vpop.eup %10514 }
0x12db   :  { %10518 = vpow2.f32 %v6465_v9  ;;  %6266 = vadd.xlane.f32.xlu0 %v6265_v42  ;;  %v6538_v50 = vmul.f32 %v10515_v34, %v15071_v41 }
0x12dc   :  { %10520 = vrcp.f32 %v6249_v51 }
0x12dd   :  { %v10517_v18 = vpop.eup %10516 }
0x12de   :  { %v6537_v19 = vmul.f32 %v10517_v18, %v15104_v58  ;;  %v6246_v21 = vpop.xlane.xlu2 %6245  ;;  %v6493_v29 = vpop.xlane.xlu1 %6492 }
0x12df   :  { %10522 = vrcp.f32 %v6246_v21  ;;  %v6252_v63 = vpop.xlane.xlu0 %6251 }
0x12e0   :  { %v6552_v45 = vpack.c.bf16 %v6538_v50, %v6537_v19  ;;  %10524 = vrcp.f32 %v6493_v29 }
0x12e1   :  { %v15205_v28 = vpop.eup %10518 }
0x12e2   :  { %v6512_v33 = vsel %vm1968_vm1, %v15205_v28, 0.0  ;;  %9222 = vmatmul.msk.bf16.gmra.mxu2 %vm1968_vm1, %v6552_v45  ;;  %v10521_v38 = vpop.eup %10520 }
0x12e3   :  { %6513 = vadd.xlane.f32.xlu2 %v6512_v33  ;;  %v6293_v41 = vmul.f32 %v10521_v38, %v15106_v10 }
0x12e5   :  { %v10523_v0 = vpop.eup %10522 }
0x12e6   :  { %v6496_v14 = vpop.xlane.xlu2 %6495  ;;  %v6292_v58 = vmul.f32 %v10523_v0, %v15118_v1  ;;  %v6255_v46 = vpop.xlane.xlu1 %6254 }
0x12e7   :  { %10526 = vrcp.f32 %v6496_v14  ;;  %v10525_v2 = vpop.eup %10524 }
0x12e8   :  { %v6306_v57 = vpack.c.bf16 %v6293_v41, %v6292_v58  ;;  %10528 = vrcp.f32 %v6255_v46  ;;  %v6539_v47 = vmul.f32 %v10525_v2, %v15115_v55 }
0x12e9   :  { %10530 = vrcp.f32 %v6252_v63 }
0x12ea   :  { %9231 = vmatmul.msk.bf16.gmra.mxu3 %vm1968_vm1, %v6306_v57 }
0x12ed   :  { %v10527_v40 = vpop.eup %10526 }
0x12ee   :  { %v6540_v49 = vmul.f32 %v10527_v40, %v15130_v11  ;;  %v10529_v15 = vpop.eup %10528  ;;  %v6499_v25 = vpop.xlane.xlu2 %6498 }
0x12ef   :  { %v10531_v10 = vpop.eup %10530  ;;  %v6295_v1 = vmul.f32 %v10529_v15, %v15132_v61  ;;  %10532 = vrcp.f32 %v6499_v25  ;;  %v6258_v11 = vpop.xlane.xlu1 %6257  ;;  %v15224_v61 = vld [vmem:[%s16089_s13 + $0x1] ss:$0 sm:$0xff] }
0x12f0   :  { %v6553_v16 = vpack.c.bf16 %v6540_v49, %v6539_v47  ;;  %v6294_v27 = vmul.f32 %v10531_v10, %v15120_v20 }
0x12f2   :  { %9223 = vmatmul.msk.bf16.gmra.mxu2 %vm1968_vm1, %v6553_v16  ;;  %v6307_v36 = vpack.c.bf16 %v6295_v1, %v6294_v27 }
0x12f5   :  { %v10533_v43 = vpop.eup %10532 }
0x12f6   :  { %v6502_v52 = vpop.xlane.xlu0 %6501  ;;  %v6541_v42 = vmul.f32 %v10533_v43, %v15142_v7 }
0x12f7   :  { %10534 = vrcp.f32 %v6502_v52 }
0x12f8   :  { %10536 = vrcp.f32 %v6258_v11 }
0x12fa   :  { %9232 = vmatmul.msk.bf16.gmra.mxu3 %vm1968_vm1, %v6307_v36 }
0x12fc   :  { %v6669_v55 = vpop.f32.mrf.mxu3 }
0x12fd   :  { %v10535_v9 = vpop.eup %10534  ;;  %v6593_v6 = vpop.f32.mrf.mxu2 }
0x12fe   :  { %v6542_v34 = vmul.f32 %v10535_v9, %v15154_v3  ;;  %v6670_v51 = vadd.f32 %v6669_v55, %v6593_v6  ;;  %v6505_v50 = vpop.xlane.xlu0 %6504  ;;  %v10537_v33 = vpop.eup %10536 }
0x12ff   :  { %10538 = vrcp.f32 %v6505_v50  ;;  %v6296_v2 = vmul.f32 %v10537_v33, %v15145_v4 }
0x1300   :  { %v6709_v20 = vadd.f32 %v6670_v51, %v14660_v22  ;;  %v6554_v18 = vpack.c.bf16 %v6542_v34, %v6541_v42 }
0x1302   :  { %v15228_v19 = vadd.f32 %v15224_v61, %v6709_v20  ;;  %9224 = vmatmul.msk.bf16.gmra.mxu2 %vm1968_vm1, %v6554_v18 }
0x1304   :  { %6746 = vadd.xlane.f32.xlu0 %v15228_v19  ;;  %v6671_v7 = vpop.f32.mrf.mxu3 }
0x1305   :  { %v6595_v3 = vpop.f32.mrf.mxu2  ;;  %v10539_v0 = vpop.eup %10538 }
0x1306   :  { %v6508_v21 = vpop.xlane.xlu1 %6507  ;;  %v6672_v29 = vadd.f32 %v6671_v7, %v6595_v3  ;;  %v6543_v63 = vmul.f32 %v10539_v0, %v15164_v8 }
0x1307   :  { %10540 = vrcp.f32 %v6508_v21  ;;  %v6261_v45 = vpop.xlane.xlu2 %6260 }
0x1308   :  { %10542 = vrcp.f32 %v6261_v45  ;;  %v6710_v22 = vadd.f32 %v6672_v29, %v14656_v48 }
0x130a   :  { %v15234_v38 = vadd.f32 %v15224_v61, %v6710_v22 }
0x130c   :  { %6748 = vadd.xlane.f32.xlu1 %v15234_v38 }
0x130d   :  { %v10541_v14 = vpop.eup %10540  ;;  %v6598_v46 = vpop.f32.mrf.mxu2 }
0x130e   :  { %v10543_v41 = vpop.eup %10542  ;;  %v6544_v58 = vmul.f32 %v10541_v14, %v15170_v23  ;;  %v6674_v57 = vpop.f32.mrf.mxu3 }
0x130f   :  { %v6297_v40 = vmul.f32 %v10543_v41, %v15172_v32  ;;  %v6675_v48 = vadd.f32 %v6674_v57, %v6598_v46 }
0x1310   :  { %v6555_v16 = vpack.c.bf16 %v6544_v58, %v6543_v63 }
0x1311   :  { %v6711_v47 = vadd.f32 %v6675_v48, %v14682_v24  ;;  %v6308_v49 = vpack.c.bf16 %v6297_v40, %v6296_v2 }
0x1312   :  { %9225 = vmatmul.msk.bf16.gmra.mxu2 %vm1968_vm1, %v6555_v16 }
0x1313   :  { %9233 = vmatmul.msk.bf16.gmra.mxu3 %vm1968_vm1, %v6308_v49  ;;  %v15244_v15 = vadd.f32 %v15224_v61, %v6711_v47 }
0x1315   :  { %6750 = vadd.xlane.f32.xlu2 %v15244_v15  ;;  %v6600_v23 = vpop.f32.mrf.mxu2 }
0x1316   :  { %v6676_v4 = vpop.f32.mrf.mxu3 }
0x1317   :  { %v6677_v25 = vadd.f32 %v6676_v4, %v6600_v23 }
0x1319   :  { %v6712_v8 = vadd.f32 %v6677_v25, %v14685_v13 }
0x131b   :  { %v15250_v32 = vadd.f32 %v15224_v61, %v6712_v8 }
0x131d   :  { %6752 = vadd.xlane.f32.xlu0 %v15250_v32 }
0x131e   :  { %v6603_v24 = vpop.f32.mrf.mxu2 }
0x131f   :  { %v6679_v10 = vpop.f32.mrf.mxu3 }
0x1320   :  { %v6680_v1 = vadd.f32 %v6679_v10, %v6603_v24 }
0x1322   :  { %v6713_v52 = vadd.f32 %v6680_v1, %v14709_v31 }
0x1324   :  { %v15255_v27 = vadd.f32 %v15224_v61, %v6713_v52 }
0x1326   :  { %6754 = vadd.xlane.f32.xlu1 %v15255_v27  ;;  %v6605_v36 = vpop.f32.mrf.mxu2 }
0x1327   :  { %v6681_v43 = vpop.f32.mrf.mxu3 }
0x1328   :  { %v6682_v55 = vadd.f32 %v6681_v43, %v6605_v36 }
0x132a   :  { %v6714_v13 = vadd.f32 %v6682_v55, %v14712_v59 }
0x132c   :  { %v15260_v9 = vadd.f32 %v15224_v61, %v6714_v13 }
0x132e   :  { %6756 = vadd.xlane.f32.xlu2 %v15260_v9 }
0x1346   :  { %v6264_v11 = vpop.xlane.xlu2 %6263 }
0x1347   :  { %10544 = vrcp.f32 %v6264_v11 }
0x134c   :  { %v6511_v31 = vpop.xlane.xlu1 %6510 }
0x134d   :  { %v10545_v42 = vpop.eup %10544 }
0x134e   :  { %v6267_v6 = vpop.xlane.xlu0 %6266  ;;  %v6298_v51 = vmul.f32 %v10545_v42, %v15187_v54 }
0x134f   :  { %10546 = vrcp.f32 %v6267_v6 }
0x1350   :  { %10548 = vrcp.f32 %v6511_v31 }
0x1355   :  { %v10547_v34 = vpop.eup %10546 }
0x1356   :  { %v6299_v20 = vmul.f32 %v10547_v34, %v15196_v37  ;;  %v6514_v18 = vpop.xlane.xlu2 %6513  ;;  %v10549_v50 = vpop.eup %10548 }
0x1357   :  { %10550 = vrcp.f32 %v6514_v18  ;;  %v6545_v3 = vmul.f32 %v10549_v50, %v15194_v30 }
0x1358   :  { %v6309_v59 = vpack.c.bf16 %v6299_v20, %v6298_v51 }
0x135a   :  { %9234 = vmatmul.msk.bf16.gmra.mxu3 %vm1968_vm1, %v6309_v59 }
0x135d   :  { %v10551_v7 = vpop.eup %10550  ;;  %v6684_v45 = vpop.f32.mrf.mxu3 }
0x135e   :  { %v6546_v21 = vmul.f32 %v10551_v7, %v15205_v28 }
0x1360   :  { %v6556_v29 = vpack.c.bf16 %v6546_v21, %v6545_v3 }
0x1362   :  { %9226 = vmatmul.msk.bf16.gmra.mxu2 %vm1968_vm1, %v6556_v29 }
0x1365   :  { %v6608_v22 = vpop.f32.mrf.mxu2  ;;  %v6686_v14 = vpop.f32.mrf.mxu3 }
0x1366   :  { %v6685_v33 = vadd.f32 %v6684_v45, %v6608_v22 }
0x1368   :  { %v6715_v54 = vadd.f32 %v6685_v33, %v14737_v12  ;;  %v9844_v33 = vld [vmem:[%s16090_s14 + $0x1ec] sm:$0xf0] }
0x136a   :  { %v15271_v37 = vadd.f32 %v15224_v61, %v6715_v54  ;;  %v9842_v54 = vld [vmem:[%s16090_s14 + $0x1e4] sm:$0xf] }
0x136c   :  { %6758 = vadd.xlane.f32.xlu2 %v15271_v37 }
0x136d   :  { %v6610_v0 = vpop.f32.mrf.mxu2  ;;  %v6689_v2 = vpop.f32.mrf.mxu3 }
0x136e   :  { %v6687_v46 = vadd.f32 %v6686_v14, %v6610_v0  ;;  %v9391_v14 = vld [vmem:[%s16090_s14 + $0x1e8] sm:$0xf] }
0x1370   :  { %v6716_v63 = vadd.f32 %v6687_v46, %v14740_v39  ;;  %v9843_v46 = vld [vmem:[%s16090_s14 + $0x1ec] sm:$0xf] }
0x1372   :  { %v15288_v16 = vadd.f32 %v15224_v61, %v6716_v63  ;;  %v9840_v63 = vld [vmem:[%s16090_s14 + $0x1cc] sm:$0xf0] }
0x1375   :  { %v6613_v58 = vpop.f32.mrf.mxu2  ;;  %v6691_v39 = vpop.f32.mrf.mxu3 }
0x1376   :  { %v6690_v47 = vadd.f32 %v6689_v2, %v6613_v58 }
0x1377   :  { %v6747_v41 = vpop.xlane.xlu0 %6746 }
0x1378   :  { %v6778_v30 = vmul.f32 %v6747_v41, %v16158_v35  ;;  %v6717_v4 = vadd.f32 %v6690_v47, %v14754_v56  ;;  %v9845_v41 = vld [vmem:[%s16090_s14 + $0x1f4] sm:$0xf0] }
0x1379   :  { %v9392_v58 = vor.u32 %v9845_v41, %v9391_v14  ;;  %v9831_v14 = vld [vmem:[%s16090_s14 + $0x18c] sm:$0xf]  ;;  %v9345_v41 = vld [vmem:[%s16090_s14 + $0x198] sm:$0xf0] }
0x137a   :  { %v15276_v28 = vsub.f32 %v15228_v19, %v6778_v30  ;;  %v15297_v24 = vadd.f32 %v15224_v61, %v6717_v4 }
0x137b   :  { %7410 = vmatpush.bf16.msrb.mxu2 %v9392_v58  ;;  %v9319_v58 = vld [vmem:[%s16090_s14 + $0x160] sm:$0xf] }
0x137c   :  { %v6810_v57 = vmul.f32 %v15276_v28, %v15276_v28 }
0x137d   :  { %v6615_v49 = vpop.f32.mrf.mxu2  ;;  %v6694_v43 = vpop.f32.mrf.mxu3 }
0x137e   :  { %6826 = vadd.xlane.f32.xlu0 %v6810_v57  ;;  %v6692_v8 = vadd.f32 %v6691_v39, %v6615_v49  ;;  %v9393_v57 = vld [vmem:[%s16090_s14 + $0x1f8] sm:$0xf0]  ;;  %v9369_v49 = vld [vmem:[%s16090_s14 + $0x1d0] sm:$0xf0] }
0x137f   :  { %v6749_v12 = vpop.xlane.xlu1 %6748  ;;  %v9396_v2 = vor.u32 %v9843_v46, %v9393_v57  ;;  %v9828_v46 = vld [vmem:[%s16090_s14 + $0x16c] sm:$0xf0]  ;;  %v9826_v57 = vld [vmem:[%s16090_s14 + $0x164] sm:$0xf] }
0x1380   :  { %v6779_v40 = vmul.f32 %v6749_v12, %v16158_v35  ;;  %v6718_v56 = vadd.f32 %v6692_v8, %v14757_v53  ;;  %v9367_v12 = vld [vmem:[%s16090_s14 + $0x1c0] sm:$0xf]  ;;  %v9377_v8 = vld [vmem:[%s16090_s14 + $0x1d8] sm:$0xf0] }
0x1381   :  { %7459 = vmatpush.bf16.msra.mxu3 %v9396_v2  ;;  %v9368_v47 = vor.u32 %v9840_v63, %v9367_v12  ;;  %v9320_v12 = vor.u32 %v9828_v46, %v9319_v58  ;;  %v9321_v63 = vld [vmem:[%s16090_s14 + $0x170] sm:$0xf0] }
0x1382   :  { %v15283_v48 = vsub.f32 %v15234_v38, %v6779_v40  ;;  %v15310_v11 = vadd.f32 %v15224_v61, %v6718_v56  ;;  %v9838_v40 = vld [vmem:[%s16090_s14 + $0x1c4] sm:$0xf]  ;;  %v9836_v56 = vld [vmem:[%s16090_s14 + $0x1ac] sm:$0xf0] }
0x1383   :  { %v9372_v4 = vor.u32 %v9838_v40, %v9369_v49  ;;  %v9327_v40 = vld [vmem:[%s16090_s14 + $0x168] sm:$0xf] }
0x1384   :  { %v6811_v19 = vmul.f32 %v15283_v48, %v15283_v48 }
0x1385   :  { %v6618_v1 = vpop.f32.mrf.mxu2 }
0x1386   :  { %6828 = vadd.xlane.f32.xlu1 %v6811_v19  ;;  %6760 = vadd.xlane.f32.xlu0 %v15288_v16  ;;  %v6695_v55 = vadd.f32 %v6694_v43, %v6618_v1  ;;  %v9375_v19 = vld [vmem:[%s16090_s14 + $0x1c8] sm:$0xf] }
0x1388   :  { %v6751_v23 = vpop.xlane.xlu2 %6750  ;;  %v6719_v6 = vadd.f32 %v6695_v55, %v14781_v5 }
0x1389   :  { %v6780_v25 = vmul.f32 %v6751_v23, %v16158_v35  ;;  %v9841_v23 = vld [vmem:[%s16090_s14 + $0x1d4] sm:$0xf0] }
0x138a   :  { %v15319_v51 = vadd.f32 %v15224_v61, %v6719_v6  ;;  %v9376_v39 = vor.u32 %v9841_v23, %v9375_v19  ;;  %v9359_v6 = vld [vmem:[%s16090_s14 + $0x1a8] sm:$0xf]  ;;  %v9324_v19 = vor.u32 %v9826_v57, %v9321_v63  ;;  %v9273_v57 = vld [vmem:[%s16090_s14 + $0x110] sm:$0xf0]  ;;  %v9817_v63 = vld [vmem:[%s16090_s14 + $0x114] sm:$0xf0] }
0x138b   :  { %v15294_v38 = vsub.f32 %v15244_v15, %v6780_v25  ;;  %v9839_v25 = vld [vmem:[%s16090_s14 + $0x1cc] sm:$0xf] }
0x138c   :  { %7411 = vmatpush.bf16.msrb.mxu2 %v9376_v39 }
0x138d   :  { %v6812_v10 = vmul.f32 %v15294_v38, %v15294_v38  ;;  %v6620_v31 = vpop.f32.mrf.mxu2 }
0x138e   :  { %6762 = vadd.xlane.f32.xlu0 %v15297_v24 }
0x138f   :  { %6830 = vadd.xlane.f32.xlu1 %v6812_v10  ;;  %v9380_v10 = vor.u32 %v9839_v25, %v9377_v8  ;;  %v9303_v8 = vld [vmem:[%s16090_s14 + $0x140] sm:$0xf] }
0x1390   :  { %v6753_v52 = vpop.xlane.xlu0 %6752 }
0x1391   :  { %v6781_v36 = vmul.f32 %v6753_v52, %v16158_v35  ;;  %v9351_v52 = vld [vmem:[%s16090_s14 + $0x1a0] sm:$0xf]  ;;  %7460 = vmatpush.bf16.msra.mxu3 %v9380_v10  ;;  %v9824_v10 = vld [vmem:[%s16090_s14 + $0x14c] sm:$0xf0] }
0x1392   :  { %v9352_v55 = vor.u32 %v9836_v56, %v9351_v52 }
0x1393   :  { %v15305_v15 = vsub.f32 %v15250_v32, %v6781_v36  ;;  %v6696_v32 = vpop.f32.mrf.mxu3  ;;  %v9834_v36 = vld [vmem:[%s16090_s14 + $0x1a4] sm:$0xf] }
0x1394   :  { %v6697_v20 = vadd.f32 %v6696_v32, %v6620_v31  ;;  %v9837_v31 = vld [vmem:[%s16090_s14 + $0x1b4] sm:$0xf0] }
0x1395   :  { %v6813_v13 = vmul.f32 %v15305_v15, %v15305_v15  ;;  %v6623_v7 = vpop.f32.mrf.mxu2  ;;  %v9360_v32 = vor.u32 %v9837_v31, %v9359_v6 }
0x1396   :  { %v6720_v5 = vadd.f32 %v6697_v20, %v14784_v62  ;;  %v9835_v20 = vld [vmem:[%s16090_s14 + $0x1ac] sm:$0xf] }
0x1397   :  { %6832 = vadd.xlane.f32.xlu2 %v6813_v13  ;;  %6764 = vadd.xlane.f32.xlu1 %v15310_v11  ;;  %v9353_v13 = vld [vmem:[%s16090_s14 + $0x1b0] sm:$0xf0] }
0x1398   :  { %v15330_v29 = vadd.f32 %v15224_v61, %v6720_v5  ;;  %7412 = vmatpush.bf16.msrb.mxu2 %v9360_v32 }
0x1399   :  { %v6755_v53 = vpop.xlane.xlu1 %6754 }
0x139a   :  { %v6782_v42 = vmul.f32 %v6755_v53, %v16158_v35 }
0x139b   :  { %v6699_v3 = vpop.f32.mrf.mxu3 }
0x139c   :  { %v15316_v34 = vsub.f32 %v15255_v27, %v6782_v42  ;;  %v6700_v21 = vadd.f32 %v6699_v3, %v6623_v7  ;;  %v9356_v42 = vor.u32 %v9834_v36, %v9353_v13  ;;  %v9335_v7 = vld [vmem:[%s16090_s14 + $0x180] sm:$0xf]  ;;  %v9832_v3 = vld [vmem:[%s16090_s14 + $0x18c] sm:$0xf0]  ;;  %v9304_v36 = vor.u32 %v9824_v10, %v9303_v8  ;;  %v9825_v13 = vld [vmem:[%s16090_s14 + $0x154] sm:$0xf0] }
0x139d   :  { %v6625_v53 = vpop.f32.mrf.mxu2 }
0x139e   :  { %v6814_v18 = vmul.f32 %v15316_v34, %v15316_v34  ;;  %v6721_v22 = vadd.f32 %v6700_v21, %v14797_v26  ;;  %v9385_v26 = vld [vmem:[%s16090_s14 + $0x1f0] sm:$0xf0]  ;;  %v9830_v21 = vld [vmem:[%s16090_s14 + $0x184] sm:$0xf] }
0x139f   :  { %6766 = vadd.xlane.f32.xlu1 %v15319_v51  ;;  %v9388_v30 = vor.u32 %v9842_v54, %v9385_v26  ;;  %v9833_v54 = vld [vmem:[%s16090_s14 + $0x194] sm:$0xf0] }
0x13a0   :  { %6834 = vadd.xlane.f32.xlu2 %v6814_v18  ;;  %v15337_v62 = vadd.f32 %v15224_v61, %v6721_v22  ;;  %v9361_v18 = vld [vmem:[%s16090_s14 + $0x1b8] sm:$0xf0]  ;;  %v9336_v22 = vor.u32 %v9832_v3, %v9335_v7  ;;  %v9289_v3 = vld [vmem:[%s16090_s14 + $0x130] sm:$0xf0] }
0x13a1   :  { %v6757_v59 = vpop.xlane.xlu2 %6756  ;;  %7361 = vmatpush.bf16.msrb.mxu1 %v9388_v30  ;;  %v9364_v5 = vor.u32 %v9835_v20, %v9361_v18  ;;  %v9348_v30 = vor.u32 %v9831_v14, %v9345_v41  ;;  %v9287_v20 = vld [vmem:[%s16090_s14 + $0x120] sm:$0xf]  ;;  %v9820_v18 = vld [vmem:[%s16090_s14 + $0x12c] sm:$0xf0]  ;;  %v9814_v41 = vld [vmem:[%s16090_s14 + $0x104] sm:$0xf] }
0x13a2   :  { %v6783_v50 = vmul.f32 %v6757_v59, %v16158_v35  ;;  %v9288_v7 = vor.u32 %v9820_v18, %v9287_v20  ;;  %v9816_v14 = vld [vmem:[%s16090_s14 + $0x10c] sm:$0xf0] }
0x13a3   :  { %7461 = vmatpush.bf16.msra.mxu3 %v9364_v5  ;;  %v9818_v5 = vld [vmem:[%s16090_s14 + $0x124] sm:$0xf] }
0x13a4   :  { %v15327_v27 = vsub.f32 %v15260_v9, %v6783_v50  ;;  %v9383_v9 = vld [vmem:[%s16090_s14 + $0x1e0] sm:$0xf]  ;;  %v6701_v50 = vpop.f32.mrf.mxu3 }
0x13a5   :  { %v9384_v0 = vor.u32 %v9844_v33, %v9383_v9  ;;  %7362 = vmatpush.bf16.msrb.mxu1 %v9372_v4  ;;  %v9337_v9 = vld [vmem:[%s16090_s14 + $0x190] sm:$0xf0]  ;;  %v9343_v33 = vld [vmem:[%s16090_s14 + $0x188] sm:$0xf]  ;;  %v9329_v4 = vld [vmem:[%s16090_s14 + $0x178] sm:$0xf0] }
0x13a6   :  { %v6815_v45 = vmul.f32 %v15327_v27, %v15327_v27  ;;  %v9344_v26 = vor.u32 %v9833_v54, %v9343_v33  ;;  %v9297_v33 = vld [vmem:[%s16090_s14 + $0x138] sm:$0xf0] }
0x13a7   :  { %7312 = vmatpush.bf16.msra.mxu0 %v9384_v0  ;;  %v9340_v0 = vor.u32 %v9830_v21, %v9337_v9  ;;  %7462 = vmatpush.bf16.msra.mxu3 %v9348_v30  ;;  %v9295_v21 = vld [vmem:[%s16090_s14 + $0x128] sm:$0xf] }
0x13a8   :  { %6768 = vadd.xlane.f32.xlu2 %v15330_v29  ;;  %6836 = vadd.xlane.f32.xlu0 %v6815_v45  ;;  %v6702_v45 = vadd.f32 %v6701_v50, %v6625_v53  ;;  %v9823_v53 = vld [vmem:[%s16090_s14 + $0x14c] sm:$0xf] }
0x13a9   :  { %7363 = vmatpush.bf16.msrb.mxu1 %v9356_v42  ;;  %7413 = vmatpush.bf16.msrb.mxu2 %v9344_v26  ;;  %v9313_v42 = vld [vmem:[%s16090_s14 + $0x158] sm:$0xf0]  ;;  %v9271_v26 = vld [vmem:[%s16090_s14 + $0x100] sm:$0xf] }
0x13aa   :  { %v6722_v2 = vadd.f32 %v6702_v45, %v14800_v44  ;;  %v9827_v44 = vld [vmem:[%s16090_s14 + $0x16c] sm:$0xf]  ;;  %v9316_v32 = vor.u32 %v9823_v53, %v9313_v42  ;;  %v9821_v45 = vld [vmem:[%s16090_s14 + $0x134] sm:$0xf0]  ;;  %v9272_v46 = vor.u32 %v9816_v14, %v9271_v26  ;;  %v10652_v26 = vld [vmem:[%s16083_s18 + $0x4] sm:$0x7] }
0x13ab   :  { %7313 = vmatpush.bf16.msra.mxu0 %v9368_v47  ;;  %v9829_v47 = vld [vmem:[%s16090_s14 + $0x174] sm:$0xf0]  ;;  %v9332_v39 = vor.u32 %v9827_v44, %v9329_v4  ;;  %v9296_v9 = vor.u32 %v9821_v45, %v9295_v21  ;;  %v15569_v14 = vperm.slane %v10652_v26, 1 }
0x13ac   :  { %v9328_v23 = vor.u32 %v9829_v47, %v9327_v40  ;;  %v15477_v56 = vadd.f32 %v15224_v61, %v6722_v2  ;;  %v9279_v2 = vld [vmem:[%s16090_s14 + $0x108] sm:$0xf]  ;;  %v9815_v40 = vld [vmem:[%s16090_s14 + $0x10c] sm:$0xf]  ;;  %v9281_v47 = vld [vmem:[%s16090_s14 + $0x118] sm:$0xf0] }
0x13ad   :  { %7364 = vmatpush.bf16.msrb.mxu1 %v9340_v0  ;;  %7463 = vmatpush.bf16.msra.mxu3 %v9332_v39 }
0x13ae   :  { %7414 = vmatpush.bf16.msrb.mxu2 %v9328_v23 }
0x13af   :  { %7314 = vmatpush.bf16.msra.mxu0 %v9352_v55  ;;  %v9311_v55 = vld [vmem:[%s16090_s14 + $0x148] sm:$0xf] }
0x13b0   :  { %6770 = vadd.xlane.f32.xlu2 %v15337_v62  ;;  %v9312_v31 = vor.u32 %v9825_v13, %v9311_v55 }
0x13b1   :  { %7365 = vmatpush.bf16.msrb.mxu1 %v9324_v19  ;;  %7464 = vmatpush.bf16.msra.mxu3 %v9316_v32  ;;  %v9284_v19 = vor.u32 %v9815_v40, %v9281_v47 }
0x13b2   :  { %7415 = vmatpush.bf16.msrb.mxu2 %v9312_v31 }
0x13b3   :  { %7315 = vmatpush.bf16.msra.mxu0 %v9336_v22  ;;  %v9292_v22 = vor.u32 %v9818_v5, %v9289_v3 }
0x13b6   :  { %7416 = vmatpush.bf16.msrb.mxu2 %v9296_v9 }
0x13b7   :  { %7316 = vmatpush.bf16.msra.mxu0 %v9320_v12  ;;  %v9276_v12 = vor.u32 %v9814_v41, %v9273_v57 }
0x13bb   :  { %7317 = vmatpush.bf16.msra.mxu0 %v9304_v36 }
0x13bf   :  { %7318 = vmatpush.bf16.msra.mxu0 %v9288_v7 }
0x13c3   :  { %7319 = vmatpush.bf16.msra.mxu0 %v9272_v46 }
0x13dd   :  { %v6704_v25 = vpop.f32.mrf.mxu3 }
0x13df   :  { %v6759_v1 = vpop.xlane.xlu2 %6758 }
0x13e0   :  { %v6784_v43 = vmul.f32 %v6759_v1, %v16158_v35  ;;  %v9822_v1 = vld [vmem:[%s16090_s14 + $0x144] sm:$0xf] }
0x13e2   :  { %v15414_v59 = vsub.f32 %v15271_v37, %v6784_v43  ;;  %v9305_v43 = vld [vmem:[%s16090_s14 + $0x150] sm:$0xf0] }
0x13e3   :  { %v9308_v6 = vor.u32 %v9822_v1, %v9305_v43 }
0x13e4   :  { %v6816_v37 = vmul.f32 %v15414_v59, %v15414_v59 }
0x13e5   :  { %v6628_v49 = vpop.f32.mrf.mxu2  ;;  %7366 = vmatpush.bf16.msrb.mxu1 %v9308_v6  ;;  %v6706_v18 = vpop.f32.mrf.mxu3 }
0x13e6   :  { %6838 = vadd.xlane.f32.xlu0 %v6816_v37  ;;  %v6705_v52 = vadd.f32 %v6704_v25, %v6628_v49  ;;  %v9280_v49 = vor.u32 %v9817_v63, %v9279_v2 }
0x13e8   :  { %v6723_v50 = vadd.f32 %v6705_v52, %v14815_v17  ;;  %v9819_v17 = vld [vmem:[%s16090_s14 + $0x12c] sm:$0xf]  ;;  %7417 = vmatpush.bf16.msrb.mxu2 %v9280_v49 }
0x13e9   :  { %v9300_v0 = vor.u32 %v9819_v17, %v9297_v33  ;;  %7367 = vmatpush.bf16.msrb.mxu1 %v9292_v22 }
0x13ea   :  { %v15531_v58 = vadd.f32 %v15224_v61, %v6723_v50 }
0x13eb   :  { %7465 = vmatpush.bf16.msra.mxu3 %v9300_v0 }
0x13ed   :  { %7368 = vmatpush.bf16.msrb.mxu1 %v9276_v12  ;;  %v6630_v53 = vpop.f32.mrf.mxu2 }
0x13ee   :  { %6772 = vadd.xlane.f32.xlu0 %v15477_v56  ;;  %v6707_v7 = vadd.f32 %v6706_v18, %v6630_v53 }
0x13ef   :  { %7466 = vmatpush.bf16.msra.mxu3 %v9284_v19 }
0x13f1   :  { %v6827_v37 = vpop.xlane.xlu0 %6826 }
0x13f2   :  { %v6858_v54 = vmul.f32 %v6827_v37, %v16158_v35 }
0x13f4   :  { %v6874_v30 = vadd.f32 1e-05, %v6858_v54 }
0x13f6   :  { %10552 = vrsqrt.f32 %v6874_v30  ;;  %6774 = vadd.xlane.f32.xlu0 %v15531_v58  ;;  %vm6896_vm2 = vweird.f32 %v6874_v30 }
0x13f9   :  { %v6829_v23 = vpop.xlane.xlu1 %6828  ;;  %v6761_v44 = vpop.xlane.xlu0 %6760 }
0x13fa   :  { %v6859_v4 = vmul.f32 %v6829_v23, %v16158_v35  ;;  %v6785_v39 = vmul.f32 %v6761_v44, %v16158_v35 }
0x13fc   :  { %v10553_v25 = vpop.eup %10552  ;;  %v6875_v8 = vadd.f32 1e-05, %v6859_v4  ;;  %v15552_v10 = vsub.f32 %v15288_v16, %v6785_v39 }
0x13fd   :  { %v6891_v1 = vmul.f32 %v10553_v25, %v6874_v30  ;;  %vm6897_vm1 = vweird.f32 %v10553_v25 }
0x13fe   :  { %10554 = vrsqrt.f32 %v6875_v8  ;;  %v6817_v52 = vmul.f32 %v15552_v10, %v15552_v10  ;;  %vm6898_vm7 = vmor %vm6896_vm2, %vm6897_vm1  ;;  %vm6906_vm9 = vweird.f32 %v6875_v8 }
0x13ff   :  { %v6892_v36 = vmul.f32 %v10553_v25, %v6891_v1 }
0x1400   :  { %6840 = vadd.xlane.f32.xlu1 %v6817_v52 }
0x1401   :  { %v6893_v43 = vmul.f32 0.5, %v6892_v36  ;;  %v6763_v55 = vpop.xlane.xlu0 %6762 }
0x1402   :  { %v6831_v13 = vpop.xlane.xlu1 %6830  ;;  %v6786_v6 = vmul.f32 %v6763_v55, %v16158_v35 }
0x1403   :  { %v6860_v31 = vmul.f32 %v6831_v13, %v16158_v35  ;;  %v6894_v42 = vsub.f32 1.5, %v6893_v43 }
0x1404   :  { %v10555_v32 = vpop.eup %10554  ;;  %v15559_v16 = vsub.f32 %v15297_v24, %v6786_v6  ;;  %v6724_v24 = vadd.f32 %v6707_v7, %v14818_v60 }
0x1405   :  { %v6876_v20 = vadd.f32 1e-05, %v6860_v31  ;;  %v6895_v5 = vmul.f32 %v10553_v25, %v6894_v42  ;;  %v6901_v50 = vmul.f32 %v10555_v32, %v6875_v8  ;;  %vm6907_vm8 = vweird.f32 %v10555_v32 }
0x1406   :  { %v6818_v3 = vmul.f32 %v15559_v16, %v15559_v16  ;;  %vm6908_vm10 = vmor %vm6906_vm9, %vm6907_vm8  ;;  %v15576_v2 = vadd.f32 %v15224_v61, %v6724_v24 }
0x1407   :  { %10556 = vrsqrt.f32 %v6876_v20  ;;  %v6902_v21 = vmul.f32 %v10555_v32, %v6901_v50  ;;  %v6899_v45 = vsel %vm6898_vm7, %v10553_v25, %v6895_v5  ;;  %vm6916_vm12 = vweird.f32 %v6876_v20 }
0x1408   :  { %6842 = vadd.xlane.f32.xlu1 %v6818_v3  ;;  %v7050_v41 = vmul.f32 %v6899_v45, %v15276_v28  ;;  %v10653_v28 = vld [vmem:[%s16084_s19 + $0x4] sm:$0x7] }
0x1409   :  { %v6903_v37 = vmul.f32 0.5, %v6902_v21 }
0x140a   :  { %v6765_v22 = vpop.xlane.xlu1 %6764  ;;  %v6833_v9 = vpop.xlane.xlu2 %6832  ;;  %v7067_v47 = vmul.f32 %v15569_v14, %v7050_v41 }
0x140b   :  { %v6787_v17 = vmul.f32 %v6765_v22, %v16158_v35  ;;  %v6861_v33 = vmul.f32 %v6833_v9, %v16158_v35  ;;  %v6904_v54 = vsub.f32 1.5, %v6903_v37 }
0x140d   :  { %v10557_v0 = vpop.eup %10556  ;;  %v15573_v30 = vsub.f32 %v15310_v11, %v6787_v17  ;;  %v6877_v46 = vadd.f32 1e-05, %v6861_v33  ;;  %v6905_v60 = vmul.f32 %v10555_v32, %v6904_v54  ;;  %v15583_v11 = vperm.slane %v10653_v28, 1 }
0x140e   :  { %v6911_v57 = vmul.f32 %v10557_v0, %v6876_v20  ;;  %vm6917_vm11 = vweird.f32 %v10557_v0 }
0x140f   :  { %10558 = vrsqrt.f32 %v6877_v46  ;;  %v6819_v12 = vmul.f32 %v15573_v30, %v15573_v30  ;;  %v6909_v63 = vsel %vm6908_vm10, %v10555_v32, %v6905_v60  ;;  %v15592_v1 = vadd.f32 %v15583_v11, %v7067_v47  ;;  %vm6918_vm13 = vmor %vm6916_vm12, %vm6917_vm11 }
0x1410   :  { %v6912_v40 = vmul.f32 %v10557_v0, %v6911_v57  ;;  %v7051_v49 = vmul.f32 %v6909_v63, %v15283_v48  ;;  %6776 = vadd.xlane.f32.xlu1 %v15576_v2  ;;  %vm6926_vm15 = vweird.f32 %v6877_v46 }
0x1411   :  { %6844 = vadd.xlane.f32.xlu2 %v6819_v12 }
0x1412   :  { %v6913_v61 = vmul.f32 0.5, %v6912_v40  ;;  %v6767_v19 = vpop.xlane.xlu1 %6766  ;;  %v7068_v23 = vmul.f32 %v15569_v14, %v7051_v49 }
0x1413   :  { %v6788_v44 = vmul.f32 %v6767_v19, %v16158_v35  ;;  %v6835_v4 = vpop.xlane.xlu2 %6834 }
0x1414   :  { %v6914_v39 = vsub.f32 1.5, %v6913_v61  ;;  %v6862_v25 = vmul.f32 %v6835_v4, %v16158_v35  ;;  %v7085_v52 = vadd.f32 %v15583_v11, %v7068_v23 }
0x1415   :  { %v10559_v8 = vpop.eup %10558  ;;  %v15596_v48 = vsub.f32 %v15319_v51, %v6788_v44 }
0x1416   :  { %v6915_v36 = vmul.f32 %v10557_v0, %v6914_v39  ;;  %v6921_v43 = vmul.f32 %v10559_v8, %v6877_v46  ;;  %v6878_v55 = vadd.f32 1e-05, %v6862_v25  ;;  %v7133_v13 = vpack.c.bf16 %v7085_v52, %v15592_v1 }
0x1417   :  { %v6820_v6 = vmul.f32 %v15596_v48, %v15596_v48  ;;  %vm6927_vm14 = vweird.f32 %v10559_v8 }
0x1418   :  { %v6922_v31 = vmul.f32 %v10559_v8, %v6921_v43  ;;  %10560 = vrsqrt.f32 %v6878_v55  ;;  %7320 = vmatmul.bf16.vlgmr.msra.gmra.mxu0 %v7133_v13  ;;  %7369 = vmatmul.bf16.vlgmr.msrb.gmra.mxu1 %v7133_v13  ;;  %v6919_v53 = vsel %vm6918_vm13, %v10557_v0, %v6915_v36  ;;  %vm6928_vm0 = vmor %vm6926_vm15, %vm6927_vm14  ;;  %vm6936_vm4 = vweird.f32 %v6878_v55 }
0x1419   :  { %7418 = vmatmul.bf16.vlgmr.msrb.gmra.mxu2 %v7133_v13  ;;  %7467 = vmatmul.bf16.vlgmr.msra.gmra.mxu3 %v7133_v13  ;;  %v7052_v20 = vmul.f32 %v6919_v53, %v15294_v38 }
0x141a   :  { %v6923_v42 = vmul.f32 0.5, %v6922_v31  ;;  %6846 = vadd.xlane.f32.xlu2 %v6820_v6 }
0x141b   :  { %v6837_v51 = vpop.xlane.xlu0 %6836  ;;  %v6769_v32 = vpop.xlane.xlu2 %6768  ;;  %v7069_v33 = vmul.f32 %v15569_v14, %v7052_v20 }
0x141c   :  { %v6924_v18 = vsub.f32 1.5, %v6923_v42  ;;  %v6863_v5 = vmul.f32 %v6837_v51, %v16158_v35  ;;  %v6789_v50 = vmul.f32 %v6769_v32, %v16158_v35 }
0x141d   :  { %v15614_v41 = vadd.f32 %v15583_v11, %v7069_v33 }
0x141e   :  { %v10561_v7 = vpop.eup %10560  ;;  %v6925_v3 = vmul.f32 %v10559_v8, %v6924_v18  ;;  %v6879_v21 = vadd.f32 1e-05, %v6863_v5  ;;  %v15605_v45 = vsub.f32 %v15330_v29, %v6789_v50 }
0x141f   :  { %v6931_v37 = vmul.f32 %v10561_v7, %v6878_v55  ;;  %vm6937_vm3 = vweird.f32 %v10561_v7 }
0x1420   :  { %v6929_v22 = vsel %vm6928_vm0, %v10559_v8, %v6925_v3  ;;  %10562 = vrsqrt.f32 %v6879_v21  ;;  %v6821_v9 = vmul.f32 %v15605_v45, %v15605_v45  ;;  %vm6938_vm5 = vmor %vm6936_vm4, %vm6937_vm3  ;;  %vm6946_vm1 = vweird.f32 %v6879_v21 }
0x1421   :  { %v7053_v24 = vmul.f32 %v6929_v22, %v15305_v15  ;;  %v6932_v17 = vmul.f32 %v10561_v7, %v6931_v37 }
0x1422   :  { %6848 = vadd.xlane.f32.xlu0 %v6821_v9 }
0x1423   :  { %v6933_v38 = vmul.f32 0.5, %v6932_v17  ;;  %v6771_v54 = vpop.xlane.xlu2 %6770  ;;  %v7070_v0 = vmul.f32 %v15569_v14, %v7053_v24 }
0x1424   :  { %v6790_v29 = vmul.f32 %v6771_v54, %v16158_v35 }
0x1425   :  { %v6934_v26 = vsub.f32 1.5, %v6933_v38  ;;  %v7087_v46 = vadd.f32 %v15583_v11, %v7070_v0 }
0x1426   :  { %v10563_v60 = vpop.eup %10562  ;;  %v15618_v57 = vsub.f32 %v15337_v62, %v6790_v29 }
0x1427   :  { %v6935_v15 = vmul.f32 %v10561_v7, %v6934_v26  ;;  %v6941_v12 = vmul.f32 %v10563_v60, %v6879_v21  ;;  %v7134_v63 = vpack.c.bf16 %v7087_v46, %v15614_v41  ;;  %vm6947_vm6 = vweird.f32 %v10563_v60 }
0x1428   :  { %v6822_v40 = vmul.f32 %v15618_v57, %v15618_v57  ;;  %vm6948_vm2 = vmor %vm6946_vm1, %vm6947_vm6 }
0x1429   :  { %v6942_v28 = vmul.f32 %v10563_v60, %v6941_v12  ;;  %7325 = vmatmul.bf16.gmra.mxu0 %v7134_v63  ;;  %7374 = vmatmul.bf16.gmra.mxu1 %v7134_v63  ;;  %v6939_v47 = vsel %vm6938_vm5, %v10561_v7, %v6935_v15 }
0x142a   :  { %7423 = vmatmul.bf16.gmra.mxu2 %v7134_v63  ;;  %7472 = vmatmul.bf16.gmra.mxu3 %v7134_v63  ;;  %v7054_v61 = vmul.f32 %v6939_v47, %v15316_v34 }
0x142b   :  { %v6943_v49 = vmul.f32 0.5, %v6942_v28  ;;  %6850 = vadd.xlane.f32.xlu1 %v6822_v40 }
0x142c   :  { %v7071_v4 = vmul.f32 %v15569_v14, %v7054_v61 }
0x142d   :  { %v6944_v62 = vsub.f32 1.5, %v6943_v49 }
0x142e   :  { %v15628_v25 = vadd.f32 %v15583_v11, %v7071_v4 }
0x142f   :  { %v6945_v19 = vmul.f32 %v10563_v60, %v6944_v62 }
0x1431   :  { %v6949_v23 = vsel %vm6948_vm2, %v10563_v60, %v6945_v19 }
0x1432   :  { %v7055_v44 = vmul.f32 %v6949_v23, %v15327_v27 }
0x1434   :  { %v7072_v39 = vmul.f32 %v15569_v14, %v7055_v44 }
0x1436   :  { %v7089_v8 = vadd.f32 %v15583_v11, %v7072_v39 }
0x1438   :  { %v7135_v52 = vpack.c.bf16 %v7089_v8, %v15628_v25 }
0x143a   :  { %7330 = vmatmul.bf16.gmra.mxu0 %v7135_v52  ;;  %7379 = vmatmul.bf16.gmra.mxu1 %v7135_v52 }
0x143b   :  { %7428 = vmatmul.bf16.gmra.mxu2 %v7135_v52  ;;  %7477 = vmatmul.bf16.gmra.mxu3 %v7135_v52 }
0x1459   :  { %v6839_v34 = vpop.xlane.xlu0 %6838 }
0x145a   :  { %v6864_v36 = vmul.f32 %v6839_v34, %v16158_v35 }
0x145c   :  { %v6880_v27 = vadd.f32 1e-05, %v6864_v36 }
0x145e   :  { %10564 = vrsqrt.f32 %v6880_v27  ;;  %vm6956_vm8 = vweird.f32 %v6880_v27 }
0x1461   :  { %v6773_v43 = vpop.xlane.xlu0 %6772 }
0x1462   :  { %v6791_v55 = vmul.f32 %v6773_v43, %v16158_v35 }
0x1464   :  { %v15635_v13 = vsub.f32 %v15477_v56, %v6791_v55  ;;  %v10565_v42 = vpop.eup %10564 }
0x1465   :  { %v6951_v18 = vmul.f32 %v10565_v42, %v6880_v27  ;;  %vm6957_vm7 = vweird.f32 %v10565_v42 }
0x1466   :  { %v6823_v6 = vmul.f32 %v15635_v13, %v15635_v13  ;;  %vm6958_vm9 = vmor %vm6956_vm8, %vm6957_vm7 }
0x1467   :  { %v6952_v5 = vmul.f32 %v10565_v42, %v6951_v18 }
0x1468   :  { %6852 = vadd.xlane.f32.xlu2 %v6823_v6 }
0x1469   :  { %v6775_v31 = vpop.xlane.xlu0 %6774  ;;  %v6953_v7 = vmul.f32 0.5, %v6952_v5 }
0x146a   :  { %v6792_v53 = vmul.f32 %v6775_v31, %v16158_v35 }
0x146b   :  { %v6954_v3 = vsub.f32 1.5, %v6953_v7 }
0x146c   :  { %v15641_v51 = vsub.f32 %v15531_v58, %v6792_v53 }
0x146d   :  { %v6955_v58 = vmul.f32 %v10565_v42, %v6954_v3 }
0x146e   :  { %v6824_v32 = vmul.f32 %v15641_v51, %v15641_v51 }
0x146f   :  { %v6959_v33 = vsel %vm6958_vm9, %v10565_v42, %v6955_v58 }
0x1470   :  { %6854 = vadd.xlane.f32.xlu0 %v6824_v32  ;;  %v7056_v15 = vmul.f32 %v6959_v33, %v15414_v59 }
0x1472   :  { %v7073_v19 = vmul.f32 %v15569_v14, %v7056_v15 }
0x1473   :  { %v6841_v56 = vpop.xlane.xlu1 %6840 }
0x1474   :  { %v6865_v50 = vmul.f32 %v6841_v56, %v16158_v35  ;;  %v15660_v8 = vadd.f32 %v15583_v11, %v7073_v19 }
0x1476   :  { %v6881_v20 = vadd.f32 1e-05, %v6865_v50 }
0x1478   :  { %10566 = vrsqrt.f32 %v6881_v20  ;;  %vm6966_vm11 = vweird.f32 %v6881_v20 }
0x147b   :  { %v6843_v21 = vpop.xlane.xlu1 %6842 }
0x147c   :  { %v6866_v37 = vmul.f32 %v6843_v21, %v16158_v35 }
0x147e   :  { %v10567_v22 = vpop.eup %10566  ;;  %v6882_v9 = vadd.f32 1e-05, %v6866_v37 }
0x147f   :  { %v6961_v24 = vmul.f32 %v10567_v22, %v6881_v20  ;;  %vm6967_vm10 = vweird.f32 %v10567_v22 }
0x1480   :  { %10568 = vrsqrt.f32 %v6882_v9  ;;  %vm6968_vm12 = vmor %vm6966_vm11, %vm6967_vm10  ;;  %vm6976_vm14 = vweird.f32 %v6882_v9 }
0x1481   :  { %v6962_v17 = vmul.f32 %v10567_v22, %v6961_v24 }
0x1483   :  { %v6963_v38 = vmul.f32 0.5, %v6962_v17  ;;  %v6777_v54 = vpop.xlane.xlu1 %6776 }
0x1484   :  { %v6845_v0 = vpop.xlane.xlu2 %6844  ;;  %v6793_v29 = vmul.f32 %v6777_v54, %v16158_v35 }
0x1485   :  { %v6867_v26 = vmul.f32 %v6845_v0, %v16158_v35  ;;  %v6964_v46 = vsub.f32 1.5, %v6963_v38 }
0x1486   :  { %v10569_v60 = vpop.eup %10568  ;;  %v15651_v12 = vsub.f32 %v15576_v2, %v6793_v29 }
0x1487   :  { %v6883_v63 = vadd.f32 1e-05, %v6867_v26  ;;  %v6965_v40 = vmul.f32 %v10567_v22, %v6964_v46  ;;  %v6971_v28 = vmul.f32 %v10569_v60, %v6882_v9  ;;  %vm6977_vm13 = vweird.f32 %v10569_v60 }
0x1488   :  { %v6825_v47 = vmul.f32 %v15651_v12, %v15651_v12  ;;  %vm6978_vm15 = vmor %vm6976_vm14, %vm6977_vm13 }
0x1489   :  { %10570 = vrsqrt.f32 %v6883_v63  ;;  %v6969_v49 = vsel %vm6968_vm12, %v10567_v22, %v6965_v40  ;;  %v6972_v62 = vmul.f32 %v10569_v60, %v6971_v28  ;;  %vm6986_vm3 = vweird.f32 %v6883_v63 }
0x148a   :  { %v7057_v61 = vmul.f32 %v6969_v49, %v15552_v10  ;;  %6856 = vadd.xlane.f32.xlu1 %v6825_v47 }
0x148b   :  { %v6973_v59 = vmul.f32 0.5, %v6972_v62 }
0x148c   :  { %v7074_v2 = vmul.f32 %v15569_v14, %v7057_v61 }
0x148d   :  { %v6974_v23 = vsub.f32 1.5, %v6973_v59  ;;  %v6847_v44 = vpop.xlane.xlu2 %6846  ;;  %v9869_v59 = vld [vmem:[%s16091_s16 + $0x1b8] sm:$0xff] }
0x148e   :  { %v6868_v39 = vmul.f32 %v6847_v44, %v16158_v35  ;;  %v7091_v52 = vadd.f32 %v15583_v11, %v7074_v2  ;;  %v9853_v2 = vld [vmem:[%s16091_s16 + $0x138] sm:$0xff]  ;;  %7948 = vmatpush.bf16.msra.mxu2 %v9869_v59  ;;  %v9856_v59 = vld [vmem:[%s16091_s16 + $0x150] sm:$0xff] }
0x148f   :  { %v10571_v4 = vpop.eup %10570  ;;  %v6975_v36 = vmul.f32 %v10569_v60, %v6974_v23  ;;  %v9877_v23 = vld [vmem:[%s16091_s16 + $0x1f8] sm:$0xff]  ;;  %7866 = vmatpush.bf16.msrb.mxu0 %v9853_v2  ;;  %v9864_v2 = vld [vmem:[%s16091_s16 + $0x190] sm:$0xff] }
0x1490   :  { %v6981_v34 = vmul.f32 %v10571_v4, %v6883_v63  ;;  %v6884_v10 = vadd.f32 1e-05, %v6868_v39  ;;  %v7136_v43 = vpack.c.bf16 %v7091_v52, %v15660_v8  ;;  %vm6987_vm0 = vweird.f32 %v10571_v4  ;;  %v9861_v39 = vld [vmem:[%s16091_s16 + $0x178] sm:$0xff]  ;;  %7989 = vmatpush.bf16.msrb.mxu3 %v9877_v23 }
0x1491   :  { %v6979_v6 = vsel %vm6978_vm15, %v10569_v60, %v6975_v36  ;;  %vm6988_vm4 = vmor %vm6986_vm3, %vm6987_vm0  ;;  %7907 = vmatpush.bf16.msra.mxu1 %v9861_v39 }
0x1492   :  { %v6982_v27 = vmul.f32 %v10571_v4, %v6981_v34  ;;  %10572 = vrsqrt.f32 %v6884_v10  ;;  %7335 = vmatmul.bf16.gmra.mxu0 %v7136_v43  ;;  %7384 = vmatmul.bf16.gmra.mxu1 %v7136_v43  ;;  %v7058_v32 = vmul.f32 %v6979_v6, %v15559_v16  ;;  %vm6996_vm6 = vweird.f32 %v6884_v10  ;;  %v9868_v34 = vld [vmem:[%s16091_s16 + $0x1b0] sm:$0xff] }
0x1493   :  { %7433 = vmatmul.bf16.gmra.mxu2 %v7136_v43  ;;  %7482 = vmatmul.bf16.gmra.mxu3 %v7136_v43 }
0x1494   :  { %v6983_v55 = vmul.f32 0.5, %v6982_v27  ;;  %v7075_v21 = vmul.f32 %v15569_v14, %v7058_v32  ;;  %7949 = vmatpush.bf16.msra.mxu2 %v9868_v34 }
0x1495   :  { %v6849_v31 = vpop.xlane.xlu0 %6848  ;;  %v15773_v23 = vpop.f32.mrf.mxu0 }
0x1496   :  { %v6984_v53 = vsub.f32 1.5, %v6983_v55  ;;  %v6869_v42 = vmul.f32 %v6849_v31, %v16158_v35  ;;  %v15671_v24 = vadd.f32 %v15583_v11, %v7075_v21 }
0x1498   :  { %v6985_v18 = vmul.f32 %v10571_v4, %v6984_v53  ;;  %v6885_v5 = vadd.f32 1e-05, %v6869_v42  ;;  %v10573_v56 = vpop.eup %10572 }
0x1499   :  { %v6991_v20 = vmul.f32 %v10573_v56, %v6884_v10  ;;  %vm6997_vm5 = vweird.f32 %v10573_v56 }
0x149a   :  { %v6989_v50 = vsel %vm6988_vm4, %v10571_v4, %v6985_v18  ;;  %10574 = vrsqrt.f32 %v6885_v5  ;;  %vm6998_vm1 = vmor %vm6996_vm6, %vm6997_vm5  ;;  %vm7006_vm7 = vweird.f32 %v6885_v5 }
0x149b   :  { %v7059_v7 = vmul.f32 %v6989_v50, %v15573_v30  ;;  %v6992_v3 = vmul.f32 %v10573_v56, %v6991_v20 }
0x149c   :  { %v15780_v39 = vpop.f32.mrf.mxu2 }
0x149d   :  { %v7076_v37 = vmul.f32 %v15569_v14, %v7059_v7  ;;  %v6993_v22 = vmul.f32 0.5, %v6992_v3 }
0x149f   :  { %v7093_v9 = vadd.f32 %v15583_v11, %v7076_v37  ;;  %v6994_v16 = vsub.f32 1.5, %v6993_v22  ;;  %v9852_v37 = vld [vmem:[%s16091_s16 + $0x130] sm:$0xff] }
0x14a0   :  { %v10575_v58 = vpop.eup %10574  ;;  %v9876_v22 = vld [vmem:[%s16091_s16 + $0x1f0] sm:$0xff]  ;;  %7867 = vmatpush.bf16.msrb.mxu0 %v9852_v37 }
0x14a1   :  { %v7001_v17 = vmul.f32 %v10575_v58, %v6885_v5  ;;  %v6995_v33 = vmul.f32 %v10573_v56, %v6994_v16  ;;  %v7137_v38 = vpack.c.bf16 %v7093_v9, %v15671_v24  ;;  %vm7007_vm2 = vweird.f32 %v10575_v58  ;;  %7990 = vmatpush.bf16.msrb.mxu3 %v9876_v22  ;;  %v9875_v16 = vld [vmem:[%s16091_s16 + $0x1e8] sm:$0xff] }
0x14a2   :  { %vm7008_vm8 = vmor %vm7006_vm7, %vm7007_vm2 }
0x14a3   :  { %v7002_v54 = vmul.f32 %v10575_v58, %v7001_v17  ;;  %7340 = vmatmul.bf16.gmra.mxu0 %v7137_v38  ;;  %7389 = vmatmul.bf16.gmra.mxu1 %v7137_v38  ;;  %v6999_v0 = vsel %vm6998_vm1, %v10573_v56, %v6995_v33  ;;  %v9859_v17 = vld [vmem:[%s16091_s16 + $0x168] sm:$0xff] }
0x14a4   :  { %7438 = vmatmul.bf16.gmra.mxu2 %v7137_v38  ;;  %7487 = vmatmul.bf16.gmra.mxu3 %v7137_v38  ;;  %v7060_v26 = vmul.f32 %v6999_v0, %v15596_v48  ;;  %v6851_v48 = vpop.xlane.xlu1 %6850 }
0x14a5   :  { %v7003_v30 = vmul.f32 0.5, %v7002_v54  ;;  %v6870_v62 = vmul.f32 %v6851_v48, %v16158_v35  ;;  %7991 = vmatpush.bf16.msrb.mxu3 %v9875_v16  ;;  %v9865_v48 = vld [vmem:[%s16091_s16 + $0x198] sm:$0xff] }
0x14a6   :  { %v7077_v63 = vmul.f32 %v15569_v14, %v7060_v26  ;;  %v9858_v26 = vld [vmem:[%s16091_s16 + $0x160] sm:$0xff] }
0x14a7   :  { %v7004_v29 = vsub.f32 1.5, %v7003_v30  ;;  %v6886_v61 = vadd.f32 1e-05, %v6870_v62  ;;  %v9873_v62 = vld [vmem:[%s16091_s16 + $0x1d8] sm:$0xff] }
0x14a8   :  { %v15679_v28 = vadd.f32 %v15583_v11, %v7077_v63 }
0x14a9   :  { %v7005_v46 = vmul.f32 %v10575_v58, %v7004_v29  ;;  %10576 = vrsqrt.f32 %v6886_v61  ;;  %vm7016_vm10 = vweird.f32 %v6886_v61  ;;  %v9850_v29 = vld [vmem:[%s16091_s16 + $0x120] sm:$0xff] }
0x14ab   :  { %v7009_v60 = vsel %vm7008_vm8, %v10575_v58, %v7005_v46  ;;  %v9851_v58 = vld [vmem:[%s16091_s16 + $0x128] sm:$0xff]  ;;  %v9866_v46 = vld [vmem:[%s16091_s16 + $0x1a0] sm:$0xff] }
0x14ac   :  { %v7061_v15 = vmul.f32 %v7009_v60, %v15605_v45  ;;  %7868 = vmatpush.bf16.msrb.mxu0 %v9851_v58  ;;  %v9874_v60 = vld [vmem:[%s16091_s16 + $0x1e0] sm:$0xff] }
0x14ad   :  { %7992 = vmatpush.bf16.msrb.mxu3 %v9874_v60 }
0x14ae   :  { %v7078_v40 = vmul.f32 %v15569_v14, %v7061_v15 }
0x14af   :  { %v10577_v45 = vpop.eup %10576 }
0x14b0   :  { %v7095_v47 = vadd.f32 %v15583_v11, %v7078_v40  ;;  %v7011_v19 = vmul.f32 %v10577_v45, %v6886_v61  ;;  %vm7017_vm9 = vweird.f32 %v10577_v45  ;;  %7869 = vmatpush.bf16.msrb.mxu0 %v9850_v29 }
0x14b1   :  { %vm7018_vm11 = vmor %vm7016_vm10, %vm7017_vm9  ;;  %7993 = vmatpush.bf16.msrb.mxu3 %v9873_v62 }
0x14b2   :  { %v7138_v49 = vpack.c.bf16 %v7095_v47, %v15679_v28  ;;  %v7012_v44 = vmul.f32 %v10577_v45, %v7011_v19  ;;  %v9849_v47 = vld [vmem:[%s16091_s16 + $0x118] sm:$0xff]  ;;  %v9848_v19 = vld [vmem:[%s16091_s16 + $0x110] sm:$0xff] }
0x14b4   :  { %7345 = vmatmul.bf16.gmra.mxu0 %v7138_v49  ;;  %7394 = vmatmul.bf16.gmra.mxu1 %v7138_v49  ;;  %v7013_v10 = vmul.f32 0.5, %v7012_v44  ;;  %v15775_v44 = vpop.f32.mrf.mxu1 }
0x14b5   :  { %7443 = vmatmul.bf16.gmra.mxu2 %v7138_v49  ;;  %7492 = vmatmul.bf16.gmra.mxu3 %v7138_v49  ;;  %v9857_v49 = vld [vmem:[%s16091_s16 + $0x158] sm:$0xff] }
0x14b6   :  { %v7014_v43 = vsub.f32 1.5, %v7013_v10  ;;  %7870 = vmatpush.bf16.msrb.mxu0 %v9849_v47  ;;  %v9855_v10 = vld [vmem:[%s16091_s16 + $0x148] sm:$0xff] }
0x14b8   :  { %v7015_v6 = vmul.f32 %v10577_v45, %v7014_v43  ;;  %v9863_v43 = vld [vmem:[%s16091_s16 + $0x188] sm:$0xff] }
0x14ba   :  { %v7019_v32 = vsel %vm7018_vm11, %v10577_v45, %v7015_v6  ;;  %7871 = vmatpush.bf16.msrb.mxu0 %v9848_v19 }
0x14bb   :  { %v7062_v50 = vmul.f32 %v7019_v32, %v15618_v57  ;;  %v9860_v57 = vld [vmem:[%s16091_s16 + $0x170] sm:$0xff] }
0x14bc   :  { %7908 = vmatpush.bf16.msra.mxu1 %v9860_v57 }
0x14bd   :  { %v7079_v21 = vmul.f32 %v15569_v14, %v7062_v50  ;;  %v7323_v50 = vpop.f32.mrf.mxu0 }
0x14bf   :  { %v15732_v38 = vadd.f32 %v15583_v11, %v7079_v21  ;;  %v7421_v21 = vpop.f32.mrf.mxu2 }
0x14c0   :  { %7909 = vmatpush.bf16.msra.mxu1 %v9859_v17 }
0x14c4   :  { %7910 = vmatpush.bf16.msra.mxu1 %v9858_v26 }
0x14c5   :  { %v7326_v17 = vpop.f32.mrf.mxu0 }
0x14c8   :  { %7911 = vmatpush.bf16.msra.mxu1 %v9857_v49 }
0x14cc   :  { %7912 = vmatpush.bf16.msra.mxu1 %v9856_v59 }
0x14d0   :  { %7913 = vmatpush.bf16.msra.mxu1 %v9855_v10 }
0x14db   :  { %v6853_v4 = vpop.xlane.xlu2 %6852 }
0x14dc   :  { %v6871_v52 = vmul.f32 %v6853_v4, %v16158_v35  ;;  %v9872_v4 = vld [vmem:[%s16091_s16 + $0x1d0] sm:$0xff] }
0x14dd   :  { %7994 = vmatpush.bf16.msrb.mxu3 %v9872_v4 }
0x14de   :  { %v6887_v36 = vadd.f32 1e-05, %v6871_v52  ;;  %v15782_v52 = vpop.f32.mrf.mxu3 }
0x14e0   :  { %10578 = vrsqrt.f32 %v6887_v36  ;;  %vm7026_vm13 = vweird.f32 %v6887_v36 }
0x14e3   :  { %v6855_v27 = vpop.xlane.xlu0 %6854 }
0x14e4   :  { %v6872_v53 = vmul.f32 %v6855_v27, %v16158_v35  ;;  %v9871_v27 = vld [vmem:[%s16091_s16 + $0x1c8] sm:$0xff] }
0x14e5   :  { %7995 = vmatpush.bf16.msrb.mxu3 %v9871_v27 }
0x14e6   :  { %v10579_v55 = vpop.eup %10578  ;;  %v15701_v5 = vadd.f32 1e-05, %v6872_v53  ;;  %v9846_v53 = vld [vmem:[%s16091_s16 + $0x100] sm:$0xff] }
0x14e7   :  { %v7021_v31 = vmul.f32 %v10579_v55, %v6887_v36  ;;  %vm7027_vm12 = vweird.f32 %v10579_v55  ;;  %v9847_v36 = vld [vmem:[%s16091_s16 + $0x108] sm:$0xff] }
0x14e8   :  { %vm7028_vm14 = vmor %vm7026_vm13, %vm7027_vm12  ;;  %10580 = vrsqrt.f32 %v15701_v5  ;;  %7872 = vmatpush.bf16.msrb.mxu0 %v9847_v36  ;;  %vm7036_vm0 = vweird.f32 %v15701_v5 }
0x14e9   :  { %v7022_v42 = vmul.f32 %v10579_v55, %v7021_v31 }
0x14eb   :  { %v7023_v18 = vmul.f32 0.5, %v7022_v42  ;;  %v9854_v42 = vld [vmem:[%s16091_s16 + $0x140] sm:$0xff] }
0x14ec   :  { %7873 = vmatpush.bf16.msrb.mxu0 %v9846_v53  ;;  %7914 = vmatpush.bf16.msra.mxu1 %v9854_v42 }
0x14ed   :  { %v7024_v56 = vsub.f32 1.5, %v7023_v18  ;;  %v9862_v18 = vld [vmem:[%s16091_s16 + $0x180] sm:$0xff] }
0x14ee   :  { %v15729_v33 = vpop.eup %10580 }
0x14ef   :  { %v7025_v20 = vmul.f32 %v10579_v55, %v7024_v56  ;;  %v7031_v0 = vmul.f32 %v15729_v33, %v15701_v5  ;;  %vm7037_vm15 = vweird.f32 %v15729_v33  ;;  %v9870_v56 = vld [vmem:[%s16091_s16 + $0x1c0] sm:$0xff]  ;;  %v7470_v5 = vpop.f32.mrf.mxu3 }
0x14f0   :  { %vm7038_vm3 = vmor %vm7036_vm0, %vm7037_vm15  ;;  %7996 = vmatpush.bf16.msrb.mxu3 %v9870_v56 }
0x14f1   :  { %v7029_v7 = vsel %vm7028_vm14, %v10579_v55, %v7025_v20  ;;  %v7032_v15 = vmul.f32 %v15729_v33, %v7031_v0  ;;  %v7372_v20 = vpop.f32.mrf.mxu1 }
0x14f2   :  { %v7063_v3 = vmul.f32 %v7029_v7, %v15635_v13  ;;  %v9867_v13 = vld [vmem:[%s16091_s16 + $0x1a8] sm:$0xff] }
0x14f3   :  { %7950 = vmatpush.bf16.msra.mxu2 %v9867_v13  ;;  %v7033_v45 = vmul.f32 0.5, %v7032_v15  ;;  %v7328_v15 = vpop.f32.mrf.mxu0 }
0x14f4   :  { %v7080_v9 = vmul.f32 %v15569_v14, %v7063_v3 }
0x14f5   :  { %v7034_v34 = vsub.f32 1.5, %v7033_v45 }
0x14f6   :  { %v7097_v54 = vadd.f32 %v15583_v11, %v7080_v9 }
0x14f7   :  { %7951 = vmatpush.bf16.msra.mxu2 %v9866_v46  ;;  %v7035_v6 = vmul.f32 %v15729_v33, %v7034_v34 }
0x14f8   :  { %v7139_v30 = vpack.c.bf16 %v7097_v54, %v15732_v38  ;;  %v7424_v54 = vpop.f32.mrf.mxu2 }
0x14f9   :  { %v7039_v7 = vsel %vm7038_vm3, %v15729_v33, %v7035_v6  ;;  %v7375_v33 = vpop.f32.mrf.mxu1 }
0x14fa   :  { %7350 = vmatmul.bf16.gmra.mxu0 %v7139_v30  ;;  %7399 = vmatmul.bf16.gmra.mxu1 %v7139_v30  ;;  %v7064_v22 = vmul.f32 %v7039_v7, %v15641_v51 }
0x14fb   :  { %7448 = vmatmul.bf16.gmra.mxu2 %v7139_v30  ;;  %7497 = vmatmul.bf16.gmra.mxu3 %v7139_v30  ;;  %v7473_v30 = vpop.f32.mrf.mxu3  ;;  %v7331_v42 = vpop.f32.mrf.mxu0 }
0x14fc   :  { %7952 = vmatpush.bf16.msra.mxu2 %v9865_v48  ;;  %v7081_v58 = vmul.f32 %v15569_v14, %v7064_v22 }
0x14fd   :  { %v6857_v63 = vpop.xlane.xlu1 %6856 }
0x14fe   :  { %v6873_v40 = vmul.f32 %v6857_v63, %v16158_v35  ;;  %v15817_v0 = vadd.f32 %v15583_v11, %v7081_v58 }
0x1500   :  { %v6889_v61 = vadd.f32 1e-05, %v6873_v40  ;;  %7953 = vmatpush.bf16.msra.mxu2 %v9864_v2  ;;  %v7426_v47 = vpop.f32.mrf.mxu2 }
0x1502   :  { %10582 = vrsqrt.f32 %v6889_v61  ;;  %vm7046_vm5 = vweird.f32 %v6889_v61 }
0x1503   :  { %v7475_v49 = vpop.f32.mrf.mxu3 }
0x1504   :  { %7954 = vmatpush.bf16.msra.mxu2 %v9863_v43 }
0x1508   :  { %v10583_v55 = vpop.eup %10582  ;;  %7955 = vmatpush.bf16.msra.mxu2 %v9862_v18 }
0x1509   :  { %v7041_v31 = vmul.f32 %v10583_v55, %v6889_v61  ;;  %vm7047_vm4 = vweird.f32 %v10583_v55 }
0x150a   :  { %vm7048_vm6 = vmor %vm7046_vm5, %vm7047_vm4 }
0x150b   :  { %v7042_v32 = vmul.f32 %v10583_v55, %v7041_v31  ;;  %v7478_v18 = vpop.f32.mrf.mxu3 }
0x150d   :  { %v7043_v3 = vmul.f32 0.5, %v7042_v32  ;;  %v7429_v32 = vpop.f32.mrf.mxu2 }
0x150f   :  { %v7044_v37 = vsub.f32 1.5, %v7043_v3 }
0x1511   :  { %v7045_v57 = vmul.f32 %v10583_v55, %v7044_v37 }
0x1513   :  { %v7049_v9 = vsel %vm7048_vm6, %v10583_v55, %v7045_v57 }
0x1514   :  { %v7065_v13 = vmul.f32 %v7049_v9, %v15651_v12  ;;  %v9268_v12 = vld [vmem:[%s16092_s15 + $0x4] sm:$0xf] }
0x1515   :  { %v15826_v26 = vperm.slane %v9268_v12, 1  ;;  %v15828_v46 = vperm.slane %v9268_v12, 2  ;;  %v15830_v60 = vperm.slane %v9268_v12, 3  ;;  %v7431_v9 = vpop.f32.mrf.mxu2 }
0x1516   :  { %v7082_v16 = vmul.f32 %v15569_v14, %v7065_v13  ;;  %v15824_v14 = vperm.slane %v9268_v12, 0  ;;  %v7480_v13 = vpop.f32.mrf.mxu3 }
0x1517   :  { %v7373_v40 = vadd.f32 %v7372_v20, %v15826_v26  ;;  %v7422_v48 = vadd.f32 %v7421_v21, %v15828_v46  ;;  %v7471_v62 = vadd.f32 %v7470_v5, %v15830_v60  ;;  %v7371_v45 = vadd.f32 %v15775_v44, %v15826_v26  ;;  %v7333_v5 = vpop.f32.mrf.mxu0 }
0x1518   :  { %v7099_v29 = vadd.f32 %v15583_v11, %v7082_v16  ;;  %v7377_v11 = vpop.f32.mrf.mxu1  ;;  %v7324_v63 = vadd.f32 %v7323_v50, %v15824_v14  ;;  %v7322_v61 = vadd.f32 %v15773_v23, %v15824_v14  ;;  %v7420_v19 = vadd.f32 %v15780_v39, %v15828_v46 }
0x1519   :  { %v7469_v59 = vadd.f32 %v15782_v52, %v15830_v60  ;;  %v7513_v4 = vmax.f32 %v7373_v40, 0.0  ;;  %v7514_v34 = vmax.f32 %v7422_v48, 0.0  ;;  %v7515_v36 = vmax.f32 %v7471_v62, 0.0 }
0x151a   :  { %v7140_v51 = vpack.c.bf16 %v7099_v29, %v15817_v0  ;;  %v7512_v2 = vmax.f32 %v7324_v63, 0.0  ;;  %v7508_v10 = vmax.f32 %v7322_v61, 0.0  ;;  %v7509_v43 = vmax.f32 %v7371_v45, 0.0 }
0x151b   :  { %v7510_v27 = vmax.f32 %v7420_v19, 0.0  ;;  %v7511_v55 = vmax.f32 %v7469_v59, 0.0  ;;  %v7329_v39 = vadd.f32 %v7328_v15, %v15824_v14  ;;  %v7378_v52 = vadd.f32 %v7377_v11, %v15826_v26 }
0x151c   :  { %7355 = vmatmul.bf16.gmra.mxu0 %v7140_v51  ;;  %7404 = vmatmul.bf16.gmra.mxu1 %v7140_v51  ;;  %v7637_v6 = vpack.c.bf16 %v7512_v2, %v7508_v10  ;;  %v7638_v31 = vpack.c.bf16 %v7513_v4, %v7509_v43  ;;  %v7427_v56 = vadd.f32 %v7426_v47, %v15828_v46 }
0x151d   :  { %7453 = vmatmul.bf16.gmra.mxu2 %v7140_v51  ;;  %7502 = vmatmul.bf16.gmra.mxu3 %v7140_v51  ;;  %v7639_v23 = vpack.c.bf16 %v7514_v34, %v7510_v27  ;;  %v7640_v53 = vpack.c.bf16 %v7515_v36, %v7511_v55  ;;  %v7476_v50 = vadd.f32 %v7475_v49, %v15830_v60  ;;  %v7520_v22 = vmax.f32 %v7329_v39, 0.0  ;;  %v7434_v40 = vpop.f32.mrf.mxu2 }
0x151e   :  { %v7327_v20 = vadd.f32 %v7326_v17, %v15824_v14  ;;  %v7376_v7 = vadd.f32 %v7375_v33, %v15826_v26  ;;  %v7425_v3 = vadd.f32 %v7424_v54, %v15828_v46  ;;  %v7474_v21 = vadd.f32 %v7473_v30, %v15830_v60  ;;  %v7483_v47 = vpop.f32.mrf.mxu3 }
0x151f   :  { %v7521_v57 = vmax.f32 %v7378_v52, 0.0  ;;  %v7522_v58 = vmax.f32 %v7427_v56, 0.0  ;;  %v7523_v16 = vmax.f32 %v7476_v50, 0.0  ;;  %v7336_v54 = vpop.f32.mrf.mxu0  ;;  %v7334_v49 = vadd.f32 %v7333_v5, %v15824_v14 }
0x1520   :  { %v7380_v44 = vpop.f32.mrf.mxu1  ;;  %v7516_v29 = vmax.f32 %v7327_v20, 0.0  ;;  %v7517_v51 = vmax.f32 %v7376_v7, 0.0  ;;  %v7518_v12 = vmax.f32 %v7425_v3, 0.0  ;;  %v7519_v15 = vmax.f32 %v7474_v21, 0.0 }
0x1521   :  { %v7432_v62 = vadd.f32 %v7431_v9, %v15828_v46  ;;  %v7481_v61 = vadd.f32 %v7480_v13, %v15830_v60  ;;  %v7332_v45 = vadd.f32 %v7331_v42, %v15824_v14  ;;  %v7381_v19 = vadd.f32 %v7380_v44, %v15826_v26 }
0x1522   :  { %v7641_v11 = vpack.c.bf16 %v7520_v22, %v7516_v29  ;;  %v7642_v17 = vpack.c.bf16 %v7521_v57, %v7517_v51  ;;  %v7643_v63 = vpack.c.bf16 %v7522_v58, %v7518_v12  ;;  %v7644_v33 = vpack.c.bf16 %v7523_v16, %v7519_v15 }
0x1523   :  { %v7430_v59 = vadd.f32 %v7429_v32, %v15828_v46  ;;  %v7479_v2 = vadd.f32 %v7478_v18, %v15830_v60  ;;  %v7528_v4 = vmax.f32 %v7334_v49, 0.0  ;;  %v7530_v36 = vmax.f32 %v7432_v62, 0.0 }
0x1524   :  { %v7531_v10 = vmax.f32 %v7481_v61, 0.0  ;;  %v7524_v55 = vmax.f32 %v7332_v45, 0.0  ;;  %v7435_v57 = vadd.f32 %v7434_v40, %v15828_v46  ;;  %v7484_v9 = vadd.f32 %v7483_v47, %v15830_v60 }
0x1525   :  { %v7527_v39 = vmax.f32 %v7479_v2, 0.0 }
0x1526   :  { %v7645_v52 = vpack.c.bf16 %v7528_v4, %v7524_v55  ;;  %v7534_v15 = vmax.f32 %v7435_v57, 0.0 }
0x1527   :  { %v7338_v43 = vpop.f32.mrf.mxu0  ;;  %v7648_v44 = vpack.c.bf16 %v7531_v10, %v7527_v39 }
0x1528   :  { %v7382_v37 = vpop.f32.mrf.mxu1  ;;  %v7339_v50 = vadd.f32 %v7338_v43, %v15824_v14 }
0x1529   :  { %v7383_v48 = vadd.f32 %v7382_v37, %v15826_v26  ;;  %v7337_v37 = vadd.f32 %v7336_v54, %v15824_v14 }
0x152a   :  { %v7536_v13 = vmax.f32 %v7339_v50, 0.0 }
0x152b   :  { %v7529_v34 = vmax.f32 %v7383_v48, 0.0  ;;  %v7532_v51 = vmax.f32 %v7337_v37, 0.0 }
0x152c   :  { %7874 = vmatmul.bf16.vlgmr.msrb.gmra.mxu0 %v7637_v6  ;;  %7915 = vmatmul.bf16.vlgmr.msra.gmra.mxu1 %v7638_v31  ;;  %v7525_v6 = vmax.f32 %v7381_v19, 0.0  ;;  %v7436_v31 = vpop.f32.mrf.mxu2 }
0x152d   :  { %7956 = vmatmul.bf16.vlgmr.msra.gmra.mxu2 %v7639_v23  ;;  %7997 = vmatmul.bf16.vlgmr.msrb.gmra.mxu3 %v7640_v53  ;;  %v7485_v23 = vpop.f32.mrf.mxu3  ;;  %v7526_v53 = vmax.f32 %v7430_v59, 0.0  ;;  %v7437_v21 = vadd.f32 %v7436_v31, %v15828_v46 }
0x152e   :  { %v7646_v42 = vpack.c.bf16 %v7529_v34, %v7525_v6  ;;  %v7486_v5 = vadd.f32 %v7485_v23, %v15830_v60 }
0x152f   :  { %v7647_v56 = vpack.c.bf16 %v7530_v36, %v7526_v53  ;;  %v7341_v32 = vpop.f32.mrf.mxu0  ;;  %v7538_v16 = vmax.f32 %v7437_v21, 0.0 }
0x1530   :  { %v7385_v30 = vpop.f32.mrf.mxu1  ;;  %v7539_v29 = vmax.f32 %v7486_v5, 0.0  ;;  %v7342_v19 = vadd.f32 %v7341_v32, %v15824_v14 }
0x1531   :  { %v7386_v22 = vadd.f32 %v7385_v30, %v15826_v26  ;;  %v7651_v48 = vpack.c.bf16 %v7538_v16, %v7534_v15 }
0x1532   :  { %v7540_v23 = vmax.f32 %v7342_v19, 0.0 }
0x1533   :  { %v7533_v12 = vmax.f32 %v7386_v22, 0.0 }
0x1534   :  { %v7439_v7 = vpop.f32.mrf.mxu2 }
0x1535   :  { %v7488_v3 = vpop.f32.mrf.mxu3  ;;  %v7440_v2 = vadd.f32 %v7439_v7, %v15828_v46 }
0x1536   :  { %v7489_v4 = vadd.f32 %v7488_v3, %v15830_v60 }
0x1537   :  { %v7542_v39 = vmax.f32 %v7440_v2, 0.0 }
0x1538   :  { %v7387_v27 = vpop.f32.mrf.mxu1 }
0x1539   :  { %v7388_v20 = vadd.f32 %v7387_v27, %v15826_v26 }
0x153b   :  { %v7537_v58 = vmax.f32 %v7388_v20, 0.0 }
0x153c   :  { %7878 = vmatmul.bf16.gmra.mxu0 %v7641_v11  ;;  %7919 = vmatmul.bf16.gmra.mxu1 %v7642_v17  ;;  %v7535_v11 = vmax.f32 %v7484_v9, 0.0  ;;  %v7649_v17 = vpack.c.bf16 %v7536_v13, %v7532_v51  ;;  %v7441_v62 = vpop.f32.mrf.mxu2 }
0x153d   :  { %7960 = vmatmul.bf16.gmra.mxu2 %v7643_v63  ;;  %8001 = vmatmul.bf16.gmra.mxu3 %v7644_v33  ;;  %v7650_v63 = vpack.c.bf16 %v7537_v58, %v7533_v12  ;;  %v7343_v33 = vpop.f32.mrf.mxu0  ;;  %v7490_v30 = vpop.f32.mrf.mxu3  ;;  %v7442_v61 = vadd.f32 %v7441_v62, %v15828_v46 }
0x153e   :  { %v7652_v54 = vpack.c.bf16 %v7539_v29, %v7535_v11  ;;  %v7344_v40 = vadd.f32 %v7343_v33, %v15824_v14  ;;  %v7491_v45 = vadd.f32 %v7490_v30, %v15830_v60 }
0x153f   :  { %v7546_v6 = vmax.f32 %v7442_v61, 0.0 }
0x1540   :  { %v7390_v18 = vpop.f32.mrf.mxu1  ;;  %v7544_v10 = vmax.f32 %v7344_v40, 0.0  ;;  %v7547_v31 = vmax.f32 %v7491_v45, 0.0 }
0x1541   :  { %v7391_v59 = vadd.f32 %v7390_v18, %v15826_v26 }
0x1543   :  { %v7541_v53 = vmax.f32 %v7391_v59, 0.0 }
0x1544   :  { %v7444_v27 = vpop.f32.mrf.mxu2 }
0x1545   :  { %v7346_v34 = vpop.f32.mrf.mxu0  ;;  %v7493_v55 = vpop.f32.mrf.mxu3  ;;  %v7445_v9 = vadd.f32 %v7444_v27, %v15828_v46 }
0x1546   :  { %v7347_v22 = vadd.f32 %v7346_v34, %v15824_v14  ;;  %v7494_v13 = vadd.f32 %v7493_v55, %v15830_v60 }
0x1548   :  { %v7392_v49 = vpop.f32.mrf.mxu1  ;;  %v7548_v11 = vmax.f32 %v7347_v22, 0.0  ;;  %v7551_v33 = vmax.f32 %v7494_v13, 0.0 }
0x1549   :  { %v7393_v47 = vadd.f32 %v7392_v49, %v15826_v26 }
0x154b   :  { %v7545_v43 = vmax.f32 %v7393_v47, 0.0 }
0x154c   :  { %7882 = vmatmul.bf16.gmra.mxu0 %v7645_v52  ;;  %7923 = vmatmul.bf16.gmra.mxu1 %v7646_v42  ;;  %v7543_v52 = vmax.f32 %v7489_v4, 0.0  ;;  %v7446_v20 = vpop.f32.mrf.mxu2 }
0x154d   :  { %7964 = vmatmul.bf16.gmra.mxu2 %v7647_v56  ;;  %8005 = vmatmul.bf16.gmra.mxu3 %v7648_v44  ;;  %v7654_v42 = vpack.c.bf16 %v7545_v43, %v7541_v53  ;;  %v7653_v56 = vpack.c.bf16 %v7544_v10, %v7540_v23  ;;  %v7655_v44 = vpack.c.bf16 %v7546_v6, %v7542_v39  ;;  %v7348_v18 = vpop.f32.mrf.mxu0  ;;  %v7495_v7 = vpop.f32.mrf.mxu3 }
0x154e   :  { %v7656_v32 = vpack.c.bf16 %v7547_v31, %v7543_v52  ;;  %v7349_v3 = vadd.f32 %v7348_v18, %v15824_v14  ;;  %v7447_v5 = vadd.f32 %v7446_v20, %v15828_v46  ;;  %v7496_v37 = vadd.f32 %v7495_v7, %v15830_v60 }
0x1550   :  { %v7395_v36 = vpop.f32.mrf.mxu1  ;;  %v7552_v58 = vmax.f32 %v7349_v3, 0.0  ;;  %v7554_v29 = vmax.f32 %v7447_v5, 0.0  ;;  %v7555_v51 = vmax.f32 %v7496_v37, 0.0 }
0x1551   :  { %v7396_v57 = vadd.f32 %v7395_v36, %v15826_v26 }
0x1552   :  { %v7660_v62 = vpack.c.bf16 %v7555_v51, %v7551_v33 }
0x1558   :  { %v7397_v50 = vpop.f32.mrf.mxu1 }
0x1559   :  { %v7398_v21 = vadd.f32 %v7397_v50, %v15826_v26 }
0x155b   :  { %v7553_v16 = vmax.f32 %v7398_v21, 0.0 }
0x155c   :  { %7886 = vmatmul.bf16.gmra.mxu0 %v7649_v17  ;;  %7927 = vmatmul.bf16.gmra.mxu1 %v7650_v63  ;;  %v7549_v17 = vmax.f32 %v7396_v57, 0.0  ;;  %v7550_v63 = vmax.f32 %v7445_v9, 0.0 }
0x155d   :  { %7968 = vmatmul.bf16.gmra.mxu2 %v7651_v48  ;;  %8009 = vmatmul.bf16.gmra.mxu3 %v7652_v54  ;;  %v7657_v48 = vpack.c.bf16 %v7552_v58, %v7548_v11 }
0x155e   :  { %v7658_v49 = vpack.c.bf16 %v7553_v16, %v7549_v17  ;;  %v7659_v54 = vpack.c.bf16 %v7554_v29, %v7550_v63  ;;  %v15901_v17 = vld [vmem:[%s16093_s17 + $0x1] ss:$0 sm:$0xff] }
0x156c   :  { %7890 = vmatmul.bf16.gmra.mxu0 %v7653_v56  ;;  %7931 = vmatmul.bf16.gmra.mxu1 %v7654_v42 }
0x156d   :  { %7972 = vmatmul.bf16.gmra.mxu2 %v7655_v44  ;;  %8013 = vmatmul.bf16.gmra.mxu3 %v7656_v32 }
0x1577   :  { %v7351_v12 = vpop.f32.mrf.mxu0  ;;  %v7400_v15 = vpop.f32.mrf.mxu1 }
0x1578   :  { %v7352_v59 = vadd.f32 %v7351_v12, %v15824_v14  ;;  %v7401_v2 = vadd.f32 %v7400_v15, %v15826_v26 }
0x157a   :  { %v7556_v31 = vmax.f32 %v7352_v59, 0.0  ;;  %v7557_v23 = vmax.f32 %v7401_v2, 0.0 }
0x157c   :  { %7894 = vmatmul.bf16.gmra.mxu0 %v7657_v48  ;;  %7935 = vmatmul.bf16.gmra.mxu1 %v7658_v49 }
0x157d   :  { %7976 = vmatmul.bf16.gmra.mxu2 %v7659_v54  ;;  %8017 = vmatmul.bf16.gmra.mxu3 %v7660_v62 }
0x157e   :  { %v7449_v30 = vpop.f32.mrf.mxu2  ;;  %v7498_v40 = vpop.f32.mrf.mxu3 }
0x157f   :  { %v7353_v47 = vpop.f32.mrf.mxu0  ;;  %v7402_v61 = vpop.f32.mrf.mxu1  ;;  %v7450_v4 = vadd.f32 %v7449_v30, %v15828_v46  ;;  %v7499_v34 = vadd.f32 %v7498_v40, %v15830_v60 }
0x1580   :  { %v7354_v45 = vadd.f32 %v7353_v47, %v15824_v14  ;;  %v7403_v19 = vadd.f32 %v7402_v61, %v15826_v26 }
0x1581   :  { %v7558_v53 = vmax.f32 %v7450_v4, 0.0  ;;  %v7559_v39 = vmax.f32 %v7499_v34, 0.0 }
0x1582   :  { %v7560_v36 = vmax.f32 %v7354_v45, 0.0  ;;  %v7561_v10 = vmax.f32 %v7403_v19, 0.0 }
0x1584   :  { %v7662_v56 = vpack.c.bf16 %v7561_v10, %v7557_v23  ;;  %v7661_v44 = vpack.c.bf16 %v7560_v36, %v7556_v31 }
0x1586   :  { %v7451_v43 = vpop.f32.mrf.mxu2  ;;  %v7500_v27 = vpop.f32.mrf.mxu3 }
0x1587   :  { %v7452_v55 = vadd.f32 %v7451_v43, %v15828_v46  ;;  %v7501_v6 = vadd.f32 %v7500_v27, %v15830_v60 }
0x1589   :  { %v7562_v52 = vmax.f32 %v7452_v55, 0.0  ;;  %v7563_v42 = vmax.f32 %v7501_v6, 0.0 }
0x158b   :  { %v7663_v32 = vpack.c.bf16 %v7562_v52, %v7558_v53  ;;  %v7664_v18 = vpack.c.bf16 %v7563_v42, %v7559_v39 }
0x158c   :  { %7898 = vmatmul.bf16.gmra.mxu0 %v7661_v44  ;;  %7939 = vmatmul.bf16.gmra.mxu1 %v7662_v56 }
0x158d   :  { %7980 = vmatmul.bf16.gmra.mxu2 %v7663_v32  ;;  %8021 = vmatmul.bf16.gmra.mxu3 %v7664_v18 }
0x1599   :  { %v7356_v50 = vpop.f32.mrf.mxu0  ;;  %v7405_v20 = vpop.f32.mrf.mxu1 }
0x159a   :  { %v7357_v7 = vadd.f32 %v7356_v50, %v15824_v14  ;;  %v7406_v3 = vadd.f32 %v7405_v20, %v15826_v26 }
0x159c   :  { %v7564_v13 = vmax.f32 %v7357_v7, 0.0  ;;  %v7565_v58 = vmax.f32 %v7406_v3, 0.0 }
0x15a0   :  { %v7454_v21 = vpop.f32.mrf.mxu2  ;;  %v7503_v5 = vpop.f32.mrf.mxu3 }
0x15a1   :  { %v7358_v37 = vpop.f32.mrf.mxu0  ;;  %v7407_v22 = vpop.f32.mrf.mxu1  ;;  %v7455_v51 = vadd.f32 %v7454_v21, %v15828_v46  ;;  %v7504_v11 = vadd.f32 %v7503_v5, %v15830_v60 }
0x15a2   :  { %v7359_v57 = vadd.f32 %v7358_v37, %v15824_v14  ;;  %v7408_v9 = vadd.f32 %v7407_v22, %v15826_v26 }
0x15a3   :  { %v7566_v54 = vmax.f32 %v7455_v51, 0.0  ;;  %v7567_v62 = vmax.f32 %v7504_v11, 0.0 }
0x15a4   :  { %v7568_v16 = vmax.f32 %v7359_v57, 0.0  ;;  %v7569_v29 = vmax.f32 %v7408_v9, 0.0 }
0x15a6   :  { %v7666_v12 = vpack.c.bf16 %v7569_v29, %v7565_v58  ;;  %v7665_v15 = vpack.c.bf16 %v7568_v16, %v7564_v13 }
0x15a8   :  { %v7456_v63 = vpop.f32.mrf.mxu2  ;;  %v7505_v33 = vpop.f32.mrf.mxu3  ;;  %7902 = vmatmul.bf16.gmra.mxu0 %v7665_v15  ;;  %7943 = vmatmul.bf16.gmra.mxu1 %v7666_v12 }
0x15a9   :  { %v7457_v14 = vadd.f32 %v7456_v63, %v15828_v46  ;;  %v7506_v26 = vadd.f32 %v7505_v33, %v15830_v60  ;;  %v7875_v49 = vpop.f32.mrf.mxu0  ;;  %v7916_v48 = vpop.f32.mrf.mxu1 }
0x15aa   :  { %v7876_v47 = vadd.f32 %v15901_v17, %v7875_v49 }
0x15ab   :  { %v7570_v30 = vmax.f32 %v7457_v14, 0.0  ;;  %v7571_v40 = vmax.f32 %v7506_v26, 0.0 }
0x15ac   :  { %v7917_v19 = vadd.f32 %v7916_v48, %v7876_v47 }
0x15ad   :  { %v7667_v61 = vpack.c.bf16 %v7570_v30, %v7566_v54  ;;  %v7668_v45 = vpack.c.bf16 %v7571_v40, %v7567_v62 }
0x15af   :  { %7984 = vmatmul.bf16.gmra.mxu2 %v7667_v61  ;;  %8025 = vmatmul.bf16.gmra.mxu3 %v7668_v45 }
0x15b0   :  { %v7957_v59 = vpop.f32.mrf.mxu2  ;;  %v7998_v2 = vpop.f32.mrf.mxu3 }
0x15b1   :  { %v7958_v4 = vadd.f32 %v7957_v59, %v7917_v19  ;;  %v7877_v34 = vpop.f32.mrf.mxu0  ;;  %v7918_v46 = vpop.f32.mrf.mxu1 }
0x15b3   :  { %v7999_v36 = vadd.f32 %v7998_v2, %v7958_v4 }
0x15b5   :  { %v15907_v60 = vadd.f32 %v7999_v36, %v15592_v1 }
0x15b7   :  { %8038 = vadd.xlane.f32.xlu2 %v15907_v60 }
0x15b8   :  { %v7959_v10 = vpop.f32.mrf.mxu2  ;;  %v8000_v43 = vpop.f32.mrf.mxu3 }
0x15b9   :  { %v7879_v27 = vpop.f32.mrf.mxu0  ;;  %v7920_v55 = vpop.f32.mrf.mxu1 }
0x15ba   :  { %v7880_v6 = vadd.f32 %v15901_v17, %v7879_v27 }
0x15bc   :  { %v7921_v31 = vadd.f32 %v7920_v55, %v7880_v6 }
0x15c0   :  { %v7961_v23 = vpop.f32.mrf.mxu2  ;;  %v8002_v53 = vpop.f32.mrf.mxu3 }
0x15c1   :  { %v7962_v39 = vadd.f32 %v7961_v23, %v7921_v31  ;;  %v7881_v52 = vpop.f32.mrf.mxu0  ;;  %v7922_v42 = vpop.f32.mrf.mxu1 }
0x15c3   :  { %v8003_v56 = vadd.f32 %v8002_v53, %v7962_v39 }
0x15c5   :  { %v15912_v44 = vadd.f32 %v8003_v56, %v15614_v41 }
0x15c7   :  { %8040 = vadd.xlane.f32.xlu0 %v15912_v44 }
0x15c8   :  { %v7963_v1 = vpop.f32.mrf.mxu2  ;;  %v8004_v32 = vpop.f32.mrf.mxu3 }
0x15c9   :  { %v7883_v18 = vpop.f32.mrf.mxu0  ;;  %v7924_v50 = vpop.f32.mrf.mxu1 }
0x15ca   :  { %v7884_v20 = vadd.f32 %v15901_v17, %v7883_v18 }
0x15cc   :  { %v7925_v7 = vadd.f32 %v7924_v50, %v7884_v20 }
0x15d0   :  { %v7965_v3 = vpop.f32.mrf.mxu2  ;;  %v8006_v21 = vpop.f32.mrf.mxu3 }
0x15d1   :  { %v7966_v5 = vadd.f32 %v7965_v3, %v7925_v7  ;;  %v7885_v37 = vpop.f32.mrf.mxu0  ;;  %v7926_v22 = vpop.f32.mrf.mxu1 }
0x15d3   :  { %v8007_v57 = vadd.f32 %v8006_v21, %v7966_v5 }
0x15d5   :  { %v15917_v9 = vadd.f32 %v8007_v57, %v15628_v25 }
0x15d7   :  { %8042 = vadd.xlane.f32.xlu1 %v15917_v9 }
0x15d8   :  { %v7967_v41 = vpop.f32.mrf.mxu2  ;;  %v8008_v13 = vpop.f32.mrf.mxu3 }
0x15d9   :  { %v7887_v58 = vpop.f32.mrf.mxu0  ;;  %v7928_v16 = vpop.f32.mrf.mxu1 }
0x15da   :  { %v7888_v29 = vadd.f32 %v15901_v17, %v7887_v58 }
0x15dc   :  { %v7929_v51 = vadd.f32 %v7928_v16, %v7888_v29 }
0x15e0   :  { %v7969_v12 = vpop.f32.mrf.mxu2  ;;  %v8010_v15 = vpop.f32.mrf.mxu3 }
0x15e1   :  { %v7970_v11 = vadd.f32 %v7969_v12, %v7929_v51  ;;  %v7889_v63 = vpop.f32.mrf.mxu0  ;;  %v7930_v33 = vpop.f32.mrf.mxu1 }
0x15e3   :  { %v8011_v14 = vadd.f32 %v8010_v15, %v7970_v11 }
0x15e5   :  { %v15922_v26 = vadd.f32 %v8011_v14, %v15660_v8 }
0x15e7   :  { %8044 = vadd.xlane.f32.xlu2 %v15922_v26 }
0x15e8   :  { %v7971_v25 = vpop.f32.mrf.mxu2  ;;  %v8012_v49 = vpop.f32.mrf.mxu3 }
0x15e9   :  { %v7891_v48 = vpop.f32.mrf.mxu0  ;;  %v7932_v54 = vpop.f32.mrf.mxu1 }
0x15ea   :  { %v7892_v62 = vadd.f32 %v15901_v17, %v7891_v48 }
0x15ec   :  { %v7933_v30 = vadd.f32 %v7932_v54, %v7892_v62 }
0x15f0   :  { %v7973_v40 = vpop.f32.mrf.mxu2  ;;  %v8014_v47 = vpop.f32.mrf.mxu3 }
0x15f1   :  { %v7974_v61 = vadd.f32 %v7973_v40, %v7933_v30  ;;  %v7893_v45 = vpop.f32.mrf.mxu0  ;;  %v7934_v19 = vpop.f32.mrf.mxu1 }
0x15f3   :  { %v8015_v59 = vadd.f32 %v8014_v47, %v7974_v61 }
0x15f5   :  { %v15927_v2 = vadd.f32 %v8015_v59, %v15671_v24 }
0x15f7   :  { %8046 = vadd.xlane.f32.xlu0 %v15927_v2 }
0x15f8   :  { %v7975_v8 = vpop.f32.mrf.mxu2  ;;  %v8016_v4 = vpop.f32.mrf.mxu3 }
0x15f9   :  { %v7895_v34 = vpop.f32.mrf.mxu0  ;;  %v7936_v46 = vpop.f32.mrf.mxu1 }
0x15fa   :  { %v7896_v36 = vadd.f32 %v15901_v17, %v7895_v34 }
0x15fc   :  { %v7937_v10 = vadd.f32 %v7936_v46, %v7896_v36 }
0x1600   :  { %v7977_v43 = vpop.f32.mrf.mxu2  ;;  %v8018_v27 = vpop.f32.mrf.mxu3 }
0x1601   :  { %v7978_v55 = vadd.f32 %v7977_v43, %v7937_v10  ;;  %v7897_v6 = vpop.f32.mrf.mxu0  ;;  %v7938_v31 = vpop.f32.mrf.mxu1  ;;  %v9885_v43 = vld [vmem:[%s16094_s20 + $0x38] sm:$0xff] }
0x1602   :  { %8288 = vmatpush.bf16.msra.mxu0 %v9885_v43  ;;  %v9882_v6 = vld [vmem:[%s16094_s20 + $0x20] sm:$0xff] }
0x1603   :  { %v8019_v23 = vadd.f32 %v8018_v27, %v7978_v55  ;;  %v9884_v27 = vld [vmem:[%s16094_s20 + $0x30] sm:$0xff]  ;;  %v9883_v55 = vld [vmem:[%s16094_s20 + $0x28] sm:$0xff] }
0x1605   :  { %v8035_v53 = vadd.f32 %v8019_v23, %v15679_v28  ;;  %v9881_v23 = vld [vmem:[%s16094_s20 + $0x18] sm:$0xff] }
0x1606   :  { %8289 = vmatpush.bf16.msra.mxu0 %v9884_v27 }
0x1607   :  { %8048 = vadd.xlane.f32.xlu1 %v8035_v53 }
0x1608   :  { %v7979_v24 = vpop.f32.mrf.mxu2  ;;  %v8020_v39 = vpop.f32.mrf.mxu3 }
0x1609   :  { %v7899_v52 = vpop.f32.mrf.mxu0  ;;  %v7940_v42 = vpop.f32.mrf.mxu1  ;;  %v9880_v39 = vld [vmem:[%s16094_s20 + $0x10] sm:$0xff] }
0x160a   :  { %v7900_v56 = vadd.f32 %v15901_v17, %v7899_v52  ;;  %8290 = vmatpush.bf16.msra.mxu0 %v9883_v55 }
0x160c   :  { %v7941_v1 = vadd.f32 %v7940_v42, %v7900_v56  ;;  %v9879_v42 = vld [vmem:[%s16094_s20 + $0x8] sm:$0xff] }
0x160e   :  { %8291 = vmatpush.bf16.msra.mxu0 %v9882_v6 }
0x1610   :  { %v7981_v32 = vpop.f32.mrf.mxu2  ;;  %v8022_v18 = vpop.f32.mrf.mxu3 }
0x1611   :  { %v7901_v50 = vpop.f32.mrf.mxu0  ;;  %v7942_v20 = vpop.f32.mrf.mxu1  ;;  %v7982_v7 = vadd.f32 %v7981_v32, %v7941_v1 }
0x1612   :  { %8292 = vmatpush.bf16.msra.mxu0 %v9881_v23 }
0x1613   :  { %v8023_v3 = vadd.f32 %v8022_v18, %v7982_v7  ;;  %v9878_v18 = vld [vmem:[%s16094_s20] sm:$0xff] }
0x1615   :  { %v8036_v21 = vadd.f32 %v8023_v3, %v15732_v38 }
0x1616   :  { %8293 = vmatpush.bf16.msra.mxu0 %v9880_v39 }
0x1617   :  { %8050 = vadd.xlane.f32.xlu1 %v8036_v21 }
0x1618   :  { %v7983_v5 = vpop.f32.mrf.mxu2  ;;  %v8024_v37 = vpop.f32.mrf.mxu3 }
0x161a   :  { %8294 = vmatpush.bf16.msra.mxu0 %v9879_v42 }
0x161e   :  { %8295 = vmatpush.bf16.msra.mxu0 %v9878_v18 }
0x1625   :  { %v7903_v28 = vpop.f32.mrf.mxu0  ;;  %v7944_v22 = vpop.f32.mrf.mxu1 }
0x1626   :  { %v7904_v13 = vadd.f32 %v15901_v17, %v7903_v28 }
0x1628   :  { %v7945_v12 = vadd.f32 %v7944_v22, %v7904_v13 }
0x162a   :  { %v8039_v57 = vpop.xlane.xlu2 %8038 }
0x162b   :  { %v8054_v41 = vmul.f32 %v8039_v57, %v16158_v35 }
0x162d   :  { %v15937_v58 = vsub.f32 %v15907_v60, %v8054_v41  ;;  %v7905_v16 = vpop.f32.mrf.mxu0  ;;  %v7946_v29 = vpop.f32.mrf.mxu1 }
0x162f   :  { %v8070_v51 = vmul.f32 %v15937_v58, %v15937_v58 }
0x1631   :  { %8078 = vadd.xlane.f32.xlu2 %v8070_v51 }
0x1632   :  { %v7985_v38 = vpop.f32.mrf.mxu2  ;;  %v8026_v15 = vpop.f32.mrf.mxu3 }
0x1633   :  { %v7986_v11 = vadd.f32 %v7985_v38, %v7945_v12 }
0x1635   :  { %v8027_v63 = vadd.f32 %v8026_v15, %v7986_v11  ;;  %v10654_v11 = vld [vmem:[%s16083_s18 + $0x4] sm:$0x7] }
0x1637   :  { %v8037_v33 = vadd.f32 %v8027_v63, %v15817_v0  ;;  %v16011_v63 = vperm.slane %v10654_v11, 2 }
0x1639   :  { %8052 = vadd.xlane.f32.xlu2 %v8037_v33 }
0x163a   :  { %v7987_v14 = vpop.f32.mrf.mxu2  ;;  %v8028_v25 = vpop.f32.mrf.mxu3 }
0x163b   :  { %v8041_v17 = vpop.xlane.xlu0 %8040 }
0x163c   :  { %v8055_v60 = vmul.f32 %v8041_v17, %v16158_v35  ;;  %v10655_v17 = vld [vmem:[%s16084_s19 + $0x4] sm:$0x7] }
0x163e   :  { %v15944_v49 = vsub.f32 %v15912_v44, %v8055_v60  ;;  %v16017_v60 = vperm.slane %v10655_v17, 2 }
0x1640   :  { %v8071_v48 = vmul.f32 %v15944_v49, %v15944_v49 }
0x1642   :  { %8080 = vadd.xlane.f32.xlu0 %v8071_v48 }
0x164a   :  { %v8043_v54 = vpop.xlane.xlu1 %8042 }
0x164b   :  { %v8056_v62 = vmul.f32 %v8043_v54, %v16158_v35 }
0x164d   :  { %v15950_v30 = vsub.f32 %v15917_v9, %v8056_v62 }
0x164f   :  { %v8072_v0 = vmul.f32 %v15950_v30, %v15950_v30 }
0x1651   :  { %8082 = vadd.xlane.f32.xlu0 %v8072_v0 }
0x165a   :  { %v8045_v40 = vpop.xlane.xlu2 %8044 }
0x165b   :  { %v8057_v47 = vmul.f32 %v8045_v40, %v16158_v35 }
0x165d   :  { %v15956_v44 = vsub.f32 %v15922_v26, %v8057_v47 }
0x165f   :  { %v8073_v61 = vmul.f32 %v15956_v44, %v15956_v44 }
0x1661   :  { %8084 = vadd.xlane.f32.xlu1 %v8073_v61 }
0x166a   :  { %v8047_v45 = vpop.xlane.xlu0 %8046 }
0x166b   :  { %v8058_v19 = vmul.f32 %v8047_v45, %v16158_v35 }
0x166d   :  { %v15962_v9 = vsub.f32 %v15927_v2, %v8058_v19 }
0x166f   :  { %v8074_v59 = vmul.f32 %v15962_v9, %v15962_v9 }
0x1671   :  { %8086 = vadd.xlane.f32.xlu2 %v8074_v59 }
0x167a   :  { %v8049_v8 = vpop.xlane.xlu1 %8048 }
0x167b   :  { %v8059_v4 = vmul.f32 %v8049_v8, %v16158_v35 }
0x167d   :  { %v15967_v34 = vsub.f32 %v8035_v53, %v8059_v4 }
0x167f   :  { %v8075_v26 = vmul.f32 %v15967_v34, %v15967_v34 }
0x1681   :  { %8088 = vadd.xlane.f32.xlu0 %v8075_v26 }
0x168a   :  { %v8051_v46 = vpop.xlane.xlu1 %8050 }
0x168b   :  { %v8060_v36 = vmul.f32 %v8051_v46, %v16158_v35 }
0x168d   :  { %v15972_v10 = vsub.f32 %v8036_v21, %v8060_v36 }
0x168f   :  { %v8076_v2 = vmul.f32 %v15972_v10, %v15972_v10 }
0x1691   :  { %8090 = vadd.xlane.f32.xlu1 %v8076_v2 }
0x16a4   :  { %v8079_v31 = vpop.xlane.xlu2 %8078 }
0x16a5   :  { %v8094_v53 = vmul.f32 %v8079_v31, %v16158_v35 }
0x16a7   :  { %v8102_v24 = vadd.f32 1e-05, %v8094_v53 }
0x16a9   :  { %10584 = vrsqrt.f32 %v8102_v24  ;;  %vm8116_vm2 = vweird.f32 %v8102_v24 }
0x16ac   :  { %v8053_v52 = vpop.xlane.xlu2 %8052 }
0x16ad   :  { %v8061_v56 = vmul.f32 %v8053_v52, %v16158_v35 }
0x16af   :  { %v10585_v1 = vpop.eup %10584  ;;  %v15999_v32 = vsub.f32 %v8037_v33, %v8061_v56 }
0x16b0   :  { %v8111_v50 = vmul.f32 %v10585_v1, %v8102_v24  ;;  %vm8117_vm1 = vweird.f32 %v10585_v1 }
0x16b1   :  { %v8077_v20 = vmul.f32 %v15999_v32, %v15999_v32  ;;  %vm8118_vm7 = vmor %vm8116_vm2, %vm8117_vm1 }
0x16b2   :  { %v8112_v7 = vmul.f32 %v10585_v1, %v8111_v50 }
0x16b3   :  { %8092 = vadd.xlane.f32.xlu2 %v8077_v20 }
0x16b4   :  { %v8113_v37 = vmul.f32 0.5, %v8112_v7 }
0x16b5   :  { %v8081_v3 = vpop.xlane.xlu0 %8080 }
0x16b6   :  { %v8095_v21 = vmul.f32 %v8081_v3, %v16158_v35  ;;  %v8114_v28 = vsub.f32 1.5, %v8113_v37 }
0x16b8   :  { %v8103_v5 = vadd.f32 1e-05, %v8095_v21  ;;  %v8115_v57 = vmul.f32 %v10585_v1, %v8114_v28 }
0x16ba   :  { %10586 = vrsqrt.f32 %v8103_v5  ;;  %v8119_v29 = vsel %vm8118_vm7, %v10585_v1, %v8115_v57  ;;  %vm8126_vm9 = vweird.f32 %v8103_v5 }
0x16bb   :  { %v8190_v33 = vmul.f32 %v8119_v29, %v15937_v58 }
0x16bd   :  { %v8199_v48 = vmul.f32 %v16011_v63, %v8190_v33 }
0x16bf   :  { %v8208_v58 = vadd.f32 %v16017_v60, %v8199_v48 }
0x16c0   :  { %v10587_v22 = vpop.eup %10586 }
0x16c1   :  { %v8121_v41 = vmul.f32 %v10587_v22, %v8103_v5  ;;  %vm8127_vm8 = vweird.f32 %v10587_v22 }
0x16c2   :  { %vm8128_vm10 = vmor %vm8126_vm9, %vm8127_vm8 }
0x16c3   :  { %v8122_v13 = vmul.f32 %v10587_v22, %v8121_v41 }
0x16c4   :  { %v8083_v16 = vpop.xlane.xlu0 %8082 }
0x16c5   :  { %v8123_v51 = vmul.f32 0.5, %v8122_v13  ;;  %v8096_v12 = vmul.f32 %v8083_v16, %v16158_v35 }
0x16c7   :  { %v8124_v38 = vsub.f32 1.5, %v8123_v51  ;;  %v8104_v15 = vadd.f32 1e-05, %v8096_v12 }
0x16c9   :  { %v8125_v14 = vmul.f32 %v10587_v22, %v8124_v38  ;;  %10588 = vrsqrt.f32 %v8104_v15  ;;  %vm8136_vm12 = vweird.f32 %v8104_v15 }
0x16cb   :  { %v8129_v25 = vsel %vm8128_vm10, %v10587_v22, %v8125_v14 }
0x16cc   :  { %v8191_v54 = vmul.f32 %v8129_v25, %v15944_v49 }
0x16ce   :  { %v8200_v62 = vmul.f32 %v16011_v63, %v8191_v54 }
0x16cf   :  { %v10589_v0 = vpop.eup %10588 }
0x16d0   :  { %v8209_v40 = vadd.f32 %v16017_v60, %v8200_v62  ;;  %v8131_v47 = vmul.f32 %v10589_v0, %v8104_v15  ;;  %vm8137_vm11 = vweird.f32 %v10589_v0 }
0x16d1   :  { %vm8138_vm13 = vmor %vm8136_vm12, %vm8137_vm11 }
0x16d2   :  { %v8232_v61 = vpack.c.bf16 %v8209_v40, %v8208_v58  ;;  %v8132_v45 = vmul.f32 %v10589_v0, %v8131_v47 }
0x16d4   :  { %8296 = vmatmul.bf16.vlgmr.msra.gmra.mxu0 %v8232_v61  ;;  %v8085_v19 = vpop.xlane.xlu1 %8084  ;;  %v8133_v4 = vmul.f32 0.5, %v8132_v45 }
0x16d5   :  { %v8097_v59 = vmul.f32 %v8085_v19, %v16158_v35 }
0x16d6   :  { %v8134_v26 = vsub.f32 1.5, %v8133_v4 }
0x16d7   :  { %v8105_v8 = vadd.f32 1e-05, %v8097_v59 }
0x16d8   :  { %v8135_v49 = vmul.f32 %v10589_v0, %v8134_v26 }
0x16d9   :  { %10590 = vrsqrt.f32 %v8105_v8  ;;  %vm8146_vm15 = vweird.f32 %v8105_v8 }
0x16da   :  { %v8139_v43 = vsel %vm8138_vm13, %v10589_v0, %v8135_v49 }
0x16db   :  { %v8192_v23 = vmul.f32 %v8139_v43, %v15950_v30 }
0x16dd   :  { %v8201_v42 = vmul.f32 %v16011_v63, %v8192_v23 }
0x16df   :  { %v10591_v46 = vpop.eup %10590  ;;  %v8210_v18 = vadd.f32 %v16017_v60, %v8201_v42 }
0x16e0   :  { %v8141_v36 = vmul.f32 %v10591_v46, %v8105_v8  ;;  %vm8147_vm14 = vweird.f32 %v10591_v46 }
0x16e1   :  { %vm8148_vm0 = vmor %vm8146_vm15, %vm8147_vm14 }
0x16e2   :  { %v8142_v2 = vmul.f32 %v10591_v46, %v8141_v36 }
0x16e4   :  { %v8143_v27 = vmul.f32 0.5, %v8142_v2  ;;  %v8087_v55 = vpop.xlane.xlu2 %8086 }
0x16e5   :  { %v8098_v6 = vmul.f32 %v8087_v55, %v16158_v35 }
0x16e6   :  { %v8144_v31 = vsub.f32 1.5, %v8143_v27 }
0x16e7   :  { %v8106_v53 = vadd.f32 1e-05, %v8098_v6 }
0x16e8   :  { %v8145_v24 = vmul.f32 %v10591_v46, %v8144_v31 }
0x16e9   :  { %10592 = vrsqrt.f32 %v8106_v53  ;;  %vm8156_vm4 = vweird.f32 %v8106_v53 }
0x16ea   :  { %v8149_v39 = vsel %vm8148_vm0, %v10591_v46, %v8145_v24 }
0x16eb   :  { %v8193_v52 = vmul.f32 %v8149_v39, %v15956_v44 }
0x16ed   :  { %v8202_v56 = vmul.f32 %v16011_v63, %v8193_v52 }
0x16ef   :  { %v10593_v1 = vpop.eup %10592  ;;  %v8211_v50 = vadd.f32 %v16017_v60, %v8202_v56 }
0x16f0   :  { %v8151_v20 = vmul.f32 %v10593_v1, %v8106_v53  ;;  %vm8157_vm3 = vweird.f32 %v10593_v1 }
0x16f1   :  { %v8233_v7 = vpack.c.bf16 %v8211_v50, %v8210_v18  ;;  %vm8158_vm5 = vmor %vm8156_vm4, %vm8157_vm3 }
0x16f2   :  { %v8152_v30 = vmul.f32 %v10593_v1, %v8151_v20 }
0x16f3   :  { %8301 = vmatmul.bf16.gmra.mxu0 %v8233_v7 }
0x16f4   :  { %v8089_v3 = vpop.xlane.xlu0 %8088  ;;  %v8153_v37 = vmul.f32 0.5, %v8152_v30 }
0x16f5   :  { %v8099_v21 = vmul.f32 %v8089_v3, %v16158_v35 }
0x16f6   :  { %v8154_v44 = vsub.f32 1.5, %v8153_v37 }
0x16f7   :  { %v8107_v5 = vadd.f32 1e-05, %v8099_v21 }
0x16f8   :  { %v8155_v22 = vmul.f32 %v10593_v1, %v8154_v44 }
0x16f9   :  { %10594 = vrsqrt.f32 %v8107_v5  ;;  %vm8166_vm1 = vweird.f32 %v8107_v5 }
0x16fa   :  { %v8159_v13 = vsel %vm8158_vm5, %v10593_v1, %v8155_v22 }
0x16fb   :  { %v8194_v51 = vmul.f32 %v8159_v13, %v15962_v9 }
0x16fd   :  { %v8203_v11 = vmul.f32 %v16011_v63, %v8194_v51 }
0x16ff   :  { %v10595_v28 = vpop.eup %10594  ;;  %v8212_v25 = vadd.f32 %v16017_v60, %v8203_v11 }
0x1700   :  { %v8161_v57 = vmul.f32 %v10595_v28, %v8107_v5  ;;  %vm8167_vm6 = vweird.f32 %v10595_v28 }
0x1701   :  { %vm8168_vm2 = vmor %vm8166_vm1, %vm8167_vm6 }
0x1702   :  { %v8162_v41 = vmul.f32 %v10595_v28, %v8161_v57 }
0x1704   :  { %v8163_v16 = vmul.f32 0.5, %v8162_v41  ;;  %v8091_v14 = vpop.xlane.xlu1 %8090 }
0x1705   :  { %v8100_v48 = vmul.f32 %v8091_v14, %v16158_v35 }
0x1706   :  { %v8164_v29 = vsub.f32 1.5, %v8163_v16 }
0x1707   :  { %v8108_v9 = vadd.f32 1e-05, %v8100_v48 }
0x1708   :  { %v8165_v12 = vmul.f32 %v10595_v28, %v8164_v29 }
0x1709   :  { %10596 = vrsqrt.f32 %v8108_v9  ;;  %vm8176_vm8 = vweird.f32 %v8108_v9 }
0x170a   :  { %v8169_v38 = vsel %vm8168_vm2, %v10595_v28, %v8165_v12 }
0x170b   :  { %v8195_v15 = vmul.f32 %v8169_v38, %v15967_v34 }
0x170d   :  { %v8204_v33 = vmul.f32 %v16011_v63, %v8195_v15 }
0x170f   :  { %v8213_v17 = vadd.f32 %v16017_v60, %v8204_v33  ;;  %v10597_v62 = vpop.eup %10596 }
0x1710   :  { %v8171_v0 = vmul.f32 %v10597_v62, %v8108_v9  ;;  %vm8177_vm7 = vweird.f32 %v10597_v62 }
0x1711   :  { %v8234_v54 = vpack.c.bf16 %v8213_v17, %v8212_v25  ;;  %vm8178_vm9 = vmor %vm8176_vm8, %vm8177_vm7 }
0x1712   :  { %v8172_v58 = vmul.f32 %v10597_v62, %v8171_v0 }
0x1713   :  { %8306 = vmatmul.bf16.gmra.mxu0 %v8234_v54 }
0x1714   :  { %v8173_v61 = vmul.f32 0.5, %v8172_v58 }
0x1716   :  { %v8174_v45 = vsub.f32 1.5, %v8173_v61 }
0x1718   :  { %v8175_v59 = vmul.f32 %v10597_v62, %v8174_v45 }
0x171a   :  { %v8179_v26 = vsel %vm8178_vm9, %v10597_v62, %v8175_v59 }
0x171b   :  { %v8196_v36 = vmul.f32 %v8179_v26, %v15972_v10  ;;  %v9909_v10 = vld [vmem:[%s16170_s7] ss:$0 sm:$0xff] }
0x171d   :  { %v8205_v27 = vmul.f32 %v16011_v63, %v8196_v36 }
0x171f   :  { %v8214_v6 = vadd.f32 %v16017_v60, %v8205_v27 }
0x1726   :  { %v8093_v40 = vpop.xlane.xlu2 %8092 }
0x1727   :  { %v8101_v34 = vmul.f32 %v8093_v40, %v16158_v35 }
0x1729   :  { %v8109_v47 = vadd.f32 1e-05, %v8101_v34 }
0x172b   :  { %10598 = vrsqrt.f32 %v8109_v47  ;;  %vm8186_vm11 = vweird.f32 %v8109_v47 }
0x1731   :  { %v10599_v19 = vpop.eup %10598 }
0x1732   :  { %v8181_v8 = vmul.f32 %v10599_v19, %v8109_v47  ;;  %vm8187_vm10 = vweird.f32 %v10599_v19 }
0x1733   :  { %vm8188_vm12 = vmor %vm8186_vm11, %vm8187_vm10 }
0x1734   :  { %v8182_v4 = vmul.f32 %v10599_v19, %v8181_v8 }
0x1736   :  { %v8183_v46 = vmul.f32 0.5, %v8182_v4 }
0x1738   :  { %v8184_v49 = vsub.f32 1.5, %v8183_v46 }
0x173a   :  { %v8185_v2 = vmul.f32 %v10599_v19, %v8184_v49 }
0x173c   :  { %v8189_v35 = vsel %vm8188_vm12, %v10599_v19, %v8185_v2 }
0x173d   :  { %v8197_v43 = vmul.f32 %v8189_v35, %v15999_v32 }
0x173f   :  { %v8206_v55 = vmul.f32 %v16011_v63, %v8197_v43 }
0x1741   :  { %v8215_v31 = vadd.f32 %v16017_v60, %v8206_v55 }
0x1743   :  { %v8235_v23 = vpack.c.bf16 %v8215_v31, %v8214_v6 }
0x1745   :  { %8311 = vmatmul.bf16.gmra.mxu0 %v8235_v23 }
0x1751   :  { %v8297_v53 = vpop.f32.mrf.mxu0 }
0x1752   :  { %v8298_v24 = vadd.f32 %v9909_v10, %v8297_v53 }
0x1754   :  { %8317 = vst [vmem:[%s16171_s24] sm:$0xff] %v8298_v24 }
0x1759   :  { %v8299_v32 = vpop.f32.mrf.mxu0 }
0x175a   :  { %v8300_v39 = vadd.f32 %v9909_v10, %v8299_v32 }
0x175c   :  { %8318 = vst [vmem:[%s16171_s24 + $0x8] sm:$0xff] %v8300_v39 }
0x1770   :  { %v8302_v63 = vpop.f32.mrf.mxu0 }
0x1771   :  { %v8303_v60 = vadd.f32 %v9909_v10, %v8302_v63 }
0x1773   :  { %8319 = vst [vmem:[%s16171_s24 + $0x10] sm:$0xff] %v8303_v60 }
0x1778   :  { %v8304_v52 = vpop.f32.mrf.mxu0 }
0x1779   :  { %v8305_v42 = vadd.f32 %v9909_v10, %v8304_v52 }
0x177b   :  { %8320 = vst [vmem:[%s16171_s24 + $0x18] sm:$0xff] %v8305_v42 }
0x1790   :  { %v8307_v56 = vpop.f32.mrf.mxu0 }
0x1791   :  { %v8308_v1 = vadd.f32 %v9909_v10, %v8307_v56 }
0x1793   :  { %8321 = vst [vmem:[%s16171_s24 + $0x20] sm:$0xff] %v8308_v1 }
0x1798   :  { %v8309_v18 = vpop.f32.mrf.mxu0 }
0x1799   :  { %v8310_v50 = vadd.f32 %v9909_v10, %v8309_v18 }
0x179b   :  { %8322 = vst [vmem:[%s16171_s24 + $0x28] sm:$0xff] %v8310_v50 }
0x17c2   :  { %v8312_v20 = vpop.f32.mrf.mxu0 }
0x17c3   :  { %v8313_v7 = vadd.f32 %v9909_v10, %v8312_v20 }
0x17c5   :  { %8323 = vst [vmem:[%s16171_s24 + $0x30] sm:$0xff] %v8313_v7 }
0x17ca   :  { %v8314_v30 = vpop.f32.mrf.mxu0 }
0x17cb   :  { %v8315_v3 = vadd.f32 %v9909_v10, %v8314_v30 }
0x17cd   :  { %8324 = vst [vmem:[%s16171_s24 + $0x38] sm:$0xff] %v8315_v3 }

</bundles_post_ra>
